<compile_context>
chip_gen: v6e
topology: v6e:2x2x1
jax: 0.10.0
libtpu: 0.0.40
codegen_flags: <defaults>
</compile_context>

<pallas_src>
import numpy as np
import jax
import jax.numpy as jnp
from jax.experimental import pallas as pl
from jax.experimental.pallas import tpu as pltpu


_CIN_PAD = 8     # pad layer-1 Cin (=1) up to one f32 sublane pack
_MIN_DIM = 8     # pad the 2x2 spatial stage (M=4) up to 8 rows


# ----------------------------------------------------------------------------
# Trace-time (numpy) constant builders: one-hot shift / pool / upsample
# matrices.  All entries are 0/1, so bf16 storage is lossless and the
# in-kernel "gathers" become plain MXU matmuls.
# ----------------------------------------------------------------------------
def _shift_matrices(H, W):
    """T[k, p, q] = 1 iff tap k of a 3x3 pad=1 conv at output pixel p reads
    input pixel q (rows for zero-padding taps are all-zero)."""
    M = H * W
    T = np.zeros((9, M, M), np.float32)
    for ky in range(3):
        for kx in range(3):
            k = ky * 3 + kx
            for h in range(H):
                hh = h + ky - 1
                if not 0 <= hh < H:
                    continue
                for w in range(W):
                    ww = w + kx - 1
                    if not 0 <= ww < W:
                        continue
                    T[k, h * W + w, hh * W + ww] = 1.0
    return T


def _pool_matrices(H, W):
    """S[k, p_out, p_in] selects corner k of each 2x2 maxpool window."""
    Ho, Wo = H // 2, W // 2
    S = np.zeros((4, Ho * Wo, H * W), np.float32)
    for a in range(2):
        for b in range(2):
            k = a * 2 + b
            for ho in range(Ho):
                for wo in range(Wo):
                    S[k, ho * Wo + wo, (2 * ho + a) * W + (2 * wo + b)] = 1.0
    return S


def _upsample_matrix(H, W):
    """U[p_out, p_in] = 1 iff nearest-neighbour 2x upsampling reads p_in."""
    Wo = 2 * W
    U = np.zeros((4 * H * W, H * W), np.float32)
    for ho in range(2 * H):
        for wo in range(Wo):
            U[ho * Wo + wo, (ho // 2) * W + (wo // 2)] = 1.0
    return U


def _pad_axis(a, axis, size):
    if a.shape[axis] >= size:
        return a
    pads = [(0, 0)] * a.ndim
    pads[axis] = (0, size - a.shape[axis])
    return np.pad(a, pads)


# ----------------------------------------------------------------------------
# In-kernel building blocks (activations are flat (M, C) f32 values)
# ----------------------------------------------------------------------------
def _conv3x3(a, t_ref, w_ref, b_ref, relu):
    """a: (M, Cin) f32; t_ref: (9, M, M) bf16 shift matrices;
    w_ref: (9, Cin, Cout) bf16; b_ref: (1, Cout) f32."""
    a16 = a.astype(jnp.bfloat16)
    acc = None
    for k in range(9):
        tap = jnp.dot(t_ref[k], a16, preferred_element_type=jnp.float32)
        contrib = jnp.dot(tap.astype(jnp.bfloat16), w_ref[k],
                          preferred_element_type=jnp.float32)
        acc = contrib if acc is None else acc + contrib
    acc = acc + b_ref[...]
    return jnp.maximum(acc, 0.0) if relu else acc


def _maxpool2x2(a, s_ref):
    a16 = a.astype(jnp.bfloat16)
    out = None
    for k in range(4):
        sel = jnp.dot(s_ref[k], a16, preferred_element_type=jnp.float32)
        out = sel if out is None else jnp.maximum(out, sel)
    return out


def _upsample2x(a, u_ref):
    return jnp.dot(u_ref[...], a.astype(jnp.bfloat16),
                   preferred_element_type=jnp.float32)


def _fused_kernel(x_ref, t16, t8, t4, t2, s16, s8, s4, u2, u4, u8,
                  w1, b1, w2, b2, w3, b3, w4, b4, w5, b5, w6, b6, o_ref):
    a = x_ref[0]                                   # (256, 8)  f32
    # ---- encoder: (conv + ReLU + maxpool) x 3 ----
    a = _conv3x3(a, t16, w1, b1, relu=True)        # (256, 64)
    a = _maxpool2x2(a, s16)                        # (64, 64)
    a = _conv3x3(a, t8, w2, b2, relu=True)         # (64, 128)
    a = _maxpool2x2(a, s8)                         # (16, 128)
    a = _conv3x3(a, t4, w3, b3, relu=True)         # (16, 256)
    a = _maxpool2x2(a, s4)                         # (8, 256)  rows 4..7 = 0
    # ---- decoder: (conv + ReLU + up) x 2, conv + up ----
    a = _conv3x3(a, t2, w4, b4, relu=True)         # (8, 128)  rows 4..7 unused
    a = _upsample2x(a, u2)                         # (16, 128) pad rows dropped
    a = _conv3x3(a, t4, w5, b5, relu=True)         # (16, 64)
    a = _upsample2x(a, u4)                         # (64, 64)
    a = _conv3x3(a, t8, w6, b6, relu=False)        # (64, 2)
    a = _upsample2x(a, u8)                         # (256, 2)
    o_ref[0] = a.astype(o_ref.dtype)


# ----------------------------------------------------------------------------
# Wrapper
# ----------------------------------------------------------------------------
@jax.jit
def colorization_net7_forward(x, params):
    """x: (B, H, W, 1) f32 NHWC  ->  (B, H, W, 2) f32."""
    B, H, W, cin = x.shape
    assert cin == 1 and H % 8 == 0 and W % 8 == 0
    M = H * W

    # flatten spatial, pad Cin 1 -> 8 (zero channels are inert)
    x_flat = jnp.pad(x.reshape(B, M, 1), ((0, 0), (0, 0), (0, _CIN_PAD - 1)))

    bf16 = jnp.bfloat16
    t16 = jnp.asarray(_shift_matrices(H, W), bf16)
    t8 = jnp.asarray(_shift_matrices(H // 2, W // 2), bf16)
    t4 = jnp.asarray(_shift_matrices(H // 4, W // 4), bf16)
    t2 = jnp.asarray(
        _pad_axis(_pad_axis(_shift_matrices(H // 8, W // 8), 1, _MIN_DIM),
                  2, _MIN_DIM), bf16)
    s16 = jnp.asarray(_pool_matrices(H, W), bf16)
    s8 = jnp.asarray(_pool_matrices(H // 2, W // 2), bf16)
    s4 = jnp.asarray(_pad_axis(_pool_matrices(H // 4, W // 4), 1, _MIN_DIM), bf16)
    u2 = jnp.asarray(_pad_axis(_upsample_matrix(H // 8, W // 8), 1, _MIN_DIM), bf16)
    u4 = jnp.asarray(_upsample_matrix(H // 4, W // 4), bf16)
    u8 = jnp.asarray(_upsample_matrix(H // 2, W // 2), bf16)

    wb = []
    for i, (wt, bias) in enumerate(params):
        kcin, kcout = wt.shape[2], wt.shape[3]
        w9 = wt.reshape(9, kcin, kcout)
        if i == 0:
            w9 = jnp.pad(w9, ((0, 0), (0, _CIN_PAD - kcin), (0, 0)))
        wb.append(w9.astype(bf16))
        wb.append(bias.astype(jnp.float32))

    ins = [x_flat, t16, t8, t4, t2, s16, s8, s4, u2, u4, u8] + wb

    def const_spec(a):
        return pl.BlockSpec(tuple(a.shape), lambda b, n=a.ndim: (0,) * n)

    in_specs = [pl.BlockSpec((1, M, _CIN_PAD), lambda b: (b, 0, 0))]
    in_specs += [const_spec(a) for a in ins[1:]]

    out = pl.pallas_call(
        _fused_kernel,
        out_shape=jax.ShapeDtypeStruct((B, M, 2), jnp.float32),
        grid=(B,),
        in_specs=in_specs,
        out_specs=pl.BlockSpec((1, M, 2), lambda b: (b, 0, 0)),
        compiler_params=pltpu.CompilerParams(
            dimension_semantics=("parallel",)),
    )(*ins)
    return out.reshape(B, H, W, 2)


# ----------------------------------------------------------------------------
# Parameters (deterministic synthetic init) and pure-JAX reference
# ----------------------------------------------------------------------------
_LAYER_DEFS = [(1, 64), (64, 128), (128, 256),     # encoder convs
               (256, 128), (128, 64), (64, 2)]     # decoder convs


def init_params(key):
    params = []
    for i, (cin, cout) in enumerate(_LAYER_DEFS):
        kw, kb = jax.random.split(jax.random.fold_in(key, i))
        w = jax.random.normal(kw, (3, 3, cin, cout), jnp.float32) / np.sqrt(cin * 9.0)
        b = 0.01 * jax.random.normal(kb, (1, cout), jnp.float32)
        params.append((w, b))
    return params


def reference_forward(x, params):
    def conv(h, w, b):
        y = jax.lax.conv_general_dilated(
            h, w, window_strides=(1, 1), padding=((1, 1), (1, 1)),
            dimension_numbers=("NHWC", "HWIO", "NHWC"),
            precision=jax.lax.Precision.HIGHEST)
        return y + b.reshape(1, 1, 1, -1)

    def pool(h):
        return jax.lax.reduce_window(h, -jnp.inf, jax.lax.max,
                                     (1, 2, 2, 1), (1, 2, 2, 1), "VALID")

    def up(h):
        return jnp.repeat(jnp.repeat(h, 2, axis=1), 2, axis=2)

    h = x
    for i in range(3):
        h = pool(jnp.maximum(conv(h, *params[i]), 0.0))
    for i in range(3, 5):
        h = up(jnp.maximum(conv(h, *params[i]), 0.0))
    return up(conv(h, *params[5]))


if __name__ == "__main__":
    key = jax.random.PRNGKey(0)
    k_x, k_p = jax.random.split(key)

    # NHWC input; the PyTorch-equivalent NCHW shape is (2, 1, 16, 16).
    x = jax.random.normal(k_x, (2, 16, 16, 1), jnp.float32)
    params = init_params(k_p)

    out = jax.block_until_ready(colorization_net7_forward(x, params))
    assert out.shape == (2, 16, 16, 2), out.shape

    ref = reference_forward(x, params)
    err = float(jnp.max(jnp.abs(out - ref)))
    # bf16 MXU inputs (f32 accumulation) vs a HIGHEST-precision f32 reference:
    # allow bf16-level headroom accumulated over 6 chained conv layers.
    assert err < 1e-1, f"mismatch vs reference: {err}"

    print("KERNEL_OK")
</pallas_src>

<mosaic_0001>
module attributes {stable_mosaic.version = 11 : i64} {
  func.func @_fused_kernel(%arg0: i32, %arg1: memref<1x256x8xf32, #tpu.memory_space<vmem>>, %arg2: memref<9x256x256xbf16, #tpu.memory_space<vmem>>, %arg3: memref<9x64x64xbf16, #tpu.memory_space<vmem>>, %arg4: memref<9x16x16xbf16, #tpu.memory_space<vmem>>, %arg5: memref<9x8x8xbf16, #tpu.memory_space<vmem>>, %arg6: memref<4x64x256xbf16, #tpu.memory_space<vmem>>, %arg7: memref<4x16x64xbf16, #tpu.memory_space<vmem>>, %arg8: memref<4x8x16xbf16, #tpu.memory_space<vmem>>, %arg9: memref<16x8xbf16, #tpu.memory_space<vmem>>, %arg10: memref<64x16xbf16, #tpu.memory_space<vmem>>, %arg11: memref<256x64xbf16, #tpu.memory_space<vmem>>, %arg12: memref<9x8x64xbf16, #tpu.memory_space<vmem>>, %arg13: memref<1x64xf32, #tpu.memory_space<vmem>>, %arg14: memref<9x64x128xbf16, #tpu.memory_space<vmem>>, %arg15: memref<1x128xf32, #tpu.memory_space<vmem>>, %arg16: memref<9x128x256xbf16, #tpu.memory_space<vmem>>, %arg17: memref<1x256xf32, #tpu.memory_space<vmem>>, %arg18: memref<9x256x128xbf16, #tpu.memory_space<vmem>>, %arg19: memref<1x128xf32, #tpu.memory_space<vmem>>, %arg20: memref<9x128x64xbf16, #tpu.memory_space<vmem>>, %arg21: memref<1x64xf32, #tpu.memory_space<vmem>>, %arg22: memref<9x64x2xbf16, #tpu.memory_space<vmem>>, %arg23: memref<1x2xf32, #tpu.memory_space<vmem>>, %arg24: memref<1x256x2xf32, #tpu.memory_space<vmem>>) attributes {dimension_semantics = [#tpu.dimension_semantics<parallel>], iteration_bounds = array<i64: 2>, scalar_prefetch = 0 : i64, scratch_operands = 0 : i64, tpu.core_type = #tpu.core_type<tc>, window_params = [{transform_indices = @transform_0, window_bounds = array<i64: 1, 256, 8>}, {pipeline_mode = #tpu.pipeline_mode<synchronous>, transform_indices = @transform_1, window_bounds = array<i64: 9, 256, 256>}, {pipeline_mode = #tpu.pipeline_mode<synchronous>, transform_indices = @transform_2, window_bounds = array<i64: 9, 64, 64>}, {pipeline_mode = #tpu.pipeline_mode<synchronous>, transform_indices = @transform_3, window_bounds = array<i64: 9, 16, 16>}, {pipeline_mode = #tpu.pipeline_mode<synchronous>, transform_indices = @transform_4, window_bounds = array<i64: 9, 8, 8>}, {pipeline_mode = #tpu.pipeline_mode<synchronous>, transform_indices = @transform_5, window_bounds = array<i64: 4, 64, 256>}, {pipeline_mode = #tpu.pipeline_mode<synchronous>, transform_indices = @transform_6, window_bounds = array<i64: 4, 16, 64>}, {pipeline_mode = #tpu.pipeline_mode<synchronous>, transform_indices = @transform_7, window_bounds = array<i64: 4, 8, 16>}, {pipeline_mode = #tpu.pipeline_mode<synchronous>, transform_indices = @transform_8, window_bounds = array<i64: 16, 8>}, {pipeline_mode = #tpu.pipeline_mode<synchronous>, transform_indices = @transform_9, window_bounds = array<i64: 64, 16>}, {pipeline_mode = #tpu.pipeline_mode<synchronous>, transform_indices = @transform_10, window_bounds = array<i64: 256, 64>}, {pipeline_mode = #tpu.pipeline_mode<synchronous>, transform_indices = @transform_11, window_bounds = array<i64: 9, 8, 64>}, {pipeline_mode = #tpu.pipeline_mode<synchronous>, transform_indices = @transform_12, window_bounds = array<i64: 1, 64>}, {pipeline_mode = #tpu.pipeline_mode<synchronous>, transform_indices = @transform_13, window_bounds = array<i64: 9, 64, 128>}, {pipeline_mode = #tpu.pipeline_mode<synchronous>, transform_indices = @transform_14, window_bounds = array<i64: 1, 128>}, {pipeline_mode = #tpu.pipeline_mode<synchronous>, transform_indices = @transform_15, window_bounds = array<i64: 9, 128, 256>}, {pipeline_mode = #tpu.pipeline_mode<synchronous>, transform_indices = @transform_16, window_bounds = array<i64: 1, 256>}, {pipeline_mode = #tpu.pipeline_mode<synchronous>, transform_indices = @transform_17, window_bounds = array<i64: 9, 256, 128>}, {pipeline_mode = #tpu.pipeline_mode<synchronous>, transform_indices = @transform_18, window_bounds = array<i64: 1, 128>}, {pipeline_mode = #tpu.pipeline_mode<synchronous>, transform_indices = @transform_19, window_bounds = array<i64: 9, 128, 64>}, {pipeline_mode = #tpu.pipeline_mode<synchronous>, transform_indices = @transform_20, window_bounds = array<i64: 1, 64>}, {pipeline_mode = #tpu.pipeline_mode<synchronous>, transform_indices = @transform_21, window_bounds = array<i64: 9, 64, 2>}, {pipeline_mode = #tpu.pipeline_mode<synchronous>, transform_indices = @transform_22, window_bounds = array<i64: 1, 2>}, {transform_indices = @transform_23, window_bounds = array<i64: 1, 256, 2>}]} {
    %c0 = arith.constant 0 : index
    %c0_0 = arith.constant 0 : index
    %c0_1 = arith.constant 0 : index
    %0 = vector.load %arg1[%c0, %c0_0, %c0_1] : memref<1x256x8xf32, #tpu.memory_space<vmem>>, vector<1x256x8xf32>
    %1 = vector.shape_cast %0 : vector<1x256x8xf32> to vector<256x8xf32>
    %2 = arith.truncf %1 : vector<256x8xf32> to vector<256x8xbf16>
    %c0_2 = arith.constant 0 : index
    %c0_3 = arith.constant 0 : index
    %c0_4 = arith.constant 0 : index
    %3 = vector.load %arg2[%c0_2, %c0_3, %c0_4] : memref<9x256x256xbf16, #tpu.memory_space<vmem>>, vector<1x256x256xbf16>
    %4 = vector.shape_cast %3 : vector<1x256x256xbf16> to vector<256x256xbf16>
    %cst = arith.constant dense<0.000000e+00> : vector<256x8xf32>
    %5 = tpu.matmul %4, %2, %cst {dimension_numbers = #tpu.dot_dimension_numbers<[1], [0], [0], [1], [0, 0, 1, 1], [], []>} : vector<256x256xbf16>, vector<256x8xbf16>, vector<256x8xf32> -> vector<256x8xf32>
    %6 = arith.truncf %5 : vector<256x8xf32> to vector<256x8xbf16>
    %c0_5 = arith.constant 0 : index
    %c0_6 = arith.constant 0 : index
    %c0_7 = arith.constant 0 : index
    %7 = vector.load %arg12[%c0_5, %c0_6, %c0_7] : memref<9x8x64xbf16, #tpu.memory_space<vmem>>, vector<1x8x64xbf16>
    %8 = vector.shape_cast %7 : vector<1x8x64xbf16> to vector<8x64xbf16>
    %cst_8 = arith.constant dense<0.000000e+00> : vector<256x64xf32>
    %9 = tpu.matmul %6, %8, %cst_8 {dimension_numbers = #tpu.dot_dimension_numbers<[1], [0], [0], [1], [0, 0, 1, 1], [], []>} : vector<256x8xbf16>, vector<8x64xbf16>, vector<256x64xf32> -> vector<256x64xf32>
    %c1 = arith.constant 1 : index
    %c0_9 = arith.constant 0 : index
    %c0_10 = arith.constant 0 : index
    %10 = vector.load %arg2[%c1, %c0_9, %c0_10] : memref<9x256x256xbf16, #tpu.memory_space<vmem>>, vector<1x256x256xbf16>
    %11 = vector.shape_cast %10 : vector<1x256x256xbf16> to vector<256x256xbf16>
    %cst_11 = arith.constant dense<0.000000e+00> : vector<256x8xf32>
    %12 = tpu.matmul %11, %2, %cst_11 {dimension_numbers = #tpu.dot_dimension_numbers<[1], [0], [0], [1], [0, 0, 1, 1], [], []>} : vector<256x256xbf16>, vector<256x8xbf16>, vector<256x8xf32> -> vector<256x8xf32>
    %13 = arith.truncf %12 : vector<256x8xf32> to vector<256x8xbf16>
    %c1_12 = arith.constant 1 : index
    %c0_13 = arith.constant 0 : index
    %c0_14 = arith.constant 0 : index
    %14 = vector.load %arg12[%c1_12, %c0_13, %c0_14] : memref<9x8x64xbf16, #tpu.memory_space<vmem>>, vector<1x8x64xbf16>
    %15 = vector.shape_cast %14 : vector<1x8x64xbf16> to vector<8x64xbf16>
    %cst_15 = arith.constant dense<0.000000e+00> : vector<256x64xf32>
    %16 = tpu.matmul %13, %15, %cst_15 {dimension_numbers = #tpu.dot_dimension_numbers<[1], [0], [0], [1], [0, 0, 1, 1], [], []>} : vector<256x8xbf16>, vector<8x64xbf16>, vector<256x64xf32> -> vector<256x64xf32>
    %17 = arith.addf %9, %16 : vector<256x64xf32>
    %c2 = arith.constant 2 : index
    %c0_16 = arith.constant 0 : index
    %c0_17 = arith.constant 0 : index
    %18 = vector.load %arg2[%c2, %c0_16, %c0_17] : memref<9x256x256xbf16, #tpu.memory_space<vmem>>, vector<1x256x256xbf16>
    %19 = vector.shape_cast %18 : vector<1x256x256xbf16> to vector<256x256xbf16>
    %cst_18 = arith.constant dense<0.000000e+00> : vector<256x8xf32>
    %20 = tpu.matmul %19, %2, %cst_18 {dimension_numbers = #tpu.dot_dimension_numbers<[1], [0], [0], [1], [0, 0, 1, 1], [], []>} : vector<256x256xbf16>, vector<256x8xbf16>, vector<256x8xf32> -> vector<256x8xf32>
    %21 = arith.truncf %20 : vector<256x8xf32> to vector<256x8xbf16>
    %c2_19 = arith.constant 2 : index
    %c0_20 = arith.constant 0 : index
    %c0_21 = arith.constant 0 : index
    %22 = vector.load %arg12[%c2_19, %c0_20, %c0_21] : memref<9x8x64xbf16, #tpu.memory_space<vmem>>, vector<1x8x64xbf16>
    %23 = vector.shape_cast %22 : vector<1x8x64xbf16> to vector<8x64xbf16>
    %cst_22 = arith.constant dense<0.000000e+00> : vector<256x64xf32>
    %24 = tpu.matmul %21, %23, %cst_22 {dimension_numbers = #tpu.dot_dimension_numbers<[1], [0], [0], [1], [0, 0, 1, 1], [], []>} : vector<256x8xbf16>, vector<8x64xbf16>, vector<256x64xf32> -> vector<256x64xf32>
    %25 = arith.addf %17, %24 : vector<256x64xf32>
    %c3 = arith.constant 3 : index
    %c0_23 = arith.constant 0 : index
    %c0_24 = arith.constant 0 : index
    %26 = vector.load %arg2[%c3, %c0_23, %c0_24] : memref<9x256x256xbf16, #tpu.memory_space<vmem>>, vector<1x256x256xbf16>
    %27 = vector.shape_cast %26 : vector<1x256x256xbf16> to vector<256x256xbf16>
    %cst_25 = arith.constant dense<0.000000e+00> : vector<256x8xf32>
    %28 = tpu.matmul %27, %2, %cst_25 {dimension_numbers = #tpu.dot_dimension_numbers<[1], [0], [0], [1], [0, 0, 1, 1], [], []>} : vector<256x256xbf16>, vector<256x8xbf16>, vector<256x8xf32> -> vector<256x8xf32>
    %29 = arith.truncf %28 : vector<256x8xf32> to vector<256x8xbf16>
    %c3_26 = arith.constant 3 : index
    %c0_27 = arith.constant 0 : index
    %c0_28 = arith.constant 0 : index
    %30 = vector.load %arg12[%c3_26, %c0_27, %c0_28] : memref<9x8x64xbf16, #tpu.memory_space<vmem>>, vector<1x8x64xbf16>
    %31 = vector.shape_cast %30 : vector<1x8x64xbf16> to vector<8x64xbf16>
    %cst_29 = arith.constant dense<0.000000e+00> : vector<256x64xf32>
    %32 = tpu.matmul %29, %31, %cst_29 {dimension_numbers = #tpu.dot_dimension_numbers<[1], [0], [0], [1], [0, 0, 1, 1], [], []>} : vector<256x8xbf16>, vector<8x64xbf16>, vector<256x64xf32> -> vector<256x64xf32>
    %33 = arith.addf %25, %32 : vector<256x64xf32>
    %c4 = arith.constant 4 : index
    %c0_30 = arith.constant 0 : index
    %c0_31 = arith.constant 0 : index
    %34 = vector.load %arg2[%c4, %c0_30, %c0_31] : memref<9x256x256xbf16, #tpu.memory_space<vmem>>, vector<1x256x256xbf16>
    %35 = vector.shape_cast %34 : vector<1x256x256xbf16> to vector<256x256xbf16>
    %cst_32 = arith.constant dense<0.000000e+00> : vector<256x8xf32>
    %36 = tpu.matmul %35, %2, %cst_32 {dimension_numbers = #tpu.dot_dimension_numbers<[1], [0], [0], [1], [0, 0, 1, 1], [], []>} : vector<256x256xbf16>, vector<256x8xbf16>, vector<256x8xf32> -> vector<256x8xf32>
    %37 = arith.truncf %36 : vector<256x8xf32> to vector<256x8xbf16>
    %c4_33 = arith.constant 4 : index
    %c0_34 = arith.constant 0 : index
    %c0_35 = arith.constant 0 : index
    %38 = vector.load %arg12[%c4_33, %c0_34, %c0_35] : memref<9x8x64xbf16, #tpu.memory_space<vmem>>, vector<1x8x64xbf16>
    %39 = vector.shape_cast %38 : vector<1x8x64xbf16> to vector<8x64xbf16>
    %cst_36 = arith.constant dense<0.000000e+00> : vector<256x64xf32>
    %40 = tpu.matmul %37, %39, %cst_36 {dimension_numbers = #tpu.dot_dimension_numbers<[1], [0], [0], [1], [0, 0, 1, 1], [], []>} : vector<256x8xbf16>, vector<8x64xbf16>, vector<256x64xf32> -> vector<256x64xf32>
    %41 = arith.addf %33, %40 : vector<256x64xf32>
    %c5 = arith.constant 5 : index
    %c0_37 = arith.constant 0 : index
    %c0_38 = arith.constant 0 : index
    %42 = vector.load %arg2[%c5, %c0_37, %c0_38] : memref<9x256x256xbf16, #tpu.memory_space<vmem>>, vector<1x256x256xbf16>
    %43 = vector.shape_cast %42 : vector<1x256x256xbf16> to vector<256x256xbf16>
    %cst_39 = arith.constant dense<0.000000e+00> : vector<256x8xf32>
    %44 = tpu.matmul %43, %2, %cst_39 {dimension_numbers = #tpu.dot_dimension_numbers<[1], [0], [0], [1], [0, 0, 1, 1], [], []>} : vector<256x256xbf16>, vector<256x8xbf16>, vector<256x8xf32> -> vector<256x8xf32>
    %45 = arith.truncf %44 : vector<256x8xf32> to vector<256x8xbf16>
    %c5_40 = arith.constant 5 : index
    %c0_41 = arith.constant 0 : index
    %c0_42 = arith.constant 0 : index
    %46 = vector.load %arg12[%c5_40, %c0_41, %c0_42] : memref<9x8x64xbf16, #tpu.memory_space<vmem>>, vector<1x8x64xbf16>
    %47 = vector.shape_cast %46 : vector<1x8x64xbf16> to vector<8x64xbf16>
    %cst_43 = arith.constant dense<0.000000e+00> : vector<256x64xf32>
    %48 = tpu.matmul %45, %47, %cst_43 {dimension_numbers = #tpu.dot_dimension_numbers<[1], [0], [0], [1], [0, 0, 1, 1], [], []>} : vector<256x8xbf16>, vector<8x64xbf16>, vector<256x64xf32> -> vector<256x64xf32>
    %49 = arith.addf %41, %48 : vector<256x64xf32>
    %c6 = arith.constant 6 : index
    %c0_44 = arith.constant 0 : index
    %c0_45 = arith.constant 0 : index
    %50 = vector.load %arg2[%c6, %c0_44, %c0_45] : memref<9x256x256xbf16, #tpu.memory_space<vmem>>, vector<1x256x256xbf16>
    %51 = vector.shape_cast %50 : vector<1x256x256xbf16> to vector<256x256xbf16>
    %cst_46 = arith.constant dense<0.000000e+00> : vector<256x8xf32>
    %52 = tpu.matmul %51, %2, %cst_46 {dimension_numbers = #tpu.dot_dimension_numbers<[1], [0], [0], [1], [0, 0, 1, 1], [], []>} : vector<256x256xbf16>, vector<256x8xbf16>, vector<256x8xf32> -> vector<256x8xf32>
    %53 = arith.truncf %52 : vector<256x8xf32> to vector<256x8xbf16>
    %c6_47 = arith.constant 6 : index
    %c0_48 = arith.constant 0 : index
    %c0_49 = arith.constant 0 : index
    %54 = vector.load %arg12[%c6_47, %c0_48, %c0_49] : memref<9x8x64xbf16, #tpu.memory_space<vmem>>, vector<1x8x64xbf16>
    %55 = vector.shape_cast %54 : vector<1x8x64xbf16> to vector<8x64xbf16>
    %cst_50 = arith.constant dense<0.000000e+00> : vector<256x64xf32>
    %56 = tpu.matmul %53, %55, %cst_50 {dimension_numbers = #tpu.dot_dimension_numbers<[1], [0], [0], [1], [0, 0, 1, 1], [], []>} : vector<256x8xbf16>, vector<8x64xbf16>, vector<256x64xf32> -> vector<256x64xf32>
    %57 = arith.addf %49, %56 : vector<256x64xf32>
    %c7 = arith.constant 7 : index
    %c0_51 = arith.constant 0 : index
    %c0_52 = arith.constant 0 : index
    %58 = vector.load %arg2[%c7, %c0_51, %c0_52] : memref<9x256x256xbf16, #tpu.memory_space<vmem>>, vector<1x256x256xbf16>
    %59 = vector.shape_cast %58 : vector<1x256x256xbf16> to vector<256x256xbf16>
    %cst_53 = arith.constant dense<0.000000e+00> : vector<256x8xf32>
    %60 = tpu.matmul %59, %2, %cst_53 {dimension_numbers = #tpu.dot_dimension_numbers<[1], [0], [0], [1], [0, 0, 1, 1], [], []>} : vector<256x256xbf16>, vector<256x8xbf16>, vector<256x8xf32> -> vector<256x8xf32>
    %61 = arith.truncf %60 : vector<256x8xf32> to vector<256x8xbf16>
    %c7_54 = arith.constant 7 : index
    %c0_55 = arith.constant 0 : index
    %c0_56 = arith.constant 0 : index
    %62 = vector.load %arg12[%c7_54, %c0_55, %c0_56] : memref<9x8x64xbf16, #tpu.memory_space<vmem>>, vector<1x8x64xbf16>
    %63 = vector.shape_cast %62 : vector<1x8x64xbf16> to vector<8x64xbf16>
    %cst_57 = arith.constant dense<0.000000e+00> : vector<256x64xf32>
    %64 = tpu.matmul %61, %63, %cst_57 {dimension_numbers = #tpu.dot_dimension_numbers<[1], [0], [0], [1], [0, 0, 1, 1], [], []>} : vector<256x8xbf16>, vector<8x64xbf16>, vector<256x64xf32> -> vector<256x64xf32>
    %65 = arith.addf %57, %64 : vector<256x64xf32>
    %c8 = arith.constant 8 : index
    %c0_58 = arith.constant 0 : index
    %c0_59 = arith.constant 0 : index
    %66 = vector.load %arg2[%c8, %c0_58, %c0_59] : memref<9x256x256xbf16, #tpu.memory_space<vmem>>, vector<1x256x256xbf16>
    %67 = vector.shape_cast %66 : vector<1x256x256xbf16> to vector<256x256xbf16>
    %cst_60 = arith.constant dense<0.000000e+00> : vector<256x8xf32>
    %68 = tpu.matmul %67, %2, %cst_60 {dimension_numbers = #tpu.dot_dimension_numbers<[1], [0], [0], [1], [0, 0, 1, 1], [], []>} : vector<256x256xbf16>, vector<256x8xbf16>, vector<256x8xf32> -> vector<256x8xf32>
    %69 = arith.truncf %68 : vector<256x8xf32> to vector<256x8xbf16>
    %c8_61 = arith.constant 8 : index
    %c0_62 = arith.constant 0 : index
    %c0_63 = arith.constant 0 : index
    %70 = vector.load %arg12[%c8_61, %c0_62, %c0_63] : memref<9x8x64xbf16, #tpu.memory_space<vmem>>, vector<1x8x64xbf16>
    %71 = vector.shape_cast %70 : vector<1x8x64xbf16> to vector<8x64xbf16>
    %cst_64 = arith.constant dense<0.000000e+00> : vector<256x64xf32>
    %72 = tpu.matmul %69, %71, %cst_64 {dimension_numbers = #tpu.dot_dimension_numbers<[1], [0], [0], [1], [0, 0, 1, 1], [], []>} : vector<256x8xbf16>, vector<8x64xbf16>, vector<256x64xf32> -> vector<256x64xf32>
    %73 = arith.addf %65, %72 : vector<256x64xf32>
    %c0_65 = arith.constant 0 : index
    %c0_66 = arith.constant 0 : index
    %74 = vector.load %arg13[%c0_65, %c0_66] : memref<1x64xf32, #tpu.memory_space<vmem>>, vector<1x64xf32>
    %75 = vector.broadcast %74 : vector<1x64xf32> to vector<256x64xf32>
    %76 = arith.addf %73, %75 : vector<256x64xf32>
    %cst_67 = arith.constant 0.000000e+00 : f32
    %77 = vector.broadcast %cst_67 : f32 to vector<256x64xf32>
    %78 = arith.maximumf %76, %77 : vector<256x64xf32>
    %79 = arith.truncf %78 : vector<256x64xf32> to vector<256x64xbf16>
    %c0_68 = arith.constant 0 : index
    %c0_69 = arith.constant 0 : index
    %c0_70 = arith.constant 0 : index
    %80 = vector.load %arg6[%c0_68, %c0_69, %c0_70] : memref<4x64x256xbf16, #tpu.memory_space<vmem>>, vector<1x64x256xbf16>
    %81 = vector.shape_cast %80 : vector<1x64x256xbf16> to vector<64x256xbf16>
    %cst_71 = arith.constant dense<0.000000e+00> : vector<64x64xf32>
    %82 = tpu.matmul %81, %79, %cst_71 {dimension_numbers = #tpu.dot_dimension_numbers<[1], [0], [0], [1], [0, 0, 1, 1], [], []>} : vector<64x256xbf16>, vector<256x64xbf16>, vector<64x64xf32> -> vector<64x64xf32>
    %c1_72 = arith.constant 1 : index
    %c0_73 = arith.constant 0 : index
    %c0_74 = arith.constant 0 : index
    %83 = vector.load %arg6[%c1_72, %c0_73, %c0_74] : memref<4x64x256xbf16, #tpu.memory_space<vmem>>, vector<1x64x256xbf16>
    %84 = vector.shape_cast %83 : vector<1x64x256xbf16> to vector<64x256xbf16>
    %cst_75 = arith.constant dense<0.000000e+00> : vector<64x64xf32>
    %85 = tpu.matmul %84, %79, %cst_75 {dimension_numbers = #tpu.dot_dimension_numbers<[1], [0], [0], [1], [0, 0, 1, 1], [], []>} : vector<64x256xbf16>, vector<256x64xbf16>, vector<64x64xf32> -> vector<64x64xf32>
    %86 = arith.maximumf %82, %85 : vector<64x64xf32>
    %c2_76 = arith.constant 2 : index
    %c0_77 = arith.constant 0 : index
    %c0_78 = arith.constant 0 : index
    %87 = vector.load %arg6[%c2_76, %c0_77, %c0_78] : memref<4x64x256xbf16, #tpu.memory_space<vmem>>, vector<1x64x256xbf16>
    %88 = vector.shape_cast %87 : vector<1x64x256xbf16> to vector<64x256xbf16>
    %cst_79 = arith.constant dense<0.000000e+00> : vector<64x64xf32>
    %89 = tpu.matmul %88, %79, %cst_79 {dimension_numbers = #tpu.dot_dimension_numbers<[1], [0], [0], [1], [0, 0, 1, 1], [], []>} : vector<64x256xbf16>, vector<256x64xbf16>, vector<64x64xf32> -> vector<64x64xf32>
    %90 = arith.maximumf %86, %89 : vector<64x64xf32>
    %c3_80 = arith.constant 3 : index
    %c0_81 = arith.constant 0 : index
    %c0_82 = arith.constant 0 : index
    %91 = vector.load %arg6[%c3_80, %c0_81, %c0_82] : memref<4x64x256xbf16, #tpu.memory_space<vmem>>, vector<1x64x256xbf16>
    %92 = vector.shape_cast %91 : vector<1x64x256xbf16> to vector<64x256xbf16>
    %cst_83 = arith.constant dense<0.000000e+00> : vector<64x64xf32>
    %93 = tpu.matmul %92, %79, %cst_83 {dimension_numbers = #tpu.dot_dimension_numbers<[1], [0], [0], [1], [0, 0, 1, 1], [], []>} : vector<64x256xbf16>, vector<256x64xbf16>, vector<64x64xf32> -> vector<64x64xf32>
    %94 = arith.maximumf %90, %93 : vector<64x64xf32>
    %95 = arith.truncf %94 : vector<64x64xf32> to vector<64x64xbf16>
    %c0_84 = arith.constant 0 : index
    %c0_85 = arith.constant 0 : index
    %c0_86 = arith.constant 0 : index
    %96 = vector.load %arg3[%c0_84, %c0_85, %c0_86] : memref<9x64x64xbf16, #tpu.memory_space<vmem>>, vector<1x64x64xbf16>
    %97 = vector.shape_cast %96 : vector<1x64x64xbf16> to vector<64x64xbf16>
    %cst_87 = arith.constant dense<0.000000e+00> : vector<64x64xf32>
    %98 = tpu.matmul %97, %95, %cst_87 {dimension_numbers = #tpu.dot_dimension_numbers<[1], [0], [0], [1], [0, 0, 1, 1], [], []>} : vector<64x64xbf16>, vector<64x64xbf16>, vector<64x64xf32> -> vector<64x64xf32>
    %99 = arith.truncf %98 : vector<64x64xf32> to vector<64x64xbf16>
    %c0_88 = arith.constant 0 : index
    %c0_89 = arith.constant 0 : index
    %c0_90 = arith.constant 0 : index
    %100 = vector.load %arg14[%c0_88, %c0_89, %c0_90] : memref<9x64x128xbf16, #tpu.memory_space<vmem>>, vector<1x64x128xbf16>
    %101 = vector.shape_cast %100 : vector<1x64x128xbf16> to vector<64x128xbf16>
    %cst_91 = arith.constant dense<0.000000e+00> : vector<64x128xf32>
    %102 = tpu.matmul %99, %101, %cst_91 {dimension_numbers = #tpu.dot_dimension_numbers<[1], [0], [0], [1], [0, 0, 1, 1], [], []>} : vector<64x64xbf16>, vector<64x128xbf16>, vector<64x128xf32> -> vector<64x128xf32>
    %c1_92 = arith.constant 1 : index
    %c0_93 = arith.constant 0 : index
    %c0_94 = arith.constant 0 : index
    %103 = vector.load %arg3[%c1_92, %c0_93, %c0_94] : memref<9x64x64xbf16, #tpu.memory_space<vmem>>, vector<1x64x64xbf16>
    %104 = vector.shape_cast %103 : vector<1x64x64xbf16> to vector<64x64xbf16>
    %cst_95 = arith.constant dense<0.000000e+00> : vector<64x64xf32>
    %105 = tpu.matmul %104, %95, %cst_95 {dimension_numbers = #tpu.dot_dimension_numbers<[1], [0], [0], [1], [0, 0, 1, 1], [], []>} : vector<64x64xbf16>, vector<64x64xbf16>, vector<64x64xf32> -> vector<64x64xf32>
    %106 = arith.truncf %105 : vector<64x64xf32> to vector<64x64xbf16>
    %c1_96 = arith.constant 1 : index
    %c0_97 = arith.constant 0 : index
    %c0_98 = arith.constant 0 : index
    %107 = vector.load %arg14[%c1_96, %c0_97, %c0_98] : memref<9x64x128xbf16, #tpu.memory_space<vmem>>, vector<1x64x128xbf16>
    %108 = vector.shape_cast %107 : vector<1x64x128xbf16> to vector<64x128xbf16>
    %cst_99 = arith.constant dense<0.000000e+00> : vector<64x128xf32>
    %109 = tpu.matmul %106, %108, %cst_99 {dimension_numbers = #tpu.dot_dimension_numbers<[1], [0], [0], [1], [0, 0, 1, 1], [], []>} : vector<64x64xbf16>, vector<64x128xbf16>, vector<64x128xf32> -> vector<64x128xf32>
    %110 = arith.addf %102, %109 : vector<64x128xf32>
    %c2_100 = arith.constant 2 : index
    %c0_101 = arith.constant 0 : index
    %c0_102 = arith.constant 0 : index
    %111 = vector.load %arg3[%c2_100, %c0_101, %c0_102] : memref<9x64x64xbf16, #tpu.memory_space<vmem>>, vector<1x64x64xbf16>
    %112 = vector.shape_cast %111 : vector<1x64x64xbf16> to vector<64x64xbf16>
    %cst_103 = arith.constant dense<0.000000e+00> : vector<64x64xf32>
    %113 = tpu.matmul %112, %95, %cst_103 {dimension_numbers = #tpu.dot_dimension_numbers<[1], [0], [0], [1], [0, 0, 1, 1], [], []>} : vector<64x64xbf16>, vector<64x64xbf16>, vector<64x64xf32> -> vector<64x64xf32>
    %114 = arith.truncf %113 : vector<64x64xf32> to vector<64x64xbf16>
    %c2_104 = arith.constant 2 : index
    %c0_105 = arith.constant 0 : index
    %c0_106 = arith.constant 0 : index
    %115 = vector.load %arg14[%c2_104, %c0_105, %c0_106] : memref<9x64x128xbf16, #tpu.memory_space<vmem>>, vector<1x64x128xbf16>
    %116 = vector.shape_cast %115 : vector<1x64x128xbf16> to vector<64x128xbf16>
    %cst_107 = arith.constant dense<0.000000e+00> : vector<64x128xf32>
    %117 = tpu.matmul %114, %116, %cst_107 {dimension_numbers = #tpu.dot_dimension_numbers<[1], [0], [0], [1], [0, 0, 1, 1], [], []>} : vector<64x64xbf16>, vector<64x128xbf16>, vector<64x128xf32> -> vector<64x128xf32>
    %118 = arith.addf %110, %117 : vector<64x128xf32>
    %c3_108 = arith.constant 3 : index
    %c0_109 = arith.constant 0 : index
    %c0_110 = arith.constant 0 : index
    %119 = vector.load %arg3[%c3_108, %c0_109, %c0_110] : memref<9x64x64xbf16, #tpu.memory_space<vmem>>, vector<1x64x64xbf16>
    %120 = vector.shape_cast %119 : vector<1x64x64xbf16> to vector<64x64xbf16>
    %cst_111 = arith.constant dense<0.000000e+00> : vector<64x64xf32>
    %121 = tpu.matmul %120, %95, %cst_111 {dimension_numbers = #tpu.dot_dimension_numbers<[1], [0], [0], [1], [0, 0, 1, 1], [], []>} : vector<64x64xbf16>, vector<64x64xbf16>, vector<64x64xf32> -> vector<64x64xf32>
    %122 = arith.truncf %121 : vector<64x64xf32> to vector<64x64xbf16>
    %c3_112 = arith.constant 3 : index
    %c0_113 = arith.constant 0 : index
    %c0_114 = arith.constant 0 : index
    %123 = vector.load %arg14[%c3_112, %c0_113, %c0_114] : memref<9x64x128xbf16, #tpu.memory_space<vmem>>, vector<1x64x128xbf16>
    %124 = vector.shape_cast %123 : vector<1x64x128xbf16> to vector<64x128xbf16>
    %cst_115 = arith.constant dense<0.000000e+00> : vector<64x128xf32>
    %125 = tpu.matmul %122, %124, %cst_115 {dimension_numbers = #tpu.dot_dimension_numbers<[1], [0], [0], [1], [0, 0, 1, 1], [], []>} : vector<64x64xbf16>, vector<64x128xbf16>, vector<64x128xf32> -> vector<64x128xf32>
    %126 = arith.addf %118, %125 : vector<64x128xf32>
    %c4_116 = arith.constant 4 : index
    %c0_117 = arith.constant 0 : index
    %c0_118 = arith.constant 0 : index
    %127 = vector.load %arg3[%c4_116, %c0_117, %c0_118] : memref<9x64x64xbf16, #tpu.memory_space<vmem>>, vector<1x64x64xbf16>
    %128 = vector.shape_cast %127 : vector<1x64x64xbf16> to vector<64x64xbf16>
    %cst_119 = arith.constant dense<0.000000e+00> : vector<64x64xf32>
    %129 = tpu.matmul %128, %95, %cst_119 {dimension_numbers = #tpu.dot_dimension_numbers<[1], [0], [0], [1], [0, 0, 1, 1], [], []>} : vector<64x64xbf16>, vector<64x64xbf16>, vector<64x64xf32> -> vector<64x64xf32>
    %130 = arith.truncf %129 : vector<64x64xf32> to vector<64x64xbf16>
    %c4_120 = arith.constant 4 : index
    %c0_121 = arith.constant 0 : index
    %c0_122 = arith.constant 0 : index
    %131 = vector.load %arg14[%c4_120, %c0_121, %c0_122] : memref<9x64x128xbf16, #tpu.memory_space<vmem>>, vector<1x64x128xbf16>
    %132 = vector.shape_cast %131 : vector<1x64x128xbf16> to vector<64x128xbf16>
    %cst_123 = arith.constant dense<0.000000e+00> : vector<64x128xf32>
    %133 = tpu.matmul %130, %132, %cst_123 {dimension_numbers = #tpu.dot_dimension_numbers<[1], [0], [0], [1], [0, 0, 1, 1], [], []>} : vector<64x64xbf16>, vector<64x128xbf16>, vector<64x128xf32> -> vector<64x128xf32>
    %134 = arith.addf %126, %133 : vector<64x128xf32>
    %c5_124 = arith.constant 5 : index
    %c0_125 = arith.constant 0 : index
    %c0_126 = arith.constant 0 : index
    %135 = vector.load %arg3[%c5_124, %c0_125, %c0_126] : memref<9x64x64xbf16, #tpu.memory_space<vmem>>, vector<1x64x64xbf16>
    %136 = vector.shape_cast %135 : vector<1x64x64xbf16> to vector<64x64xbf16>
    %cst_127 = arith.constant dense<0.000000e+00> : vector<64x64xf32>
    %137 = tpu.matmul %136, %95, %cst_127 {dimension_numbers = #tpu.dot_dimension_numbers<[1], [0], [0], [1], [0, 0, 1, 1], [], []>} : vector<64x64xbf16>, vector<64x64xbf16>, vector<64x64xf32> -> vector<64x64xf32>
    %138 = arith.truncf %137 : vector<64x64xf32> to vector<64x64xbf16>
    %c5_128 = arith.constant 5 : index
    %c0_129 = arith.constant 0 : index
    %c0_130 = arith.constant 0 : index
    %139 = vector.load %arg14[%c5_128, %c0_129, %c0_130] : memref<9x64x128xbf16, #tpu.memory_space<vmem>>, vector<1x64x128xbf16>
    %140 = vector.shape_cast %139 : vector<1x64x128xbf16> to vector<64x128xbf16>
    %cst_131 = arith.constant dense<0.000000e+00> : vector<64x128xf32>
    %141 = tpu.matmul %138, %140, %cst_131 {dimension_numbers = #tpu.dot_dimension_numbers<[1], [0], [0], [1], [0, 0, 1, 1], [], []>} : vector<64x64xbf16>, vector<64x128xbf16>, vector<64x128xf32> -> vector<64x128xf32>
    %142 = arith.addf %134, %141 : vector<64x128xf32>
    %c6_132 = arith.constant 6 : index
    %c0_133 = arith.constant 0 : index
    %c0_134 = arith.constant 0 : index
    %143 = vector.load %arg3[%c6_132, %c0_133, %c0_134] : memref<9x64x64xbf16, #tpu.memory_space<vmem>>, vector<1x64x64xbf16>
    %144 = vector.shape_cast %143 : vector<1x64x64xbf16> to vector<64x64xbf16>
    %cst_135 = arith.constant dense<0.000000e+00> : vector<64x64xf32>
    %145 = tpu.matmul %144, %95, %cst_135 {dimension_numbers = #tpu.dot_dimension_numbers<[1], [0], [0], [1], [0, 0, 1, 1], [], []>} : vector<64x64xbf16>, vector<64x64xbf16>, vector<64x64xf32> -> vector<64x64xf32>
    %146 = arith.truncf %145 : vector<64x64xf32> to vector<64x64xbf16>
    %c6_136 = arith.constant 6 : index
    %c0_137 = arith.constant 0 : index
    %c0_138 = arith.constant 0 : index
    %147 = vector.load %arg14[%c6_136, %c0_137, %c0_138] : memref<9x64x128xbf16, #tpu.memory_space<vmem>>, vector<1x64x128xbf16>
    %148 = vector.shape_cast %147 : vector<1x64x128xbf16> to vector<64x128xbf16>
    %cst_139 = arith.constant dense<0.000000e+00> : vector<64x128xf32>
    %149 = tpu.matmul %146, %148, %cst_139 {dimension_numbers = #tpu.dot_dimension_numbers<[1], [0], [0], [1], [0, 0, 1, 1], [], []>} : vector<64x64xbf16>, vector<64x128xbf16>, vector<64x128xf32> -> vector<64x128xf32>
    %150 = arith.addf %142, %149 : vector<64x128xf32>
    %c7_140 = arith.constant 7 : index
    %c0_141 = arith.constant 0 : index
    %c0_142 = arith.constant 0 : index
    %151 = vector.load %arg3[%c7_140, %c0_141, %c0_142] : memref<9x64x64xbf16, #tpu.memory_space<vmem>>, vector<1x64x64xbf16>
    %152 = vector.shape_cast %151 : vector<1x64x64xbf16> to vector<64x64xbf16>
    %cst_143 = arith.constant dense<0.000000e+00> : vector<64x64xf32>
    %153 = tpu.matmul %152, %95, %cst_143 {dimension_numbers = #tpu.dot_dimension_numbers<[1], [0], [0], [1], [0, 0, 1, 1], [], []>} : vector<64x64xbf16>, vector<64x64xbf16>, vector<64x64xf32> -> vector<64x64xf32>
    %154 = arith.truncf %153 : vector<64x64xf32> to vector<64x64xbf16>
    %c7_144 = arith.constant 7 : index
    %c0_145 = arith.constant 0 : index
    %c0_146 = arith.constant 0 : index
    %155 = vector.load %arg14[%c7_144, %c0_145, %c0_146] : memref<9x64x128xbf16, #tpu.memory_space<vmem>>, vector<1x64x128xbf16>
    %156 = vector.shape_cast %155 : vector<1x64x128xbf16> to vector<64x128xbf16>
    %cst_147 = arith.constant dense<0.000000e+00> : vector<64x128xf32>
    %157 = tpu.matmul %154, %156, %cst_147 {dimension_numbers = #tpu.dot_dimension_numbers<[1], [0], [0], [1], [0, 0, 1, 1], [], []>} : vector<64x64xbf16>, vector<64x128xbf16>, vector<64x128xf32> -> vector<64x128xf32>
    %158 = arith.addf %150, %157 : vector<64x128xf32>
    %c8_148 = arith.constant 8 : index
    %c0_149 = arith.constant 0 : index
    %c0_150 = arith.constant 0 : index
    %159 = vector.load %arg3[%c8_148, %c0_149, %c0_150] : memref<9x64x64xbf16, #tpu.memory_space<vmem>>, vector<1x64x64xbf16>
    %160 = vector.shape_cast %159 : vector<1x64x64xbf16> to vector<64x64xbf16>
    %cst_151 = arith.constant dense<0.000000e+00> : vector<64x64xf32>
    %161 = tpu.matmul %160, %95, %cst_151 {dimension_numbers = #tpu.dot_dimension_numbers<[1], [0], [0], [1], [0, 0, 1, 1], [], []>} : vector<64x64xbf16>, vector<64x64xbf16>, vector<64x64xf32> -> vector<64x64xf32>
    %162 = arith.truncf %161 : vector<64x64xf32> to vector<64x64xbf16>
    %c8_152 = arith.constant 8 : index
    %c0_153 = arith.constant 0 : index
    %c0_154 = arith.constant 0 : index
    %163 = vector.load %arg14[%c8_152, %c0_153, %c0_154] : memref<9x64x128xbf16, #tpu.memory_space<vmem>>, vector<1x64x128xbf16>
    %164 = vector.shape_cast %163 : vector<1x64x128xbf16> to vector<64x128xbf16>
    %cst_155 = arith.constant dense<0.000000e+00> : vector<64x128xf32>
    %165 = tpu.matmul %162, %164, %cst_155 {dimension_numbers = #tpu.dot_dimension_numbers<[1], [0], [0], [1], [0, 0, 1, 1], [], []>} : vector<64x64xbf16>, vector<64x128xbf16>, vector<64x128xf32> -> vector<64x128xf32>
    %166 = arith.addf %158, %165 : vector<64x128xf32>
    %c0_156 = arith.constant 0 : index
    %c0_157 = arith.constant 0 : index
    %167 = vector.load %arg15[%c0_156, %c0_157] : memref<1x128xf32, #tpu.memory_space<vmem>>, vector<1x128xf32>
    %168 = vector.broadcast %167 : vector<1x128xf32> to vector<64x128xf32>
    %169 = arith.addf %166, %168 : vector<64x128xf32>
    %cst_158 = arith.constant 0.000000e+00 : f32
    %170 = vector.broadcast %cst_158 : f32 to vector<64x128xf32>
    %171 = arith.maximumf %169, %170 : vector<64x128xf32>
    %172 = arith.truncf %171 : vector<64x128xf32> to vector<64x128xbf16>
    %c0_159 = arith.constant 0 : index
    %c0_160 = arith.constant 0 : index
    %c0_161 = arith.constant 0 : index
    %173 = vector.load %arg7[%c0_159, %c0_160, %c0_161] : memref<4x16x64xbf16, #tpu.memory_space<vmem>>, vector<1x16x64xbf16>
    %174 = vector.shape_cast %173 : vector<1x16x64xbf16> to vector<16x64xbf16>
    %cst_162 = arith.constant dense<0.000000e+00> : vector<16x128xf32>
    %175 = tpu.matmul %174, %172, %cst_162 {dimension_numbers = #tpu.dot_dimension_numbers<[1], [0], [0], [1], [0, 0, 1, 1], [], []>} : vector<16x64xbf16>, vector<64x128xbf16>, vector<16x128xf32> -> vector<16x128xf32>
    %c1_163 = arith.constant 1 : index
    %c0_164 = arith.constant 0 : index
    %c0_165 = arith.constant 0 : index
    %176 = vector.load %arg7[%c1_163, %c0_164, %c0_165] : memref<4x16x64xbf16, #tpu.memory_space<vmem>>, vector<1x16x64xbf16>
    %177 = vector.shape_cast %176 : vector<1x16x64xbf16> to vector<16x64xbf16>
    %cst_166 = arith.constant dense<0.000000e+00> : vector<16x128xf32>
    %178 = tpu.matmul %177, %172, %cst_166 {dimension_numbers = #tpu.dot_dimension_numbers<[1], [0], [0], [1], [0, 0, 1, 1], [], []>} : vector<16x64xbf16>, vector<64x128xbf16>, vector<16x128xf32> -> vector<16x128xf32>
    %179 = arith.maximumf %175, %178 : vector<16x128xf32>
    %c2_167 = arith.constant 2 : index
    %c0_168 = arith.constant 0 : index
    %c0_169 = arith.constant 0 : index
    %180 = vector.load %arg7[%c2_167, %c0_168, %c0_169] : memref<4x16x64xbf16, #tpu.memory_space<vmem>>, vector<1x16x64xbf16>
    %181 = vector.shape_cast %180 : vector<1x16x64xbf16> to vector<16x64xbf16>
    %cst_170 = arith.constant dense<0.000000e+00> : vector<16x128xf32>
    %182 = tpu.matmul %181, %172, %cst_170 {dimension_numbers = #tpu.dot_dimension_numbers<[1], [0], [0], [1], [0, 0, 1, 1], [], []>} : vector<16x64xbf16>, vector<64x128xbf16>, vector<16x128xf32> -> vector<16x128xf32>
    %183 = arith.maximumf %179, %182 : vector<16x128xf32>
    %c3_171 = arith.constant 3 : index
    %c0_172 = arith.constant 0 : index
    %c0_173 = arith.constant 0 : index
    %184 = vector.load %arg7[%c3_171, %c0_172, %c0_173] : memref<4x16x64xbf16, #tpu.memory_space<vmem>>, vector<1x16x64xbf16>
    %185 = vector.shape_cast %184 : vector<1x16x64xbf16> to vector<16x64xbf16>
    %cst_174 = arith.constant dense<0.000000e+00> : vector<16x128xf32>
    %186 = tpu.matmul %185, %172, %cst_174 {dimension_numbers = #tpu.dot_dimension_numbers<[1], [0], [0], [1], [0, 0, 1, 1], [], []>} : vector<16x64xbf16>, vector<64x128xbf16>, vector<16x128xf32> -> vector<16x128xf32>
    %187 = arith.maximumf %183, %186 : vector<16x128xf32>
    %188 = arith.truncf %187 : vector<16x128xf32> to vector<16x128xbf16>
    %c0_175 = arith.constant 0 : index
    %c0_176 = arith.constant 0 : index
    %c0_177 = arith.constant 0 : index
    %189 = vector.load %arg4[%c0_175, %c0_176, %c0_177] : memref<9x16x16xbf16, #tpu.memory_space<vmem>>, vector<1x16x16xbf16>
    %190 = vector.shape_cast %189 : vector<1x16x16xbf16> to vector<16x16xbf16>
    %cst_178 = arith.constant dense<0.000000e+00> : vector<16x128xf32>
    %191 = tpu.matmul %190, %188, %cst_178 {dimension_numbers = #tpu.dot_dimension_numbers<[1], [0], [0], [1], [0, 0, 1, 1], [], []>} : vector<16x16xbf16>, vector<16x128xbf16>, vector<16x128xf32> -> vector<16x128xf32>
    %192 = arith.truncf %191 : vector<16x128xf32> to vector<16x128xbf16>
    %c0_179 = arith.constant 0 : index
    %c0_180 = arith.constant 0 : index
    %c0_181 = arith.constant 0 : index
    %193 = vector.load %arg16[%c0_179, %c0_180, %c0_181] : memref<9x128x256xbf16, #tpu.memory_space<vmem>>, vector<1x128x256xbf16>
    %194 = vector.shape_cast %193 : vector<1x128x256xbf16> to vector<128x256xbf16>
    %cst_182 = arith.constant dense<0.000000e+00> : vector<16x256xf32>
    %195 = tpu.matmul %192, %194, %cst_182 {dimension_numbers = #tpu.dot_dimension_numbers<[1], [0], [0], [1], [0, 0, 1, 1], [], []>} : vector<16x128xbf16>, vector<128x256xbf16>, vector<16x256xf32> -> vector<16x256xf32>
    %c1_183 = arith.constant 1 : index
    %c0_184 = arith.constant 0 : index
    %c0_185 = arith.constant 0 : index
    %196 = vector.load %arg4[%c1_183, %c0_184, %c0_185] : memref<9x16x16xbf16, #tpu.memory_space<vmem>>, vector<1x16x16xbf16>
    %197 = vector.shape_cast %196 : vector<1x16x16xbf16> to vector<16x16xbf16>
    %cst_186 = arith.constant dense<0.000000e+00> : vector<16x128xf32>
    %198 = tpu.matmul %197, %188, %cst_186 {dimension_numbers = #tpu.dot_dimension_numbers<[1], [0], [0], [1], [0, 0, 1, 1], [], []>} : vector<16x16xbf16>, vector<16x128xbf16>, vector<16x128xf32> -> vector<16x128xf32>
    %199 = arith.truncf %198 : vector<16x128xf32> to vector<16x128xbf16>
    %c1_187 = arith.constant 1 : index
    %c0_188 = arith.constant 0 : index
    %c0_189 = arith.constant 0 : index
    %200 = vector.load %arg16[%c1_187, %c0_188, %c0_189] : memref<9x128x256xbf16, #tpu.memory_space<vmem>>, vector<1x128x256xbf16>
    %201 = vector.shape_cast %200 : vector<1x128x256xbf16> to vector<128x256xbf16>
    %cst_190 = arith.constant dense<0.000000e+00> : vector<16x256xf32>
    %202 = tpu.matmul %199, %201, %cst_190 {dimension_numbers = #tpu.dot_dimension_numbers<[1], [0], [0], [1], [0, 0, 1, 1], [], []>} : vector<16x128xbf16>, vector<128x256xbf16>, vector<16x256xf32> -> vector<16x256xf32>
    %203 = arith.addf %195, %202 : vector<16x256xf32>
    %c2_191 = arith.constant 2 : index
    %c0_192 = arith.constant 0 : index
    %c0_193 = arith.constant 0 : index
    %204 = vector.load %arg4[%c2_191, %c0_192, %c0_193] : memref<9x16x16xbf16, #tpu.memory_space<vmem>>, vector<1x16x16xbf16>
    %205 = vector.shape_cast %204 : vector<1x16x16xbf16> to vector<16x16xbf16>
    %cst_194 = arith.constant dense<0.000000e+00> : vector<16x128xf32>
    %206 = tpu.matmul %205, %188, %cst_194 {dimension_numbers = #tpu.dot_dimension_numbers<[1], [0], [0], [1], [0, 0, 1, 1], [], []>} : vector<16x16xbf16>, vector<16x128xbf16>, vector<16x128xf32> -> vector<16x128xf32>
    %207 = arith.truncf %206 : vector<16x128xf32> to vector<16x128xbf16>
    %c2_195 = arith.constant 2 : index
    %c0_196 = arith.constant 0 : index
    %c0_197 = arith.constant 0 : index
    %208 = vector.load %arg16[%c2_195, %c0_196, %c0_197] : memref<9x128x256xbf16, #tpu.memory_space<vmem>>, vector<1x128x256xbf16>
    %209 = vector.shape_cast %208 : vector<1x128x256xbf16> to vector<128x256xbf16>
    %cst_198 = arith.constant dense<0.000000e+00> : vector<16x256xf32>
    %210 = tpu.matmul %207, %209, %cst_198 {dimension_numbers = #tpu.dot_dimension_numbers<[1], [0], [0], [1], [0, 0, 1, 1], [], []>} : vector<16x128xbf16>, vector<128x256xbf16>, vector<16x256xf32> -> vector<16x256xf32>
    %211 = arith.addf %203, %210 : vector<16x256xf32>
    %c3_199 = arith.constant 3 : index
    %c0_200 = arith.constant 0 : index
    %c0_201 = arith.constant 0 : index
    %212 = vector.load %arg4[%c3_199, %c0_200, %c0_201] : memref<9x16x16xbf16, #tpu.memory_space<vmem>>, vector<1x16x16xbf16>
    %213 = vector.shape_cast %212 : vector<1x16x16xbf16> to vector<16x16xbf16>
    %cst_202 = arith.constant dense<0.000000e+00> : vector<16x128xf32>
    %214 = tpu.matmul %213, %188, %cst_202 {dimension_numbers = #tpu.dot_dimension_numbers<[1], [0], [0], [1], [0, 0, 1, 1], [], []>} : vector<16x16xbf16>, vector<16x128xbf16>, vector<16x128xf32> -> vector<16x128xf32>
    %215 = arith.truncf %214 : vector<16x128xf32> to vector<16x128xbf16>
    %c3_203 = arith.constant 3 : index
    %c0_204 = arith.constant 0 : index
    %c0_205 = arith.constant 0 : index
    %216 = vector.load %arg16[%c3_203, %c0_204, %c0_205] : memref<9x128x256xbf16, #tpu.memory_space<vmem>>, vector<1x128x256xbf16>
    %217 = vector.shape_cast %216 : vector<1x128x256xbf16> to vector<128x256xbf16>
    %cst_206 = arith.constant dense<0.000000e+00> : vector<16x256xf32>
    %218 = tpu.matmul %215, %217, %cst_206 {dimension_numbers = #tpu.dot_dimension_numbers<[1], [0], [0], [1], [0, 0, 1, 1], [], []>} : vector<16x128xbf16>, vector<128x256xbf16>, vector<16x256xf32> -> vector<16x256xf32>
    %219 = arith.addf %211, %218 : vector<16x256xf32>
    %c4_207 = arith.constant 4 : index
    %c0_208 = arith.constant 0 : index
    %c0_209 = arith.constant 0 : index
    %220 = vector.load %arg4[%c4_207, %c0_208, %c0_209] : memref<9x16x16xbf16, #tpu.memory_space<vmem>>, vector<1x16x16xbf16>
    %221 = vector.shape_cast %220 : vector<1x16x16xbf16> to vector<16x16xbf16>
    %cst_210 = arith.constant dense<0.000000e+00> : vector<16x128xf32>
    %222 = tpu.matmul %221, %188, %cst_210 {dimension_numbers = #tpu.dot_dimension_numbers<[1], [0], [0], [1], [0, 0, 1, 1], [], []>} : vector<16x16xbf16>, vector<16x128xbf16>, vector<16x128xf32> -> vector<16x128xf32>
    %223 = arith.truncf %222 : vector<16x128xf32> to vector<16x128xbf16>
    %c4_211 = arith.constant 4 : index
    %c0_212 = arith.constant 0 : index
    %c0_213 = arith.constant 0 : index
    %224 = vector.load %arg16[%c4_211, %c0_212, %c0_213] : memref<9x128x256xbf16, #tpu.memory_space<vmem>>, vector<1x128x256xbf16>
    %225 = vector.shape_cast %224 : vector<1x128x256xbf16> to vector<128x256xbf16>
    %cst_214 = arith.constant dense<0.000000e+00> : vector<16x256xf32>
    %226 = tpu.matmul %223, %225, %cst_214 {dimension_numbers = #tpu.dot_dimension_numbers<[1], [0], [0], [1], [0, 0, 1, 1], [], []>} : vector<16x128xbf16>, vector<128x256xbf16>, vector<16x256xf32> -> vector<16x256xf32>
    %227 = arith.addf %219, %226 : vector<16x256xf32>
    %c5_215 = arith.constant 5 : index
    %c0_216 = arith.constant 0 : index
    %c0_217 = arith.constant 0 : index
    %228 = vector.load %arg4[%c5_215, %c0_216, %c0_217] : memref<9x16x16xbf16, #tpu.memory_space<vmem>>, vector<1x16x16xbf16>
    %229 = vector.shape_cast %228 : vector<1x16x16xbf16> to vector<16x16xbf16>
    %cst_218 = arith.constant dense<0.000000e+00> : vector<16x128xf32>
    %230 = tpu.matmul %229, %188, %cst_218 {dimension_numbers = #tpu.dot_dimension_numbers<[1], [0], [0], [1], [0, 0, 1, 1], [], []>} : vector<16x16xbf16>, vector<16x128xbf16>, vector<16x128xf32> -> vector<16x128xf32>
    %231 = arith.truncf %230 : vector<16x128xf32> to vector<16x128xbf16>
    %c5_219 = arith.constant 5 : index
    %c0_220 = arith.constant 0 : index
    %c0_221 = arith.constant 0 : index
    %232 = vector.load %arg16[%c5_219, %c0_220, %c0_221] : memref<9x128x256xbf16, #tpu.memory_space<vmem>>, vector<1x128x256xbf16>
    %233 = vector.shape_cast %232 : vector<1x128x256xbf16> to vector<128x256xbf16>
    %cst_222 = arith.constant dense<0.000000e+00> : vector<16x256xf32>
    %234 = tpu.matmul %231, %233, %cst_222 {dimension_numbers = #tpu.dot_dimension_numbers<[1], [0], [0], [1], [0, 0, 1, 1], [], []>} : vector<16x128xbf16>, vector<128x256xbf16>, vector<16x256xf32> -> vector<16x256xf32>
    %235 = arith.addf %227, %234 : vector<16x256xf32>
    %c6_223 = arith.constant 6 : index
    %c0_224 = arith.constant 0 : index
    %c0_225 = arith.constant 0 : index
    %236 = vector.load %arg4[%c6_223, %c0_224, %c0_225] : memref<9x16x16xbf16, #tpu.memory_space<vmem>>, vector<1x16x16xbf16>
    %237 = vector.shape_cast %236 : vector<1x16x16xbf16> to vector<16x16xbf16>
    %cst_226 = arith.constant dense<0.000000e+00> : vector<16x128xf32>
    %238 = tpu.matmul %237, %188, %cst_226 {dimension_numbers = #tpu.dot_dimension_numbers<[1], [0], [0], [1], [0, 0, 1, 1], [], []>} : vector<16x16xbf16>, vector<16x128xbf16>, vector<16x128xf32> -> vector<16x128xf32>
    %239 = arith.truncf %238 : vector<16x128xf32> to vector<16x128xbf16>
    %c6_227 = arith.constant 6 : index
    %c0_228 = arith.constant 0 : index
    %c0_229 = arith.constant 0 : index
    %240 = vector.load %arg16[%c6_227, %c0_228, %c0_229] : memref<9x128x256xbf16, #tpu.memory_space<vmem>>, vector<1x128x256xbf16>
    %241 = vector.shape_cast %240 : vector<1x128x256xbf16> to vector<128x256xbf16>
    %cst_230 = arith.constant dense<0.000000e+00> : vector<16x256xf32>
    %242 = tpu.matmul %239, %241, %cst_230 {dimension_numbers = #tpu.dot_dimension_numbers<[1], [0], [0], [1], [0, 0, 1, 1], [], []>} : vector<16x128xbf16>, vector<128x256xbf16>, vector<16x256xf32> -> vector<16x256xf32>
    %243 = arith.addf %235, %242 : vector<16x256xf32>
    %c7_231 = arith.constant 7 : index
    %c0_232 = arith.constant 0 : index
    %c0_233 = arith.constant 0 : index
    %244 = vector.load %arg4[%c7_231, %c0_232, %c0_233] : memref<9x16x16xbf16, #tpu.memory_space<vmem>>, vector<1x16x16xbf16>
    %245 = vector.shape_cast %244 : vector<1x16x16xbf16> to vector<16x16xbf16>
    %cst_234 = arith.constant dense<0.000000e+00> : vector<16x128xf32>
    %246 = tpu.matmul %245, %188, %cst_234 {dimension_numbers = #tpu.dot_dimension_numbers<[1], [0], [0], [1], [0, 0, 1, 1], [], []>} : vector<16x16xbf16>, vector<16x128xbf16>, vector<16x128xf32> -> vector<16x128xf32>
    %247 = arith.truncf %246 : vector<16x128xf32> to vector<16x128xbf16>
    %c7_235 = arith.constant 7 : index
    %c0_236 = arith.constant 0 : index
    %c0_237 = arith.constant 0 : index
    %248 = vector.load %arg16[%c7_235, %c0_236, %c0_237] : memref<9x128x256xbf16, #tpu.memory_space<vmem>>, vector<1x128x256xbf16>
    %249 = vector.shape_cast %248 : vector<1x128x256xbf16> to vector<128x256xbf16>
    %cst_238 = arith.constant dense<0.000000e+00> : vector<16x256xf32>
    %250 = tpu.matmul %247, %249, %cst_238 {dimension_numbers = #tpu.dot_dimension_numbers<[1], [0], [0], [1], [0, 0, 1, 1], [], []>} : vector<16x128xbf16>, vector<128x256xbf16>, vector<16x256xf32> -> vector<16x256xf32>
    %251 = arith.addf %243, %250 : vector<16x256xf32>
    %c8_239 = arith.constant 8 : index
    %c0_240 = arith.constant 0 : index
    %c0_241 = arith.constant 0 : index
    %252 = vector.load %arg4[%c8_239, %c0_240, %c0_241] : memref<9x16x16xbf16, #tpu.memory_space<vmem>>, vector<1x16x16xbf16>
    %253 = vector.shape_cast %252 : vector<1x16x16xbf16> to vector<16x16xbf16>
    %cst_242 = arith.constant dense<0.000000e+00> : vector<16x128xf32>
    %254 = tpu.matmul %253, %188, %cst_242 {dimension_numbers = #tpu.dot_dimension_numbers<[1], [0], [0], [1], [0, 0, 1, 1], [], []>} : vector<16x16xbf16>, vector<16x128xbf16>, vector<16x128xf32> -> vector<16x128xf32>
    %255 = arith.truncf %254 : vector<16x128xf32> to vector<16x128xbf16>
    %c8_243 = arith.constant 8 : index
    %c0_244 = arith.constant 0 : index
    %c0_245 = arith.constant 0 : index
    %256 = vector.load %arg16[%c8_243, %c0_244, %c0_245] : memref<9x128x256xbf16, #tpu.memory_space<vmem>>, vector<1x128x256xbf16>
    %257 = vector.shape_cast %256 : vector<1x128x256xbf16> to vector<128x256xbf16>
    %cst_246 = arith.constant dense<0.000000e+00> : vector<16x256xf32>
    %258 = tpu.matmul %255, %257, %cst_246 {dimension_numbers = #tpu.dot_dimension_numbers<[1], [0], [0], [1], [0, 0, 1, 1], [], []>} : vector<16x128xbf16>, vector<128x256xbf16>, vector<16x256xf32> -> vector<16x256xf32>
    %259 = arith.addf %251, %258 : vector<16x256xf32>
    %c0_247 = arith.constant 0 : index
    %c0_248 = arith.constant 0 : index
    %260 = vector.load %arg17[%c0_247, %c0_248] : memref<1x256xf32, #tpu.memory_space<vmem>>, vector<1x256xf32>
    %261 = vector.broadcast %260 : vector<1x256xf32> to vector<16x256xf32>
    %262 = arith.addf %259, %261 : vector<16x256xf32>
    %cst_249 = arith.constant 0.000000e+00 : f32
    %263 = vector.broadcast %cst_249 : f32 to vector<16x256xf32>
    %264 = arith.maximumf %262, %263 : vector<16x256xf32>
    %265 = arith.truncf %264 : vector<16x256xf32> to vector<16x256xbf16>
    %c0_250 = arith.constant 0 : index
    %c0_251 = arith.constant 0 : index
    %c0_252 = arith.constant 0 : index
    %266 = vector.load %arg8[%c0_250, %c0_251, %c0_252] : memref<4x8x16xbf16, #tpu.memory_space<vmem>>, vector<1x8x16xbf16>
    %267 = vector.shape_cast %266 : vector<1x8x16xbf16> to vector<8x16xbf16>
    %cst_253 = arith.constant dense<0.000000e+00> : vector<8x256xf32>
    %268 = tpu.matmul %267, %265, %cst_253 {dimension_numbers = #tpu.dot_dimension_numbers<[1], [0], [0], [1], [0, 0, 1, 1], [], []>} : vector<8x16xbf16>, vector<16x256xbf16>, vector<8x256xf32> -> vector<8x256xf32>
    %c1_254 = arith.constant 1 : index
    %c0_255 = arith.constant 0 : index
    %c0_256 = arith.constant 0 : index
    %269 = vector.load %arg8[%c1_254, %c0_255, %c0_256] : memref<4x8x16xbf16, #tpu.memory_space<vmem>>, vector<1x8x16xbf16>
    %270 = vector.shape_cast %269 : vector<1x8x16xbf16> to vector<8x16xbf16>
    %cst_257 = arith.constant dense<0.000000e+00> : vector<8x256xf32>
    %271 = tpu.matmul %270, %265, %cst_257 {dimension_numbers = #tpu.dot_dimension_numbers<[1], [0], [0], [1], [0, 0, 1, 1], [], []>} : vector<8x16xbf16>, vector<16x256xbf16>, vector<8x256xf32> -> vector<8x256xf32>
    %272 = arith.maximumf %268, %271 : vector<8x256xf32>
    %c2_258 = arith.constant 2 : index
    %c0_259 = arith.constant 0 : index
    %c0_260 = arith.constant 0 : index
    %273 = vector.load %arg8[%c2_258, %c0_259, %c0_260] : memref<4x8x16xbf16, #tpu.memory_space<vmem>>, vector<1x8x16xbf16>
    %274 = vector.shape_cast %273 : vector<1x8x16xbf16> to vector<8x16xbf16>
    %cst_261 = arith.constant dense<0.000000e+00> : vector<8x256xf32>
    %275 = tpu.matmul %274, %265, %cst_261 {dimension_numbers = #tpu.dot_dimension_numbers<[1], [0], [0], [1], [0, 0, 1, 1], [], []>} : vector<8x16xbf16>, vector<16x256xbf16>, vector<8x256xf32> -> vector<8x256xf32>
    %276 = arith.maximumf %272, %275 : vector<8x256xf32>
    %c3_262 = arith.constant 3 : index
    %c0_263 = arith.constant 0 : index
    %c0_264 = arith.constant 0 : index
    %277 = vector.load %arg8[%c3_262, %c0_263, %c0_264] : memref<4x8x16xbf16, #tpu.memory_space<vmem>>, vector<1x8x16xbf16>
    %278 = vector.shape_cast %277 : vector<1x8x16xbf16> to vector<8x16xbf16>
    %cst_265 = arith.constant dense<0.000000e+00> : vector<8x256xf32>
    %279 = tpu.matmul %278, %265, %cst_265 {dimension_numbers = #tpu.dot_dimension_numbers<[1], [0], [0], [1], [0, 0, 1, 1], [], []>} : vector<8x16xbf16>, vector<16x256xbf16>, vector<8x256xf32> -> vector<8x256xf32>
    %280 = arith.maximumf %276, %279 : vector<8x256xf32>
    %281 = arith.truncf %280 : vector<8x256xf32> to vector<8x256xbf16>
    %c0_266 = arith.constant 0 : index
    %c0_267 = arith.constant 0 : index
    %c0_268 = arith.constant 0 : index
    %282 = vector.load %arg5[%c0_266, %c0_267, %c0_268] : memref<9x8x8xbf16, #tpu.memory_space<vmem>>, vector<1x8x8xbf16>
    %283 = vector.shape_cast %282 : vector<1x8x8xbf16> to vector<8x8xbf16>
    %cst_269 = arith.constant dense<0.000000e+00> : vector<8x256xf32>
    %284 = tpu.matmul %283, %281, %cst_269 {dimension_numbers = #tpu.dot_dimension_numbers<[1], [0], [0], [1], [0, 0, 1, 1], [], []>} : vector<8x8xbf16>, vector<8x256xbf16>, vector<8x256xf32> -> vector<8x256xf32>
    %285 = arith.truncf %284 : vector<8x256xf32> to vector<8x256xbf16>
    %c0_270 = arith.constant 0 : index
    %c0_271 = arith.constant 0 : index
    %c0_272 = arith.constant 0 : index
    %286 = vector.load %arg18[%c0_270, %c0_271, %c0_272] : memref<9x256x128xbf16, #tpu.memory_space<vmem>>, vector<1x256x128xbf16>
    %287 = vector.shape_cast %286 : vector<1x256x128xbf16> to vector<256x128xbf16>
    %cst_273 = arith.constant dense<0.000000e+00> : vector<8x128xf32>
    %288 = tpu.matmul %285, %287, %cst_273 {dimension_numbers = #tpu.dot_dimension_numbers<[1], [0], [0], [1], [0, 0, 1, 1], [], []>} : vector<8x256xbf16>, vector<256x128xbf16>, vector<8x128xf32> -> vector<8x128xf32>
    %c1_274 = arith.constant 1 : index
    %c0_275 = arith.constant 0 : index
    %c0_276 = arith.constant 0 : index
    %289 = vector.load %arg5[%c1_274, %c0_275, %c0_276] : memref<9x8x8xbf16, #tpu.memory_space<vmem>>, vector<1x8x8xbf16>
    %290 = vector.shape_cast %289 : vector<1x8x8xbf16> to vector<8x8xbf16>
    %cst_277 = arith.constant dense<0.000000e+00> : vector<8x256xf32>
    %291 = tpu.matmul %290, %281, %cst_277 {dimension_numbers = #tpu.dot_dimension_numbers<[1], [0], [0], [1], [0, 0, 1, 1], [], []>} : vector<8x8xbf16>, vector<8x256xbf16>, vector<8x256xf32> -> vector<8x256xf32>
    %292 = arith.truncf %291 : vector<8x256xf32> to vector<8x256xbf16>
    %c1_278 = arith.constant 1 : index
    %c0_279 = arith.constant 0 : index
    %c0_280 = arith.constant 0 : index
    %293 = vector.load %arg18[%c1_278, %c0_279, %c0_280] : memref<9x256x128xbf16, #tpu.memory_space<vmem>>, vector<1x256x128xbf16>
    %294 = vector.shape_cast %293 : vector<1x256x128xbf16> to vector<256x128xbf16>
    %cst_281 = arith.constant dense<0.000000e+00> : vector<8x128xf32>
    %295 = tpu.matmul %292, %294, %cst_281 {dimension_numbers = #tpu.dot_dimension_numbers<[1], [0], [0], [1], [0, 0, 1, 1], [], []>} : vector<8x256xbf16>, vector<256x128xbf16>, vector<8x128xf32> -> vector<8x128xf32>
    %296 = arith.addf %288, %295 : vector<8x128xf32>
    %c2_282 = arith.constant 2 : index
    %c0_283 = arith.constant 0 : index
    %c0_284 = arith.constant 0 : index
    %297 = vector.load %arg5[%c2_282, %c0_283, %c0_284] : memref<9x8x8xbf16, #tpu.memory_space<vmem>>, vector<1x8x8xbf16>
    %298 = vector.shape_cast %297 : vector<1x8x8xbf16> to vector<8x8xbf16>
    %cst_285 = arith.constant dense<0.000000e+00> : vector<8x256xf32>
    %299 = tpu.matmul %298, %281, %cst_285 {dimension_numbers = #tpu.dot_dimension_numbers<[1], [0], [0], [1], [0, 0, 1, 1], [], []>} : vector<8x8xbf16>, vector<8x256xbf16>, vector<8x256xf32> -> vector<8x256xf32>
    %300 = arith.truncf %299 : vector<8x256xf32> to vector<8x256xbf16>
    %c2_286 = arith.constant 2 : index
    %c0_287 = arith.constant 0 : index
    %c0_288 = arith.constant 0 : index
    %301 = vector.load %arg18[%c2_286, %c0_287, %c0_288] : memref<9x256x128xbf16, #tpu.memory_space<vmem>>, vector<1x256x128xbf16>
    %302 = vector.shape_cast %301 : vector<1x256x128xbf16> to vector<256x128xbf16>
    %cst_289 = arith.constant dense<0.000000e+00> : vector<8x128xf32>
    %303 = tpu.matmul %300, %302, %cst_289 {dimension_numbers = #tpu.dot_dimension_numbers<[1], [0], [0], [1], [0, 0, 1, 1], [], []>} : vector<8x256xbf16>, vector<256x128xbf16>, vector<8x128xf32> -> vector<8x128xf32>
    %304 = arith.addf %296, %303 : vector<8x128xf32>
    %c3_290 = arith.constant 3 : index
    %c0_291 = arith.constant 0 : index
    %c0_292 = arith.constant 0 : index
    %305 = vector.load %arg5[%c3_290, %c0_291, %c0_292] : memref<9x8x8xbf16, #tpu.memory_space<vmem>>, vector<1x8x8xbf16>
    %306 = vector.shape_cast %305 : vector<1x8x8xbf16> to vector<8x8xbf16>
    %cst_293 = arith.constant dense<0.000000e+00> : vector<8x256xf32>
    %307 = tpu.matmul %306, %281, %cst_293 {dimension_numbers = #tpu.dot_dimension_numbers<[1], [0], [0], [1], [0, 0, 1, 1], [], []>} : vector<8x8xbf16>, vector<8x256xbf16>, vector<8x256xf32> -> vector<8x256xf32>
    %308 = arith.truncf %307 : vector<8x256xf32> to vector<8x256xbf16>
    %c3_294 = arith.constant 3 : index
    %c0_295 = arith.constant 0 : index
    %c0_296 = arith.constant 0 : index
    %309 = vector.load %arg18[%c3_294, %c0_295, %c0_296] : memref<9x256x128xbf16, #tpu.memory_space<vmem>>, vector<1x256x128xbf16>
    %310 = vector.shape_cast %309 : vector<1x256x128xbf16> to vector<256x128xbf16>
    %cst_297 = arith.constant dense<0.000000e+00> : vector<8x128xf32>
    %311 = tpu.matmul %308, %310, %cst_297 {dimension_numbers = #tpu.dot_dimension_numbers<[1], [0], [0], [1], [0, 0, 1, 1], [], []>} : vector<8x256xbf16>, vector<256x128xbf16>, vector<8x128xf32> -> vector<8x128xf32>
    %312 = arith.addf %304, %311 : vector<8x128xf32>
    %c4_298 = arith.constant 4 : index
    %c0_299 = arith.constant 0 : index
    %c0_300 = arith.constant 0 : index
    %313 = vector.load %arg5[%c4_298, %c0_299, %c0_300] : memref<9x8x8xbf16, #tpu.memory_space<vmem>>, vector<1x8x8xbf16>
    %314 = vector.shape_cast %313 : vector<1x8x8xbf16> to vector<8x8xbf16>
    %cst_301 = arith.constant dense<0.000000e+00> : vector<8x256xf32>
    %315 = tpu.matmul %314, %281, %cst_301 {dimension_numbers = #tpu.dot_dimension_numbers<[1], [0], [0], [1], [0, 0, 1, 1], [], []>} : vector<8x8xbf16>, vector<8x256xbf16>, vector<8x256xf32> -> vector<8x256xf32>
    %316 = arith.truncf %315 : vector<8x256xf32> to vector<8x256xbf16>
    %c4_302 = arith.constant 4 : index
    %c0_303 = arith.constant 0 : index
    %c0_304 = arith.constant 0 : index
    %317 = vector.load %arg18[%c4_302, %c0_303, %c0_304] : memref<9x256x128xbf16, #tpu.memory_space<vmem>>, vector<1x256x128xbf16>
    %318 = vector.shape_cast %317 : vector<1x256x128xbf16> to vector<256x128xbf16>
    %cst_305 = arith.constant dense<0.000000e+00> : vector<8x128xf32>
    %319 = tpu.matmul %316, %318, %cst_305 {dimension_numbers = #tpu.dot_dimension_numbers<[1], [0], [0], [1], [0, 0, 1, 1], [], []>} : vector<8x256xbf16>, vector<256x128xbf16>, vector<8x128xf32> -> vector<8x128xf32>
    %320 = arith.addf %312, %319 : vector<8x128xf32>
    %c5_306 = arith.constant 5 : index
    %c0_307 = arith.constant 0 : index
    %c0_308 = arith.constant 0 : index
    %321 = vector.load %arg5[%c5_306, %c0_307, %c0_308] : memref<9x8x8xbf16, #tpu.memory_space<vmem>>, vector<1x8x8xbf16>
    %322 = vector.shape_cast %321 : vector<1x8x8xbf16> to vector<8x8xbf16>
    %cst_309 = arith.constant dense<0.000000e+00> : vector<8x256xf32>
    %323 = tpu.matmul %322, %281, %cst_309 {dimension_numbers = #tpu.dot_dimension_numbers<[1], [0], [0], [1], [0, 0, 1, 1], [], []>} : vector<8x8xbf16>, vector<8x256xbf16>, vector<8x256xf32> -> vector<8x256xf32>
    %324 = arith.truncf %323 : vector<8x256xf32> to vector<8x256xbf16>
    %c5_310 = arith.constant 5 : index
    %c0_311 = arith.constant 0 : index
    %c0_312 = arith.constant 0 : index
    %325 = vector.load %arg18[%c5_310, %c0_311, %c0_312] : memref<9x256x128xbf16, #tpu.memory_space<vmem>>, vector<1x256x128xbf16>
    %326 = vector.shape_cast %325 : vector<1x256x128xbf16> to vector<256x128xbf16>
    %cst_313 = arith.constant dense<0.000000e+00> : vector<8x128xf32>
    %327 = tpu.matmul %324, %326, %cst_313 {dimension_numbers = #tpu.dot_dimension_numbers<[1], [0], [0], [1], [0, 0, 1, 1], [], []>} : vector<8x256xbf16>, vector<256x128xbf16>, vector<8x128xf32> -> vector<8x128xf32>
    %328 = arith.addf %320, %327 : vector<8x128xf32>
    %c6_314 = arith.constant 6 : index
    %c0_315 = arith.constant 0 : index
    %c0_316 = arith.constant 0 : index
    %329 = vector.load %arg5[%c6_314, %c0_315, %c0_316] : memref<9x8x8xbf16, #tpu.memory_space<vmem>>, vector<1x8x8xbf16>
    %330 = vector.shape_cast %329 : vector<1x8x8xbf16> to vector<8x8xbf16>
    %cst_317 = arith.constant dense<0.000000e+00> : vector<8x256xf32>
    %331 = tpu.matmul %330, %281, %cst_317 {dimension_numbers = #tpu.dot_dimension_numbers<[1], [0], [0], [1], [0, 0, 1, 1], [], []>} : vector<8x8xbf16>, vector<8x256xbf16>, vector<8x256xf32> -> vector<8x256xf32>
    %332 = arith.truncf %331 : vector<8x256xf32> to vector<8x256xbf16>
    %c6_318 = arith.constant 6 : index
    %c0_319 = arith.constant 0 : index
    %c0_320 = arith.constant 0 : index
    %333 = vector.load %arg18[%c6_318, %c0_319, %c0_320] : memref<9x256x128xbf16, #tpu.memory_space<vmem>>, vector<1x256x128xbf16>
    %334 = vector.shape_cast %333 : vector<1x256x128xbf16> to vector<256x128xbf16>
    %cst_321 = arith.constant dense<0.000000e+00> : vector<8x128xf32>
    %335 = tpu.matmul %332, %334, %cst_321 {dimension_numbers = #tpu.dot_dimension_numbers<[1], [0], [0], [1], [0, 0, 1, 1], [], []>} : vector<8x256xbf16>, vector<256x128xbf16>, vector<8x128xf32> -> vector<8x128xf32>
    %336 = arith.addf %328, %335 : vector<8x128xf32>
    %c7_322 = arith.constant 7 : index
    %c0_323 = arith.constant 0 : index
    %c0_324 = arith.constant 0 : index
    %337 = vector.load %arg5[%c7_322, %c0_323, %c0_324] : memref<9x8x8xbf16, #tpu.memory_space<vmem>>, vector<1x8x8xbf16>
    %338 = vector.shape_cast %337 : vector<1x8x8xbf16> to vector<8x8xbf16>
    %cst_325 = arith.constant dense<0.000000e+00> : vector<8x256xf32>
    %339 = tpu.matmul %338, %281, %cst_325 {dimension_numbers = #tpu.dot_dimension_numbers<[1], [0], [0], [1], [0, 0, 1, 1], [], []>} : vector<8x8xbf16>, vector<8x256xbf16>, vector<8x256xf32> -> vector<8x256xf32>
    %340 = arith.truncf %339 : vector<8x256xf32> to vector<8x256xbf16>
    %c7_326 = arith.constant 7 : index
    %c0_327 = arith.constant 0 : index
    %c0_328 = arith.constant 0 : index
    %341 = vector.load %arg18[%c7_326, %c0_327, %c0_328] : memref<9x256x128xbf16, #tpu.memory_space<vmem>>, vector<1x256x128xbf16>
    %342 = vector.shape_cast %341 : vector<1x256x128xbf16> to vector<256x128xbf16>
    %cst_329 = arith.constant dense<0.000000e+00> : vector<8x128xf32>
    %343 = tpu.matmul %340, %342, %cst_329 {dimension_numbers = #tpu.dot_dimension_numbers<[1], [0], [0], [1], [0, 0, 1, 1], [], []>} : vector<8x256xbf16>, vector<256x128xbf16>, vector<8x128xf32> -> vector<8x128xf32>
    %344 = arith.addf %336, %343 : vector<8x128xf32>
    %c8_330 = arith.constant 8 : index
    %c0_331 = arith.constant 0 : index
    %c0_332 = arith.constant 0 : index
    %345 = vector.load %arg5[%c8_330, %c0_331, %c0_332] : memref<9x8x8xbf16, #tpu.memory_space<vmem>>, vector<1x8x8xbf16>
    %346 = vector.shape_cast %345 : vector<1x8x8xbf16> to vector<8x8xbf16>
    %cst_333 = arith.constant dense<0.000000e+00> : vector<8x256xf32>
    %347 = tpu.matmul %346, %281, %cst_333 {dimension_numbers = #tpu.dot_dimension_numbers<[1], [0], [0], [1], [0, 0, 1, 1], [], []>} : vector<8x8xbf16>, vector<8x256xbf16>, vector<8x256xf32> -> vector<8x256xf32>
    %348 = arith.truncf %347 : vector<8x256xf32> to vector<8x256xbf16>
    %c8_334 = arith.constant 8 : index
    %c0_335 = arith.constant 0 : index
    %c0_336 = arith.constant 0 : index
    %349 = vector.load %arg18[%c8_334, %c0_335, %c0_336] : memref<9x256x128xbf16, #tpu.memory_space<vmem>>, vector<1x256x128xbf16>
    %350 = vector.shape_cast %349 : vector<1x256x128xbf16> to vector<256x128xbf16>
    %cst_337 = arith.constant dense<0.000000e+00> : vector<8x128xf32>
    %351 = tpu.matmul %348, %350, %cst_337 {dimension_numbers = #tpu.dot_dimension_numbers<[1], [0], [0], [1], [0, 0, 1, 1], [], []>} : vector<8x256xbf16>, vector<256x128xbf16>, vector<8x128xf32> -> vector<8x128xf32>
    %352 = arith.addf %344, %351 : vector<8x128xf32>
    %c0_338 = arith.constant 0 : index
    %c0_339 = arith.constant 0 : index
    %353 = vector.load %arg19[%c0_338, %c0_339] : memref<1x128xf32, #tpu.memory_space<vmem>>, vector<1x128xf32>
    %354 = vector.broadcast %353 : vector<1x128xf32> to vector<8x128xf32>
    %355 = arith.addf %352, %354 : vector<8x128xf32>
    %cst_340 = arith.constant 0.000000e+00 : f32
    %356 = vector.broadcast %cst_340 : f32 to vector<8x128xf32>
    %357 = arith.maximumf %355, %356 : vector<8x128xf32>
    %c0_341 = arith.constant 0 : index
    %c0_342 = arith.constant 0 : index
    %358 = vector.load %arg9[%c0_341, %c0_342] : memref<16x8xbf16, #tpu.memory_space<vmem>>, vector<16x8xbf16>
    %359 = arith.truncf %357 : vector<8x128xf32> to vector<8x128xbf16>
    %cst_343 = arith.constant dense<0.000000e+00> : vector<16x128xf32>
    %360 = tpu.matmul %358, %359, %cst_343 {dimension_numbers = #tpu.dot_dimension_numbers<[1], [0], [0], [1], [0, 0, 1, 1], [], []>} : vector<16x8xbf16>, vector<8x128xbf16>, vector<16x128xf32> -> vector<16x128xf32>
    %361 = arith.truncf %360 : vector<16x128xf32> to vector<16x128xbf16>
    %c0_344 = arith.constant 0 : index
    %c0_345 = arith.constant 0 : index
    %c0_346 = arith.constant 0 : index
    %362 = vector.load %arg4[%c0_344, %c0_345, %c0_346] : memref<9x16x16xbf16, #tpu.memory_space<vmem>>, vector<1x16x16xbf16>
    %363 = vector.shape_cast %362 : vector<1x16x16xbf16> to vector<16x16xbf16>
    %cst_347 = arith.constant dense<0.000000e+00> : vector<16x128xf32>
    %364 = tpu.matmul %363, %361, %cst_347 {dimension_numbers = #tpu.dot_dimension_numbers<[1], [0], [0], [1], [0, 0, 1, 1], [], []>} : vector<16x16xbf16>, vector<16x128xbf16>, vector<16x128xf32> -> vector<16x128xf32>
    %365 = arith.truncf %364 : vector<16x128xf32> to vector<16x128xbf16>
    %c0_348 = arith.constant 0 : index
    %c0_349 = arith.constant 0 : index
    %c0_350 = arith.constant 0 : index
    %366 = vector.load %arg20[%c0_348, %c0_349, %c0_350] : memref<9x128x64xbf16, #tpu.memory_space<vmem>>, vector<1x128x64xbf16>
    %367 = vector.shape_cast %366 : vector<1x128x64xbf16> to vector<128x64xbf16>
    %cst_351 = arith.constant dense<0.000000e+00> : vector<16x64xf32>
    %368 = tpu.matmul %365, %367, %cst_351 {dimension_numbers = #tpu.dot_dimension_numbers<[1], [0], [0], [1], [0, 0, 1, 1], [], []>} : vector<16x128xbf16>, vector<128x64xbf16>, vector<16x64xf32> -> vector<16x64xf32>
    %c1_352 = arith.constant 1 : index
    %c0_353 = arith.constant 0 : index
    %c0_354 = arith.constant 0 : index
    %369 = vector.load %arg4[%c1_352, %c0_353, %c0_354] : memref<9x16x16xbf16, #tpu.memory_space<vmem>>, vector<1x16x16xbf16>
    %370 = vector.shape_cast %369 : vector<1x16x16xbf16> to vector<16x16xbf16>
    %cst_355 = arith.constant dense<0.000000e+00> : vector<16x128xf32>
    %371 = tpu.matmul %370, %361, %cst_355 {dimension_numbers = #tpu.dot_dimension_numbers<[1], [0], [0], [1], [0, 0, 1, 1], [], []>} : vector<16x16xbf16>, vector<16x128xbf16>, vector<16x128xf32> -> vector<16x128xf32>
    %372 = arith.truncf %371 : vector<16x128xf32> to vector<16x128xbf16>
    %c1_356 = arith.constant 1 : index
    %c0_357 = arith.constant 0 : index
    %c0_358 = arith.constant 0 : index
    %373 = vector.load %arg20[%c1_356, %c0_357, %c0_358] : memref<9x128x64xbf16, #tpu.memory_space<vmem>>, vector<1x128x64xbf16>
    %374 = vector.shape_cast %373 : vector<1x128x64xbf16> to vector<128x64xbf16>
    %cst_359 = arith.constant dense<0.000000e+00> : vector<16x64xf32>
    %375 = tpu.matmul %372, %374, %cst_359 {dimension_numbers = #tpu.dot_dimension_numbers<[1], [0], [0], [1], [0, 0, 1, 1], [], []>} : vector<16x128xbf16>, vector<128x64xbf16>, vector<16x64xf32> -> vector<16x64xf32>
    %376 = arith.addf %368, %375 : vector<16x64xf32>
    %c2_360 = arith.constant 2 : index
    %c0_361 = arith.constant 0 : index
    %c0_362 = arith.constant 0 : index
    %377 = vector.load %arg4[%c2_360, %c0_361, %c0_362] : memref<9x16x16xbf16, #tpu.memory_space<vmem>>, vector<1x16x16xbf16>
    %378 = vector.shape_cast %377 : vector<1x16x16xbf16> to vector<16x16xbf16>
    %cst_363 = arith.constant dense<0.000000e+00> : vector<16x128xf32>
    %379 = tpu.matmul %378, %361, %cst_363 {dimension_numbers = #tpu.dot_dimension_numbers<[1], [0], [0], [1], [0, 0, 1, 1], [], []>} : vector<16x16xbf16>, vector<16x128xbf16>, vector<16x128xf32> -> vector<16x128xf32>
    %380 = arith.truncf %379 : vector<16x128xf32> to vector<16x128xbf16>
    %c2_364 = arith.constant 2 : index
    %c0_365 = arith.constant 0 : index
    %c0_366 = arith.constant 0 : index
    %381 = vector.load %arg20[%c2_364, %c0_365, %c0_366] : memref<9x128x64xbf16, #tpu.memory_space<vmem>>, vector<1x128x64xbf16>
    %382 = vector.shape_cast %381 : vector<1x128x64xbf16> to vector<128x64xbf16>
    %cst_367 = arith.constant dense<0.000000e+00> : vector<16x64xf32>
    %383 = tpu.matmul %380, %382, %cst_367 {dimension_numbers = #tpu.dot_dimension_numbers<[1], [0], [0], [1], [0, 0, 1, 1], [], []>} : vector<16x128xbf16>, vector<128x64xbf16>, vector<16x64xf32> -> vector<16x64xf32>
    %384 = arith.addf %376, %383 : vector<16x64xf32>
    %c3_368 = arith.constant 3 : index
    %c0_369 = arith.constant 0 : index
    %c0_370 = arith.constant 0 : index
    %385 = vector.load %arg4[%c3_368, %c0_369, %c0_370] : memref<9x16x16xbf16, #tpu.memory_space<vmem>>, vector<1x16x16xbf16>
    %386 = vector.shape_cast %385 : vector<1x16x16xbf16> to vector<16x16xbf16>
    %cst_371 = arith.constant dense<0.000000e+00> : vector<16x128xf32>
    %387 = tpu.matmul %386, %361, %cst_371 {dimension_numbers = #tpu.dot_dimension_numbers<[1], [0], [0], [1], [0, 0, 1, 1], [], []>} : vector<16x16xbf16>, vector<16x128xbf16>, vector<16x128xf32> -> vector<16x128xf32>
    %388 = arith.truncf %387 : vector<16x128xf32> to vector<16x128xbf16>
    %c3_372 = arith.constant 3 : index
    %c0_373 = arith.constant 0 : index
    %c0_374 = arith.constant 0 : index
    %389 = vector.load %arg20[%c3_372, %c0_373, %c0_374] : memref<9x128x64xbf16, #tpu.memory_space<vmem>>, vector<1x128x64xbf16>
    %390 = vector.shape_cast %389 : vector<1x128x64xbf16> to vector<128x64xbf16>
    %cst_375 = arith.constant dense<0.000000e+00> : vector<16x64xf32>
    %391 = tpu.matmul %388, %390, %cst_375 {dimension_numbers = #tpu.dot_dimension_numbers<[1], [0], [0], [1], [0, 0, 1, 1], [], []>} : vector<16x128xbf16>, vector<128x64xbf16>, vector<16x64xf32> -> vector<16x64xf32>
    %392 = arith.addf %384, %391 : vector<16x64xf32>
    %c4_376 = arith.constant 4 : index
    %c0_377 = arith.constant 0 : index
    %c0_378 = arith.constant 0 : index
    %393 = vector.load %arg4[%c4_376, %c0_377, %c0_378] : memref<9x16x16xbf16, #tpu.memory_space<vmem>>, vector<1x16x16xbf16>
    %394 = vector.shape_cast %393 : vector<1x16x16xbf16> to vector<16x16xbf16>
    %cst_379 = arith.constant dense<0.000000e+00> : vector<16x128xf32>
    %395 = tpu.matmul %394, %361, %cst_379 {dimension_numbers = #tpu.dot_dimension_numbers<[1], [0], [0], [1], [0, 0, 1, 1], [], []>} : vector<16x16xbf16>, vector<16x128xbf16>, vector<16x128xf32> -> vector<16x128xf32>
    %396 = arith.truncf %395 : vector<16x128xf32> to vector<16x128xbf16>
    %c4_380 = arith.constant 4 : index
    %c0_381 = arith.constant 0 : index
    %c0_382 = arith.constant 0 : index
    %397 = vector.load %arg20[%c4_380, %c0_381, %c0_382] : memref<9x128x64xbf16, #tpu.memory_space<vmem>>, vector<1x128x64xbf16>
    %398 = vector.shape_cast %397 : vector<1x128x64xbf16> to vector<128x64xbf16>
    %cst_383 = arith.constant dense<0.000000e+00> : vector<16x64xf32>
    %399 = tpu.matmul %396, %398, %cst_383 {dimension_numbers = #tpu.dot_dimension_numbers<[1], [0], [0], [1], [0, 0, 1, 1], [], []>} : vector<16x128xbf16>, vector<128x64xbf16>, vector<16x64xf32> -> vector<16x64xf32>
    %400 = arith.addf %392, %399 : vector<16x64xf32>
    %c5_384 = arith.constant 5 : index
    %c0_385 = arith.constant 0 : index
    %c0_386 = arith.constant 0 : index
    %401 = vector.load %arg4[%c5_384, %c0_385, %c0_386] : memref<9x16x16xbf16, #tpu.memory_space<vmem>>, vector<1x16x16xbf16>
    %402 = vector.shape_cast %401 : vector<1x16x16xbf16> to vector<16x16xbf16>
    %cst_387 = arith.constant dense<0.000000e+00> : vector<16x128xf32>
    %403 = tpu.matmul %402, %361, %cst_387 {dimension_numbers = #tpu.dot_dimension_numbers<[1], [0], [0], [1], [0, 0, 1, 1], [], []>} : vector<16x16xbf16>, vector<16x128xbf16>, vector<16x128xf32> -> vector<16x128xf32>
    %404 = arith.truncf %403 : vector<16x128xf32> to vector<16x128xbf16>
    %c5_388 = arith.constant 5 : index
    %c0_389 = arith.constant 0 : index
    %c0_390 = arith.constant 0 : index
    %405 = vector.load %arg20[%c5_388, %c0_389, %c0_390] : memref<9x128x64xbf16, #tpu.memory_space<vmem>>, vector<1x128x64xbf16>
    %406 = vector.shape_cast %405 : vector<1x128x64xbf16> to vector<128x64xbf16>
    %cst_391 = arith.constant dense<0.000000e+00> : vector<16x64xf32>
    %407 = tpu.matmul %404, %406, %cst_391 {dimension_numbers = #tpu.dot_dimension_numbers<[1], [0], [0], [1], [0, 0, 1, 1], [], []>} : vector<16x128xbf16>, vector<128x64xbf16>, vector<16x64xf32> -> vector<16x64xf32>
    %408 = arith.addf %400, %407 : vector<16x64xf32>
    %c6_392 = arith.constant 6 : index
    %c0_393 = arith.constant 0 : index
    %c0_394 = arith.constant 0 : index
    %409 = vector.load %arg4[%c6_392, %c0_393, %c0_394] : memref<9x16x16xbf16, #tpu.memory_space<vmem>>, vector<1x16x16xbf16>
    %410 = vector.shape_cast %409 : vector<1x16x16xbf16> to vector<16x16xbf16>
    %cst_395 = arith.constant dense<0.000000e+00> : vector<16x128xf32>
    %411 = tpu.matmul %410, %361, %cst_395 {dimension_numbers = #tpu.dot_dimension_numbers<[1], [0], [0], [1], [0, 0, 1, 1], [], []>} : vector<16x16xbf16>, vector<16x128xbf16>, vector<16x128xf32> -> vector<16x128xf32>
    %412 = arith.truncf %411 : vector<16x128xf32> to vector<16x128xbf16>
    %c6_396 = arith.constant 6 : index
    %c0_397 = arith.constant 0 : index
    %c0_398 = arith.constant 0 : index
    %413 = vector.load %arg20[%c6_396, %c0_397, %c0_398] : memref<9x128x64xbf16, #tpu.memory_space<vmem>>, vector<1x128x64xbf16>
    %414 = vector.shape_cast %413 : vector<1x128x64xbf16> to vector<128x64xbf16>
    %cst_399 = arith.constant dense<0.000000e+00> : vector<16x64xf32>
    %415 = tpu.matmul %412, %414, %cst_399 {dimension_numbers = #tpu.dot_dimension_numbers<[1], [0], [0], [1], [0, 0, 1, 1], [], []>} : vector<16x128xbf16>, vector<128x64xbf16>, vector<16x64xf32> -> vector<16x64xf32>
    %416 = arith.addf %408, %415 : vector<16x64xf32>
    %c7_400 = arith.constant 7 : index
    %c0_401 = arith.constant 0 : index
    %c0_402 = arith.constant 0 : index
    %417 = vector.load %arg4[%c7_400, %c0_401, %c0_402] : memref<9x16x16xbf16, #tpu.memory_space<vmem>>, vector<1x16x16xbf16>
    %418 = vector.shape_cast %417 : vector<1x16x16xbf16> to vector<16x16xbf16>
    %cst_403 = arith.constant dense<0.000000e+00> : vector<16x128xf32>
    %419 = tpu.matmul %418, %361, %cst_403 {dimension_numbers = #tpu.dot_dimension_numbers<[1], [0], [0], [1], [0, 0, 1, 1], [], []>} : vector<16x16xbf16>, vector<16x128xbf16>, vector<16x128xf32> -> vector<16x128xf32>
    %420 = arith.truncf %419 : vector<16x128xf32> to vector<16x128xbf16>
    %c7_404 = arith.constant 7 : index
    %c0_405 = arith.constant 0 : index
    %c0_406 = arith.constant 0 : index
    %421 = vector.load %arg20[%c7_404, %c0_405, %c0_406] : memref<9x128x64xbf16, #tpu.memory_space<vmem>>, vector<1x128x64xbf16>
    %422 = vector.shape_cast %421 : vector<1x128x64xbf16> to vector<128x64xbf16>
    %cst_407 = arith.constant dense<0.000000e+00> : vector<16x64xf32>
    %423 = tpu.matmul %420, %422, %cst_407 {dimension_numbers = #tpu.dot_dimension_numbers<[1], [0], [0], [1], [0, 0, 1, 1], [], []>} : vector<16x128xbf16>, vector<128x64xbf16>, vector<16x64xf32> -> vector<16x64xf32>
    %424 = arith.addf %416, %423 : vector<16x64xf32>
    %c8_408 = arith.constant 8 : index
    %c0_409 = arith.constant 0 : index
    %c0_410 = arith.constant 0 : index
    %425 = vector.load %arg4[%c8_408, %c0_409, %c0_410] : memref<9x16x16xbf16, #tpu.memory_space<vmem>>, vector<1x16x16xbf16>
    %426 = vector.shape_cast %425 : vector<1x16x16xbf16> to vector<16x16xbf16>
    %cst_411 = arith.constant dense<0.000000e+00> : vector<16x128xf32>
    %427 = tpu.matmul %426, %361, %cst_411 {dimension_numbers = #tpu.dot_dimension_numbers<[1], [0], [0], [1], [0, 0, 1, 1], [], []>} : vector<16x16xbf16>, vector<16x128xbf16>, vector<16x128xf32> -> vector<16x128xf32>
    %428 = arith.truncf %427 : vector<16x128xf32> to vector<16x128xbf16>
    %c8_412 = arith.constant 8 : index
    %c0_413 = arith.constant 0 : index
    %c0_414 = arith.constant 0 : index
    %429 = vector.load %arg20[%c8_412, %c0_413, %c0_414] : memref<9x128x64xbf16, #tpu.memory_space<vmem>>, vector<1x128x64xbf16>
    %430 = vector.shape_cast %429 : vector<1x128x64xbf16> to vector<128x64xbf16>
    %cst_415 = arith.constant dense<0.000000e+00> : vector<16x64xf32>
    %431 = tpu.matmul %428, %430, %cst_415 {dimension_numbers = #tpu.dot_dimension_numbers<[1], [0], [0], [1], [0, 0, 1, 1], [], []>} : vector<16x128xbf16>, vector<128x64xbf16>, vector<16x64xf32> -> vector<16x64xf32>
    %432 = arith.addf %424, %431 : vector<16x64xf32>
    %c0_416 = arith.constant 0 : index
    %c0_417 = arith.constant 0 : index
    %433 = vector.load %arg21[%c0_416, %c0_417] : memref<1x64xf32, #tpu.memory_space<vmem>>, vector<1x64xf32>
    %434 = vector.broadcast %433 : vector<1x64xf32> to vector<16x64xf32>
    %435 = arith.addf %432, %434 : vector<16x64xf32>
    %cst_418 = arith.constant 0.000000e+00 : f32
    %436 = vector.broadcast %cst_418 : f32 to vector<16x64xf32>
    %437 = arith.maximumf %435, %436 : vector<16x64xf32>
    %c0_419 = arith.constant 0 : index
    %c0_420 = arith.constant 0 : index
    %438 = vector.load %arg10[%c0_419, %c0_420] : memref<64x16xbf16, #tpu.memory_space<vmem>>, vector<64x16xbf16>
    %439 = arith.truncf %437 : vector<16x64xf32> to vector<16x64xbf16>
    %cst_421 = arith.constant dense<0.000000e+00> : vector<64x64xf32>
    %440 = tpu.matmul %438, %439, %cst_421 {dimension_numbers = #tpu.dot_dimension_numbers<[1], [0], [0], [1], [0, 0, 1, 1], [], []>} : vector<64x16xbf16>, vector<16x64xbf16>, vector<64x64xf32> -> vector<64x64xf32>
    %441 = arith.truncf %440 : vector<64x64xf32> to vector<64x64xbf16>
    %c0_422 = arith.constant 0 : index
    %c0_423 = arith.constant 0 : index
    %c0_424 = arith.constant 0 : index
    %442 = vector.load %arg3[%c0_422, %c0_423, %c0_424] : memref<9x64x64xbf16, #tpu.memory_space<vmem>>, vector<1x64x64xbf16>
    %443 = vector.shape_cast %442 : vector<1x64x64xbf16> to vector<64x64xbf16>
    %cst_425 = arith.constant dense<0.000000e+00> : vector<64x64xf32>
    %444 = tpu.matmul %443, %441, %cst_425 {dimension_numbers = #tpu.dot_dimension_numbers<[1], [0], [0], [1], [0, 0, 1, 1], [], []>} : vector<64x64xbf16>, vector<64x64xbf16>, vector<64x64xf32> -> vector<64x64xf32>
    %445 = arith.truncf %444 : vector<64x64xf32> to vector<64x64xbf16>
    %c0_426 = arith.constant 0 : index
    %c0_427 = arith.constant 0 : index
    %c0_428 = arith.constant 0 : index
    %446 = vector.load %arg22[%c0_426, %c0_427, %c0_428] : memref<9x64x2xbf16, #tpu.memory_space<vmem>>, vector<1x64x2xbf16>
    %447 = vector.shape_cast %446 : vector<1x64x2xbf16> to vector<64x2xbf16>
    %cst_429 = arith.constant dense<0.000000e+00> : vector<64x2xf32>
    %448 = tpu.matmul %445, %447, %cst_429 {dimension_numbers = #tpu.dot_dimension_numbers<[1], [0], [0], [1], [0, 0, 1, 1], [], []>} : vector<64x64xbf16>, vector<64x2xbf16>, vector<64x2xf32> -> vector<64x2xf32>
    %c1_430 = arith.constant 1 : index
    %c0_431 = arith.constant 0 : index
    %c0_432 = arith.constant 0 : index
    %449 = vector.load %arg3[%c1_430, %c0_431, %c0_432] : memref<9x64x64xbf16, #tpu.memory_space<vmem>>, vector<1x64x64xbf16>
    %450 = vector.shape_cast %449 : vector<1x64x64xbf16> to vector<64x64xbf16>
    %cst_433 = arith.constant dense<0.000000e+00> : vector<64x64xf32>
    %451 = tpu.matmul %450, %441, %cst_433 {dimension_numbers = #tpu.dot_dimension_numbers<[1], [0], [0], [1], [0, 0, 1, 1], [], []>} : vector<64x64xbf16>, vector<64x64xbf16>, vector<64x64xf32> -> vector<64x64xf32>
    %452 = arith.truncf %451 : vector<64x64xf32> to vector<64x64xbf16>
    %c1_434 = arith.constant 1 : index
    %c0_435 = arith.constant 0 : index
    %c0_436 = arith.constant 0 : index
    %453 = vector.load %arg22[%c1_434, %c0_435, %c0_436] : memref<9x64x2xbf16, #tpu.memory_space<vmem>>, vector<1x64x2xbf16>
    %454 = vector.shape_cast %453 : vector<1x64x2xbf16> to vector<64x2xbf16>
    %cst_437 = arith.constant dense<0.000000e+00> : vector<64x2xf32>
    %455 = tpu.matmul %452, %454, %cst_437 {dimension_numbers = #tpu.dot_dimension_numbers<[1], [0], [0], [1], [0, 0, 1, 1], [], []>} : vector<64x64xbf16>, vector<64x2xbf16>, vector<64x2xf32> -> vector<64x2xf32>
    %456 = arith.addf %448, %455 : vector<64x2xf32>
    %c2_438 = arith.constant 2 : index
    %c0_439 = arith.constant 0 : index
    %c0_440 = arith.constant 0 : index
    %457 = vector.load %arg3[%c2_438, %c0_439, %c0_440] : memref<9x64x64xbf16, #tpu.memory_space<vmem>>, vector<1x64x64xbf16>
    %458 = vector.shape_cast %457 : vector<1x64x64xbf16> to vector<64x64xbf16>
    %cst_441 = arith.constant dense<0.000000e+00> : vector<64x64xf32>
    %459 = tpu.matmul %458, %441, %cst_441 {dimension_numbers = #tpu.dot_dimension_numbers<[1], [0], [0], [1], [0, 0, 1, 1], [], []>} : vector<64x64xbf16>, vector<64x64xbf16>, vector<64x64xf32> -> vector<64x64xf32>
    %460 = arith.truncf %459 : vector<64x64xf32> to vector<64x64xbf16>
    %c2_442 = arith.constant 2 : index
    %c0_443 = arith.constant 0 : index
    %c0_444 = arith.constant 0 : index
    %461 = vector.load %arg22[%c2_442, %c0_443, %c0_444] : memref<9x64x2xbf16, #tpu.memory_space<vmem>>, vector<1x64x2xbf16>
    %462 = vector.shape_cast %461 : vector<1x64x2xbf16> to vector<64x2xbf16>
    %cst_445 = arith.constant dense<0.000000e+00> : vector<64x2xf32>
    %463 = tpu.matmul %460, %462, %cst_445 {dimension_numbers = #tpu.dot_dimension_numbers<[1], [0], [0], [1], [0, 0, 1, 1], [], []>} : vector<64x64xbf16>, vector<64x2xbf16>, vector<64x2xf32> -> vector<64x2xf32>
    %464 = arith.addf %456, %463 : vector<64x2xf32>
    %c3_446 = arith.constant 3 : index
    %c0_447 = arith.constant 0 : index
    %c0_448 = arith.constant 0 : index
    %465 = vector.load %arg3[%c3_446, %c0_447, %c0_448] : memref<9x64x64xbf16, #tpu.memory_space<vmem>>, vector<1x64x64xbf16>
    %466 = vector.shape_cast %465 : vector<1x64x64xbf16> to vector<64x64xbf16>
    %cst_449 = arith.constant dense<0.000000e+00> : vector<64x64xf32>
    %467 = tpu.matmul %466, %441, %cst_449 {dimension_numbers = #tpu.dot_dimension_numbers<[1], [0], [0], [1], [0, 0, 1, 1], [], []>} : vector<64x64xbf16>, vector<64x64xbf16>, vector<64x64xf32> -> vector<64x64xf32>
    %468 = arith.truncf %467 : vector<64x64xf32> to vector<64x64xbf16>
    %c3_450 = arith.constant 3 : index
    %c0_451 = arith.constant 0 : index
    %c0_452 = arith.constant 0 : index
    %469 = vector.load %arg22[%c3_450, %c0_451, %c0_452] : memref<9x64x2xbf16, #tpu.memory_space<vmem>>, vector<1x64x2xbf16>
    %470 = vector.shape_cast %469 : vector<1x64x2xbf16> to vector<64x2xbf16>
    %cst_453 = arith.constant dense<0.000000e+00> : vector<64x2xf32>
    %471 = tpu.matmul %468, %470, %cst_453 {dimension_numbers = #tpu.dot_dimension_numbers<[1], [0], [0], [1], [0, 0, 1, 1], [], []>} : vector<64x64xbf16>, vector<64x2xbf16>, vector<64x2xf32> -> vector<64x2xf32>
    %472 = arith.addf %464, %471 : vector<64x2xf32>
    %c4_454 = arith.constant 4 : index
    %c0_455 = arith.constant 0 : index
    %c0_456 = arith.constant 0 : index
    %473 = vector.load %arg3[%c4_454, %c0_455, %c0_456] : memref<9x64x64xbf16, #tpu.memory_space<vmem>>, vector<1x64x64xbf16>
    %474 = vector.shape_cast %473 : vector<1x64x64xbf16> to vector<64x64xbf16>
    %cst_457 = arith.constant dense<0.000000e+00> : vector<64x64xf32>
    %475 = tpu.matmul %474, %441, %cst_457 {dimension_numbers = #tpu.dot_dimension_numbers<[1], [0], [0], [1], [0, 0, 1, 1], [], []>} : vector<64x64xbf16>, vector<64x64xbf16>, vector<64x64xf32> -> vector<64x64xf32>
    %476 = arith.truncf %475 : vector<64x64xf32> to vector<64x64xbf16>
    %c4_458 = arith.constant 4 : index
    %c0_459 = arith.constant 0 : index
    %c0_460 = arith.constant 0 : index
    %477 = vector.load %arg22[%c4_458, %c0_459, %c0_460] : memref<9x64x2xbf16, #tpu.memory_space<vmem>>, vector<1x64x2xbf16>
    %478 = vector.shape_cast %477 : vector<1x64x2xbf16> to vector<64x2xbf16>
    %cst_461 = arith.constant dense<0.000000e+00> : vector<64x2xf32>
    %479 = tpu.matmul %476, %478, %cst_461 {dimension_numbers = #tpu.dot_dimension_numbers<[1], [0], [0], [1], [0, 0, 1, 1], [], []>} : vector<64x64xbf16>, vector<64x2xbf16>, vector<64x2xf32> -> vector<64x2xf32>
    %480 = arith.addf %472, %479 : vector<64x2xf32>
    %c5_462 = arith.constant 5 : index
    %c0_463 = arith.constant 0 : index
    %c0_464 = arith.constant 0 : index
    %481 = vector.load %arg3[%c5_462, %c0_463, %c0_464] : memref<9x64x64xbf16, #tpu.memory_space<vmem>>, vector<1x64x64xbf16>
    %482 = vector.shape_cast %481 : vector<1x64x64xbf16> to vector<64x64xbf16>
    %cst_465 = arith.constant dense<0.000000e+00> : vector<64x64xf32>
    %483 = tpu.matmul %482, %441, %cst_465 {dimension_numbers = #tpu.dot_dimension_numbers<[1], [0], [0], [1], [0, 0, 1, 1], [], []>} : vector<64x64xbf16>, vector<64x64xbf16>, vector<64x64xf32> -> vector<64x64xf32>
    %484 = arith.truncf %483 : vector<64x64xf32> to vector<64x64xbf16>
    %c5_466 = arith.constant 5 : index
    %c0_467 = arith.constant 0 : index
    %c0_468 = arith.constant 0 : index
    %485 = vector.load %arg22[%c5_466, %c0_467, %c0_468] : memref<9x64x2xbf16, #tpu.memory_space<vmem>>, vector<1x64x2xbf16>
    %486 = vector.shape_cast %485 : vector<1x64x2xbf16> to vector<64x2xbf16>
    %cst_469 = arith.constant dense<0.000000e+00> : vector<64x2xf32>
    %487 = tpu.matmul %484, %486, %cst_469 {dimension_numbers = #tpu.dot_dimension_numbers<[1], [0], [0], [1], [0, 0, 1, 1], [], []>} : vector<64x64xbf16>, vector<64x2xbf16>, vector<64x2xf32> -> vector<64x2xf32>
    %488 = arith.addf %480, %487 : vector<64x2xf32>
    %c6_470 = arith.constant 6 : index
    %c0_471 = arith.constant 0 : index
    %c0_472 = arith.constant 0 : index
    %489 = vector.load %arg3[%c6_470, %c0_471, %c0_472] : memref<9x64x64xbf16, #tpu.memory_space<vmem>>, vector<1x64x64xbf16>
    %490 = vector.shape_cast %489 : vector<1x64x64xbf16> to vector<64x64xbf16>
    %cst_473 = arith.constant dense<0.000000e+00> : vector<64x64xf32>
    %491 = tpu.matmul %490, %441, %cst_473 {dimension_numbers = #tpu.dot_dimension_numbers<[1], [0], [0], [1], [0, 0, 1, 1], [], []>} : vector<64x64xbf16>, vector<64x64xbf16>, vector<64x64xf32> -> vector<64x64xf32>
    %492 = arith.truncf %491 : vector<64x64xf32> to vector<64x64xbf16>
    %c6_474 = arith.constant 6 : index
    %c0_475 = arith.constant 0 : index
    %c0_476 = arith.constant 0 : index
    %493 = vector.load %arg22[%c6_474, %c0_475, %c0_476] : memref<9x64x2xbf16, #tpu.memory_space<vmem>>, vector<1x64x2xbf16>
    %494 = vector.shape_cast %493 : vector<1x64x2xbf16> to vector<64x2xbf16>
    %cst_477 = arith.constant dense<0.000000e+00> : vector<64x2xf32>
    %495 = tpu.matmul %492, %494, %cst_477 {dimension_numbers = #tpu.dot_dimension_numbers<[1], [0], [0], [1], [0, 0, 1, 1], [], []>} : vector<64x64xbf16>, vector<64x2xbf16>, vector<64x2xf32> -> vector<64x2xf32>
    %496 = arith.addf %488, %495 : vector<64x2xf32>
    %c7_478 = arith.constant 7 : index
    %c0_479 = arith.constant 0 : index
    %c0_480 = arith.constant 0 : index
    %497 = vector.load %arg3[%c7_478, %c0_479, %c0_480] : memref<9x64x64xbf16, #tpu.memory_space<vmem>>, vector<1x64x64xbf16>
    %498 = vector.shape_cast %497 : vector<1x64x64xbf16> to vector<64x64xbf16>
    %cst_481 = arith.constant dense<0.000000e+00> : vector<64x64xf32>
    %499 = tpu.matmul %498, %441, %cst_481 {dimension_numbers = #tpu.dot_dimension_numbers<[1], [0], [0], [1], [0, 0, 1, 1], [], []>} : vector<64x64xbf16>, vector<64x64xbf16>, vector<64x64xf32> -> vector<64x64xf32>
    %500 = arith.truncf %499 : vector<64x64xf32> to vector<64x64xbf16>
    %c7_482 = arith.constant 7 : index
    %c0_483 = arith.constant 0 : index
    %c0_484 = arith.constant 0 : index
    %501 = vector.load %arg22[%c7_482, %c0_483, %c0_484] : memref<9x64x2xbf16, #tpu.memory_space<vmem>>, vector<1x64x2xbf16>
    %502 = vector.shape_cast %501 : vector<1x64x2xbf16> to vector<64x2xbf16>
    %cst_485 = arith.constant dense<0.000000e+00> : vector<64x2xf32>
    %503 = tpu.matmul %500, %502, %cst_485 {dimension_numbers = #tpu.dot_dimension_numbers<[1], [0], [0], [1], [0, 0, 1, 1], [], []>} : vector<64x64xbf16>, vector<64x2xbf16>, vector<64x2xf32> -> vector<64x2xf32>
    %504 = arith.addf %496, %503 : vector<64x2xf32>
    %c8_486 = arith.constant 8 : index
    %c0_487 = arith.constant 0 : index
    %c0_488 = arith.constant 0 : index
    %505 = vector.load %arg3[%c8_486, %c0_487, %c0_488] : memref<9x64x64xbf16, #tpu.memory_space<vmem>>, vector<1x64x64xbf16>
    %506 = vector.shape_cast %505 : vector<1x64x64xbf16> to vector<64x64xbf16>
    %cst_489 = arith.constant dense<0.000000e+00> : vector<64x64xf32>
    %507 = tpu.matmul %506, %441, %cst_489 {dimension_numbers = #tpu.dot_dimension_numbers<[1], [0], [0], [1], [0, 0, 1, 1], [], []>} : vector<64x64xbf16>, vector<64x64xbf16>, vector<64x64xf32> -> vector<64x64xf32>
    %508 = arith.truncf %507 : vector<64x64xf32> to vector<64x64xbf16>
    %c8_490 = arith.constant 8 : index
    %c0_491 = arith.constant 0 : index
    %c0_492 = arith.constant 0 : index
    %509 = vector.load %arg22[%c8_490, %c0_491, %c0_492] : memref<9x64x2xbf16, #tpu.memory_space<vmem>>, vector<1x64x2xbf16>
    %510 = vector.shape_cast %509 : vector<1x64x2xbf16> to vector<64x2xbf16>
    %cst_493 = arith.constant dense<0.000000e+00> : vector<64x2xf32>
    %511 = tpu.matmul %508, %510, %cst_493 {dimension_numbers = #tpu.dot_dimension_numbers<[1], [0], [0], [1], [0, 0, 1, 1], [], []>} : vector<64x64xbf16>, vector<64x2xbf16>, vector<64x2xf32> -> vector<64x2xf32>
    %512 = arith.addf %504, %511 : vector<64x2xf32>
    %c0_494 = arith.constant 0 : index
    %c0_495 = arith.constant 0 : index
    %513 = vector.load %arg23[%c0_494, %c0_495] : memref<1x2xf32, #tpu.memory_space<vmem>>, vector<1x2xf32>
    %514 = vector.broadcast %513 : vector<1x2xf32> to vector<64x2xf32>
    %515 = arith.addf %512, %514 : vector<64x2xf32>
    %c0_496 = arith.constant 0 : index
    %c0_497 = arith.constant 0 : index
    %516 = vector.load %arg11[%c0_496, %c0_497] : memref<256x64xbf16, #tpu.memory_space<vmem>>, vector<256x64xbf16>
    %517 = arith.truncf %515 : vector<64x2xf32> to vector<64x2xbf16>
    %cst_498 = arith.constant dense<0.000000e+00> : vector<256x2xf32>
    %518 = tpu.matmul %516, %517, %cst_498 {dimension_numbers = #tpu.dot_dimension_numbers<[1], [0], [0], [1], [0, 0, 1, 1], [], []>} : vector<256x64xbf16>, vector<64x2xbf16>, vector<256x2xf32> -> vector<256x2xf32>
    %c0_499 = arith.constant 0 : index
    %c0_500 = arith.constant 0 : index
    %c0_501 = arith.constant 0 : index
    %519 = vector.load %arg24[%c0_499, %c0_500, %c0_501] : memref<1x256x2xf32, #tpu.memory_space<vmem>>, vector<1x256x2xf32>
    %520 = vector.shape_cast %519 : vector<1x256x2xf32> to vector<256x2xf32>
    %521 = vector.shape_cast %518 : vector<256x2xf32> to vector<1x256x2xf32>
    tpu.vector_store %arg24[%c0_499, %c0_500, %c0_501], %521 {strides = array<i32>} : memref<1x256x2xf32, #tpu.memory_space<vmem>>, vector<1x256x2xf32>,
    return
  }
  func.func @transform_0(%arg0: i32) -> (i32, i32, i32) {
    %c0_i32 = arith.constant 0 : i32
    %c0_i32_0 = arith.constant 0 : i32
    %c0_i32_1 = arith.constant 0 : i32
    return %arg0, %c0_i32, %c0_i32_0 : i32, i32, i32
  }
  func.func @transform_1(%arg0: i32) -> (i32, i32, i32) {
    %c0_i32 = arith.constant 0 : i32
    %c0_i32_0 = arith.constant 0 : i32
    %c0_i32_1 = arith.constant 0 : i32
    %c0_i32_2 = arith.constant 0 : i32
    return %c0_i32, %c0_i32_0, %c0_i32_1 : i32, i32, i32
  }
  func.func @transform_2(%arg0: i32) -> (i32, i32, i32) {
    %c0_i32 = arith.constant 0 : i32
    %c0_i32_0 = arith.constant 0 : i32
    %c0_i32_1 = arith.constant 0 : i32
    %c0_i32_2 = arith.constant 0 : i32
    return %c0_i32, %c0_i32_0, %c0_i32_1 : i32, i32, i32
  }
  func.func @transform_3(%arg0: i32) -> (i32, i32, i32) {
    %c0_i32 = arith.constant 0 : i32
    %c0_i32_0 = arith.constant 0 : i32
    %c0_i32_1 = arith.constant 0 : i32
    %c0_i32_2 = arith.constant 0 : i32
    return %c0_i32, %c0_i32_0, %c0_i32_1 : i32, i32, i32
  }
  func.func @transform_4(%arg0: i32) -> (i32, i32, i32) {
    %c0_i32 = arith.constant 0 : i32
    %c0_i32_0 = arith.constant 0 : i32
    %c0_i32_1 = arith.constant 0 : i32
    %c0_i32_2 = arith.constant 0 : i32
    return %c0_i32, %c0_i32_0, %c0_i32_1 : i32, i32, i32
  }
  func.func @transform_5(%arg0: i32) -> (i32, i32, i32) {
    %c0_i32 = arith.constant 0 : i32
    %c0_i32_0 = arith.constant 0 : i32
    %c0_i32_1 = arith.constant 0 : i32
    %c0_i32_2 = arith.constant 0 : i32
    return %c0_i32, %c0_i32_0, %c0_i32_1 : i32, i32, i32
  }
  func.func @transform_6(%arg0: i32) -> (i32, i32, i32) {
    %c0_i32 = arith.constant 0 : i32
    %c0_i32_0 = arith.constant 0 : i32
    %c0_i32_1 = arith.constant 0 : i32
    %c0_i32_2 = arith.constant 0 : i32
    return %c0_i32, %c0_i32_0, %c0_i32_1 : i32, i32, i32
  }
  func.func @transform_7(%arg0: i32) -> (i32, i32, i32) {
    %c0_i32 = arith.constant 0 : i32
    %c0_i32_0 = arith.constant 0 : i32
    %c0_i32_1 = arith.constant 0 : i32
    %c0_i32_2 = arith.constant 0 : i32
    return %c0_i32, %c0_i32_0, %c0_i32_1 : i32, i32, i32
  }
  func.func @transform_8(%arg0: i32) -> (i32, i32) {
    %c0_i32 = arith.constant 0 : i32
    %c0_i32_0 = arith.constant 0 : i32
    %c0_i32_1 = arith.constant 0 : i32
    return %c0_i32, %c0_i32_0 : i32, i32
  }
  func.func @transform_9(%arg0: i32) -> (i32, i32) {
    %c0_i32 = arith.constant 0 : i32
    %c0_i32_0 = arith.constant 0 : i32
    %c0_i32_1 = arith.constant 0 : i32
    return %c0_i32, %c0_i32_0 : i32, i32
  }
  func.func @transform_10(%arg0: i32) -> (i32, i32) {
    %c0_i32 = arith.constant 0 : i32
    %c0_i32_0 = arith.constant 0 : i32
    %c0_i32_1 = arith.constant 0 : i32
    return %c0_i32, %c0_i32_0 : i32, i32
  }
  func.func @transform_11(%arg0: i32) -> (i32, i32, i32) {
    %c0_i32 = arith.constant 0 : i32
    %c0_i32_0 = arith.constant 0 : i32
    %c0_i32_1 = arith.constant 0 : i32
    %c0_i32_2 = arith.constant 0 : i32
    return %c0_i32, %c0_i32_0, %c0_i32_1 : i32, i32, i32
  }
  func.func @transform_12(%arg0: i32) -> (i32, i32) {
    %c0_i32 = arith.constant 0 : i32
    %c0_i32_0 = arith.constant 0 : i32
    %c0_i32_1 = arith.constant 0 : i32
    return %c0_i32, %c0_i32_0 : i32, i32
  }
  func.func @transform_13(%arg0: i32) -> (i32, i32, i32) {
    %c0_i32 = arith.constant 0 : i32
    %c0_i32_0 = arith.constant 0 : i32
    %c0_i32_1 = arith.constant 0 : i32
    %c0_i32_2 = arith.constant 0 : i32
    return %c0_i32, %c0_i32_0, %c0_i32_1 : i32, i32, i32
  }
  func.func @transform_14(%arg0: i32) -> (i32, i32) {
    %c0_i32 = arith.constant 0 : i32
    %c0_i32_0 = arith.constant 0 : i32
    %c0_i32_1 = arith.constant 0 : i32
    return %c0_i32, %c0_i32_0 : i32, i32
  }
  func.func @transform_15(%arg0: i32) -> (i32, i32, i32) {
    %c0_i32 = arith.constant 0 : i32
    %c0_i32_0 = arith.constant 0 : i32
    %c0_i32_1 = arith.constant 0 : i32
    %c0_i32_2 = arith.constant 0 : i32
    return %c0_i32, %c0_i32_0, %c0_i32_1 : i32, i32, i32
  }
  func.func @transform_16(%arg0: i32) -> (i32, i32) {
    %c0_i32 = arith.constant 0 : i32
    %c0_i32_0 = arith.constant 0 : i32
    %c0_i32_1 = arith.constant 0 : i32
    return %c0_i32, %c0_i32_0 : i32, i32
  }
  func.func @transform_17(%arg0: i32) -> (i32, i32, i32) {
    %c0_i32 = arith.constant 0 : i32
    %c0_i32_0 = arith.constant 0 : i32
    %c0_i32_1 = arith.constant 0 : i32
    %c0_i32_2 = arith.constant 0 : i32
    return %c0_i32, %c0_i32_0, %c0_i32_1 : i32, i32, i32
  }
  func.func @transform_18(%arg0: i32) -> (i32, i32) {
    %c0_i32 = arith.constant 0 : i32
    %c0_i32_0 = arith.constant 0 : i32
    %c0_i32_1 = arith.constant 0 : i32
    return %c0_i32, %c0_i32_0 : i32, i32
  }
  func.func @transform_19(%arg0: i32) -> (i32, i32, i32) {
    %c0_i32 = arith.constant 0 : i32
    %c0_i32_0 = arith.constant 0 : i32
    %c0_i32_1 = arith.constant 0 : i32
    %c0_i32_2 = arith.constant 0 : i32
    return %c0_i32, %c0_i32_0, %c0_i32_1 : i32, i32, i32
  }
  func.func @transform_20(%arg0: i32) -> (i32, i32) {
    %c0_i32 = arith.constant 0 : i32
    %c0_i32_0 = arith.constant 0 : i32
    %c0_i32_1 = arith.constant 0 : i32
    return %c0_i32, %c0_i32_0 : i32, i32
  }
  func.func @transform_21(%arg0: i32) -> (i32, i32, i32) {
    %c0_i32 = arith.constant 0 : i32
    %c0_i32_0 = arith.constant 0 : i32
    %c0_i32_1 = arith.constant 0 : i32
    %c0_i32_2 = arith.constant 0 : i32
    return %c0_i32, %c0_i32_0, %c0_i32_1 : i32, i32, i32
  }
  func.func @transform_22(%arg0: i32) -> (i32, i32) {
    %c0_i32 = arith.constant 0 : i32
    %c0_i32_0 = arith.constant 0 : i32
    %c0_i32_1 = arith.constant 0 : i32
    return %c0_i32, %c0_i32_0 : i32, i32
  }
  func.func @transform_23(%arg0: i32) -> (i32, i32, i32) {
    %c0_i32 = arith.constant 0 : i32
    %c0_i32_0 = arith.constant 0 : i32
    %c0_i32_1 = arith.constant 0 : i32
    return %arg0, %c0_i32, %c0_i32_0 : i32, i32, i32
  }
}

</mosaic_0001>

<bundles_post_ra>
// kernel: colorization_net7_forward.1
= control target key start
LH: loop header
LB: loop body
LE: loop exit
PB: predicated region body
PF: predicated region fallthrough
CT: control target
= control target key end

     0   :  { %s28377_s0 = inlined_call_operand.vmem [shape: f32[2,256,8], index: 0, kind: input, shape index: {}]   ;;  %s28378_s1 = inlined_call_operand.vmem [shape: bf16[9,256,256], index: 1, kind: input, shape index: {}]   ;;  %s28379_s2 = inlined_call_operand.vmem [shape: bf16[9,64,64], index: 2, kind: input, shape index: {}]   ;;  %s28380_s3 = inlined_call_operand.vmem [shape: bf16[9,16,16], index: 3, kind: input, shape index: {}]   ;;  %s28381_s4 = inlined_call_operand.vmem [shape: bf16[9,8,8], index: 4, kind: input, shape index: {}]   ;;  %s28382_s5 = inlined_call_operand.vmem [shape: bf16[4,64,256], index: 5, kind: input, shape index: {}]   ;;  %s28383_s6 = inlined_call_operand.vmem [shape: bf16[4,16,64], index: 6, kind: input, shape index: {}]   ;;  %s28384_s7 = inlined_call_operand.vmem [shape: bf16[4,8,16], index: 7, kind: input, shape index: {}]   ;;  %s28385_s8 = inlined_call_operand.vmem [shape: bf16[16,8], index: 8, kind: input, shape index: {}]   ;;  %s28386_s9 = inlined_call_operand.vmem [shape: bf16[64,16], index: 9, kind: input, shape index: {}]   ;;  %s28387_s10 = inlined_call_operand.vmem [shape: bf16[256,64], index: 10, kind: input, shape index: {}]   ;;  %s28388_s11 = inlined_call_operand.vmem [shape: bf16[9,8,64], index: 11, kind: input, shape index: {}]   ;;  %s28389_s12 = inlined_call_operand.vmem [shape: f32[1,64], index: 12, kind: input, shape index: {}]   ;;  %s28390_s13 = inlined_call_operand.vmem [shape: bf16[9,64,128], index: 13, kind: input, shape index: {}]   ;;  %s28391_s14 = inlined_call_operand.vmem [shape: f32[1,128], index: 14, kind: input, shape index: {}]   ;;  %s28392_s15 = inlined_call_operand.vmem [shape: bf16[9,128,256], index: 15, kind: input, shape index: {}]   ;;  %s28393_s16 = inlined_call_operand.vmem [shape: f32[1,256], index: 16, kind: input, shape index: {}]   ;;  %s28394_s17 = inlined_call_operand.vmem [shape: bf16[9,256,128], index: 17, kind: input, shape index: {}]   ;;  %s28395_s18 = inlined_call_operand.vmem [shape: f32[1,128], index: 18, kind: input, shape index: {}]   ;;  %s28396_s19 = inlined_call_operand.vmem [shape: bf16[9,128,64], index: 19, kind: input, shape index: {}]   ;;  %s28397_s20 = inlined_call_operand.vmem [shape: f32[1,64], index: 20, kind: input, shape index: {}]   ;;  %s28398_s21 = inlined_call_operand.vmem [shape: bf16[9,64,2], index: 21, kind: input, shape index: {}]   ;;  %s28399_s22 = inlined_call_operand.vmem [shape: f32[1,2], index: 22, kind: input, shape index: {}]   ;;  %s28400_s23 = inlined_call_operand.vmem [shape: f32[2,256,2], index: 23, kind: output, shape index: {}]  }
   0x1   :  { %28440 = sst [smem:[#allocation51_spill]] %s28377_s0 }
   0x2   :  { %28441 = sst [smem:[#allocation52_spill]] %s28378_s1 }
   0x3   :  { %28442 = sst [smem:[#allocation53_spill]] %s28379_s2 }
   0x4   :  { %28443 = sst [smem:[#allocation54_spill]] %s28380_s3 }
   0x5   :  { %28444 = sst [smem:[#allocation55_spill]] %s28381_s4  ;;  %s23368_s4 = smov 0  }
   0x6   :  { %28445 = sst [smem:[#allocation56_spill]] %s28382_s5 }
   0x7   :  { %28446 = sst [smem:[#allocation57_spill]] %s28383_s6 }
   0x8   :  { %28447 = sst [smem:[#allocation58_spill]] %s28384_s7 }
   0x9   :  { %28448 = sst [smem:[#allocation59_spill]] %s28388_s11 }
   0xa   :  { %28449 = sst [smem:[#allocation60_spill]] %s28389_s12 }
   0xb LB: > { %s16652_s30 = sadd.s32 4294967295, %s23243_s4   ;;  %p16656_p0 = scmp.ge.s32.totalorder %s23243_s4, 1  ;;  %s23243_s4 = sphi %s23368_s4, %s33_s4  }
   0xc   : > { %p637_p1 = scmp.lt.s32.totalorder %s23243_s4, 3 }
   0xe   : > { %p638_p2 = pnand %p16656_p0, %p637_p1 }
  0x10   : > { %641 = sbr.rel (%p638_p2) target bundleno = 9532 (0x253c), region = 112 }
  0x15   : > { %p701_p3 = scmp.lt.s32.totalorder %s16652_s30, 1  ;;  %s28450_s5 = sld [smem:[#allocation52_spill]]  ;;  %vm1551_vm0 = vcmask 1043456   ;;  %vm1502_vm1 = vcmask 64512   ;;  %vm6838_vm2 = vcmask 523264   ;;  %vm23246_vm3 = vmmov 0  }
  0x16   : > { %s28451_s6 = sld [smem:[#allocation51_spill]]  ;;  %vm9093_vm4 = vcmask 130048   ;;  %vm16564_vm5 = vcmask 15360  }
  0x17   : > { %s28601_s30 = smov (!%p701_p3, %s16652_s30), 1  ;;  %s28466_s11 = sld [smem:[#allocation59_spill]] }
  0x18   : > { %s28437_s1 = sshll.u32 %s28601_s30, 8  ;;  %s28542_s12 = sld [smem:[#allocation60_spill]] }
  0x19   : > { %s28544_s29 = sld [smem:[#allocation56_spill]] }
  0x1a   : > { %s28594_s26 = sld [smem:[#allocation53_spill]] }
  0x1b   : > { %v22140_v0 = vld [vmem:[%s28450_s5 + $0x104] ss:$8 sps:$4 sm:$0xff]   ;;  %v22138_v50 = vld [vmem:[%s28450_s5 + $0x100] ss:$8 sps:$4 sm:$0xff]   ;;  %v22141_v52 = vld [vmem:[%s28450_s5 + $0x114] ss:$8 sps:$4 sm:$0xff]  }
  0x1c   : > { %1355 = vmatprep.mubr.bf16.mxu1 %v22140_v0  ;;  %s23387_s27 = scalar_lea.vmem %s28451_s6, %s28437_s1  ;;  %v22173_v40 = vld [vmem:[%s28450_s5 + $0x4] ss:$8 sps:$4 sm:$0xff]   ;;  %v22171_v51 = vld [vmem:[%s28450_s5] ss:$8 sps:$4 sm:$0xff]   ;;  %v22177_v53 = vld [vmem:[%s28450_s5 + $0x14] ss:$8 sps:$4 sm:$0xff]  }
  0x1d   : > { %v742_v1 = vld [vmem:[%s23387_s27 + $0xf0] sm:$0xff]  ;;  %v743_v2 = vld [vmem:[%s23387_s27 + $0xf8] sm:$0xff]  ;;  %v740_v6 = vld [vmem:[%s23387_s27 + $0xe0] sm:$0xff]  ;;  %984 = vmatprep.mubr.bf16.mxu0 %v22173_v40  ;;  %s28595_s28 = sld [smem:[#allocation57_spill]] }
  0x1e   : > { %v726_v3 = vld [vmem:[%s23387_s27 + $0x70] sm:$0xff]  ;;  %v23392_v4 = vpack.c.bf16 %v743_v2, %v742_v1  ;;  %v727_v5 = vld [vmem:[%s23387_s27 + $0x78] sm:$0xff]  ;;  %v741_v7 = vld [vmem:[%s23387_s27 + $0xe8] sm:$0xff]  ;;  %s28596_s25 = sld [smem:[#allocation54_spill]] }
  0x1f   : > { %v23397_v8 = vpack.c.bf16 %v727_v5, %v726_v3  ;;  %v23399_v9 = vpack.c.bf16 %v741_v7, %v740_v6  ;;  %v724_v10 = vld [vmem:[%s23387_s27 + $0x60] sm:$0xff]  ;;  %v725_v11 = vld [vmem:[%s23387_s27 + $0x68] sm:$0xff]  ;;  %v738_v12 = vld [vmem:[%s23387_s27 + $0xd0] sm:$0xff]  ;;  %s28598_s6 = sld [smem:[#allocation55_spill]] }
  0x20   : > { %18982 = vmatprep.subr.bf16.mxu1 %v23392_v4  ;;  %v739_v13 = vld [vmem:[%s23387_s27 + $0xd8] sm:$0xff]  ;;  %18870 = vmatprep.subr.bf16.mxu0 %v23392_v4  ;;  %v23408_v14 = vpack.c.bf16 %v725_v11, %v724_v10  ;;  %v722_v16 = vld [vmem:[%s23387_s27 + $0x50] sm:$0xff]  ;;  %v736_v18 = vld [vmem:[%s23387_s27 + $0xc0] sm:$0xff] }
  0x21   : > { %28452 = vst [vmem:[#allocation2_spill] sm:$0xff] %v23399_v9  ;;  %18983 = vmatpush3.bf16.msra.mxu1 %v23397_v8  ;;  %18871 = vmatpush3.bf16.msra.mxu0 %v23397_v8  ;;  %v23412_v15 = vpack.c.bf16 %v739_v13, %v738_v12  ;;  %v723_v17 = vld [vmem:[%s23387_s27 + $0x58] sm:$0xff]  ;;  %v737_v19 = vld [vmem:[%s23387_s27 + $0xc8] sm:$0xff]  ;;  %v720_v22 = vld [vmem:[%s23387_s27 + $0x40] sm:$0xff] }
  0x22   : > { %28453 = vst [vmem:[#allocation3_spill] sm:$0xff] %v23408_v14  ;;  %18984 = vmatprep.subr.bf16.mxu1 %v23399_v9  ;;  %18872 = vmatprep.subr.bf16.mxu0 %v23399_v9  ;;  %v23420_v20 = vpack.c.bf16 %v723_v17, %v722_v16  ;;  %v23424_v21 = vpack.c.bf16 %v737_v19, %v736_v18  ;;  %v721_v23 = vld [vmem:[%s23387_s27 + $0x48] sm:$0xff]  ;;  %v734_v24 = vld [vmem:[%s23387_s27 + $0xb0] sm:$0xff]  ;;  %v735_v25 = vld [vmem:[%s23387_s27 + $0xb8] sm:$0xff] }
  0x23   : > { %28454 = vst [vmem:[#allocation4_spill] sm:$0xff] %v23412_v15  ;;  %v23432_v26 = vpack.c.bf16 %v721_v23, %v720_v22  ;;  %v718_v27 = vld [vmem:[%s23387_s27 + $0x30] sm:$0xff]  ;;  %v23437_v28 = vpack.c.bf16 %v735_v25, %v734_v24  ;;  %v719_v29 = vld [vmem:[%s23387_s27 + $0x38] sm:$0xff]  ;;  %v732_v30 = vld [vmem:[%s23387_s27 + $0xa0] sm:$0xff] }
  0x24   : > { %28455 = vst [vmem:[#allocation5_spill] sm:$0xff] %v23420_v20  ;;  %28456 = vst [vmem:[#allocation6_spill] sm:$0xff] %v23424_v21  ;;  %v733_v31 = vld [vmem:[%s23387_s27 + $0xa8] sm:$0xff]  ;;  %v23444_v32 = vpack.c.bf16 %v719_v29, %v718_v27  ;;  %v716_v33 = vld [vmem:[%s23387_s27 + $0x20] sm:$0xff] }
  0x25   : > { %18985 = vmatpush3.bf16.msra.mxu1 %v23408_v14  ;;  %18873 = vmatpush3.bf16.msra.mxu0 %v23408_v14  ;;  %28457 = vst [vmem:[#allocation7_spill] sm:$0xff] %v23432_v26  ;;  %28458 = vst [vmem:[#allocation8_spill] sm:$0xff] %v23437_v28  ;;  %v23449_v34 = vpack.c.bf16 %v733_v31, %v732_v30  ;;  %v717_v35 = vld [vmem:[%s23387_s27 + $0x28] sm:$0xff]  ;;  %v730_v36 = vld [vmem:[%s23387_s27 + $0x90] sm:$0xff] }
  0x26   : > { %18986 = vmatprep.subr.bf16.mxu1 %v23412_v15  ;;  %18874 = vmatprep.subr.bf16.mxu0 %v23412_v15  ;;  %28459 = vst [vmem:[#allocation9_spill] sm:$0xff] %v23444_v32  ;;  %v731_v37 = vld [vmem:[%s23387_s27 + $0x98] sm:$0xff]  ;;  %v23456_v38 = vpack.c.bf16 %v717_v35, %v716_v33  ;;  %v714_v39 = vld [vmem:[%s23387_s27 + $0x10] sm:$0xff]  ;;  %v728_v43 = vld [vmem:[%s23387_s27 + $0x80] sm:$0xff] }
  0x27   : > { %28460 = vst [vmem:[#allocation10_spill] sm:$0xff] %v23449_v34  ;;  %v23464_v41 = vpack.c.bf16 %v731_v37, %v730_v36  ;;  %v715_v42 = vld [vmem:[%s23387_s27 + $0x18] sm:$0xff]  ;;  %v729_v44 = vld [vmem:[%s23387_s27 + $0x88] sm:$0xff]  ;;  %v712_v47 = vld [vmem:[%s23387_s27] sm:$0xff] }
  0x28   : > { %28461 = vst [vmem:[#allocation11_spill] sm:$0xff] %v23456_v38  ;;  %v23471_v45 = vpack.c.bf16 %v715_v42, %v714_v39  ;;  %v23475_v46 = vpack.c.bf16 %v729_v44, %v728_v43  ;;  %v713_v48 = vld [vmem:[%s23387_s27 + $0x8] sm:$0xff]  ;;  %v16757_v54 = vld [vmem:[%s28466_s11 + $0x4] sm:$0xf]  ;;  %v22143_v56 = vld [vmem:[%s28450_s5 + $0x110] ss:$8 sps:$4 sm:$0xff]  }
  0x29   : > { %18987 = vmatpush3.bf16.msra.mxu1 %v23420_v20  ;;  %18875 = vmatpush3.bf16.msra.mxu0 %v23420_v20  ;;  %28462 = vst [vmem:[#allocation12_spill] sm:$0xff] %v23464_v41  ;;  %v23481_v49 = vpack.c.bf16 %v713_v48, %v712_v47  ;;  %v1553_v55 = vsel %vm1551_vm0, %v16757_v54, 0  ;;  %v22179_v57 = vld [vmem:[%s28450_s5 + $0x10] ss:$8 sps:$4 sm:$0xff]   ;;  %v22144_v58 = vld [vmem:[%s28450_s5 + $0x124] ss:$8 sps:$4 sm:$0xff]  }
  0x2a   : > { %18988 = vmatprep.subr.bf16.mxu1 %v23424_v21  ;;  %18876 = vmatprep.subr.bf16.mxu0 %v23424_v21  ;;  %28463 = vst [vmem:[#allocation13_spill] sm:$0xff] %v23471_v45  ;;  %28464 = vst [vmem:[#allocation14_spill] sm:$0xff] %v23475_v46  ;;  %v22183_v59 = vld [vmem:[%s28450_s5 + $0x24] ss:$8 sps:$4 sm:$0xff]   ;;  %v22146_v60 = vld [vmem:[%s28450_s5 + $0x120] ss:$8 sps:$4 sm:$0xff]  }
  0x2b   : > { %28465 = vst [vmem:[#allocation15_spill] sm:$0xff] %v23481_v49  ;;  %v22185_v61 = vld [vmem:[%s28450_s5 + $0x20] ss:$8 sps:$4 sm:$0xff]   ;;  %v22147_v62 = vld [vmem:[%s28450_s5 + $0x134] ss:$8 sps:$4 sm:$0xff]  }
  0x2c   : > { %v22189_v63 = vld [vmem:[%s28450_s5 + $0x34] ss:$8 sps:$4 sm:$0xff]   ;;  %v22149_v0 = vld [vmem:[%s28450_s5 + $0x130] ss:$8 sps:$4 sm:$0xff]   ;;  %v22150_v2 = vld [vmem:[%s28450_s5 + $0x144] ss:$8 sps:$4 sm:$0xff]  }
  0x2d   : > { %18989 = vmatpush3.bf16.msra.mxu1 %v23432_v26  ;;  %18877 = vmatpush3.bf16.msra.mxu0 %v23432_v26  ;;  %v22191_v1 = vld [vmem:[%s28450_s5 + $0x30] ss:$8 sps:$4 sm:$0xff]   ;;  %v22195_v3 = vld [vmem:[%s28450_s5 + $0x44] ss:$8 sps:$4 sm:$0xff]   ;;  %v22152_v5 = vld [vmem:[%s28450_s5 + $0x140] ss:$8 sps:$4 sm:$0xff]  }
  0x2e   : > { %18990 = vmatprep.subr.bf16.mxu1 %v23437_v28  ;;  %18878 = vmatprep.subr.bf16.mxu0 %v23437_v28  ;;  %v22197_v6 = vld [vmem:[%s28450_s5 + $0x40] ss:$8 sps:$4 sm:$0xff]   ;;  %v22153_v7 = vld [vmem:[%s28450_s5 + $0x154] ss:$8 sps:$4 sm:$0xff]   ;;  %v22155_v11 = vld [vmem:[%s28450_s5 + $0x150] ss:$8 sps:$4 sm:$0xff]  }
  0x2f   : > { %v22201_v10 = vld [vmem:[%s28450_s5 + $0x54] ss:$8 sps:$4 sm:$0xff]   ;;  %v22203_v12 = vld [vmem:[%s28450_s5 + $0x50] ss:$8 sps:$4 sm:$0xff]   ;;  %v22156_v13 = vld [vmem:[%s28450_s5 + $0x164] ss:$8 sps:$4 sm:$0xff]  }
  0x30   : > { %v22204_v16 = vld [vmem:[%s28450_s5 + $0x64] ss:$8 sps:$4 sm:$0xff]   ;;  %v22158_v17 = vld [vmem:[%s28450_s5 + $0x160] ss:$8 sps:$4 sm:$0xff]   ;;  %v22159_v19 = vld [vmem:[%s28450_s5 + $0x174] ss:$8 sps:$4 sm:$0xff]  }
  0x31   : > { %18991 = vmatpush3.bf16.msra.mxu1 %v23444_v32  ;;  %18879 = vmatpush3.bf16.msra.mxu0 %v23444_v32  ;;  %v22206_v18 = vld [vmem:[%s28450_s5 + $0x60] ss:$8 sps:$4 sm:$0xff]   ;;  %v22207_v22 = vld [vmem:[%s28450_s5 + $0x74] ss:$8 sps:$4 sm:$0xff]   ;;  %v22161_v23 = vld [vmem:[%s28450_s5 + $0x170] ss:$8 sps:$4 sm:$0xff]  }
  0x32   : > { %18992 = vmatprep.subr.bf16.mxu1 %v23449_v34  ;;  %18880 = vmatprep.subr.bf16.mxu0 %v23449_v34  ;;  %v22209_v24 = vld [vmem:[%s28450_s5 + $0x70] ss:$8 sps:$4 sm:$0xff]   ;;  %v22162_v25 = vld [vmem:[%s28450_s5 + $0x184] ss:$8 sps:$4 sm:$0xff]   ;;  %v22164_v29 = vld [vmem:[%s28450_s5 + $0x180] ss:$8 sps:$4 sm:$0xff]  }
  0x33   : > { %v22210_v27 = vld [vmem:[%s28450_s5 + $0x84] ss:$8 sps:$4 sm:$0xff]   ;;  %v22212_v30 = vld [vmem:[%s28450_s5 + $0x80] ss:$8 sps:$4 sm:$0xff]   ;;  %v22165_v31 = vld [vmem:[%s28450_s5 + $0x194] ss:$8 sps:$4 sm:$0xff]  }
  0x34   : > { %v22213_v33 = vld [vmem:[%s28450_s5 + $0x94] ss:$8 sps:$4 sm:$0xff]   ;;  %v22167_v35 = vld [vmem:[%s28450_s5 + $0x190] ss:$8 sps:$4 sm:$0xff]   ;;  %v22168_v37 = vld [vmem:[%s28450_s5 + $0x1a4] ss:$8 sps:$4 sm:$0xff]  }
  0x35   : > { %18993 = vmatpush3.bf16.msra.mxu1 %v23456_v38  ;;  %18881 = vmatpush3.bf16.msra.mxu0 %v23456_v38  ;;  %v22215_v36 = vld [vmem:[%s28450_s5 + $0x90] ss:$8 sps:$4 sm:$0xff]   ;;  %v22216_v39 = vld [vmem:[%s28450_s5 + $0xa4] ss:$8 sps:$4 sm:$0xff]   ;;  %v22170_v40 = vld [vmem:[%s28450_s5 + $0x1a0] ss:$8 sps:$4 sm:$0xff]  }
  0x36   : > { %18994 = vmatprep.subr.bf16.mxu1 %v23464_v41  ;;  %18882 = vmatprep.subr.bf16.mxu0 %v23464_v41  ;;  %v22218_v42 = vld [vmem:[%s28450_s5 + $0xa0] ss:$8 sps:$4 sm:$0xff]   ;;  %v22174_v43 = vld [vmem:[%s28450_s5 + $0x1b4] ss:$8 sps:$4 sm:$0xff]   ;;  %v22176_v47 = vld [vmem:[%s28450_s5 + $0x1b0] ss:$8 sps:$4 sm:$0xff]  }
  0x37   : > { %v22219_v44 = vld [vmem:[%s28450_s5 + $0xb4] ss:$8 sps:$4 sm:$0xff]   ;;  %v22221_v48 = vld [vmem:[%s28450_s5 + $0xb0] ss:$8 sps:$4 sm:$0xff]  }
  0x39   : > { %18995 = vmatpush3.bf16.msra.mxu1 %v23471_v45  ;;  %18883 = vmatpush3.bf16.msra.mxu0 %v23471_v45 }
  0x3a   : > { %18996 = vmatprep.subr.bf16.mxu1 %v23475_v46  ;;  %18884 = vmatprep.subr.bf16.mxu0 %v23475_v46 }
  0x3d   : > { %18997 = vmatpush3.bf16.msra.mxu1 %v23481_v49  ;;  %18885 = vmatpush3.bf16.msra.mxu0 %v23481_v49 }
  0x3e   : > { %22117 = vmatprep.subr.msk.bf16.mxu0 %vm1551_vm0, %v16757_v54  ;;  %22118 = vmatprep.subr.msk.bf16.mxu1 %vm1551_vm0, %v16757_v54  ;;  %v22186_v54 = vld [vmem:[%s28450_s5 + $0x1d4] ss:$8 sps:$4 sm:$0xff]  }
  0x40   : > { %1356 = vmatmul.mubr.bf16.vlgmr.msra.gmra.mxu1 %v22138_v50  ;;  %985 = vmatmul.mubr.bf16.vlgmr.msra.gmra.mxu0 %v22171_v51  ;;  %v22180_v50 = vld [vmem:[%s28450_s5 + $0x1c4] ss:$8 sps:$4 sm:$0xff]  }
  0x41   : > { %1363 = vmatprep.mubr.bf16.mxu1 %v22141_v52  ;;  %992 = vmatprep.mubr.bf16.mxu0 %v22177_v53  ;;  %v22222_v51 = vld [vmem:[%s28450_s5 + $0xc4] ss:$8 sps:$4 sm:$0xff]   ;;  %v22182_v52 = vld [vmem:[%s28450_s5 + $0x1c0] ss:$8 sps:$4 sm:$0xff]  }
  0x42   : > { %20842 = vmatpush3.bf16.msra.mxu0 %v1553_v55  ;;  %22116 = vmatpush3.bf16.msra.mxu1 %v1553_v55  ;;  %v22224_v53 = vld [vmem:[%s28450_s5 + $0xc0] ss:$8 sps:$4 sm:$0xff]   ;;  %v22225_v55 = vld [vmem:[%s28450_s5 + $0xd4] ss:$8 sps:$4 sm:$0xff]  }
  0x43   : > { %19128 = vmatprep.subr.bf16.mxu0 %v23392_v4 }
  0x48   : > { %1364 = vmatmul.mubr.bf16.gmra.mxu1 %v22143_v56  ;;  %993 = vmatmul.mubr.bf16.gmra.mxu0 %v22179_v57  ;;  %v22188_v56 = vld [vmem:[%s28450_s5 + $0x1d0] ss:$8 sps:$4 sm:$0xff]  }
  0x49   : > { %1371 = vmatprep.mubr.bf16.mxu1 %v22144_v58  ;;  %1000 = vmatprep.mubr.bf16.mxu0 %v22183_v59  ;;  %v22227_v57 = vld [vmem:[%s28450_s5 + $0xd0] ss:$8 sps:$4 sm:$0xff]   ;;  %v22192_v58 = vld [vmem:[%s28450_s5 + $0x1e4] ss:$8 sps:$4 sm:$0xff]  }
  0x4a   : > { %v22228_v59 = vld [vmem:[%s28450_s5 + $0xe4] ss:$8 sps:$4 sm:$0xff]  }
  0x50   : > { %1372 = vmatmul.mubr.bf16.gmra.mxu1 %v22146_v60  ;;  %1001 = vmatmul.mubr.bf16.gmra.mxu0 %v22185_v61  ;;  %v22194_v60 = vld [vmem:[%s28450_s5 + $0x1e0] ss:$8 sps:$4 sm:$0xff]  }
  0x51   : > { %1379 = vmatprep.mubr.bf16.mxu1 %v22147_v62  ;;  %1008 = vmatprep.mubr.bf16.mxu0 %v22189_v63  ;;  %v22230_v61 = vld [vmem:[%s28450_s5 + $0xe0] ss:$8 sps:$4 sm:$0xff]   ;;  %v22198_v62 = vld [vmem:[%s28450_s5 + $0x1f4] ss:$8 sps:$4 sm:$0xff]  }
  0x52   : > { %v22231_v63 = vld [vmem:[%s28450_s5 + $0xf4] ss:$8 sps:$4 sm:$0xff]  }
  0x58   : > { %1380 = vmatmul.mubr.bf16.gmra.mxu1 %v22149_v0  ;;  %1009 = vmatmul.mubr.bf16.gmra.mxu0 %v22191_v1  ;;  %v22200_v0 = vld [vmem:[%s28450_s5 + $0x1f0] ss:$8 sps:$4 sm:$0xff]  }
  0x59   : > { %1387 = vmatprep.mubr.bf16.mxu1 %v22150_v2  ;;  %1016 = vmatprep.mubr.bf16.mxu0 %v22195_v3  ;;  %v22233_v1 = vld [vmem:[%s28450_s5 + $0xf0] ss:$8 sps:$4 sm:$0xff]  }
  0x60   : > { %1388 = vmatmul.mubr.bf16.gmra.mxu1 %v22152_v5  ;;  %1017 = vmatmul.mubr.bf16.gmra.mxu0 %v22197_v6 }
  0x61   : > { %1395 = vmatprep.mubr.bf16.mxu1 %v22153_v7  ;;  %1024 = vmatprep.mubr.bf16.mxu0 %v22201_v10 }
  0x68   : > { %1396 = vmatmul.mubr.bf16.gmra.mxu1 %v22155_v11  ;;  %1025 = vmatmul.mubr.bf16.gmra.mxu0 %v22203_v12  ;;  %v23690_v11 = vld [vmem:[%s28466_s11] sm:$0xf] }
  0x69   : > { %1403 = vmatprep.mubr.bf16.mxu1 %v22156_v13  ;;  %1032 = vmatprep.mubr.bf16.mxu0 %v22204_v16 }
  0x6a   : > { %22119 = vmatprep.subr.msk.bf16.mxu1 %vm1551_vm0, %v23690_v11 }
  0x70   : > { %1404 = vmatmul.mubr.bf16.gmra.mxu1 %v22158_v17  ;;  %1033 = vmatmul.mubr.bf16.gmra.mxu0 %v22206_v18 }
  0x71   : > { %1411 = vmatprep.mubr.bf16.mxu1 %v22159_v19  ;;  %1040 = vmatprep.mubr.bf16.mxu0 %v22207_v22 }
  0x78   : > { %1412 = vmatmul.mubr.bf16.gmra.mxu1 %v22161_v23  ;;  %1041 = vmatmul.mubr.bf16.gmra.mxu0 %v22209_v24 }
  0x79   : > { %1419 = vmatprep.mubr.bf16.mxu1 %v22162_v25  ;;  %1048 = vmatprep.mubr.bf16.mxu0 %v22210_v27 }
  0x80   : > { %1420 = vmatmul.mubr.bf16.gmra.mxu1 %v22164_v29  ;;  %1049 = vmatmul.mubr.bf16.gmra.mxu0 %v22212_v30 }
  0x81   : > { %1427 = vmatprep.mubr.bf16.mxu1 %v22165_v31  ;;  %1056 = vmatprep.mubr.bf16.mxu0 %v22213_v33 }
  0x88   : > { %1428 = vmatmul.mubr.bf16.gmra.mxu1 %v22167_v35  ;;  %1057 = vmatmul.mubr.bf16.gmra.mxu0 %v22215_v36 }
  0x89   : > { %1435 = vmatprep.mubr.bf16.mxu1 %v22168_v37  ;;  %1064 = vmatprep.mubr.bf16.mxu0 %v22216_v39 }
  0x90   : > { %1436 = vmatmul.mubr.bf16.gmra.mxu1 %v22170_v40  ;;  %1065 = vmatmul.mubr.bf16.gmra.mxu0 %v22218_v42 }
  0x91   : > { %1443 = vmatprep.mubr.bf16.mxu1 %v22174_v43  ;;  %1072 = vmatprep.mubr.bf16.mxu0 %v22219_v44 }
  0x98   : > { %1444 = vmatmul.mubr.bf16.gmra.mxu1 %v22176_v47  ;;  %1073 = vmatmul.mubr.bf16.gmra.mxu0 %v22221_v48 }
  0x99   : > { %1451 = vmatprep.mubr.bf16.mxu1 %v22180_v50  ;;  %1080 = vmatprep.mubr.bf16.mxu0 %v22222_v51 }
  0xa0   : > { %1452 = vmatmul.mubr.bf16.gmra.mxu1 %v22182_v52  ;;  %1081 = vmatmul.mubr.bf16.gmra.mxu0 %v22224_v53 }
  0xa1   : > { %1459 = vmatprep.mubr.bf16.mxu1 %v22186_v54  ;;  %1088 = vmatprep.mubr.bf16.mxu0 %v22225_v55 }
  0xa8   : > { %1460 = vmatmul.mubr.bf16.gmra.mxu1 %v22188_v56  ;;  %1089 = vmatmul.mubr.bf16.gmra.mxu0 %v22227_v57 }
  0xa9   : > { %1467 = vmatprep.mubr.bf16.mxu1 %v22192_v58  ;;  %1096 = vmatprep.mubr.bf16.mxu0 %v22228_v59 }
  0xb0   : > { %1468 = vmatmul.mubr.bf16.gmra.mxu1 %v22194_v60  ;;  %1097 = vmatmul.mubr.bf16.gmra.mxu0 %v22230_v61 }
  0xb1   : > { %1475 = vmatprep.mubr.bf16.mxu1 %v22198_v62  ;;  %1104 = vmatprep.mubr.bf16.mxu0 %v22231_v63 }
  0xb8   : > { %1476 = vmatmul.mubr.bf16.gmra.mxu1 %v22200_v0  ;;  %1105 = vmatmul.mubr.bf16.gmra.mxu0 %v22233_v1 }
 0x100   : > { %v18998_v2 = vpop.f32.mrf.mxu1  ;;  %v23681_v3 = vpop.f32.mrf.mxu0 }
 0x102   : > { %v18999_v5 = vpop.f32.mrf.mxu1  ;;  %v23683_v6 = vpop.f32.mrf.mxu0 }
 0x103   : > { %v19000_v16 = vadd.f32 %v18999_v5, %v18998_v2 }
 0x104   : > { %v19001_v7 = vpop.f32.mrf.mxu1  ;;  %v23685_v10 = vpop.f32.mrf.mxu0 }
 0x106   : > { %v19002_v12 = vpop.f32.mrf.mxu1  ;;  %v23694_v13 = vpop.f32.mrf.mxu0 }
 0x107   : > { %v19003_v17 = vadd.f32 %v19002_v12, %v19001_v7 }
 0x108   : > { %v19004_v18 = vpop.f32.mrf.mxu1  ;;  %v23696_v19 = vpop.f32.mrf.mxu0 }
 0x109   : > { %v1484_v22 = vpack.c.bf16 %v19003_v17, %v19000_v16 }
 0x10a   : > { %v19005_v23 = vpop.f32.mrf.mxu1  ;;  %v23698_v24 = vpop.f32.mrf.mxu0 }
 0x10b   : > { %20843 = vmatprep.mubr.msk.bf16.mxu0 %vm1502_vm1, %v1484_v22  ;;  %v19006_v31 = vadd.f32 %v19005_v23, %v19004_v18 }
 0x10c   : > { %v19007_v25 = vpop.f32.mrf.mxu1  ;;  %v23701_v27 = vpop.f32.mrf.mxu0 }
 0x10e   : > { %v19008_v29 = vpop.f32.mrf.mxu1  ;;  %v23703_v30 = vpop.f32.mrf.mxu0 }
 0x10f   : > { %v19009_v33 = vadd.f32 %v19008_v29, %v19007_v25 }
 0x110   : > { %v19010_v35 = vpop.f32.mrf.mxu1  ;;  %v23705_v36 = vpop.f32.mrf.mxu0 }
 0x111   : > { %v1485_v37 = vpack.c.bf16 %v19009_v33, %v19006_v31 }
 0x112   : > { %v19011_v39 = vpop.f32.mrf.mxu1  ;;  %v23707_v40 = vpop.f32.mrf.mxu0 }
 0x113   : > { %20844 = vmatmul.mubr.msk.bf16.vlgmr.msra.gmra.mxu0 %vm1502_vm1, %v1485_v37  ;;  %v19012_v48 = vadd.f32 %v19011_v39, %v19010_v35 }
 0x114   : > { %v19013_v42 = vpop.f32.mrf.mxu1  ;;  %19129 = vmatpush3.bf16.msra.mxu0 %v23397_v8  ;;  %v23711_v43 = vpop.f32.mrf.mxu0 }
 0x115   : > { %19130 = vmatprep.subr.bf16.mxu0 %v23399_v9 }
 0x116   : > { %v19014_v44 = vpop.f32.mrf.mxu1  ;;  %v23714_v47 = vpop.f32.mrf.mxu0 }
 0x117   : > { %v19015_v50 = vadd.f32 %v19014_v44, %v19013_v42 }
 0x118   : > { %v19016_v51 = vpop.f32.mrf.mxu1  ;;  %19131 = vmatpush3.bf16.msra.mxu0 %v23408_v14  ;;  %v23717_v52 = vpop.f32.mrf.mxu0 }
 0x119   : > { %v1486_v53 = vpack.c.bf16 %v19015_v50, %v19012_v48  ;;  %19132 = vmatprep.subr.bf16.mxu0 %v23412_v15 }
 0x11a   : > { %v19017_v54 = vpop.f32.mrf.mxu1  ;;  %v23720_v55 = vpop.f32.mrf.mxu0 }
 0x11b   : > { %20847 = vmatprep.mubr.msk.bf16.mxu0 %vm1502_vm1, %v1486_v53  ;;  %v19018_v60 = vadd.f32 %v19017_v54, %v19016_v51 }
 0x11c   : > { %v19019_v56 = vpop.f32.mrf.mxu1  ;;  %19133 = vmatpush3.bf16.msra.mxu0 %v23420_v20  ;;  %v23724_v57 = vpop.f32.mrf.mxu0 }
 0x11d   : > { %19134 = vmatprep.subr.bf16.mxu0 %v23424_v21 }
 0x11e   : > { %v19020_v58 = vpop.f32.mrf.mxu1  ;;  %v23727_v59 = vpop.f32.mrf.mxu0 }
 0x11f   : > { %v19021_v61 = vadd.f32 %v19020_v58, %v19019_v56 }
 0x120   : > { %v19022_v62 = vpop.f32.mrf.mxu1  ;;  %19135 = vmatpush3.bf16.msra.mxu0 %v23432_v26  ;;  %v23730_v63 = vpop.f32.mrf.mxu0 }
 0x121   : > { %v1487_v0 = vpack.c.bf16 %v19021_v61, %v19018_v60  ;;  %19136 = vmatprep.subr.bf16.mxu0 %v23437_v28 }
 0x122   : > { %v19023_v1 = vpop.f32.mrf.mxu1  ;;  %v23733_v2 = vpop.f32.mrf.mxu0 }
 0x123   : > { %20848 = vmatmul.mubr.msk.bf16.gmra.mxu0 %vm1502_vm1, %v1487_v0  ;;  %v19024_v17 = vadd.f32 %v19023_v1, %v19022_v62 }
 0x124   : > { %v19025_v5 = vpop.f32.mrf.mxu1  ;;  %19137 = vmatpush3.bf16.msra.mxu0 %v23444_v32  ;;  %v23737_v7 = vpop.f32.mrf.mxu0 }
 0x125   : > { %19138 = vmatprep.subr.bf16.mxu0 %v23449_v34 }
 0x126   : > { %v19026_v12 = vpop.f32.mrf.mxu1  ;;  %v23740_v16 = vpop.f32.mrf.mxu0 }
 0x127   : > { %v19027_v18 = vadd.f32 %v19026_v12, %v19025_v5 }
 0x128   : > { %v19028_v22 = vpop.f32.mrf.mxu1  ;;  %19139 = vmatpush3.bf16.msra.mxu0 %v23456_v38  ;;  %v23743_v23 = vpop.f32.mrf.mxu0 }
 0x129   : > { %v1488_v25 = vpack.c.bf16 %v19027_v18, %v19024_v17  ;;  %19140 = vmatprep.subr.bf16.mxu0 %v23464_v41 }
 0x12a   : > { %v19029_v29 = vpop.f32.mrf.mxu1  ;;  %v23746_v31 = vpop.f32.mrf.mxu0 }
 0x12b   : > { %20851 = vmatprep.mubr.msk.bf16.mxu0 %vm1502_vm1, %v1488_v25  ;;  %v19030_v42 = vadd.f32 %v19029_v29, %v19028_v22  ;;  %v1765_v22 = vsel %vm1551_vm0, %v23690_v11, 0 }
 0x12c   : > { %v19031_v33 = vpop.f32.mrf.mxu1  ;;  %19141 = vmatpush3.bf16.msra.mxu0 %v23471_v45  ;;  %v23750_v35 = vpop.f32.mrf.mxu0 }
 0x12d   : > { %19142 = vmatprep.subr.bf16.mxu0 %v23475_v46 }
 0x12e   : > { %v19032_v37 = vpop.f32.mrf.mxu1  ;;  %v23753_v39 = vpop.f32.mrf.mxu0 }
 0x12f   : > { %v19033_v44 = vadd.f32 %v19032_v37, %v19031_v33  ;;  %v22236_v37 = vld [vmem:[%s28450_s5 + $0x204] ss:$8 sps:$4 sm:$0xff]  }
 0x130   : > { %v19034_v48 = vpop.f32.mrf.mxu1  ;;  %19143 = vmatpush3.bf16.msra.mxu0 %v23481_v49  ;;  %v23756_v50 = vpop.f32.mrf.mxu0 }
 0x131   : > { %v1489_v51 = vpack.c.bf16 %v19033_v44, %v19030_v42 }
 0x132   : > { %v19035_v53 = vpop.f32.mrf.mxu1  ;;  %v23758_v54 = vpop.f32.mrf.mxu0 }
 0x133   : > { %20852 = vmatmul.mubr.msk.bf16.gmra.mxu0 %vm1502_vm1, %v1489_v51  ;;  %v19036_v62 = vadd.f32 %v19035_v53, %v19034_v48 }
 0x134   : > { %v19037_v56 = vpop.f32.mrf.mxu1  ;;  %v23761_v58 = vpop.f32.mrf.mxu0 }
 0x136   : > { %v19038_v60 = vpop.f32.mrf.mxu1  ;;  %v23763_v61 = vpop.f32.mrf.mxu0 }
 0x137   : > { %v19039_v0 = vadd.f32 %v19038_v60, %v19037_v56 }
 0x138   : > { %v19040_v1 = vpop.f32.mrf.mxu1  ;;  %v23765_v5 = vpop.f32.mrf.mxu0 }
 0x139   : > { %v1490_v12 = vpack.c.bf16 %v19039_v0, %v19036_v62 }
 0x13a   : > { %v19041_v17 = vpop.f32.mrf.mxu1  ;;  %v23767_v18 = vpop.f32.mrf.mxu0 }
 0x13b   : > { %20855 = vmatprep.mubr.msk.bf16.mxu0 %vm1502_vm1, %v1490_v12  ;;  %v19042_v44 = vadd.f32 %v19041_v17, %v19040_v1  ;;  %v22234_v12 = vld [vmem:[%s28450_s5 + $0x200] ss:$8 sps:$4 sm:$0xff]   ;;  %v22237_v1 = vld [vmem:[%s28450_s5 + $0x214] ss:$8 sps:$4 sm:$0xff]  }
 0x13c   : > { %v19043_v25 = vpop.f32.mrf.mxu1  ;;  %v23772_v29 = vpop.f32.mrf.mxu0 }
 0x13e   : > { %v19044_v33 = vpop.f32.mrf.mxu1  ;;  %v23777_v42 = vpop.f32.mrf.mxu0 }
 0x13f   : > { %v19045_v48 = vadd.f32 %v19044_v33, %v19043_v25 }
 0x140   : > { %v19046_v51 = vpop.f32.mrf.mxu1  ;;  %v23779_v53 = vpop.f32.mrf.mxu0 }
 0x141   : > { %v1491_v56 = vpack.c.bf16 %v19045_v48, %v19042_v44 }
 0x142   : > { %v19047_v60 = vpop.f32.mrf.mxu1  ;;  %v23781_v62 = vpop.f32.mrf.mxu0 }
 0x143   : > { %20856 = vmatmul.mubr.msk.bf16.gmra.mxu0 %vm1502_vm1, %v1491_v56  ;;  %v19048_v0 = vadd.f32 %v19047_v60, %v19046_v51  ;;  %v22239_v56 = vld [vmem:[%s28450_s5 + $0x210] ss:$8 sps:$4 sm:$0xff]  }
 0x144   : > { %v19049_v11 = vpop.f32.mrf.mxu1  ;;  %2153 = vmatprep.mubr.bf16.mxu0 %v22236_v37  ;;  %v23790_v17 = vpop.f32.mrf.mxu0 }
 0x146   : > { %v19050_v49 = vpop.f32.mrf.mxu1  ;;  %v23792_v46 = vpop.f32.mrf.mxu0 }
 0x147   : > { %v19051_v25 = vadd.f32 %v19050_v49, %v19049_v11  ;;  %v22240_v49 = vld [vmem:[%s28450_s5 + $0x224] ss:$8 sps:$4 sm:$0xff]  }
 0x148   : > { %v19052_v33 = vpop.f32.mrf.mxu1  ;;  %v23801_v11 = vpop.f32.mrf.mxu0 }
 0x149   : > { %v1492_v44 = vpack.c.bf16 %v19051_v25, %v19048_v0 }
 0x14a   : > { %v19053_v48 = vpop.f32.mrf.mxu1  ;;  %v23803_v41 = vpop.f32.mrf.mxu0 }
 0x14b   : > { %2154 = vmatmul.mubr.bf16.vlgmr.msra.gmra.mxu0 %v22234_v12  ;;  %20859 = vmatprep.mubr.msk.bf16.mxu1 %vm1502_vm1, %v1492_v44  ;;  %v19054_v51 = vadd.f32 %v19053_v48, %v19052_v33  ;;  %v22242_v44 = vld [vmem:[%s28450_s5 + $0x220] ss:$8 sps:$4 sm:$0xff]  }
 0x14c   : > { %v19055_v37 = vpop.f32.mrf.mxu1  ;;  %2161 = vmatprep.mubr.bf16.mxu0 %v22237_v1 }
 0x14e   : > { %v19056_v60 = vpop.f32.mrf.mxu1 }
 0x14f   : > { %v19057_v0 = vadd.f32 %v19056_v60, %v19055_v37  ;;  %v22243_v37 = vld [vmem:[%s28450_s5 + $0x234] ss:$8 sps:$4 sm:$0xff]  }
 0x150   : > { %v19058_v25 = vpop.f32.mrf.mxu1 }
 0x151   : > { %v1493_v45 = vpack.c.bf16 %v19057_v0, %v19054_v51  ;;  %v23812_v51 = vpop.f32.mrf.mxu0 }
 0x152   : > { %v19059_v12 = vpop.f32.mrf.mxu1 }
 0x153   : > { %2162 = vmatmul.mubr.bf16.gmra.mxu0 %v22239_v56  ;;  %20860 = vmatmul.mubr.msk.bf16.vlgmr.msra.gmra.mxu1 %vm1502_vm1, %v1493_v45  ;;  %v19060_v33 = vadd.f32 %v19059_v12, %v19058_v25  ;;  %v23814_v45 = vpop.f32.mrf.mxu0  ;;  %v22245_v25 = vld [vmem:[%s28450_s5 + $0x230] ss:$8 sps:$4 sm:$0xff]  }
 0x154   : > { %v19061_v1 = vpop.f32.mrf.mxu1  ;;  %2169 = vmatprep.mubr.bf16.mxu0 %v22240_v49  ;;  %20876 = vmatpush3.bf16.msra.mxu1 %v1765_v22 }
 0x156   : > { %v19062_v48 = vpop.f32.mrf.mxu1 }
 0x157   : > { %v19063_v60 = vadd.f32 %v19062_v48, %v19061_v1  ;;  %v22246_v1 = vld [vmem:[%s28450_s5 + $0x244] ss:$8 sps:$4 sm:$0xff]   ;;  %v23823_v48 = vpop.f32.mrf.mxu0 }
 0x158   : > { %v19064_v0 = vpop.f32.mrf.mxu1 }
 0x159   : > { %v1494_v56 = vpack.c.bf16 %v19063_v60, %v19060_v33  ;;  %v23825_v32 = vpop.f32.mrf.mxu0 }
 0x15a   : > { %v19065_v38 = vpop.f32.mrf.mxu1 }
 0x15b   : > { %2170 = vmatmul.mubr.bf16.gmra.mxu0 %v22242_v44  ;;  %20863 = vmatprep.mubr.msk.bf16.mxu1 %vm1502_vm1, %v1494_v56  ;;  %v19066_v49 = vadd.f32 %v19065_v38, %v19064_v0  ;;  %v22248_v0 = vld [vmem:[%s28450_s5 + $0x240] ss:$8 sps:$4 sm:$0xff]  }
 0x15c   : > { %v19067_v22 = vpop.f32.mrf.mxu1  ;;  %2177 = vmatprep.mubr.bf16.mxu0 %v22243_v37 }
 0x15e   : > { %v19068_v12 = vpop.f32.mrf.mxu1 }
 0x15f   : > { %v19069_v33 = vadd.f32 %v19068_v12, %v19067_v22  ;;  %v22249_v22 = vld [vmem:[%s28450_s5 + $0x254] ss:$8 sps:$4 sm:$0xff]   ;;  %v23834_v12 = vpop.f32.mrf.mxu0 }
 0x160   : > { %v19070_v60 = vpop.f32.mrf.mxu1 }
 0x161   : > { %v1495_v34 = vpack.c.bf16 %v19069_v33, %v19066_v49  ;;  %v23836_v26 = vpop.f32.mrf.mxu0 }
 0x162   : > { %v19071_v44 = vpop.f32.mrf.mxu1 }
 0x163   : > { %2178 = vmatmul.mubr.bf16.gmra.mxu0 %v22245_v25  ;;  %20864 = vmatmul.mubr.msk.bf16.gmra.mxu1 %vm1502_vm1, %v1495_v34  ;;  %v19072_v37 = vadd.f32 %v19071_v44, %v19070_v60  ;;  %v22251_v60 = vld [vmem:[%s28450_s5 + $0x250] ss:$8 sps:$4 sm:$0xff]  }
 0x164   : > { %v19073_v38 = vpop.f32.mrf.mxu1  ;;  %2185 = vmatprep.mubr.bf16.mxu0 %v22246_v1 }
 0x166   : > { %v19074_v56 = vpop.f32.mrf.mxu1 }
 0x167   : > { %v19075_v49 = vadd.f32 %v19074_v56, %v19073_v38  ;;  %v22252_v38 = vld [vmem:[%s28450_s5 + $0x264] ss:$8 sps:$4 sm:$0xff]   ;;  %v23845_v56 = vpop.f32.mrf.mxu0 }
 0x168   : > { %v19076_v33 = vpop.f32.mrf.mxu1 }
 0x169   : > { %v1496_v28 = vpack.c.bf16 %v19075_v49, %v19072_v37  ;;  %v23847_v20 = vpop.f32.mrf.mxu0 }
 0x16a   : > { %v19077_v25 = vpop.f32.mrf.mxu1 }
 0x16b   : > { %2186 = vmatmul.mubr.bf16.gmra.mxu0 %v22248_v0  ;;  %20867 = vmatprep.mubr.msk.bf16.mxu1 %vm1502_vm1, %v1496_v28  ;;  %v19078_v1 = vadd.f32 %v19077_v25, %v19076_v33  ;;  %v22254_v33 = vld [vmem:[%s28450_s5 + $0x260] ss:$8 sps:$4 sm:$0xff]  }
 0x16c   : > { %v19079_v34 = vpop.f32.mrf.mxu1  ;;  %2193 = vmatprep.mubr.bf16.mxu0 %v22249_v22 }
 0x16e   : > { %v19080_v44 = vpop.f32.mrf.mxu1 }
 0x16f   : > { %v19081_v37 = vadd.f32 %v19080_v44, %v19079_v34  ;;  %v22255_v34 = vld [vmem:[%s28450_s5 + $0x274] ss:$8 sps:$4 sm:$0xff]   ;;  %v23856_v44 = vpop.f32.mrf.mxu0 }
 0x170   : > { %v19082_v49 = vpop.f32.mrf.mxu1 }
 0x171   : > { %v1497_v21 = vpack.c.bf16 %v19081_v37, %v19078_v1  ;;  %v23858_v14 = vpop.f32.mrf.mxu0 }
 0x172   : > { %v19083_v0 = vpop.f32.mrf.mxu1 }
 0x173   : > { %2194 = vmatmul.mubr.bf16.gmra.mxu0 %v22251_v60  ;;  %20868 = vmatmul.mubr.msk.bf16.gmra.mxu1 %vm1502_vm1, %v1497_v21  ;;  %v19084_v22 = vadd.f32 %v19083_v0, %v19082_v49  ;;  %v22257_v49 = vld [vmem:[%s28450_s5 + $0x270] ss:$8 sps:$4 sm:$0xff]   ;;  %v18888_v0 = vadd.f32 %v23683_v6, %v23681_v3  ;;  %v18894_v3 = vadd.f32 %v23698_v24, %v23696_v19 }
 0x174   : > { %v19085_v28 = vpop.f32.mrf.mxu1  ;;  %2201 = vmatprep.mubr.bf16.mxu0 %v22252_v38  ;;  %v18897_v6 = vadd.f32 %v23703_v30, %v23701_v27  ;;  %v18906_v27 = vadd.f32 %v23720_v55, %v23717_v52  ;;  %v18909_v30 = vadd.f32 %v23727_v59, %v23724_v57  ;;  %v18924_v57 = vadd.f32 %v23758_v54, %v23756_v50 }
 0x175   : > { %v18927_v59 = vadd.f32 %v23763_v61, %v23761_v58  ;;  %v16854_v61 = vld [vmem:[%s28466_s11 + $0x8] sm:$0xf] }
 0x176   : > { %v19086_v25 = vpop.f32.mrf.mxu1  ;;  %v1114_v19 = vpack.c.bf16 %v18897_v6, %v18894_v3  ;;  %v1116_v52 = vpack.c.bf16 %v18909_v30, %v18906_v27  ;;  %22120 = vmatprep.subr.msk.bf16.mxu1 %vm1551_vm0, %v16854_v61  ;;  %v22273_v6 = vld [vmem:[%s28450_s5 + $0x2d0] ss:$8 sps:$4 sm:$0xff]  }
 0x177   : > { %v19087_v1 = vadd.f32 %v19086_v25, %v19085_v28  ;;  %v18891_v28 = vadd.f32 %v23694_v13, %v23685_v10  ;;  %v23871_v25 = vpop.f32.mrf.mxu0  ;;  %v22258_v10 = vld [vmem:[%s28450_s5 + $0x280] ss:$8 sps:$4 sm:$0xff]   ;;  %v18900_v13 = vadd.f32 %v23707_v40, %v23705_v36  ;;  %v22261_v36 = vld [vmem:[%s28450_s5 + $0x290] ss:$8 sps:$4 sm:$0xff]   ;;  %v18912_v40 = vadd.f32 %v23733_v2, %v23730_v63 }
 0x178   : > { %v19088_v37 = vpop.f32.mrf.mxu1  ;;  %v18918_v63 = vadd.f32 %v23746_v31, %v23743_v23  ;;  %v18921_v2 = vadd.f32 %v23753_v39, %v23750_v35  ;;  %v1119_v54 = vpack.c.bf16 %v18927_v59, %v18924_v57  ;;  %v2349_v23 = vsel %vm1551_vm0, %v16854_v61, 0 }
 0x179   : > { %v1498_v15 = vpack.c.bf16 %v19087_v1, %v19084_v22  ;;  %v1113_v1 = vpack.c.bf16 %v18891_v28, %v18888_v0  ;;  %v18930_v31 = vadd.f32 %v23767_v18, %v23765_v5  ;;  %v18933_v35 = vadd.f32 %v23777_v42, %v23772_v29  ;;  %v22272_v5 = vld [vmem:[%s28450_s5 + $0x2c4] ss:$8 sps:$4 sm:$0xff]  }
 0x17a   : > { %v19089_v60 = vpop.f32.mrf.mxu1  ;;  %v1118_v58 = vpack.c.bf16 %v18921_v2, %v18918_v63  ;;  %v18936_v39 = vadd.f32 %v23781_v62, %v23779_v53  ;;  %v18945_v62 = vadd.f32 %v23814_v45, %v23812_v51 }
 0x17b   : > { %2202 = vmatmul.mubr.bf16.gmra.mxu0 %v22254_v33  ;;  %20871 = vmatprep.mubr.msk.bf16.mxu1 %vm1502_vm1, %v1498_v15  ;;  %v19090_v38 = vadd.f32 %v19089_v60, %v19088_v37  ;;  %v22260_v33 = vld [vmem:[%s28450_s5 + $0x284] ss:$8 sps:$4 sm:$0xff]   ;;  %v23873_v37 = vpop.f32.mrf.mxu0  ;;  %v18903_v60 = vadd.f32 %v23714_v47, %v23711_v43  ;;  %v18915_v43 = vadd.f32 %v23740_v16, %v23737_v7  ;;  %v22264_v7 = vld [vmem:[%s28450_s5 + $0x2a0] ss:$8 sps:$4 sm:$0xff]   ;;  %v22269_v16 = vld [vmem:[%s28450_s5 + $0x2b4] ss:$8 sps:$4 sm:$0xff]  }
 0x17c   : > { %v19091_v21 = vpop.f32.mrf.mxu1  ;;  %2209 = vmatprep.mubr.bf16.mxu0 %v22255_v34  ;;  %v22266_v47 = vld [vmem:[%s28450_s5 + $0x2a4] ss:$8 sps:$4 sm:$0xff]   ;;  %v1120_v29 = vpack.c.bf16 %v18933_v35, %v18930_v31 }
 0x17d   : > { %v1115_v24 = vpack.c.bf16 %v18903_v60, %v18900_v13  ;;  %v1117_v55 = vpack.c.bf16 %v18915_v43, %v18912_v40  ;;  %v22279_v40 = vld [vmem:[%s28450_s5 + $0x2f0] ss:$8 sps:$4 sm:$0xff]  }
 0x17e   : > { %v19092_v22 = vpop.f32.mrf.mxu1 }
 0x17f   : > { %v19093_v15 = vadd.f32 %v19092_v22, %v19091_v21  ;;  %v22263_v21 = vld [vmem:[%s28450_s5 + $0x294] ss:$8 sps:$4 sm:$0xff]  }
 0x181   : > { %v1499_v34 = vpack.c.bf16 %v19093_v15, %v19090_v38  ;;  %v23891_v38 = vpop.f32.mrf.mxu0  ;;  %v22267_v15 = vld [vmem:[%s28450_s5 + $0x2b0] ss:$8 sps:$4 sm:$0xff]  }
 0x183   : > { %20872 = vmatmul.mubr.msk.bf16.gmra.mxu1 %vm1502_vm1, %v1499_v34  ;;  %2210 = vmatmul.mubr.bf16.gmra.mxu0 %v22257_v49  ;;  %v23893_v49 = vpop.f32.mrf.mxu0  ;;  %v18951_v34 = vadd.f32 %v23836_v26, %v23834_v12  ;;  %v18957_v26 = vadd.f32 %v23858_v14, %v23856_v44 }
 0x184   : > { %20877 = vmatprep.mubr.msk.bf16.mxu1 %vm1502_vm1, %v1113_v1  ;;  %2217 = vmatprep.mubr.bf16.mxu0 %v22260_v33  ;;  %v18939_v33 = vadd.f32 %v23792_v46, %v23790_v17  ;;  %v18942_v46 = vadd.f32 %v23803_v41, %v23801_v11  ;;  %v18948_v17 = vadd.f32 %v23825_v32, %v23823_v48  ;;  %v22270_v1 = vld [vmem:[%s28450_s5 + $0x2c0] ss:$8 sps:$4 sm:$0xff]   ;;  %v22275_v41 = vld [vmem:[%s28450_s5 + $0x2d4] ss:$8 sps:$4 sm:$0xff]  }
 0x185   : > { %v23911_v0 = vpop.f32.mrf.mxu0  ;;  %v18954_v32 = vadd.f32 %v23847_v20, %v23845_v56  ;;  %v18960_v48 = vadd.f32 %v23873_v37, %v23871_v25  ;;  %v18963_v12 = vadd.f32 %v23893_v49, %v23891_v38  ;;  %v22278_v20 = vld [vmem:[%s28450_s5 + $0x2e4] ss:$8 sps:$4 sm:$0xff]   ;;  %v22281_v38 = vld [vmem:[%s28450_s5 + $0x2f4] ss:$8 sps:$4 sm:$0xff]  }
 0x186   : > { %v1121_v42 = vpack.c.bf16 %v18939_v33, %v18936_v39  ;;  %v1122_v51 = vpack.c.bf16 %v18945_v62, %v18942_v46  ;;  %v1123_v45 = vpack.c.bf16 %v18951_v34, %v18948_v17 }
 0x187   : > { %v23913_v28 = vpop.f32.mrf.mxu0  ;;  %v1124_v56 = vpack.c.bf16 %v18957_v26, %v18954_v32  ;;  %v1125_v44 = vpack.c.bf16 %v18963_v12, %v18960_v48 }
 0x188   : > { %v18966_v25 = vadd.f32 %v23913_v28, %v23911_v0 }
 0x189   : > { %v18967_v50 = vpop.f32.mrf.mxu0 }
 0x18b   : > { %20878 = vmatmul.mubr.msk.bf16.vlgmr.msra.gmra.mxu1 %vm1502_vm1, %v1114_v19  ;;  %2218 = vmatmul.mubr.bf16.gmra.mxu0 %v22258_v10  ;;  %v18968_v22 = vpop.f32.mrf.mxu0 }
 0x18c   : > { %20881 = vmatprep.mubr.msk.bf16.mxu1 %vm1502_vm1, %v1115_v24  ;;  %2225 = vmatprep.mubr.bf16.mxu0 %v22263_v21  ;;  %v18969_v37 = vadd.f32 %v18968_v22, %v18967_v50  ;;  %v22276_v21 = vld [vmem:[%s28450_s5 + $0x2e0] ss:$8 sps:$4 sm:$0xff]  }
 0x18d   : > { %20910 = vmatpush3.bf16.msra.mxu1 %v2349_v23  ;;  %v18970_v18 = vpop.f32.mrf.mxu0 }
 0x18e   : > { %19257 = vmatprep.subr.bf16.mxu1 %v23392_v4  ;;  %v1126_v24 = vpack.c.bf16 %v18969_v37, %v18966_v25  ;;  %v28474_v37 = vld [vmem:[#allocation5_spill] sm:$0xff] }
 0x18f   : > { %v18971_v53 = vpop.f32.mrf.mxu0 }
 0x190   : > { %v18972_v13 = vadd.f32 %v18971_v53, %v18970_v18 }
 0x191   : > { %v18973_v11 = vpop.f32.mrf.mxu0 }
 0x193   : > { %20882 = vmatmul.mubr.msk.bf16.gmra.mxu1 %vm1502_vm1, %v1116_v52  ;;  %2226 = vmatmul.mubr.bf16.gmra.mxu0 %v22261_v36  ;;  %v18974_v3 = vpop.f32.mrf.mxu0 }
 0x194   : > { %20885 = vmatprep.mubr.msk.bf16.mxu1 %vm1502_vm1, %v1117_v55  ;;  %2233 = vmatprep.mubr.bf16.mxu0 %v22266_v47  ;;  %v18975_v60 = vadd.f32 %v18974_v3, %v18973_v11 }
 0x195   : > { %v18976_v14 = vpop.f32.mrf.mxu0 }
 0x196   : > { %v1127_v49 = vpack.c.bf16 %v18975_v60, %v18972_v13  ;;  %v28475_v13 = vld [vmem:[#allocation6_spill] sm:$0xff] }
 0x197   : > { %v18977_v10 = vpop.f32.mrf.mxu0 }
 0x198   : > { %v18978_v30 = vadd.f32 %v18977_v10, %v18976_v14 }
 0x199   : > { %v18979_v19 = vpop.f32.mrf.mxu0 }
 0x19b   : > { %20886 = vmatmul.mubr.msk.bf16.gmra.mxu1 %vm1502_vm1, %v1118_v58  ;;  %2234 = vmatmul.mubr.bf16.gmra.mxu0 %v22264_v7  ;;  %v18980_v27 = vpop.f32.mrf.mxu0 }
 0x19c   : > { %20889 = vmatprep.mubr.msk.bf16.mxu1 %vm1502_vm1, %v1119_v54  ;;  %2241 = vmatprep.mubr.bf16.mxu0 %v22269_v16  ;;  %v18981_v36 = vadd.f32 %v18980_v27, %v18979_v19 }
 0x19e   : > { %v1128_v43 = vpack.c.bf16 %v18981_v36, %v18978_v30  ;;  %v28477_v30 = vld [vmem:[#allocation8_spill] sm:$0xff] }
 0x1a3   : > { %20890 = vmatmul.mubr.msk.bf16.gmra.mxu1 %vm1502_vm1, %v1120_v29  ;;  %2242 = vmatmul.mubr.bf16.gmra.mxu0 %v22267_v15 }
 0x1a4   : > { %2249 = vmatprep.mubr.bf16.mxu0 %v22272_v5  ;;  %20893 = vmatprep.mubr.msk.bf16.mxu1 %vm1502_vm1, %v1121_v42 }
 0x1ab   : > { %2250 = vmatmul.mubr.bf16.gmra.mxu0 %v22270_v1  ;;  %20894 = vmatmul.mubr.msk.bf16.gmra.mxu1 %vm1502_vm1, %v1122_v51 }
 0x1ac   : > { %2257 = vmatprep.mubr.bf16.mxu0 %v22275_v41  ;;  %20897 = vmatprep.mubr.msk.bf16.mxu1 %vm1502_vm1, %v1123_v45 }
 0x1b3   : > { %2258 = vmatmul.mubr.bf16.gmra.mxu0 %v22273_v6  ;;  %20898 = vmatmul.mubr.msk.bf16.gmra.mxu1 %vm1502_vm1, %v1124_v56  ;;  %v28473_v56 = vld [vmem:[#allocation4_spill] sm:$0xff] }
 0x1b4   : > { %2265 = vmatprep.mubr.bf16.mxu0 %v22278_v20  ;;  %20901 = vmatprep.mubr.msk.bf16.mxu1 %vm1502_vm1, %v1125_v44  ;;  %v28472_v20 = vld [vmem:[#allocation3_spill] sm:$0xff] }
 0x1bb   : > { %2266 = vmatmul.mubr.bf16.gmra.mxu0 %v22276_v21  ;;  %20902 = vmatmul.mubr.msk.bf16.gmra.mxu1 %vm1502_vm1, %v1126_v24 }
 0x1bc   : > { %2273 = vmatprep.mubr.bf16.mxu0 %v22281_v38  ;;  %20905 = vmatprep.mubr.msk.bf16.mxu1 %vm1502_vm1, %v1127_v49  ;;  %v28476_v49 = vld [vmem:[#allocation7_spill] sm:$0xff] }
 0x1c3   : > { %2274 = vmatmul.mubr.bf16.gmra.mxu0 %v22279_v40  ;;  %20906 = vmatmul.mubr.msk.bf16.gmra.mxu1 %vm1502_vm1, %v1128_v43 }
 0x1d3   : > { %v24001_v47 = vpop.f32.mrf.mxu0 }
 0x1d5   : > { %v24003_v0 = vpop.f32.mrf.mxu0 }
 0x1d7   : > { %v24005_v52 = vpop.f32.mrf.mxu0 }
 0x1d9   : > { %v24007_v55 = vpop.f32.mrf.mxu0 }
 0x1da   : > { %28467 = vst [vmem:[#allocation16_spill] sm:$0xff] %v24007_v55 }
 0x1e3   : > { %v24009_v28 = vpop.f32.mrf.mxu0 }
 0x1e5   : > { %v24011_v57 = vpop.f32.mrf.mxu0 }
 0x1e7   : > { %v24013_v59 = vpop.f32.mrf.mxu0 }
 0x1e9   : > { %v24015_v63 = vpop.f32.mrf.mxu0 }
 0x1ea   : > { %28468 = vst [vmem:[#allocation17_spill] sm:$0xff] %v24015_v63 }
 0x1f3   : > { %v24017_v2 = vpop.f32.mrf.mxu0 }
 0x1f5   : > { %v24019_v7 = vpop.f32.mrf.mxu0 }
 0x1f7   : > { %v24021_v16 = vpop.f32.mrf.mxu0 }
 0x1f9   : > { %v24023_v50 = vpop.f32.mrf.mxu0 }
 0x1fa   : > { %28469 = vst [vmem:[#allocation18_spill] sm:$0xff] %v24023_v50 }
 0x203   : > { %v24025_v54 = vpop.f32.mrf.mxu0 }
 0x205   : > { %v24027_v58 = vpop.f32.mrf.mxu0 }
 0x207   : > { %v24029_v61 = vpop.f32.mrf.mxu0 }
 0x209   : > { %v24031_v22 = vpop.f32.mrf.mxu0 }
 0x20a   : > { %28470 = vst [vmem:[#allocation19_spill] sm:$0xff] %v24031_v22 }
 0x20b   : > { %v19144_v23 = vpop.f32.mrf.mxu0 }
 0x20d   : > { %v19145_v31 = vpop.f32.mrf.mxu0 }
 0x20e   : > { %v19146_v33 = vadd.f32 %v19145_v31, %v19144_v23  ;;  %v28479_v23 = vld [vmem:[#allocation9_spill] sm:$0xff]  ;;  %v28480_v31 = vld [vmem:[#allocation10_spill] sm:$0xff] }
 0x20f   : > { %v19147_v35 = vpop.f32.mrf.mxu0 }
 0x211   : > { %v19148_v39 = vpop.f32.mrf.mxu0 }
 0x212   : > { %v19149_v15 = vadd.f32 %v19148_v39, %v19147_v35 }
 0x213   : > { %v19150_v5 = vpop.f32.mrf.mxu0  ;;  %v24033_v18 = vpop.f32.mrf.mxu1 }
 0x214   : > { %v2282_v29 = vpack.c.bf16 %v19149_v15, %v19146_v33 }
 0x215   : > { %v19151_v42 = vpop.f32.mrf.mxu0  ;;  %v24036_v46 = vpop.f32.mrf.mxu1 }
 0x216   : > { %20911 = vmatprep.mubr.msk.bf16.mxu1 %vm1502_vm1, %v2282_v29  ;;  %v19152_v17 = vadd.f32 %v19151_v42, %v19150_v5  ;;  %v28481_v29 = vld [vmem:[#allocation11_spill] sm:$0xff] }
 0x217   : > { %v19153_v53 = vpop.f32.mrf.mxu0  ;;  %v24038_v41 = vpop.f32.mrf.mxu1 }
 0x219   : > { %v19154_v62 = vpop.f32.mrf.mxu0  ;;  %v24041_v3 = vpop.f32.mrf.mxu1 }
 0x21a   : > { %v19155_v34 = vadd.f32 %v19154_v62, %v19153_v53  ;;  %28471 = vst [vmem:[#allocation20_spill] sm:$0xff] %v24041_v3  ;;  %v28482_v53 = vld [vmem:[#allocation12_spill] sm:$0xff] }
 0x21b   : > { %v19156_v1 = vpop.f32.mrf.mxu0 }
 0x21c   : > { %v2283_v11 = vpack.c.bf16 %v19155_v34, %v19152_v17 }
 0x21d   : > { %v19157_v51 = vpop.f32.mrf.mxu0 }
 0x21e   : > { %20912 = vmatmul.mubr.msk.bf16.vlgmr.msra.gmra.mxu1 %vm1502_vm1, %v2283_v11  ;;  %v19158_v26 = vadd.f32 %v19157_v51, %v19156_v1  ;;  %v28483_v1 = vld [vmem:[#allocation13_spill] sm:$0xff]  ;;  %v28484_v11 = vld [vmem:[#allocation14_spill] sm:$0xff] }
 0x21f   : > { %v19159_v45 = vpop.f32.mrf.mxu0  ;;  %19258 = vmatpush3.bf16.msra.mxu1 %v23397_v8 }
 0x220   : > { %19259 = vmatprep.subr.bf16.mxu1 %v23399_v9 }
 0x221   : > { %v19160_v32 = vpop.f32.mrf.mxu0 }
 0x222   : > { %v19161_v48 = vadd.f32 %v19160_v32, %v19159_v45 }
 0x223   : > { %v19162_v12 = vpop.f32.mrf.mxu0  ;;  %v24045_v6 = vpop.f32.mrf.mxu1  ;;  %19260 = vmatpush3.bf16.msra.mxu1 %v28472_v20 }
 0x224   : > { %v2284_v14 = vpack.c.bf16 %v19161_v48, %v19158_v26  ;;  %19261 = vmatprep.subr.bf16.mxu1 %v28473_v56 }
 0x225   : > { %v19163_v44 = vpop.f32.mrf.mxu0  ;;  %v24050_v25 = vpop.f32.mrf.mxu1 }
 0x226   : > { %20915 = vmatprep.mubr.msk.bf16.mxu1 %vm1502_vm1, %v2284_v14  ;;  %v19164_v21 = vadd.f32 %v19163_v44, %v19162_v12  ;;  %v28485_v12 = vld [vmem:[#allocation15_spill] sm:$0xff] }
 0x227   : > { %v19165_v10 = vpop.f32.mrf.mxu0  ;;  %19262 = vmatpush3.bf16.msra.mxu1 %v28474_v37  ;;  %v24054_v24 = vpop.f32.mrf.mxu1 }
 0x228   : > { %19263 = vmatprep.subr.bf16.mxu1 %v28475_v13 }
 0x229   : > { %v19166_v60 = vpop.f32.mrf.mxu0  ;;  %v24059_v43 = vpop.f32.mrf.mxu1 }
 0x22a   : > { %v19167_v38 = vadd.f32 %v19166_v60, %v19165_v10  ;;  %28478 = vst [vmem:[#allocation21_spill] sm:$0xff] %v24059_v43 }
 0x22b   : > { %v19168_v19 = vpop.f32.mrf.mxu0  ;;  %19264 = vmatpush3.bf16.msra.mxu1 %v28476_v49 }
 0x22c   : > { %v2285_v27 = vpack.c.bf16 %v19167_v38, %v19164_v21  ;;  %19265 = vmatprep.subr.bf16.mxu1 %v28477_v30 }
 0x22d   : > { %v19169_v36 = vpop.f32.mrf.mxu0 }
 0x22e   : > { %20916 = vmatmul.mubr.msk.bf16.gmra.mxu1 %vm1502_vm1, %v2285_v27  ;;  %v19170_v39 = vadd.f32 %v19169_v36, %v19168_v19 }
 0x22f   : > { %v19171_v40 = vpop.f32.mrf.mxu0  ;;  %19266 = vmatpush3.bf16.msra.mxu1 %v28479_v23 }
 0x230   : > { %19267 = vmatprep.subr.bf16.mxu1 %v28480_v31 }
 0x231   : > { %v19172_v35 = vpop.f32.mrf.mxu0 }
 0x232   : > { %v19173_v33 = vadd.f32 %v19172_v35, %v19171_v40 }
 0x233   : > { %v19174_v15 = vpop.f32.mrf.mxu0  ;;  %v24063_v5 = vpop.f32.mrf.mxu1  ;;  %19268 = vmatpush3.bf16.msra.mxu1 %v28481_v29 }
 0x234   : > { %v2286_v42 = vpack.c.bf16 %v19173_v33, %v19170_v39  ;;  %19269 = vmatprep.subr.bf16.mxu1 %v28482_v53 }
 0x235   : > { %v19175_v62 = vpop.f32.mrf.mxu0  ;;  %v24068_v34 = vpop.f32.mrf.mxu1 }
 0x236   : > { %20919 = vmatprep.mubr.msk.bf16.mxu1 %vm1502_vm1, %v2286_v42  ;;  %v19176_v45 = vadd.f32 %v19175_v62, %v19174_v15 }
 0x237   : > { %v19177_v17 = vpop.f32.mrf.mxu0  ;;  %19270 = vmatpush3.bf16.msra.mxu1 %v28483_v1  ;;  %v24072_v48 = vpop.f32.mrf.mxu1 }
 0x238   : > { %19271 = vmatprep.subr.bf16.mxu1 %v28484_v11 }
 0x239   : > { %v19178_v51 = vpop.f32.mrf.mxu0  ;;  %v24076_v60 = vpop.f32.mrf.mxu1 }
 0x23a   : > { %v19179_v32 = vadd.f32 %v19178_v51, %v19177_v17  ;;  %28486 = vst [vmem:[#allocation22_spill] sm:$0xff] %v24076_v60 }
 0x23b   : > { %v19180_v26 = vpop.f32.mrf.mxu0  ;;  %19272 = vmatpush3.bf16.msra.mxu1 %v28485_v12 }
 0x23c   : > { %v2287_v14 = vpack.c.bf16 %v19179_v32, %v19176_v45 }
 0x23d   : > { %v19181_v44 = vpop.f32.mrf.mxu0 }
 0x23e   : > { %20920 = vmatmul.mubr.msk.bf16.gmra.mxu1 %vm1502_vm1, %v2287_v14  ;;  %v19182_v38 = vadd.f32 %v19181_v44, %v19180_v26 }
 0x23f   : > { %v19183_v10 = vpop.f32.mrf.mxu0 }
 0x241   : > { %v19184_v21 = vpop.f32.mrf.mxu0 }
 0x242   : > { %v19185_v19 = vadd.f32 %v19184_v21, %v19183_v10 }
 0x243   : > { %v24078_v27 = vpop.f32.mrf.mxu1  ;;  %v19186_v36 = vpop.f32.mrf.mxu0 }
 0x244   : > { %v2288_v40 = vpack.c.bf16 %v19185_v19, %v19182_v38 }
 0x245   : > { %v24080_v35 = vpop.f32.mrf.mxu1  ;;  %v19187_v39 = vpop.f32.mrf.mxu0 }
 0x246   : > { %20923 = vmatprep.mubr.msk.bf16.mxu1 %vm1502_vm1, %v2288_v40  ;;  %v19188_v17 = vadd.f32 %v19187_v39, %v19186_v36 }
 0x247   : > { %v24083_v33 = vpop.f32.mrf.mxu1  ;;  %v19189_v15 = vpop.f32.mrf.mxu0 }
 0x249   : > { %v24085_v42 = vpop.f32.mrf.mxu1  ;;  %v19190_v62 = vpop.f32.mrf.mxu0 }
 0x24a   : > { %28487 = vst [vmem:[#allocation23_spill] sm:$0xff] %v24085_v42  ;;  %v19191_v51 = vadd.f32 %v19190_v62, %v19189_v15 }
 0x24b   : > { %v24087_v45 = vpop.f32.mrf.mxu1  ;;  %v19192_v32 = vpop.f32.mrf.mxu0 }
 0x24c   : > { %v2289_v26 = vpack.c.bf16 %v19191_v51, %v19188_v17 }
 0x24d   : > { %v24089_v14 = vpop.f32.mrf.mxu1  ;;  %v19193_v44 = vpop.f32.mrf.mxu0 }
 0x24e   : > { %20924 = vmatmul.mubr.msk.bf16.gmra.mxu1 %vm1502_vm1, %v2289_v26  ;;  %v19194_v40 = vadd.f32 %v19193_v44, %v19192_v32 }
 0x24f   : > { %v24092_v10 = vpop.f32.mrf.mxu1  ;;  %v19195_v21 = vpop.f32.mrf.mxu0 }
 0x251   : > { %v24094_v38 = vpop.f32.mrf.mxu1  ;;  %v19196_v19 = vpop.f32.mrf.mxu0 }
 0x252   : > { %28488 = vst [vmem:[#allocation24_spill] sm:$0xff] %v24094_v38  ;;  %v19197_v55 = vadd.f32 %v19196_v19, %v19195_v21 }
 0x253   : > { %v24096_v3 = vpop.f32.mrf.mxu1  ;;  %v19198_v36 = vpop.f32.mrf.mxu0 }
 0x254   : > { %v2290_v39 = vpack.c.bf16 %v19197_v55, %v19194_v40 }
 0x255   : > { %v24098_v15 = vpop.f32.mrf.mxu1  ;;  %v19199_v62 = vpop.f32.mrf.mxu0 }
 0x256   : > { %20927 = vmatprep.mubr.msk.bf16.mxu1 %vm1502_vm1, %v2290_v39  ;;  %v19200_v43 = vadd.f32 %v19199_v62, %v19198_v36 }
 0x257   : > { %v24101_v17 = vpop.f32.mrf.mxu1  ;;  %v19201_v51 = vpop.f32.mrf.mxu0 }
 0x259   : > { %v24103_v26 = vpop.f32.mrf.mxu1  ;;  %v19202_v63 = vpop.f32.mrf.mxu0 }
 0x25a   : > { %28489 = vst [vmem:[#allocation25_spill] sm:$0xff] %v24103_v26  ;;  %v19203_v38 = vadd.f32 %v19202_v63, %v19201_v51 }
 0x25b   : > { %v24105_v50 = vpop.f32.mrf.mxu1  ;;  %v19204_v32 = vpop.f32.mrf.mxu0 }
 0x25c   : > { %v2291_v44 = vpack.c.bf16 %v19203_v38, %v19200_v43 }
 0x25d   : > { %v24107_v21 = vpop.f32.mrf.mxu1  ;;  %v19205_v55 = vpop.f32.mrf.mxu0 }
 0x25e   : > { %20928 = vmatmul.mubr.msk.bf16.gmra.mxu1 %vm1502_vm1, %v2291_v44  ;;  %v19206_v42 = vadd.f32 %v19205_v55, %v19204_v32 }
 0x25f   : > { %v24110_v19 = vpop.f32.mrf.mxu1  ;;  %v19207_v40 = vpop.f32.mrf.mxu0 }
 0x261   : > { %v24112_v39 = vpop.f32.mrf.mxu1  ;;  %v19208_v60 = vpop.f32.mrf.mxu0 }
 0x262   : > { %28490 = vst [vmem:[#allocation26_spill] sm:$0xff] %v24112_v39  ;;  %v19209_v26 = vadd.f32 %v19208_v60, %v19207_v40 }
 0x263   : > { %v24114_v22 = vpop.f32.mrf.mxu1  ;;  %v19210_v63 = vpop.f32.mrf.mxu0 }
 0x264   : > { %v2292_v36 = vpack.c.bf16 %v19209_v26, %v19206_v42 }
 0x265   : > { %v24116_v62 = vpop.f32.mrf.mxu1  ;;  %v19211_v43 = vpop.f32.mrf.mxu0 }
 0x266   : > { %20931 = vmatprep.mubr.msk.bf16.mxu1 %vm1502_vm1, %v2292_v36  ;;  %v19212_v11 = vadd.f32 %v19211_v43, %v19210_v63 }
 0x267   : > { %v24119_v38 = vpop.f32.mrf.mxu1  ;;  %v19213_v51 = vpop.f32.mrf.mxu0 }
 0x269   : > { %v24121_v44 = vpop.f32.mrf.mxu1  ;;  %v19214_v12 = vpop.f32.mrf.mxu0 }
 0x26a   : > { %28491 = vst [vmem:[#allocation27_spill] sm:$0xff] %v24121_v44  ;;  %v19215_v39 = vadd.f32 %v19214_v12, %v19213_v51 }
 0x26b   : > { %v19216_v1 = vpop.f32.mrf.mxu0  ;;  %v24123_v32 = vpop.f32.mrf.mxu1 }
 0x26c   : > { %v2293_v60 = vpack.c.bf16 %v19215_v39, %v19212_v11 }
 0x26d   : > { %v19217_v55 = vpop.f32.mrf.mxu0  ;;  %v24125_v40 = vpop.f32.mrf.mxu1 }
 0x26e   : > { %20932 = vmatmul.mubr.msk.bf16.gmra.mxu1 %vm1502_vm1, %v2293_v60  ;;  %v19218_v29 = vadd.f32 %v19217_v55, %v19216_v1 }
 0x26f   : > { %v19219_v42 = vpop.f32.mrf.mxu0  ;;  %v24128_v26 = vpop.f32.mrf.mxu1 }
 0x271   : > { %v19220_v36 = vpop.f32.mrf.mxu0  ;;  %v24130_v53 = vpop.f32.mrf.mxu1 }
 0x272   : > { %28492 = vst [vmem:[#allocation28_spill] sm:$0xff] %v24130_v53  ;;  %v19221_v44 = vadd.f32 %v19220_v36, %v19219_v42 }
 0x273   : > { %v19222_v31 = vpop.f32.mrf.mxu0  ;;  %v24132_v63 = vpop.f32.mrf.mxu1 }
 0x274   : > { %v2294_v12 = vpack.c.bf16 %v19221_v44, %v19218_v29 }
 0x275   : > { %v19223_v43 = vpop.f32.mrf.mxu0  ;;  %v24134_v51 = vpop.f32.mrf.mxu1 }
 0x276   : > { %20935 = vmatprep.mubr.msk.bf16.mxu1 %vm1502_vm1, %v2294_v12  ;;  %v19224_v30 = vadd.f32 %v19223_v43, %v19222_v31 }
 0x277   : > { %v19225_v11 = vpop.f32.mrf.mxu0  ;;  %v24137_v39 = vpop.f32.mrf.mxu1 }
 0x279   : > { %v19226_v60 = vpop.f32.mrf.mxu0  ;;  %v24139_v23 = vpop.f32.mrf.mxu1 }
 0x27a   : > { %28493 = vst [vmem:[#allocation29_spill] sm:$0xff] %v24139_v23  ;;  %v19227_v49 = vadd.f32 %v19226_v60, %v19225_v11 }
 0x27b   : > { %v19228_v53 = vpop.f32.mrf.mxu0  ;;  %v24141_v1 = vpop.f32.mrf.mxu1 }
 0x27c   : > { %v2295_v55 = vpack.c.bf16 %v19227_v49, %v19224_v30 }
 0x27d   : > { %v19229_v42 = vpop.f32.mrf.mxu0  ;;  %v24143_v36 = vpop.f32.mrf.mxu1 }
 0x27e   : > { %20936 = vmatmul.mubr.msk.bf16.gmra.mxu1 %vm1502_vm1, %v2295_v55  ;;  %v19230_v37 = vadd.f32 %v19229_v42, %v19228_v53 }
 0x27f   : > { %v19231_v29 = vpop.f32.mrf.mxu0  ;;  %v24146_v44 = vpop.f32.mrf.mxu1 }
 0x281   : > { %v19232_v12 = vpop.f32.mrf.mxu0  ;;  %v24148_v13 = vpop.f32.mrf.mxu1 }
 0x282   : > { %v19233_v56 = vadd.f32 %v19232_v12, %v19231_v29  ;;  %v22293_v12 = vld [vmem:[%s28450_s5 + $0x334] ss:$8 sps:$4 sm:$0xff]  }
 0x283   : > { %v19234_v23 = vpop.f32.mrf.mxu0  ;;  %v20907_v31 = vpop.f32.mrf.mxu1 }
 0x284   : > { %v2296_v43 = vpack.c.bf16 %v19233_v56, %v19230_v37  ;;  %v24151_v11 = vadd.f32 %v20907_v31, %v24078_v27  ;;  %v22284_v56 = vld [vmem:[%s28450_s5 + $0x304] ss:$8 sps:$4 sm:$0xff]   ;;  %v22282_v27 = vld [vmem:[%s28450_s5 + $0x300] ss:$8 sps:$4 sm:$0xff]   ;;  %v22291_v31 = vld [vmem:[%s28450_s5 + $0x330] ss:$8 sps:$4 sm:$0xff]  }
 0x285   : > { %v19235_v49 = vpop.f32.mrf.mxu0  ;;  %v1913_v30 = vpop.f32.mrf.mxu1 }
 0x286   : > { %20939 = vmatprep.mubr.msk.bf16.mxu1 %vm1502_vm1, %v2296_v43  ;;  %v24155_v60 = vadd.f32 %v1913_v30, %v24080_v35  ;;  %v19236_v42 = vadd.f32 %v19235_v49, %v19234_v23  ;;  %v22285_v23 = vld [vmem:[%s28450_s5 + $0x310] ss:$8 sps:$4 sm:$0xff]   ;;  %v22290_v35 = vld [vmem:[%s28450_s5 + $0x324] ss:$8 sps:$4 sm:$0xff]   ;;  %v22294_v49 = vld [vmem:[%s28450_s5 + $0x340] ss:$8 sps:$4 sm:$0xff]  }
 0x287   : > { %v19237_v55 = vpop.f32.mrf.mxu0  ;;  %v20908_v20 = vpop.f32.mrf.mxu1  ;;  %v22296_v43 = vld [vmem:[%s28450_s5 + $0x344] ss:$8 sps:$4 sm:$0xff]   ;;  %v22299_v30 = vld [vmem:[%s28450_s5 + $0x354] ss:$8 sps:$4 sm:$0xff]  }
 0x288   : > { %v24158_v9 = vadd.f32 %v20908_v20, %v24083_v33  ;;  %v22287_v20 = vld [vmem:[%s28450_s5 + $0x314] ss:$8 sps:$4 sm:$0xff]   ;;  %v22288_v33 = vld [vmem:[%s28450_s5 + $0x320] ss:$8 sps:$4 sm:$0xff]  }
 0x289   : > { %v19238_v53 = vpop.f32.mrf.mxu0 }
 0x28a   : > { %v19239_v29 = vadd.f32 %v19238_v53, %v19237_v55  ;;  %v22297_v55 = vld [vmem:[%s28450_s5 + $0x350] ss:$8 sps:$4 sm:$0xff]   ;;  %v22302_v53 = vld [vmem:[%s28450_s5 + $0x364] ss:$8 sps:$4 sm:$0xff]  }
 0x28c   : > { %v2297_v37 = vpack.c.bf16 %v19239_v29, %v19236_v42  ;;  %v22300_v42 = vld [vmem:[%s28450_s5 + $0x360] ss:$8 sps:$4 sm:$0xff]   ;;  %v22305_v29 = vld [vmem:[%s28450_s5 + $0x374] ss:$8 sps:$4 sm:$0xff]  }
 0x28e   : > { %20940 = vmatmul.mubr.msk.bf16.gmra.mxu1 %vm1502_vm1, %v2297_v37 }
 0x28f   : > { %2769 = vmatprep.mubr.bf16.mxu1 %v22284_v56  ;;  %v16935_v56 = vld [vmem:[%s28466_s11 + $0xc] sm:$0xf] }
 0x290   : > { %22121 = vmatprep.subr.msk.bf16.mxu0 %vm1551_vm0, %v16935_v56  ;;  %v2965_v37 = vsel %vm1551_vm0, %v16935_v56, 0 }
 0x291   : > { %20944 = vmatpush3.bf16.msra.mxu0 %v2965_v37  ;;  %v22312_v37 = vld [vmem:[%s28450_s5 + $0x3a0] ss:$8 sps:$4 sm:$0xff]  }
 0x292   : > { %19386 = vmatprep.subr.bf16.mxu0 %v23392_v4 }
 0x296   : > { %2770 = vmatmul.mubr.bf16.vlgmr.msra.gmra.mxu1 %v22282_v27  ;;  %v22303_v27 = vld [vmem:[%s28450_s5 + $0x370] ss:$8 sps:$4 sm:$0xff]  }
 0x297   : > { %2777 = vmatprep.mubr.bf16.mxu1 %v22287_v20  ;;  %v22308_v20 = vld [vmem:[%s28450_s5 + $0x384] ss:$8 sps:$4 sm:$0xff]  }
 0x29e   : > { %2778 = vmatmul.mubr.bf16.gmra.mxu1 %v22285_v23  ;;  %v22306_v23 = vld [vmem:[%s28450_s5 + $0x380] ss:$8 sps:$4 sm:$0xff]  }
 0x29f   : > { %2785 = vmatprep.mubr.bf16.mxu1 %v22290_v35  ;;  %v22311_v35 = vld [vmem:[%s28450_s5 + $0x394] ss:$8 sps:$4 sm:$0xff]  }
 0x2a6   : > { %2786 = vmatmul.mubr.bf16.gmra.mxu1 %v22288_v33  ;;  %v22309_v33 = vld [vmem:[%s28450_s5 + $0x390] ss:$8 sps:$4 sm:$0xff]  }
 0x2a7   : > { %2793 = vmatprep.mubr.bf16.mxu1 %v22293_v12  ;;  %v22314_v12 = vld [vmem:[%s28450_s5 + $0x3a4] ss:$8 sps:$4 sm:$0xff]  }
 0x2ae   : > { %2794 = vmatmul.mubr.bf16.gmra.mxu1 %v22291_v31  ;;  %v24230_v31 = vpop.f32.mrf.mxu1 }
 0x2af   : > { %2801 = vmatprep.mubr.bf16.mxu1 %v22296_v43  ;;  %v1810_v43 = vadd.f32 %v24087_v45, %v24001_v47  ;;  %v22315_v45 = vld [vmem:[%s28450_s5 + $0x3b0] ss:$8 sps:$4 sm:$0xff]  }
 0x2b6   : > { %2802 = vmatmul.mubr.bf16.gmra.mxu1 %v22294_v49 }
 0x2b7   : > { %2809 = vmatprep.mubr.bf16.mxu1 %v22299_v30  ;;  %v1802_v30 = vadd.f32 %v24089_v14, %v24003_v0  ;;  %v22317_v0 = vld [vmem:[%s28450_s5 + $0x3b4] ss:$8 sps:$4 sm:$0xff]  }
 0x2be   : > { %2810 = vmatmul.mubr.bf16.gmra.mxu1 %v22297_v55 }
 0x2bf   : > { %2817 = vmatprep.mubr.bf16.mxu1 %v22302_v53 }
 0x2c6   : > { %2818 = vmatmul.mubr.bf16.gmra.mxu1 %v22300_v42  ;;  %v1813_v42 = vadd.f32 %v24092_v10, %v24005_v52  ;;  %v22320_v52 = vld [vmem:[%s28450_s5 + $0x3c4] ss:$8 sps:$4 sm:$0xff]   ;;  %v1826_v10 = vadd.f32 %v24096_v3, %v24009_v28  ;;  %v22321_v3 = vld [vmem:[%s28450_s5 + $0x3d0] ss:$8 sps:$4 sm:$0xff]  }
 0x2c7   : > { %2825 = vmatprep.mubr.bf16.mxu1 %v22305_v29 }
 0x2ce   : > { %2826 = vmatmul.mubr.bf16.gmra.mxu1 %v22303_v27 }
 0x2cf   : > { %2833 = vmatprep.mubr.bf16.mxu1 %v22308_v20  ;;  %v1818_v20 = vadd.f32 %v24098_v15, %v24011_v57  ;;  %v22323_v57 = vld [vmem:[%s28450_s5 + $0x3d4] ss:$8 sps:$4 sm:$0xff]  }
 0x2d6   : > { %2834 = vmatmul.mubr.bf16.gmra.mxu1 %v22306_v23 }
 0x2d7   : > { %2841 = vmatprep.mubr.bf16.mxu1 %v22311_v35 }
 0x2de   : > { %v20913_v49 = vpop.f32.mrf.mxu1  ;;  %2842 = vmatmul.mubr.bf16.gmra.mxu1 %v22309_v33  ;;  %v1829_v33 = vadd.f32 %v24101_v17, %v24013_v59  ;;  %v22326_v59 = vld [vmem:[%s28450_s5 + $0x3e4] ss:$8 sps:$4 sm:$0xff]   ;;  %v1842_v17 = vadd.f32 %v24105_v50, %v24017_v2  ;;  %v22327_v50 = vld [vmem:[%s28450_s5 + $0x3f0] ss:$8 sps:$4 sm:$0xff]  }
 0x2df   : > { %v24236_v55 = vadd.f32 %v20913_v49, %v1810_v43  ;;  %2849 = vmatprep.mubr.bf16.mxu1 %v22314_v12  ;;  %v22318_v49 = vld [vmem:[%s28450_s5 + $0x3c0] ss:$8 sps:$4 sm:$0xff]  }
 0x2e0   : > { %v2385_v53 = vpop.f32.mrf.mxu1 }
 0x2e1   : > { %v24240_v29 = vadd.f32 %v2385_v53, %v1802_v30  ;;  %v1834_v53 = vadd.f32 %v24107_v21, %v24019_v7  ;;  %v22329_v7 = vld [vmem:[%s28450_s5 + $0x3f4] ss:$8 sps:$4 sm:$0xff]   ;;  %v1858_v21 = vadd.f32 %v24114_v22, %v24025_v54  ;;  %v1874_v54 = vadd.f32 %v24123_v32, %v24033_v18 }
 0x2e2   : > { %v20914_v56 = vpop.f32.mrf.mxu1  ;;  %v1890_v18 = vadd.f32 %v24132_v63, %v24045_v6  ;;  %v1906_v6 = vadd.f32 %v24141_v1, %v24063_v5 }
 0x2e3   : > { %v24245_v47 = vadd.f32 %v20914_v56, %v1813_v42 }
 0x2e4   : > { %v24256_v14 = vpop.f32.mrf.mxu1 }
 0x2e5   : > { %28494 = vst [vmem:[#allocation30_spill] sm:$0xff] %v24256_v14 }
 0x2e6   : > { %2850 = vmatmul.mubr.bf16.gmra.mxu1 %v22312_v37  ;;  %v1845_v37 = vadd.f32 %v24110_v19, %v24021_v16 }
 0x2e7   : > { %2857 = vmatprep.mubr.bf16.mxu1 %v22317_v0 }
 0x2ee   : > { %v20917_v27 = vpop.f32.mrf.mxu1  ;;  %2858 = vmatmul.mubr.bf16.gmra.mxu1 %v22315_v45 }
 0x2ef   : > { %v24262_v23 = vadd.f32 %v20917_v27, %v1826_v10  ;;  %2865 = vmatprep.mubr.bf16.mxu1 %v22320_v52  ;;  %v22324_v52 = vld [vmem:[%s28450_s5 + $0x3e0] ss:$8 sps:$4 sm:$0xff]   ;;  %v1850_v10 = vadd.f32 %v24116_v62, %v24027_v58  ;;  %v1866_v58 = vadd.f32 %v24125_v40, %v24036_v46  ;;  %v1882_v46 = vadd.f32 %v24134_v51, %v24050_v25 }
 0x2f0   : > { %v2401_v35 = vpop.f32.mrf.mxu1  ;;  %v1898_v25 = vadd.f32 %v24143_v36, %v24068_v34 }
 0x2f1   : > { %v24266_v12 = vadd.f32 %v2401_v35, %v1818_v20  ;;  %v1861_v35 = vadd.f32 %v24119_v38, %v24029_v61  ;;  %v1877_v61 = vadd.f32 %v24128_v26, %v24038_v41  ;;  %v1893_v41 = vadd.f32 %v24137_v39, %v24054_v24 }
 0x2f2   : > { %v20918_v43 = vpop.f32.mrf.mxu1  ;;  %v1909_v24 = vadd.f32 %v24146_v44, %v24072_v48 }
 0x2f3   : > { %v24271_v28 = vadd.f32 %v20918_v43, %v1829_v33 }
 0x2f4   : > { %v24282_v15 = vpop.f32.mrf.mxu1 }
 0x2f5   : > { %28495 = vst [vmem:[#allocation31_spill] sm:$0xff] %v24282_v15 }
 0x2f6   : > { %2866 = vmatmul.mubr.bf16.gmra.mxu1 %v22318_v49 }
 0x2f7   : > { %2873 = vmatprep.mubr.bf16.mxu1 %v22323_v57 }
 0x2fe   : > { %v20921_v30 = vpop.f32.mrf.mxu1  ;;  %2874 = vmatmul.mubr.bf16.gmra.mxu1 %v22321_v3 }
 0x2ff   : > { %v24288_v42 = vadd.f32 %v20921_v30, %v1842_v17  ;;  %2881 = vmatprep.mubr.bf16.mxu1 %v22326_v59 }
 0x300   : > { %v2417_v56 = vpop.f32.mrf.mxu1 }
 0x301   : > { %v24292_v0 = vadd.f32 %v2417_v56, %v1834_v53 }
 0x302   : > { %v20922_v45 = vpop.f32.mrf.mxu1 }
 0x303   : > { %v24297_v2 = vadd.f32 %v20922_v45, %v1845_v37 }
 0x304   : > { %v24305_v16 = vpop.f32.mrf.mxu1 }
 0x305   : > { %28496 = vst [vmem:[#allocation32_spill] sm:$0xff] %v24305_v16 }
 0x306   : > { %2882 = vmatmul.mubr.bf16.gmra.mxu1 %v22324_v52 }
 0x307   : > { %2889 = vmatprep.mubr.bf16.mxu1 %v22329_v7 }
 0x30e   : > { %v20925_v19 = vpop.f32.mrf.mxu1  ;;  %2890 = vmatmul.mubr.bf16.gmra.mxu1 %v22327_v50 }
 0x30f   : > { %v24311_v27 = vadd.f32 %v20925_v19, %v1858_v21 }
 0x310   : > { %v2433_v20 = vpop.f32.mrf.mxu1 }
 0x311   : > { %v24315_v33 = vadd.f32 %v2433_v20, %v1850_v10 }
 0x312   : > { %v20926_v43 = vpop.f32.mrf.mxu1 }
 0x313   : > { %v24317_v49 = vadd.f32 %v20926_v43, %v1861_v35 }
 0x314   : > { %v24319_v57 = vpop.f32.mrf.mxu1 }
 0x31e   : > { %v20929_v22 = vpop.f32.mrf.mxu1 }
 0x31f   : > { %v24325_v62 = vadd.f32 %v20929_v22, %v1874_v54 }
 0x320   : > { %v2449_v3 = vpop.f32.mrf.mxu1 }
 0x321   : > { %v24329_v38 = vadd.f32 %v2449_v3, %v1866_v58 }
 0x322   : > { %v20930_v59 = vpop.f32.mrf.mxu1 }
 0x323   : > { %v24331_v17 = vadd.f32 %v20930_v59, %v1877_v61 }
 0x324   : > { %v24333_v30 = vpop.f32.mrf.mxu1 }
 0x325   : > { %28497 = vst [vmem:[#allocation33_spill] sm:$0xff] %v24333_v30 }
 0x32e   : > { %v20933_v32 = vpop.f32.mrf.mxu1 }
 0x32f   : > { %v24339_v40 = vadd.f32 %v20933_v32, %v1890_v18 }
 0x330   : > { %v2465_v53 = vpop.f32.mrf.mxu1 }
 0x331   : > { %v24343_v26 = vadd.f32 %v2465_v53, %v1882_v46 }
 0x332   : > { %v20934_v56 = vpop.f32.mrf.mxu1 }
 0x333   : > { %v24345_v37 = vadd.f32 %v20934_v56, %v1893_v41  ;;  %v28501_v41 = vld [vmem:[#allocation2_spill] sm:$0xff] }
 0x334   : > { %v24347_v45 = vpop.f32.mrf.mxu1 }
 0x335   : > { %28498 = vst [vmem:[#allocation34_spill] sm:$0xff] %v24347_v45 }
 0x33e   : > { %v20937_v63 = vpop.f32.mrf.mxu1 }
 0x33f   : > { %v24353_v51 = vadd.f32 %v20937_v63, %v1906_v6 }
 0x340   : > { %v2481_v52 = vpop.f32.mrf.mxu1 }
 0x341   : > { %v24357_v39 = vadd.f32 %v2481_v52, %v1898_v25  ;;  %v28502_v52 = vld [vmem:[#allocation3_spill] sm:$0xff] }
 0x342   : > { %v20938_v7 = vpop.f32.mrf.mxu1 }
 0x343   : > { %v24359_v50 = vadd.f32 %v20938_v7, %v1909_v24  ;;  %v28503_v7 = vld [vmem:[#allocation4_spill] sm:$0xff] }
 0x344   : > { %v24361_v21 = vpop.f32.mrf.mxu1 }
 0x345   : > { %28499 = vst [vmem:[#allocation35_spill] sm:$0xff] %v24361_v21 }
 0x34e   : > { %v20941_v19 = vpop.f32.mrf.mxu1 }
 0x34f   : > { %v24364_v5 = vadd.f32 %v20941_v19, %v24151_v11 }
 0x350   : > { %v2497_v1 = vpop.f32.mrf.mxu1 }
 0x351   : > { %v24367_v34 = vadd.f32 %v2497_v1, %v24155_v60 }
 0x352   : > { %v20942_v36 = vpop.f32.mrf.mxu1 }
 0x353   : > { %v24370_v10 = vadd.f32 %v20942_v36, %v24158_v9  ;;  %v28504_v36 = vld [vmem:[#allocation5_spill] sm:$0xff] }
 0x354   : > { %v24372_v48 = vpop.f32.mrf.mxu1 }
 0x355   : > { %28500 = vst [vmem:[#allocation36_spill] sm:$0xff] %v24372_v48 }
 0x356   : > { %v19273_v44 = vpop.f32.mrf.mxu1 }
 0x358   : > { %v19274_v20 = vpop.f32.mrf.mxu1 }
 0x359   : > { %v19275_v54 = vadd.f32 %v19274_v20, %v19273_v44  ;;  %v28505_v44 = vld [vmem:[#allocation6_spill] sm:$0xff] }
 0x35a   : > { %v19276_v35 = vpop.f32.mrf.mxu1 }
 0x35c   : > { %v19277_v43 = vpop.f32.mrf.mxu1 }
 0x35d   : > { %v19278_v22 = vadd.f32 %v19277_v43, %v19276_v35 }
 0x35e   : > { %v19279_v58 = vpop.f32.mrf.mxu1 }
 0x35f   : > { %v2898_v3 = vpack.c.bf16 %v19278_v22, %v19275_v54  ;;  %v28506_v22 = vld [vmem:[#allocation7_spill] sm:$0xff] }
 0x360   : > { %v19280_v11 = vpop.f32.mrf.mxu1 }
 0x361   : > { %20945 = vmatprep.mubr.msk.bf16.mxu0 %vm1502_vm1, %v2898_v3  ;;  %v19281_v59 = vadd.f32 %v19280_v11, %v19279_v58  ;;  %v28507_v3 = vld [vmem:[#allocation8_spill] sm:$0xff] }
 0x362   : > { %v19282_v61 = vpop.f32.mrf.mxu1 }
 0x364   : > { %v19283_v60 = vpop.f32.mrf.mxu1 }
 0x365   : > { %v19284_v18 = vadd.f32 %v19283_v60, %v19282_v61  ;;  %v28508_v60 = vld [vmem:[#allocation9_spill] sm:$0xff] }
 0x366   : > { %v19285_v32 = vpop.f32.mrf.mxu1 }
 0x367   : > { %v2899_v9 = vpack.c.bf16 %v19284_v18, %v19281_v59  ;;  %v28509_v59 = vld [vmem:[#allocation10_spill] sm:$0xff] }
 0x368   : > { %v19286_v46 = vpop.f32.mrf.mxu1 }
 0x369   : > { %20946 = vmatmul.mubr.msk.bf16.vlgmr.msra.gmra.mxu0 %vm1502_vm1, %v2899_v9  ;;  %v19287_v6 = vadd.f32 %v19286_v46, %v19285_v32 }
 0x36a   : > { %v19288_v53 = vpop.f32.mrf.mxu1  ;;  %19387 = vmatpush3.bf16.msra.mxu0 %v23397_v8 }
 0x36b   : > { %19388 = vmatprep.subr.bf16.mxu0 %v28501_v41 }
 0x36c   : > { %v19289_v56 = vpop.f32.mrf.mxu1 }
 0x36d   : > { %v19290_v63 = vadd.f32 %v19289_v56, %v19288_v53  ;;  %v28510_v53 = vld [vmem:[#allocation11_spill] sm:$0xff] }
 0x36e   : > { %v19291_v25 = vpop.f32.mrf.mxu1  ;;  %19389 = vmatpush3.bf16.msra.mxu0 %v28502_v52 }
 0x36f   : > { %v2900_v24 = vpack.c.bf16 %v19290_v63, %v19287_v6  ;;  %19390 = vmatprep.subr.bf16.mxu0 %v28503_v7  ;;  %v28511_v6 = vld [vmem:[#allocation12_spill] sm:$0xff] }
 0x370   : > { %v19292_v19 = vpop.f32.mrf.mxu1 }
 0x371   : > { %20949 = vmatprep.mubr.msk.bf16.mxu0 %vm1502_vm1, %v2900_v24  ;;  %v19293_v35 = vadd.f32 %v19292_v19, %v19291_v25  ;;  %v28512_v24 = vld [vmem:[#allocation13_spill] sm:$0xff]  ;;  %v28513_v19 = vld [vmem:[#allocation14_spill] sm:$0xff] }
 0x372   : > { %v19294_v1 = vpop.f32.mrf.mxu1  ;;  %19391 = vmatpush3.bf16.msra.mxu0 %v28504_v36 }
 0x373   : > { %19392 = vmatprep.subr.bf16.mxu0 %v28505_v44 }
 0x374   : > { %v19295_v20 = vpop.f32.mrf.mxu1 }
 0x375   : > { %v19296_v43 = vadd.f32 %v19295_v20, %v19294_v1 }
 0x376   : > { %v19297_v54 = vpop.f32.mrf.mxu1  ;;  %19393 = vmatpush3.bf16.msra.mxu0 %v28506_v22 }
 0x377   : > { %v2901_v58 = vpack.c.bf16 %v19296_v43, %v19293_v35  ;;  %19394 = vmatprep.subr.bf16.mxu0 %v28507_v3 }
 0x378   : > { %v19298_v11 = vpop.f32.mrf.mxu1 }
 0x379   : > { %20950 = vmatmul.mubr.msk.bf16.gmra.mxu0 %vm1502_vm1, %v2901_v58  ;;  %v19299_v32 = vadd.f32 %v19298_v11, %v19297_v54  ;;  %v28514_v54 = vld [vmem:[#allocation15_spill] sm:$0xff] }
 0x37a   : > { %v19300_v61 = vpop.f32.mrf.mxu1  ;;  %19395 = vmatpush3.bf16.msra.mxu0 %v28508_v60 }
 0x37b   : > { %19396 = vmatprep.subr.bf16.mxu0 %v28509_v59 }
 0x37c   : > { %v19301_v18 = vpop.f32.mrf.mxu1 }
 0x37d   : > { %v19302_v9 = vadd.f32 %v19301_v18, %v19300_v61 }
 0x37e   : > { %v19303_v46 = vpop.f32.mrf.mxu1  ;;  %19397 = vmatpush3.bf16.msra.mxu0 %v28510_v53 }
 0x37f   : > { %v2902_v56 = vpack.c.bf16 %v19302_v9, %v19299_v32  ;;  %19398 = vmatprep.subr.bf16.mxu0 %v28511_v6 }
 0x380   : > { %v19304_v63 = vpop.f32.mrf.mxu1 }
 0x381   : > { %20953 = vmatprep.mubr.msk.bf16.mxu0 %vm1502_vm1, %v2902_v56  ;;  %v19305_v20 = vadd.f32 %v19304_v63, %v19303_v46 }
 0x382   : > { %v19306_v25 = vpop.f32.mrf.mxu1  ;;  %19399 = vmatpush3.bf16.msra.mxu0 %v28512_v24 }
 0x383   : > { %19400 = vmatprep.subr.bf16.mxu0 %v28513_v19 }
 0x384   : > { %v19307_v1 = vpop.f32.mrf.mxu1 }
 0x385   : > { %v19308_v35 = vadd.f32 %v19307_v1, %v19306_v25 }
 0x386   : > { %v19309_v43 = vpop.f32.mrf.mxu1  ;;  %19401 = vmatpush3.bf16.msra.mxu0 %v28514_v54 }
 0x387   : > { %v2903_v58 = vpack.c.bf16 %v19308_v35, %v19305_v20 }
 0x388   : > { %v19310_v11 = vpop.f32.mrf.mxu1 }
 0x389   : > { %20954 = vmatmul.mubr.msk.bf16.gmra.mxu0 %vm1502_vm1, %v2903_v58  ;;  %v19311_v32 = vadd.f32 %v19310_v11, %v19309_v43 }
 0x38a   : > { %v19312_v61 = vpop.f32.mrf.mxu1 }
 0x38c   : > { %v19313_v18 = vpop.f32.mrf.mxu1 }
 0x38d   : > { %v19314_v9 = vadd.f32 %v19313_v18, %v19312_v61 }
 0x38e   : > { %v19315_v56 = vpop.f32.mrf.mxu1 }
 0x38f   : > { %v2904_v14 = vpack.c.bf16 %v19314_v9, %v19311_v32 }
 0x390   : > { %v19316_v30 = vpop.f32.mrf.mxu1 }
 0x391   : > { %20957 = vmatprep.mubr.msk.bf16.mxu0 %vm1502_vm1, %v2904_v14  ;;  %v19317_v46 = vadd.f32 %v19316_v30, %v19315_v56 }
 0x392   : > { %v19318_v15 = vpop.f32.mrf.mxu1 }
 0x394   : > { %v19319_v45 = vpop.f32.mrf.mxu1 }
 0x395   : > { %v19320_v63 = vadd.f32 %v19319_v45, %v19318_v15 }
 0x396   : > { %v19321_v25 = vpop.f32.mrf.mxu1 }
 0x397   : > { %v2905_v1 = vpack.c.bf16 %v19320_v63, %v19317_v46 }
 0x398   : > { %v19322_v16 = vpop.f32.mrf.mxu1 }
 0x399   : > { %20958 = vmatmul.mubr.msk.bf16.gmra.mxu0 %vm1502_vm1, %v2905_v1  ;;  %v19323_v58 = vadd.f32 %v19322_v16, %v19321_v25 }
 0x39a   : > { %v19324_v20 = vpop.f32.mrf.mxu1 }
 0x39c   : > { %v19325_v35 = vpop.f32.mrf.mxu1 }
 0x39d   : > { %v19326_v21 = vadd.f32 %v19325_v35, %v19324_v20 }
 0x39e   : > { %v19327_v43 = vpop.f32.mrf.mxu1 }
 0x39f   : > { %v2906_v11 = vpack.c.bf16 %v19326_v21, %v19323_v58 }
 0x3a0   : > { %v19328_v61 = vpop.f32.mrf.mxu1 }
 0x3a1   : > { %20961 = vmatprep.mubr.msk.bf16.mxu0 %vm1502_vm1, %v2906_v11  ;;  %v19329_v32 = vadd.f32 %v19328_v61, %v19327_v43 }
 0x3a2   : > { %v19330_v18 = vpop.f32.mrf.mxu1 }
 0x3a4   : > { %v19331_v14 = vpop.f32.mrf.mxu1 }
 0x3a5   : > { %v19332_v9 = vadd.f32 %v19331_v14, %v19330_v18 }
 0x3a6   : > { %v19333_v30 = vpop.f32.mrf.mxu1 }
 0x3a7   : > { %v2907_v15 = vpack.c.bf16 %v19332_v9, %v19329_v32 }
 0x3a8   : > { %v19334_v45 = vpop.f32.mrf.mxu1 }
 0x3a9   : > { %20962 = vmatmul.mubr.msk.bf16.gmra.mxu0 %vm1502_vm1, %v2907_v15  ;;  %v19335_v63 = vadd.f32 %v19334_v45, %v19333_v30 }
 0x3aa   : > { %v19336_v56 = vpop.f32.mrf.mxu1 }
 0x3ac   : > { %v19337_v46 = vpop.f32.mrf.mxu1 }
 0x3ad   : > { %v19338_v1 = vadd.f32 %v19337_v46, %v19336_v56 }
 0x3ae   : > { %v19339_v16 = vpop.f32.mrf.mxu1 }
 0x3af   : > { %v2908_v25 = vpack.c.bf16 %v19338_v1, %v19335_v63 }
 0x3b0   : > { %v19340_v20 = vpop.f32.mrf.mxu1 }
 0x3b1   : > { %20965 = vmatprep.mubr.msk.bf16.mxu0 %vm1502_vm1, %v2908_v25  ;;  %v19341_v58 = vadd.f32 %v19340_v20, %v19339_v16 }
 0x3b2   : > { %v19342_v21 = vpop.f32.mrf.mxu1 }
 0x3b4   : > { %v19343_v35 = vpop.f32.mrf.mxu1 }
 0x3b5   : > { %v19344_v11 = vadd.f32 %v19343_v35, %v19342_v21 }
 0x3b6   : > { %v19345_v43 = vpop.f32.mrf.mxu1 }
 0x3b7   : > { %v2909_v61 = vpack.c.bf16 %v19344_v11, %v19341_v58 }
 0x3b8   : > { %v19346_v18 = vpop.f32.mrf.mxu1 }
 0x3b9   : > { %20966 = vmatmul.mubr.msk.bf16.gmra.mxu0 %vm1502_vm1, %v2909_v61  ;;  %v19347_v9 = vadd.f32 %v19346_v18, %v19345_v43 }
 0x3ba   : > { %v19348_v14 = vpop.f32.mrf.mxu1 }
 0x3bc   : > { %v19349_v32 = vpop.f32.mrf.mxu1 }
 0x3bd   : > { %v19350_v15 = vadd.f32 %v19349_v32, %v19348_v14 }
 0x3be   : > { %v19351_v30 = vpop.f32.mrf.mxu1 }
 0x3bf   : > { %v2910_v45 = vpack.c.bf16 %v19350_v15, %v19347_v9 }
 0x3c0   : > { %v19352_v56 = vpop.f32.mrf.mxu1 }
 0x3c1   : > { %20969 = vmatprep.mubr.msk.bf16.mxu0 %vm1502_vm1, %v2910_v45  ;;  %v19353_v1 = vadd.f32 %v19352_v56, %v19351_v30  ;;  %v22332_v30 = vld [vmem:[%s28450_s5 + $0x404] ss:$8 sps:$4 sm:$0xff]  }
 0x3c2   : > { %v19354_v46 = vpop.f32.mrf.mxu1 }
 0x3c4   : > { %v19355_v63 = vpop.f32.mrf.mxu1 }
 0x3c5   : > { %v19356_v25 = vadd.f32 %v19355_v63, %v19354_v46  ;;  %v22330_v46 = vld [vmem:[%s28450_s5 + $0x400] ss:$8 sps:$4 sm:$0xff]   ;;  %v22335_v63 = vld [vmem:[%s28450_s5 + $0x414] ss:$8 sps:$4 sm:$0xff]  }
 0x3c6   : > { %v19357_v16 = vpop.f32.mrf.mxu1 }
 0x3c7   : > { %v2911_v20 = vpack.c.bf16 %v19356_v25, %v19353_v1  ;;  %v22333_v1 = vld [vmem:[%s28450_s5 + $0x410] ss:$8 sps:$4 sm:$0xff]   ;;  %v22338_v25 = vld [vmem:[%s28450_s5 + $0x424] ss:$8 sps:$4 sm:$0xff]  }
 0x3c8   : > { %v19358_v21 = vpop.f32.mrf.mxu1 }
 0x3c9   : > { %20970 = vmatmul.mubr.msk.bf16.gmra.mxu0 %vm1502_vm1, %v2911_v20  ;;  %v19359_v11 = vadd.f32 %v19358_v21, %v19357_v16  ;;  %v22336_v16 = vld [vmem:[%s28450_s5 + $0x420] ss:$8 sps:$4 sm:$0xff]   ;;  %v22341_v20 = vld [vmem:[%s28450_s5 + $0x434] ss:$8 sps:$4 sm:$0xff]   ;;  %v22339_v21 = vld [vmem:[%s28450_s5 + $0x430] ss:$8 sps:$4 sm:$0xff]  }
 0x3ca   : > { %v19360_v35 = vpop.f32.mrf.mxu1 }
 0x3cc   : > { %v19361_v58 = vpop.f32.mrf.mxu1 }
 0x3cd   : > { %v19362_v61 = vadd.f32 %v19361_v58, %v19360_v35  ;;  %v22344_v35 = vld [vmem:[%s28450_s5 + $0x444] ss:$8 sps:$4 sm:$0xff]   ;;  %v22342_v58 = vld [vmem:[%s28450_s5 + $0x440] ss:$8 sps:$4 sm:$0xff]  }
 0x3ce   : > { %v19363_v43 = vpop.f32.mrf.mxu1 }
 0x3cf   : > { %v2912_v18 = vpack.c.bf16 %v19362_v61, %v19359_v11  ;;  %v22347_v11 = vld [vmem:[%s28450_s5 + $0x454] ss:$8 sps:$4 sm:$0xff]   ;;  %v22345_v61 = vld [vmem:[%s28450_s5 + $0x450] ss:$8 sps:$4 sm:$0xff]  }
 0x3d0   : > { %v19364_v14 = vpop.f32.mrf.mxu1 }
 0x3d1   : > { %20973 = vmatprep.mubr.msk.bf16.mxu0 %vm1502_vm1, %v2912_v18  ;;  %v19365_v15 = vadd.f32 %v19364_v14, %v19363_v43  ;;  %v22350_v43 = vld [vmem:[%s28450_s5 + $0x464] ss:$8 sps:$4 sm:$0xff]   ;;  %v22348_v18 = vld [vmem:[%s28450_s5 + $0x460] ss:$8 sps:$4 sm:$0xff]   ;;  %v22353_v14 = vld [vmem:[%s28450_s5 + $0x474] ss:$8 sps:$4 sm:$0xff]  }
 0x3d2   : > { %v19366_v32 = vpop.f32.mrf.mxu1 }
 0x3d4   : > { %v19367_v9 = vpop.f32.mrf.mxu1 }
 0x3d5   : > { %v19368_v45 = vadd.f32 %v19367_v9, %v19366_v32  ;;  %v17016_v32 = vld [vmem:[%s28466_s11 + $0x10] sm:$0xf] }
 0x3d6   : > { %22122 = vmatprep.subr.msk.bf16.mxu1 %vm1551_vm0, %v17016_v32  ;;  %v3581_v9 = vsel %vm1551_vm0, %v17016_v32, 0 }
 0x3d7   : > { %v2913_v56 = vpack.c.bf16 %v19368_v45, %v19365_v15  ;;  %20978 = vmatpush3.bf16.msra.mxu1 %v3581_v9  ;;  %v22351_v15 = vld [vmem:[%s28450_s5 + $0x470] ss:$8 sps:$4 sm:$0xff]   ;;  %v22356_v45 = vld [vmem:[%s28450_s5 + $0x484] ss:$8 sps:$4 sm:$0xff]   ;;  %v22366_v9 = vld [vmem:[%s28450_s5 + $0x4c0] ss:$8 sps:$4 sm:$0xff]  }
 0x3d8   : > { %19515 = vmatprep.subr.bf16.mxu1 %v23392_v4 }
 0x3d9   : > { %20974 = vmatmul.mubr.msk.bf16.gmra.mxu0 %vm1502_vm1, %v2913_v56  ;;  %v22359_v56 = vld [vmem:[%s28450_s5 + $0x494] ss:$8 sps:$4 sm:$0xff]  }
 0x3da   : > { %3385 = vmatprep.mubr.bf16.mxu0 %v22332_v30  ;;  %v22354_v30 = vld [vmem:[%s28450_s5 + $0x480] ss:$8 sps:$4 sm:$0xff]  }
 0x3e1   : > { %3386 = vmatmul.mubr.bf16.vlgmr.msra.gmra.mxu0 %v22330_v46  ;;  %v22357_v46 = vld [vmem:[%s28450_s5 + $0x490] ss:$8 sps:$4 sm:$0xff]  }
 0x3e2   : > { %3393 = vmatprep.mubr.bf16.mxu0 %v22335_v63  ;;  %v22362_v63 = vld [vmem:[%s28450_s5 + $0x4a4] ss:$8 sps:$4 sm:$0xff]  }
 0x3e9   : > { %3394 = vmatmul.mubr.bf16.gmra.mxu0 %v22333_v1 }
 0x3ea   : > { %3401 = vmatprep.mubr.bf16.mxu0 %v22338_v25 }
 0x3f1   : > { %3402 = vmatmul.mubr.bf16.gmra.mxu0 %v22336_v16 }
 0x3f2   : > { %3409 = vmatprep.mubr.bf16.mxu0 %v22341_v20 }
 0x3f9   : > { %3410 = vmatmul.mubr.bf16.gmra.mxu0 %v22339_v21 }
 0x3fa   : > { %3417 = vmatprep.mubr.bf16.mxu0 %v22344_v35  ;;  %v22360_v35 = vld [vmem:[%s28450_s5 + $0x4a0] ss:$8 sps:$4 sm:$0xff]  }
 0x401   : > { %3418 = vmatmul.mubr.bf16.gmra.mxu0 %v22342_v58 }
 0x402   : > { %3425 = vmatprep.mubr.bf16.mxu0 %v22347_v11  ;;  %v22365_v11 = vld [vmem:[%s28450_s5 + $0x4b4] ss:$8 sps:$4 sm:$0xff]  }
 0x409   : > { %3426 = vmatmul.mubr.bf16.gmra.mxu0 %v22345_v61 }
 0x40a   : > { %3433 = vmatprep.mubr.bf16.mxu0 %v22350_v43 }
 0x411   : > { %3434 = vmatmul.mubr.bf16.gmra.mxu0 %v22348_v18 }
 0x412   : > { %3441 = vmatprep.mubr.bf16.mxu0 %v22353_v14 }
 0x419   : > { %3442 = vmatmul.mubr.bf16.gmra.mxu0 %v22351_v15 }
 0x41a   : > { %3449 = vmatprep.mubr.bf16.mxu0 %v22356_v45  ;;  %v22371_v45 = vld [vmem:[%s28450_s5 + $0x4d4] ss:$8 sps:$4 sm:$0xff]  }
 0x421   : > { %3450 = vmatmul.mubr.bf16.gmra.mxu0 %v22354_v30 }
 0x422   : > { %3457 = vmatprep.mubr.bf16.mxu0 %v22359_v56 }
 0x429   : > { %v20947_v1 = vpop.f32.mrf.mxu0  ;;  %3458 = vmatmul.mubr.bf16.gmra.mxu0 %v22357_v46 }
 0x42a   : > { %v24475_v25 = vadd.f32 %v20947_v1, %v24236_v55  ;;  %3465 = vmatprep.mubr.bf16.mxu0 %v22362_v63  ;;  %v22363_v55 = vld [vmem:[%s28450_s5 + $0x4b0] ss:$8 sps:$4 sm:$0xff]  }
 0x42b   : > { %v3001_v16 = vpop.f32.mrf.mxu0 }
 0x42c   : > { %v24478_v20 = vadd.f32 %v3001_v16, %v24240_v29  ;;  %v22368_v29 = vld [vmem:[%s28450_s5 + $0x4c4] ss:$8 sps:$4 sm:$0xff]   ;;  %v22372_v16 = vld [vmem:[%s28450_s5 + $0x4e0] ss:$8 sps:$4 sm:$0xff]  }
 0x42d   : > { %v20948_v21 = vpop.f32.mrf.mxu0 }
 0x42e   : > { %v24484_v58 = vadd.f32 %v20948_v21, %v24245_v47 }
 0x42f   : > { %v24495_v61 = vpop.f32.mrf.mxu0 }
 0x430   : > { %28515 = vst [vmem:[#allocation2_spill] sm:$0xff] %v24495_v61 }
 0x431   : > { %3466 = vmatmul.mubr.bf16.gmra.mxu0 %v22360_v35  ;;  %v22377_v35 = vld [vmem:[%s28450_s5 + $0x4f4] ss:$8 sps:$4 sm:$0xff]  }
 0x432   : > { %3473 = vmatprep.mubr.bf16.mxu0 %v22365_v11 }
 0x439   : > { %v20951_v43 = vpop.f32.mrf.mxu0  ;;  %3474 = vmatmul.mubr.bf16.gmra.mxu0 %v22363_v55 }
 0x43a   : > { %v24498_v47 = vadd.f32 %v20951_v43, %v24262_v23  ;;  %3481 = vmatprep.mubr.bf16.mxu0 %v22368_v29  ;;  %v22369_v23 = vld [vmem:[%s28450_s5 + $0x4d0] ss:$8 sps:$4 sm:$0xff]  }
 0x43b   : > { %v3017_v18 = vpop.f32.mrf.mxu0 }
 0x43c   : > { %v24501_v14 = vadd.f32 %v3017_v18, %v24266_v12  ;;  %v22374_v12 = vld [vmem:[%s28450_s5 + $0x4e4] ss:$8 sps:$4 sm:$0xff]  }
 0x43d   : > { %v20952_v32 = vpop.f32.mrf.mxu0 }
 0x43e   : > { %v24507_v15 = vadd.f32 %v20952_v32, %v24271_v28 }
 0x43f   : > { %v24518_v30 = vpop.f32.mrf.mxu0 }
 0x440   : > { %28516 = vst [vmem:[#allocation3_spill] sm:$0xff] %v24518_v30 }
 0x441   : > { %3482 = vmatmul.mubr.bf16.gmra.mxu0 %v22366_v9 }
 0x442   : > { %3489 = vmatprep.mubr.bf16.mxu0 %v22371_v45 }
 0x449   : > { %v20955_v56 = vpop.f32.mrf.mxu0  ;;  %3490 = vmatmul.mubr.bf16.gmra.mxu0 %v22369_v23 }
 0x44a   : > { %v24521_v28 = vadd.f32 %v20955_v56, %v24288_v42  ;;  %3497 = vmatprep.mubr.bf16.mxu0 %v22374_v12  ;;  %v22375_v42 = vld [vmem:[%s28450_s5 + $0x4f0] ss:$8 sps:$4 sm:$0xff]  }
 0x44b   : > { %v3033_v46 = vpop.f32.mrf.mxu0 }
 0x44c   : > { %v24524_v63 = vadd.f32 %v3033_v46, %v24292_v0 }
 0x44d   : > { %v20956_v1 = vpop.f32.mrf.mxu0 }
 0x44e   : > { %v24530_v21 = vadd.f32 %v20956_v1, %v24297_v2 }
 0x44f   : > { %v24538_v0 = vpop.f32.mrf.mxu0 }
 0x450   : > { %28517 = vst [vmem:[#allocation4_spill] sm:$0xff] %v24538_v0 }
 0x451   : > { %3498 = vmatmul.mubr.bf16.gmra.mxu0 %v22372_v16 }
 0x452   : > { %3505 = vmatprep.mubr.bf16.mxu0 %v22377_v35 }
 0x459   : > { %v20959_v11 = vpop.f32.mrf.mxu0  ;;  %3506 = vmatmul.mubr.bf16.gmra.mxu0 %v22375_v42 }
 0x45a   : > { %v24541_v55 = vadd.f32 %v20959_v11, %v24311_v27 }
 0x45b   : > { %v3049_v29 = vpop.f32.mrf.mxu0 }
 0x45c   : > { %v24544_v2 = vadd.f32 %v3049_v29, %v24315_v33 }
 0x45d   : > { %v20960_v43 = vpop.f32.mrf.mxu0 }
 0x45e   : > { %v24547_v18 = vadd.f32 %v20960_v43, %v24317_v49 }
 0x45f   : > { %v24549_v32 = vpop.f32.mrf.mxu0 }
 0x469   : > { %v20963_v9 = vpop.f32.mrf.mxu0 }
 0x46a   : > { %v24552_v45 = vadd.f32 %v20963_v9, %v24325_v62 }
 0x46b   : > { %v3065_v23 = vpop.f32.mrf.mxu0 }
 0x46c   : > { %v24555_v12 = vadd.f32 %v3065_v23, %v24329_v38 }
 0x46d   : > { %v20964_v27 = vpop.f32.mrf.mxu0 }
 0x46e   : > { %v24558_v56 = vadd.f32 %v20964_v27, %v24331_v17 }
 0x46f   : > { %v24560_v33 = vpop.f32.mrf.mxu0 }
 0x470   : > { %28518 = vst [vmem:[#allocation5_spill] sm:$0xff] %v24560_v33 }
 0x479   : > { %v20967_v46 = vpop.f32.mrf.mxu0 }
 0x47a   : > { %v24563_v49 = vadd.f32 %v20967_v46, %v24339_v40 }
 0x47b   : > { %v3081_v1 = vpop.f32.mrf.mxu0 }
 0x47c   : > { %v24566_v16 = vadd.f32 %v3081_v1, %v24343_v26 }
 0x47d   : > { %v20968_v62 = vpop.f32.mrf.mxu0 }
 0x47e   : > { %v24569_v35 = vadd.f32 %v20968_v62, %v24345_v37 }
 0x47f   : > { %v24571_v38 = vpop.f32.mrf.mxu0 }
 0x480   : > { %28519 = vst [vmem:[#allocation6_spill] sm:$0xff] %v24571_v38 }
 0x489   : > { %v20971_v42 = vpop.f32.mrf.mxu0 }
 0x48a   : > { %v24574_v17 = vadd.f32 %v20971_v42, %v24353_v51 }
 0x48b   : > { %v3097_v11 = vpop.f32.mrf.mxu0 }
 0x48c   : > { %v24577_v29 = vadd.f32 %v3097_v11, %v24357_v39 }
 0x48d   : > { %v20972_v40 = vpop.f32.mrf.mxu0 }
 0x48e   : > { %v24580_v43 = vadd.f32 %v20972_v40, %v24359_v50 }
 0x48f   : > { %v24582_v26 = vpop.f32.mrf.mxu0 }
 0x490   : > { %28520 = vst [vmem:[#allocation7_spill] sm:$0xff] %v24582_v26 }
 0x499   : > { %v20975_v9 = vpop.f32.mrf.mxu0 }
 0x49a   : > { %v24585_v37 = vadd.f32 %v20975_v9, %v24364_v5 }
 0x49b   : > { %v3113_v23 = vpop.f32.mrf.mxu0 }
 0x49c   : > { %v24588_v27 = vadd.f32 %v3113_v23, %v24367_v34 }
 0x49d   : > { %v20976_v51 = vpop.f32.mrf.mxu0 }
 0x49e   : > { %v24591_v46 = vadd.f32 %v20976_v51, %v24370_v10 }
 0x49f   : > { %v24593_v39 = vpop.f32.mrf.mxu0 }
 0x4a0   : > { %28521 = vst [vmem:[#allocation8_spill] sm:$0xff] %v24593_v39 }
 0x4a1   : > { %v19402_v1 = vpop.f32.mrf.mxu0 }
 0x4a3   : > { %v19403_v62 = vpop.f32.mrf.mxu0 }
 0x4a4   : > { %v19404_v11 = vadd.f32 %v19403_v62, %v19402_v1 }
 0x4a5   : > { %v19405_v50 = vpop.f32.mrf.mxu0 }
 0x4a7   : > { %v19406_v42 = vpop.f32.mrf.mxu0 }
 0x4a8   : > { %v19407_v40 = vadd.f32 %v19406_v42, %v19405_v50 }
 0x4a9   : > { %v19408_v61 = vpop.f32.mrf.mxu0 }
 0x4aa   : > { %v3514_v33 = vpack.c.bf16 %v19407_v40, %v19404_v11 }
 0x4ab   : > { %v19409_v5 = vpop.f32.mrf.mxu0 }
 0x4ac   : > { %20979 = vmatprep.mubr.msk.bf16.mxu1 %vm1502_vm1, %v3514_v33  ;;  %v19410_v23 = vadd.f32 %v19409_v5, %v19408_v61 }
 0x4ad   : > { %v19411_v9 = vpop.f32.mrf.mxu0 }
 0x4af   : > { %v19412_v34 = vpop.f32.mrf.mxu0 }
 0x4b0   : > { %v19413_v30 = vadd.f32 %v19412_v34, %v19411_v9 }
 0x4b1   : > { %v19414_v38 = vpop.f32.mrf.mxu0 }
 0x4b2   : > { %v3515_v10 = vpack.c.bf16 %v19413_v30, %v19410_v23 }
 0x4b3   : > { %v19415_v51 = vpop.f32.mrf.mxu0 }
 0x4b4   : > { %20980 = vmatmul.mubr.msk.bf16.vlgmr.msra.gmra.mxu1 %vm1502_vm1, %v3515_v10  ;;  %v19416_v62 = vadd.f32 %v19415_v51, %v19414_v38 }
 0x4b5   : > { %v19417_v0 = vpop.f32.mrf.mxu0  ;;  %19516 = vmatpush3.bf16.msra.mxu1 %v23397_v8 }
 0x4b6   : > { %19517 = vmatprep.subr.bf16.mxu1 %v28501_v41 }
 0x4b7   : > { %v19418_v1 = vpop.f32.mrf.mxu0 }
 0x4b8   : > { %v19419_v50 = vadd.f32 %v19418_v1, %v19417_v0 }
 0x4b9   : > { %v19420_v42 = vpop.f32.mrf.mxu0  ;;  %19518 = vmatpush3.bf16.msra.mxu1 %v28502_v52 }
 0x4ba   : > { %v3516_v33 = vpack.c.bf16 %v19419_v50, %v19416_v62  ;;  %19519 = vmatprep.subr.bf16.mxu1 %v28503_v7 }
 0x4bb   : > { %v19421_v61 = vpop.f32.mrf.mxu0 }
 0x4bc   : > { %20983 = vmatprep.mubr.msk.bf16.mxu1 %vm1502_vm1, %v3516_v33  ;;  %v19422_v40 = vadd.f32 %v19421_v61, %v19420_v42 }
 0x4bd   : > { %v19423_v30 = vpop.f32.mrf.mxu0  ;;  %19520 = vmatpush3.bf16.msra.mxu1 %v28504_v36 }
 0x4be   : > { %19521 = vmatprep.subr.bf16.mxu1 %v28505_v44 }
 0x4bf   : > { %v19424_v11 = vpop.f32.mrf.mxu0 }
 0x4c0   : > { %v19425_v5 = vadd.f32 %v19424_v11, %v19423_v30 }
 0x4c1   : > { %v19426_v9 = vpop.f32.mrf.mxu0  ;;  %19522 = vmatpush3.bf16.msra.mxu1 %v28506_v22 }
 0x4c2   : > { %v3517_v0 = vpack.c.bf16 %v19425_v5, %v19422_v40  ;;  %19523 = vmatprep.subr.bf16.mxu1 %v28507_v3 }
 0x4c3   : > { %v19427_v38 = vpop.f32.mrf.mxu0 }
 0x4c4   : > { %20984 = vmatmul.mubr.msk.bf16.gmra.mxu1 %vm1502_vm1, %v3517_v0  ;;  %v19428_v10 = vadd.f32 %v19427_v38, %v19426_v9 }
 0x4c5   : > { %v19429_v34 = vpop.f32.mrf.mxu0  ;;  %19524 = vmatpush3.bf16.msra.mxu1 %v28508_v60 }
 0x4c6   : > { %19525 = vmatprep.subr.bf16.mxu1 %v28509_v59 }
 0x4c7   : > { %v19430_v23 = vpop.f32.mrf.mxu0 }
 0x4c8   : > { %v19431_v51 = vadd.f32 %v19430_v23, %v19429_v34 }
 0x4c9   : > { %v19432_v1 = vpop.f32.mrf.mxu0  ;;  %19526 = vmatpush3.bf16.msra.mxu1 %v28510_v53 }
 0x4ca   : > { %v3518_v62 = vpack.c.bf16 %v19431_v51, %v19428_v10  ;;  %19527 = vmatprep.subr.bf16.mxu1 %v28511_v6 }
 0x4cb   : > { %v19433_v50 = vpop.f32.mrf.mxu0 }
 0x4cc   : > { %20987 = vmatprep.mubr.msk.bf16.mxu1 %vm1502_vm1, %v3518_v62  ;;  %v19434_v61 = vadd.f32 %v19433_v50, %v19432_v1 }
 0x4cd   : > { %v19435_v42 = vpop.f32.mrf.mxu0  ;;  %19528 = vmatpush3.bf16.msra.mxu1 %v28512_v24 }
 0x4ce   : > { %19529 = vmatprep.subr.bf16.mxu1 %v28513_v19 }
 0x4cf   : > { %v19436_v33 = vpop.f32.mrf.mxu0 }
 0x4d0   : > { %v19437_v30 = vadd.f32 %v19436_v33, %v19435_v42 }
 0x4d1   : > { %v19438_v11 = vpop.f32.mrf.mxu0  ;;  %19530 = vmatpush3.bf16.msra.mxu1 %v28514_v54 }
 0x4d2   : > { %v3519_v40 = vpack.c.bf16 %v19437_v30, %v19434_v61 }
 0x4d3   : > { %v19439_v5 = vpop.f32.mrf.mxu0 }
 0x4d4   : > { %20988 = vmatmul.mubr.msk.bf16.gmra.mxu1 %vm1502_vm1, %v3519_v40  ;;  %v19440_v38 = vadd.f32 %v19439_v5, %v19438_v11 }
 0x4d5   : > { %v19441_v9 = vpop.f32.mrf.mxu0 }
 0x4d7   : > { %v19442_v0 = vpop.f32.mrf.mxu0 }
 0x4d8   : > { %v19443_v34 = vadd.f32 %v19442_v0, %v19441_v9 }
 0x4d9   : > { %v19444_v23 = vpop.f32.mrf.mxu0 }
 0x4da   : > { %v3520_v10 = vpack.c.bf16 %v19443_v34, %v19440_v38 }
 0x4db   : > { %v19445_v51 = vpop.f32.mrf.mxu0 }
 0x4dc   : > { %20991 = vmatprep.mubr.msk.bf16.mxu1 %vm1502_vm1, %v3520_v10  ;;  %v19446_v1 = vadd.f32 %v19445_v51, %v19444_v23 }
 0x4dd   : > { %v19447_v62 = vpop.f32.mrf.mxu0 }
 0x4df   : > { %v19448_v26 = vpop.f32.mrf.mxu0 }
 0x4e0   : > { %v19449_v50 = vadd.f32 %v19448_v26, %v19447_v62 }
 0x4e1   : > { %v19450_v42 = vpop.f32.mrf.mxu0 }
 0x4e2   : > { %v3521_v33 = vpack.c.bf16 %v19449_v50, %v19446_v1 }
 0x4e3   : > { %v19451_v39 = vpop.f32.mrf.mxu0 }
 0x4e4   : > { %20992 = vmatmul.mubr.msk.bf16.gmra.mxu1 %vm1502_vm1, %v3521_v33  ;;  %v19452_v40 = vadd.f32 %v19451_v39, %v19450_v42 }
 0x4e5   : > { %v19453_v61 = vpop.f32.mrf.mxu0 }
 0x4e7   : > { %v19454_v30 = vpop.f32.mrf.mxu0 }
 0x4e8   : > { %v19455_v48 = vadd.f32 %v19454_v30, %v19453_v61 }
 0x4e9   : > { %v19456_v11 = vpop.f32.mrf.mxu0 }
 0x4ea   : > { %v3522_v5 = vpack.c.bf16 %v19455_v48, %v19452_v40 }
 0x4eb   : > { %v19457_v9 = vpop.f32.mrf.mxu0 }
 0x4ec   : > { %20995 = vmatprep.mubr.msk.bf16.mxu1 %vm1502_vm1, %v3522_v5  ;;  %v19458_v34 = vadd.f32 %v19457_v9, %v19456_v11 }
 0x4ed   : > { %v19459_v0 = vpop.f32.mrf.mxu0 }
 0x4ef   : > { %v19460_v38 = vpop.f32.mrf.mxu0 }
 0x4f0   : > { %v19461_v10 = vadd.f32 %v19460_v38, %v19459_v0 }
 0x4f1   : > { %v19462_v23 = vpop.f32.mrf.mxu0 }
 0x4f2   : > { %v3523_v26 = vpack.c.bf16 %v19461_v10, %v19458_v34 }
 0x4f3   : > { %v19463_v51 = vpop.f32.mrf.mxu0 }
 0x4f4   : > { %20996 = vmatmul.mubr.msk.bf16.gmra.mxu1 %vm1502_vm1, %v3523_v26  ;;  %v19464_v50 = vadd.f32 %v19463_v51, %v19462_v23 }
 0x4f5   : > { %v19465_v62 = vpop.f32.mrf.mxu0 }
 0x4f7   : > { %v19466_v1 = vpop.f32.mrf.mxu0 }
 0x4f8   : > { %v19467_v33 = vadd.f32 %v19466_v1, %v19465_v62 }
 0x4f9   : > { %v19468_v39 = vpop.f32.mrf.mxu0 }
 0x4fa   : > { %v3524_v42 = vpack.c.bf16 %v19467_v33, %v19464_v50 }
 0x4fb   : > { %v19469_v61 = vpop.f32.mrf.mxu0 }
 0x4fc   : > { %20999 = vmatprep.mubr.msk.bf16.mxu1 %vm1502_vm1, %v3524_v42  ;;  %v19470_v40 = vadd.f32 %v19469_v61, %v19468_v39 }
 0x4fd   : > { %v19471_v48 = vpop.f32.mrf.mxu0 }
 0x4ff   : > { %v19472_v30 = vpop.f32.mrf.mxu0 }
 0x500   : > { %v19473_v5 = vadd.f32 %v19472_v30, %v19471_v48 }
 0x501   : > { %v19474_v11 = vpop.f32.mrf.mxu0 }
 0x502   : > { %v3525_v9 = vpack.c.bf16 %v19473_v5, %v19470_v40 }
 0x503   : > { %v19475_v0 = vpop.f32.mrf.mxu0 }
 0x504   : > { %21000 = vmatmul.mubr.msk.bf16.gmra.mxu1 %vm1502_vm1, %v3525_v9  ;;  %v19476_v10 = vadd.f32 %v19475_v0, %v19474_v11 }
 0x505   : > { %v19477_v38 = vpop.f32.mrf.mxu0 }
 0x507   : > { %v19478_v34 = vpop.f32.mrf.mxu0 }
 0x508   : > { %v19479_v26 = vadd.f32 %v19478_v34, %v19477_v38 }
 0x509   : > { %v19480_v23 = vpop.f32.mrf.mxu0 }
 0x50a   : > { %v3526_v51 = vpack.c.bf16 %v19479_v26, %v19476_v10 }
 0x50b   : > { %v19481_v62 = vpop.f32.mrf.mxu0 }
 0x50c   : > { %21003 = vmatprep.mubr.msk.bf16.mxu1 %vm1502_vm1, %v3526_v51  ;;  %v19482_v33 = vadd.f32 %v19481_v62, %v19480_v23  ;;  %v22380_v23 = vld [vmem:[%s28450_s5 + $0x504] ss:$8 sps:$4 sm:$0xff]  }
 0x50d   : > { %v19483_v1 = vpop.f32.mrf.mxu0 }
 0x50f   : > { %v19484_v50 = vpop.f32.mrf.mxu0 }
 0x510   : > { %v19485_v42 = vadd.f32 %v19484_v50, %v19483_v1  ;;  %v22378_v1 = vld [vmem:[%s28450_s5 + $0x500] ss:$8 sps:$4 sm:$0xff]   ;;  %v22383_v50 = vld [vmem:[%s28450_s5 + $0x514] ss:$8 sps:$4 sm:$0xff]  }
 0x511   : > { %v19486_v39 = vpop.f32.mrf.mxu0 }
 0x512   : > { %v3527_v61 = vpack.c.bf16 %v19485_v42, %v19482_v33  ;;  %v22381_v33 = vld [vmem:[%s28450_s5 + $0x510] ss:$8 sps:$4 sm:$0xff]   ;;  %v22386_v42 = vld [vmem:[%s28450_s5 + $0x524] ss:$8 sps:$4 sm:$0xff]  }
 0x513   : > { %v19487_v48 = vpop.f32.mrf.mxu0 }
 0x514   : > { %21004 = vmatmul.mubr.msk.bf16.gmra.mxu1 %vm1502_vm1, %v3527_v61  ;;  %v19488_v5 = vadd.f32 %v19487_v48, %v19486_v39  ;;  %v22384_v39 = vld [vmem:[%s28450_s5 + $0x520] ss:$8 sps:$4 sm:$0xff]   ;;  %v22389_v61 = vld [vmem:[%s28450_s5 + $0x534] ss:$8 sps:$4 sm:$0xff]   ;;  %v22387_v48 = vld [vmem:[%s28450_s5 + $0x530] ss:$8 sps:$4 sm:$0xff]  }
 0x515   : > { %v19489_v30 = vpop.f32.mrf.mxu0 }
 0x517   : > { %v19490_v40 = vpop.f32.mrf.mxu0 }
 0x518   : > { %v19491_v9 = vadd.f32 %v19490_v40, %v19489_v30  ;;  %v22392_v30 = vld [vmem:[%s28450_s5 + $0x544] ss:$8 sps:$4 sm:$0xff]   ;;  %v22390_v40 = vld [vmem:[%s28450_s5 + $0x540] ss:$8 sps:$4 sm:$0xff]  }
 0x519   : > { %v19492_v11 = vpop.f32.mrf.mxu0 }
 0x51a   : > { %v3528_v0 = vpack.c.bf16 %v19491_v9, %v19488_v5  ;;  %v22395_v5 = vld [vmem:[%s28450_s5 + $0x554] ss:$8 sps:$4 sm:$0xff]   ;;  %v22393_v9 = vld [vmem:[%s28450_s5 + $0x550] ss:$8 sps:$4 sm:$0xff]  }
 0x51b   : > { %v19493_v38 = vpop.f32.mrf.mxu0 }
 0x51c   : > { %21007 = vmatprep.mubr.msk.bf16.mxu1 %vm1502_vm1, %v3528_v0  ;;  %v19494_v26 = vadd.f32 %v19493_v38, %v19492_v11  ;;  %v22398_v11 = vld [vmem:[%s28450_s5 + $0x564] ss:$8 sps:$4 sm:$0xff]   ;;  %v22396_v0 = vld [vmem:[%s28450_s5 + $0x560] ss:$8 sps:$4 sm:$0xff]   ;;  %v22401_v38 = vld [vmem:[%s28450_s5 + $0x574] ss:$8 sps:$4 sm:$0xff]  }
 0x51d   : > { %v19495_v34 = vpop.f32.mrf.mxu0 }
 0x51f   : > { %v19496_v10 = vpop.f32.mrf.mxu0 }
 0x520   : > { %v19497_v51 = vadd.f32 %v19496_v10, %v19495_v34  ;;  %v17097_v34 = vld [vmem:[%s28466_s11 + $0x14] sm:$0xf] }
 0x521   : > { %22123 = vmatprep.subr.msk.bf16.mxu0 %vm1551_vm0, %v17097_v34  ;;  %v4197_v10 = vsel %vm1551_vm0, %v17097_v34, 0 }
 0x522   : > { %v3529_v62 = vpack.c.bf16 %v19497_v51, %v19494_v26  ;;  %21012 = vmatpush3.bf16.msra.mxu0 %v4197_v10  ;;  %v22399_v26 = vld [vmem:[%s28450_s5 + $0x570] ss:$8 sps:$4 sm:$0xff]   ;;  %v22404_v51 = vld [vmem:[%s28450_s5 + $0x584] ss:$8 sps:$4 sm:$0xff]   ;;  %v22414_v10 = vld [vmem:[%s28450_s5 + $0x5c0] ss:$8 sps:$4 sm:$0xff]  }
 0x523   : > { %19644 = vmatprep.subr.bf16.mxu0 %v23392_v4 }
 0x524   : > { %21008 = vmatmul.mubr.msk.bf16.gmra.mxu1 %vm1502_vm1, %v3529_v62  ;;  %v22407_v62 = vld [vmem:[%s28450_s5 + $0x594] ss:$8 sps:$4 sm:$0xff]  }
 0x525   : > { %4001 = vmatprep.mubr.bf16.mxu1 %v22380_v23  ;;  %v22402_v23 = vld [vmem:[%s28450_s5 + $0x580] ss:$8 sps:$4 sm:$0xff]  }
 0x52c   : > { %4002 = vmatmul.mubr.bf16.vlgmr.msra.gmra.mxu1 %v22378_v1  ;;  %v22405_v1 = vld [vmem:[%s28450_s5 + $0x590] ss:$8 sps:$4 sm:$0xff]  }
 0x52d   : > { %4009 = vmatprep.mubr.bf16.mxu1 %v22383_v50  ;;  %v22410_v50 = vld [vmem:[%s28450_s5 + $0x5a4] ss:$8 sps:$4 sm:$0xff]  }
 0x534   : > { %4010 = vmatmul.mubr.bf16.gmra.mxu1 %v22381_v33 }
 0x535   : > { %4017 = vmatprep.mubr.bf16.mxu1 %v22386_v42 }
 0x53c   : > { %4018 = vmatmul.mubr.bf16.gmra.mxu1 %v22384_v39 }
 0x53d   : > { %4025 = vmatprep.mubr.bf16.mxu1 %v22389_v61 }
 0x544   : > { %4026 = vmatmul.mubr.bf16.gmra.mxu1 %v22387_v48 }
 0x545   : > { %4033 = vmatprep.mubr.bf16.mxu1 %v22392_v30  ;;  %v22408_v30 = vld [vmem:[%s28450_s5 + $0x5a0] ss:$8 sps:$4 sm:$0xff]  }
 0x54c   : > { %4034 = vmatmul.mubr.bf16.gmra.mxu1 %v22390_v40 }
 0x54d   : > { %4041 = vmatprep.mubr.bf16.mxu1 %v22395_v5  ;;  %v22413_v5 = vld [vmem:[%s28450_s5 + $0x5b4] ss:$8 sps:$4 sm:$0xff]  }
 0x554   : > { %4042 = vmatmul.mubr.bf16.gmra.mxu1 %v22393_v9 }
 0x555   : > { %4049 = vmatprep.mubr.bf16.mxu1 %v22398_v11 }
 0x55c   : > { %4050 = vmatmul.mubr.bf16.gmra.mxu1 %v22396_v0 }
 0x55d   : > { %4057 = vmatprep.mubr.bf16.mxu1 %v22401_v38 }
 0x564   : > { %4058 = vmatmul.mubr.bf16.gmra.mxu1 %v22399_v26 }
 0x565   : > { %4065 = vmatprep.mubr.bf16.mxu1 %v22404_v51  ;;  %v22419_v51 = vld [vmem:[%s28450_s5 + $0x5d4] ss:$8 sps:$4 sm:$0xff]  }
 0x56c   : > { %4066 = vmatmul.mubr.bf16.gmra.mxu1 %v22402_v23 }
 0x56d   : > { %4073 = vmatprep.mubr.bf16.mxu1 %v22407_v62 }
 0x574   : > { %v20981_v33 = vpop.f32.mrf.mxu1  ;;  %4074 = vmatmul.mubr.bf16.gmra.mxu1 %v22405_v1 }
 0x575   : > { %v24696_v42 = vadd.f32 %v20981_v33, %v24475_v25  ;;  %4081 = vmatprep.mubr.bf16.mxu1 %v22410_v50  ;;  %v22411_v25 = vld [vmem:[%s28450_s5 + $0x5b0] ss:$8 sps:$4 sm:$0xff]  }
 0x576   : > { %v3617_v39 = vpop.f32.mrf.mxu1 }
 0x577   : > { %v24699_v61 = vadd.f32 %v3617_v39, %v24478_v20  ;;  %v22416_v20 = vld [vmem:[%s28450_s5 + $0x5c4] ss:$8 sps:$4 sm:$0xff]   ;;  %v22420_v39 = vld [vmem:[%s28450_s5 + $0x5e0] ss:$8 sps:$4 sm:$0xff]  }
 0x578   : > { %v20982_v48 = vpop.f32.mrf.mxu1 }
 0x579   : > { %v24705_v40 = vadd.f32 %v20982_v48, %v24484_v58 }
 0x57a   : > { %v24716_v9 = vpop.f32.mrf.mxu1 }
 0x57b   : > { %28522 = vst [vmem:[#allocation9_spill] sm:$0xff] %v24716_v9 }
 0x57c   : > { %4082 = vmatmul.mubr.bf16.gmra.mxu1 %v22408_v30  ;;  %v22425_v30 = vld [vmem:[%s28450_s5 + $0x5f4] ss:$8 sps:$4 sm:$0xff]  }
 0x57d   : > { %4089 = vmatprep.mubr.bf16.mxu1 %v22413_v5 }
 0x584   : > { %v20985_v11 = vpop.f32.mrf.mxu1  ;;  %4090 = vmatmul.mubr.bf16.gmra.mxu1 %v22411_v25 }
 0x585   : > { %v24719_v58 = vadd.f32 %v20985_v11, %v24498_v47  ;;  %4097 = vmatprep.mubr.bf16.mxu1 %v22416_v20  ;;  %v22417_v47 = vld [vmem:[%s28450_s5 + $0x5d0] ss:$8 sps:$4 sm:$0xff]  }
 0x586   : > { %v3633_v0 = vpop.f32.mrf.mxu1 }
 0x587   : > { %v24722_v38 = vadd.f32 %v3633_v0, %v24501_v14  ;;  %v22422_v14 = vld [vmem:[%s28450_s5 + $0x5e4] ss:$8 sps:$4 sm:$0xff]  }
 0x588   : > { %v20986_v34 = vpop.f32.mrf.mxu1 }
 0x589   : > { %v24728_v26 = vadd.f32 %v20986_v34, %v24507_v15 }
 0x58a   : > { %v24739_v23 = vpop.f32.mrf.mxu1 }
 0x58b   : > { %28523 = vst [vmem:[#allocation10_spill] sm:$0xff] %v24739_v23 }
 0x58c   : > { %4098 = vmatmul.mubr.bf16.gmra.mxu1 %v22414_v10 }
 0x58d   : > { %4105 = vmatprep.mubr.bf16.mxu1 %v22419_v51 }
 0x594   : > { %v20989_v62 = vpop.f32.mrf.mxu1  ;;  %4106 = vmatmul.mubr.bf16.gmra.mxu1 %v22417_v47 }
 0x595   : > { %v24742_v15 = vadd.f32 %v20989_v62, %v24521_v28  ;;  %4113 = vmatprep.mubr.bf16.mxu1 %v22422_v14  ;;  %v22423_v28 = vld [vmem:[%s28450_s5 + $0x5f0] ss:$8 sps:$4 sm:$0xff]  }
 0x596   : > { %v3649_v1 = vpop.f32.mrf.mxu1 }
 0x597   : > { %v24745_v50 = vadd.f32 %v3649_v1, %v24524_v63 }
 0x598   : > { %v20990_v33 = vpop.f32.mrf.mxu1 }
 0x599   : > { %v24751_v48 = vadd.f32 %v20990_v33, %v24530_v21 }
 0x59a   : > { %v24759_v63 = vpop.f32.mrf.mxu1 }
 0x59b   : > { %28524 = vst [vmem:[#allocation11_spill] sm:$0xff] %v24759_v63 }
 0x59c   : > { %4114 = vmatmul.mubr.bf16.gmra.mxu1 %v22420_v39 }
 0x59d   : > { %4121 = vmatprep.mubr.bf16.mxu1 %v22425_v30 }
 0x5a4   : > { %v20993_v5 = vpop.f32.mrf.mxu1  ;;  %4122 = vmatmul.mubr.bf16.gmra.mxu1 %v22423_v28 }
 0x5a5   : > { %v24762_v25 = vadd.f32 %v20993_v5, %v24541_v55 }
 0x5a6   : > { %v3665_v20 = vpop.f32.mrf.mxu1 }
 0x5a7   : > { %v24765_v21 = vadd.f32 %v3665_v20, %v24544_v2 }
 0x5a8   : > { %v20994_v11 = vpop.f32.mrf.mxu1 }
 0x5a9   : > { %v24768_v0 = vadd.f32 %v20994_v11, %v24547_v18 }
 0x5aa   : > { %v24770_v34 = vpop.f32.mrf.mxu1 }
 0x5ab   : > { %28525 = vst [vmem:[#allocation12_spill] sm:$0xff] %v24770_v34 }
 0x5b4   : > { %v20997_v10 = vpop.f32.mrf.mxu1 }
 0x5b5   : > { %v24773_v51 = vadd.f32 %v20997_v10, %v24552_v45 }
 0x5b6   : > { %v3681_v47 = vpop.f32.mrf.mxu1 }
 0x5b7   : > { %v24776_v14 = vadd.f32 %v3681_v47, %v24555_v12 }
 0x5b8   : > { %v20998_v55 = vpop.f32.mrf.mxu1 }
 0x5b9   : > { %v24779_v62 = vadd.f32 %v20998_v55, %v24558_v56 }
 0x5ba   : > { %v24781_v2 = vpop.f32.mrf.mxu1 }
 0x5bb   : > { %28526 = vst [vmem:[#allocation13_spill] sm:$0xff] %v24781_v2 }
 0x5c4   : > { %v21001_v1 = vpop.f32.mrf.mxu1 }
 0x5c5   : > { %v24784_v18 = vadd.f32 %v21001_v1, %v24563_v49 }
 0x5c6   : > { %v3697_v33 = vpop.f32.mrf.mxu1 }
 0x5c7   : > { %v24787_v39 = vadd.f32 %v3697_v33, %v24566_v16 }
 0x5c8   : > { %v21002_v45 = vpop.f32.mrf.mxu1 }
 0x5c9   : > { %v24790_v30 = vadd.f32 %v21002_v45, %v24569_v35 }
 0x5ca   : > { %v24792_v12 = vpop.f32.mrf.mxu1 }
 0x5cb   : > { %28527 = vst [vmem:[#allocation14_spill] sm:$0xff] %v24792_v12 }
 0x5d4   : > { %v21005_v28 = vpop.f32.mrf.mxu1 }
 0x5d5   : > { %v24795_v56 = vadd.f32 %v21005_v28, %v24574_v17 }
 0x5d6   : > { %v3713_v5 = vpop.f32.mrf.mxu1 }
 0x5d7   : > { %v24798_v20 = vadd.f32 %v3713_v5, %v24577_v29 }
 0x5d8   : > { %v21006_v49 = vpop.f32.mrf.mxu1 }
 0x5d9   : > { %v24801_v11 = vadd.f32 %v21006_v49, %v24580_v43 }
 0x5da   : > { %v24803_v16 = vpop.f32.mrf.mxu1 }
 0x5db   : > { %28528 = vst [vmem:[#allocation15_spill] sm:$0xff] %v24803_v16 }
 0x5e4   : > { %v21009_v10 = vpop.f32.mrf.mxu1 }
 0x5e5   : > { %v24806_v35 = vadd.f32 %v21009_v10, %v24585_v37 }
 0x5e6   : > { %v3729_v47 = vpop.f32.mrf.mxu1 }
 0x5e7   : > { %v24809_v55 = vadd.f32 %v3729_v47, %v24588_v27 }
 0x5e8   : > { %v21010_v17 = vpop.f32.mrf.mxu1 }
 0x5e9   : > { %v24812_v1 = vadd.f32 %v21010_v17, %v24591_v46 }
 0x5ea   : > { %v24814_v29 = vpop.f32.mrf.mxu1 }
 0x5eb   : > { %28529 = vst [vmem:[#allocation37_spill] sm:$0xff] %v24814_v29 }
 0x5ec   : > { %v19531_v33 = vpop.f32.mrf.mxu1 }
 0x5ee   : > { %v19532_v45 = vpop.f32.mrf.mxu1 }
 0x5ef   : > { %v19533_v5 = vadd.f32 %v19532_v45, %v19531_v33 }
 0x5f0   : > { %v19534_v43 = vpop.f32.mrf.mxu1 }
 0x5f2   : > { %v19535_v28 = vpop.f32.mrf.mxu1 }
 0x5f3   : > { %v19536_v49 = vadd.f32 %v19535_v28, %v19534_v43 }
 0x5f4   : > { %v19537_v9 = vpop.f32.mrf.mxu1 }
 0x5f5   : > { %v4130_v2 = vpack.c.bf16 %v19536_v49, %v19533_v5 }
 0x5f6   : > { %v19538_v37 = vpop.f32.mrf.mxu1 }
 0x5f7   : > { %21013 = vmatprep.mubr.msk.bf16.mxu0 %vm1502_vm1, %v4130_v2  ;;  %v19539_v47 = vadd.f32 %v19538_v37, %v19537_v9 }
 0x5f8   : > { %v19540_v10 = vpop.f32.mrf.mxu1 }
 0x5fa   : > { %v19541_v27 = vpop.f32.mrf.mxu1 }
 0x5fb   : > { %v19542_v23 = vadd.f32 %v19541_v27, %v19540_v10 }
 0x5fc   : > { %v19543_v12 = vpop.f32.mrf.mxu1 }
 0x5fd   : > { %v4131_v46 = vpack.c.bf16 %v19542_v23, %v19539_v47 }
 0x5fe   : > { %v19544_v17 = vpop.f32.mrf.mxu1 }
 0x5ff   : > { %21014 = vmatmul.mubr.msk.bf16.vlgmr.msra.gmra.mxu0 %vm1502_vm1, %v4131_v46  ;;  %v19545_v45 = vadd.f32 %v19544_v17, %v19543_v12 }
 0x600   : > { %v19546_v63 = vpop.f32.mrf.mxu1  ;;  %19645 = vmatpush3.bf16.msra.mxu0 %v23397_v8 }
 0x601   : > { %19646 = vmatprep.subr.bf16.mxu0 %v28501_v41 }
 0x602   : > { %v19547_v33 = vpop.f32.mrf.mxu1 }
 0x603   : > { %v19548_v43 = vadd.f32 %v19547_v33, %v19546_v63 }
 0x604   : > { %v19549_v28 = vpop.f32.mrf.mxu1  ;;  %19647 = vmatpush3.bf16.msra.mxu0 %v28502_v52 }
 0x605   : > { %v4132_v2 = vpack.c.bf16 %v19548_v43, %v19545_v45  ;;  %19648 = vmatprep.subr.bf16.mxu0 %v28503_v7 }
 0x606   : > { %v19550_v9 = vpop.f32.mrf.mxu1 }
 0x607   : > { %21017 = vmatprep.mubr.msk.bf16.mxu0 %vm1502_vm1, %v4132_v2  ;;  %v19551_v49 = vadd.f32 %v19550_v9, %v19549_v28 }
 0x608   : > { %v19552_v23 = vpop.f32.mrf.mxu1  ;;  %19649 = vmatpush3.bf16.msra.mxu0 %v28504_v36 }
 0x609   : > { %19650 = vmatprep.subr.bf16.mxu0 %v28505_v44 }
 0x60a   : > { %v19553_v5 = vpop.f32.mrf.mxu1 }
 0x60b   : > { %v19554_v37 = vadd.f32 %v19553_v5, %v19552_v23 }
 0x60c   : > { %v19555_v10 = vpop.f32.mrf.mxu1  ;;  %19651 = vmatpush3.bf16.msra.mxu0 %v28506_v22 }
 0x60d   : > { %v4133_v63 = vpack.c.bf16 %v19554_v37, %v19551_v49  ;;  %19652 = vmatprep.subr.bf16.mxu0 %v28507_v3 }
 0x60e   : > { %v19556_v12 = vpop.f32.mrf.mxu1 }
 0x60f   : > { %21018 = vmatmul.mubr.msk.bf16.gmra.mxu0 %vm1502_vm1, %v4133_v63  ;;  %v19557_v46 = vadd.f32 %v19556_v12, %v19555_v10 }
 0x610   : > { %v19558_v27 = vpop.f32.mrf.mxu1  ;;  %19653 = vmatpush3.bf16.msra.mxu0 %v28508_v60 }
 0x611   : > { %19654 = vmatprep.subr.bf16.mxu0 %v28509_v59 }
 0x612   : > { %v19559_v47 = vpop.f32.mrf.mxu1 }
 0x613   : > { %v19560_v17 = vadd.f32 %v19559_v47, %v19558_v27 }
 0x614   : > { %v19561_v33 = vpop.f32.mrf.mxu1  ;;  %19655 = vmatpush3.bf16.msra.mxu0 %v28510_v53 }
 0x615   : > { %v4134_v45 = vpack.c.bf16 %v19560_v17, %v19557_v46  ;;  %19656 = vmatprep.subr.bf16.mxu0 %v28511_v6 }
 0x616   : > { %v19562_v43 = vpop.f32.mrf.mxu1 }
 0x617   : > { %21021 = vmatprep.mubr.msk.bf16.mxu0 %vm1502_vm1, %v4134_v45  ;;  %v19563_v9 = vadd.f32 %v19562_v43, %v19561_v33 }
 0x618   : > { %v19564_v28 = vpop.f32.mrf.mxu1  ;;  %19657 = vmatpush3.bf16.msra.mxu0 %v28512_v24 }
 0x619   : > { %19658 = vmatprep.subr.bf16.mxu0 %v28513_v19 }
 0x61a   : > { %v19565_v2 = vpop.f32.mrf.mxu1 }
 0x61b   : > { %v19566_v23 = vadd.f32 %v19565_v2, %v19564_v28 }
 0x61c   : > { %v19567_v5 = vpop.f32.mrf.mxu1  ;;  %19659 = vmatpush3.bf16.msra.mxu0 %v28514_v54 }
 0x61d   : > { %v4135_v49 = vpack.c.bf16 %v19566_v23, %v19563_v9 }
 0x61e   : > { %v19568_v37 = vpop.f32.mrf.mxu1 }
 0x61f   : > { %21022 = vmatmul.mubr.msk.bf16.gmra.mxu0 %vm1502_vm1, %v4135_v49  ;;  %v19569_v12 = vadd.f32 %v19568_v37, %v19567_v5 }
 0x620   : > { %v19570_v10 = vpop.f32.mrf.mxu1 }
 0x622   : > { %v19571_v63 = vpop.f32.mrf.mxu1 }
 0x623   : > { %v19572_v27 = vadd.f32 %v19571_v63, %v19570_v10 }
 0x624   : > { %v19573_v47 = vpop.f32.mrf.mxu1 }
 0x625   : > { %v4136_v46 = vpack.c.bf16 %v19572_v27, %v19569_v12 }
 0x626   : > { %v19574_v17 = vpop.f32.mrf.mxu1 }
 0x627   : > { %21025 = vmatprep.mubr.msk.bf16.mxu0 %vm1502_vm1, %v4136_v46  ;;  %v19575_v33 = vadd.f32 %v19574_v17, %v19573_v47 }
 0x628   : > { %v19576_v45 = vpop.f32.mrf.mxu1 }
 0x62a   : > { %v19577_v16 = vpop.f32.mrf.mxu1 }
 0x62b   : > { %v19578_v43 = vadd.f32 %v19577_v16, %v19576_v45 }
 0x62c   : > { %v19579_v28 = vpop.f32.mrf.mxu1 }
 0x62d   : > { %v4137_v2 = vpack.c.bf16 %v19578_v43, %v19575_v33 }
 0x62e   : > { %v19580_v29 = vpop.f32.mrf.mxu1 }
 0x62f   : > { %21026 = vmatmul.mubr.msk.bf16.gmra.mxu0 %vm1502_vm1, %v4137_v2  ;;  %v19581_v49 = vadd.f32 %v19580_v29, %v19579_v28 }
 0x630   : > { %v19582_v9 = vpop.f32.mrf.mxu1 }
 0x632   : > { %v19583_v23 = vpop.f32.mrf.mxu1 }
 0x633   : > { %v19584_v34 = vadd.f32 %v19583_v23, %v19582_v9 }
 0x634   : > { %v19585_v5 = vpop.f32.mrf.mxu1 }
 0x635   : > { %v4138_v37 = vpack.c.bf16 %v19584_v34, %v19581_v49 }
 0x636   : > { %v19586_v10 = vpop.f32.mrf.mxu1 }
 0x637   : > { %21029 = vmatprep.mubr.msk.bf16.mxu0 %vm1502_vm1, %v4138_v37  ;;  %v19587_v27 = vadd.f32 %v19586_v10, %v19585_v5 }
 0x638   : > { %v19588_v63 = vpop.f32.mrf.mxu1 }
 0x63a   : > { %v19589_v12 = vpop.f32.mrf.mxu1 }
 0x63b   : > { %v19590_v46 = vadd.f32 %v19589_v12, %v19588_v63 }
 0x63c   : > { %v19591_v47 = vpop.f32.mrf.mxu1 }
 0x63d   : > { %v4139_v16 = vpack.c.bf16 %v19590_v46, %v19587_v27 }
 0x63e   : > { %v19592_v17 = vpop.f32.mrf.mxu1 }
 0x63f   : > { %21030 = vmatmul.mubr.msk.bf16.gmra.mxu0 %vm1502_vm1, %v4139_v16  ;;  %v19593_v43 = vadd.f32 %v19592_v17, %v19591_v47 }
 0x640   : > { %v19594_v45 = vpop.f32.mrf.mxu1 }
 0x642   : > { %v19595_v33 = vpop.f32.mrf.mxu1 }
 0x643   : > { %v19596_v2 = vadd.f32 %v19595_v33, %v19594_v45 }
 0x644   : > { %v19597_v29 = vpop.f32.mrf.mxu1 }
 0x645   : > { %v4140_v28 = vpack.c.bf16 %v19596_v2, %v19593_v43 }
 0x646   : > { %v19598_v9 = vpop.f32.mrf.mxu1 }
 0x647   : > { %21033 = vmatprep.mubr.msk.bf16.mxu0 %vm1502_vm1, %v4140_v28  ;;  %v19599_v49 = vadd.f32 %v19598_v9, %v19597_v29 }
 0x648   : > { %v19600_v34 = vpop.f32.mrf.mxu1 }
 0x64a   : > { %v19601_v23 = vpop.f32.mrf.mxu1 }
 0x64b   : > { %v19602_v37 = vadd.f32 %v19601_v23, %v19600_v34 }
 0x64c   : > { %v19603_v5 = vpop.f32.mrf.mxu1 }
 0x64d   : > { %v4141_v10 = vpack.c.bf16 %v19602_v37, %v19599_v49 }
 0x64e   : > { %v19604_v63 = vpop.f32.mrf.mxu1 }
 0x64f   : > { %21034 = vmatmul.mubr.msk.bf16.gmra.mxu0 %vm1502_vm1, %v4141_v10  ;;  %v19605_v46 = vadd.f32 %v19604_v63, %v19603_v5 }
 0x650   : > { %v19606_v12 = vpop.f32.mrf.mxu1 }
 0x652   : > { %v19607_v27 = vpop.f32.mrf.mxu1 }
 0x653   : > { %v19608_v16 = vadd.f32 %v19607_v27, %v19606_v12 }
 0x654   : > { %v19609_v47 = vpop.f32.mrf.mxu1 }
 0x655   : > { %v4142_v17 = vpack.c.bf16 %v19608_v16, %v19605_v46 }
 0x656   : > { %v19610_v45 = vpop.f32.mrf.mxu1 }
 0x657   : > { %21037 = vmatprep.mubr.msk.bf16.mxu0 %vm1502_vm1, %v4142_v17  ;;  %v19611_v2 = vadd.f32 %v19610_v45, %v19609_v47  ;;  %v22428_v47 = vld [vmem:[%s28450_s5 + $0x604] ss:$8 sps:$4 sm:$0xff]  }
 0x658   : > { %v19612_v33 = vpop.f32.mrf.mxu1 }
 0x65a   : > { %v19613_v43 = vpop.f32.mrf.mxu1 }
 0x65b   : > { %v19614_v28 = vadd.f32 %v19613_v43, %v19612_v33  ;;  %v22426_v33 = vld [vmem:[%s28450_s5 + $0x600] ss:$8 sps:$4 sm:$0xff]   ;;  %v22431_v43 = vld [vmem:[%s28450_s5 + $0x614] ss:$8 sps:$4 sm:$0xff]  }
 0x65c   : > { %v19615_v29 = vpop.f32.mrf.mxu1 }
 0x65d   : > { %v4143_v9 = vpack.c.bf16 %v19614_v28, %v19611_v2  ;;  %v22429_v2 = vld [vmem:[%s28450_s5 + $0x610] ss:$8 sps:$4 sm:$0xff]   ;;  %v22434_v28 = vld [vmem:[%s28450_s5 + $0x624] ss:$8 sps:$4 sm:$0xff]  }
 0x65e   : > { %v19616_v34 = vpop.f32.mrf.mxu1 }
 0x65f   : > { %21038 = vmatmul.mubr.msk.bf16.gmra.mxu0 %vm1502_vm1, %v4143_v9  ;;  %v19617_v37 = vadd.f32 %v19616_v34, %v19615_v29  ;;  %v22432_v29 = vld [vmem:[%s28450_s5 + $0x620] ss:$8 sps:$4 sm:$0xff]   ;;  %v22437_v9 = vld [vmem:[%s28450_s5 + $0x634] ss:$8 sps:$4 sm:$0xff]   ;;  %v22435_v34 = vld [vmem:[%s28450_s5 + $0x630] ss:$8 sps:$4 sm:$0xff]  }
 0x660   : > { %v19618_v23 = vpop.f32.mrf.mxu1 }
 0x662   : > { %v19619_v49 = vpop.f32.mrf.mxu1 }
 0x663   : > { %v19620_v10 = vadd.f32 %v19619_v49, %v19618_v23  ;;  %v22440_v23 = vld [vmem:[%s28450_s5 + $0x644] ss:$8 sps:$4 sm:$0xff]   ;;  %v22438_v49 = vld [vmem:[%s28450_s5 + $0x640] ss:$8 sps:$4 sm:$0xff]  }
 0x664   : > { %v19621_v5 = vpop.f32.mrf.mxu1 }
 0x665   : > { %v4144_v63 = vpack.c.bf16 %v19620_v10, %v19617_v37  ;;  %v22443_v37 = vld [vmem:[%s28450_s5 + $0x654] ss:$8 sps:$4 sm:$0xff]   ;;  %v22441_v10 = vld [vmem:[%s28450_s5 + $0x650] ss:$8 sps:$4 sm:$0xff]  }
 0x666   : > { %v19622_v12 = vpop.f32.mrf.mxu1 }
 0x667   : > { %21041 = vmatprep.mubr.msk.bf16.mxu0 %vm1502_vm1, %v4144_v63  ;;  %v19623_v16 = vadd.f32 %v19622_v12, %v19621_v5  ;;  %v22446_v5 = vld [vmem:[%s28450_s5 + $0x664] ss:$8 sps:$4 sm:$0xff]   ;;  %v22444_v63 = vld [vmem:[%s28450_s5 + $0x660] ss:$8 sps:$4 sm:$0xff]   ;;  %v22449_v12 = vld [vmem:[%s28450_s5 + $0x674] ss:$8 sps:$4 sm:$0xff]  }
 0x668   : > { %v19624_v27 = vpop.f32.mrf.mxu1 }
 0x66a   : > { %v19625_v46 = vpop.f32.mrf.mxu1 }
 0x66b   : > { %v19626_v17 = vadd.f32 %v19625_v46, %v19624_v27  ;;  %v17178_v27 = vld [vmem:[%s28466_s11 + $0x18] sm:$0xf] }
 0x66c   : > { %22124 = vmatprep.subr.msk.bf16.mxu1 %vm1551_vm0, %v17178_v27  ;;  %v4813_v46 = vsel %vm1551_vm0, %v17178_v27, 0 }
 0x66d   : > { %v4145_v45 = vpack.c.bf16 %v19626_v17, %v19623_v16  ;;  %21046 = vmatpush3.bf16.msra.mxu1 %v4813_v46  ;;  %v22447_v16 = vld [vmem:[%s28450_s5 + $0x670] ss:$8 sps:$4 sm:$0xff]   ;;  %v22452_v17 = vld [vmem:[%s28450_s5 + $0x684] ss:$8 sps:$4 sm:$0xff]   ;;  %v22462_v46 = vld [vmem:[%s28450_s5 + $0x6c0] ss:$8 sps:$4 sm:$0xff]  }
 0x66e   : > { %19773 = vmatprep.subr.bf16.mxu1 %v23392_v4 }
 0x66f   : > { %21042 = vmatmul.mubr.msk.bf16.gmra.mxu0 %vm1502_vm1, %v4145_v45  ;;  %v22455_v45 = vld [vmem:[%s28450_s5 + $0x694] ss:$8 sps:$4 sm:$0xff]  }
 0x670   : > { %4617 = vmatprep.mubr.bf16.mxu0 %v22428_v47  ;;  %v22450_v47 = vld [vmem:[%s28450_s5 + $0x680] ss:$8 sps:$4 sm:$0xff]  }
 0x677   : > { %4618 = vmatmul.mubr.bf16.vlgmr.msra.gmra.mxu0 %v22426_v33  ;;  %v22453_v33 = vld [vmem:[%s28450_s5 + $0x690] ss:$8 sps:$4 sm:$0xff]  }
 0x678   : > { %4625 = vmatprep.mubr.bf16.mxu0 %v22431_v43  ;;  %v22458_v43 = vld [vmem:[%s28450_s5 + $0x6a4] ss:$8 sps:$4 sm:$0xff]  }
 0x67f   : > { %4626 = vmatmul.mubr.bf16.gmra.mxu0 %v22429_v2 }
 0x680   : > { %4633 = vmatprep.mubr.bf16.mxu0 %v22434_v28 }
 0x687   : > { %4634 = vmatmul.mubr.bf16.gmra.mxu0 %v22432_v29 }
 0x688   : > { %4641 = vmatprep.mubr.bf16.mxu0 %v22437_v9 }
 0x68f   : > { %4642 = vmatmul.mubr.bf16.gmra.mxu0 %v22435_v34 }
 0x690   : > { %4649 = vmatprep.mubr.bf16.mxu0 %v22440_v23  ;;  %v22456_v23 = vld [vmem:[%s28450_s5 + $0x6a0] ss:$8 sps:$4 sm:$0xff]  }
 0x697   : > { %4650 = vmatmul.mubr.bf16.gmra.mxu0 %v22438_v49 }
 0x698   : > { %4657 = vmatprep.mubr.bf16.mxu0 %v22443_v37  ;;  %v22461_v37 = vld [vmem:[%s28450_s5 + $0x6b4] ss:$8 sps:$4 sm:$0xff]  }
 0x69f   : > { %4658 = vmatmul.mubr.bf16.gmra.mxu0 %v22441_v10 }
 0x6a0   : > { %4665 = vmatprep.mubr.bf16.mxu0 %v22446_v5 }
 0x6a7   : > { %4666 = vmatmul.mubr.bf16.gmra.mxu0 %v22444_v63 }
 0x6a8   : > { %4673 = vmatprep.mubr.bf16.mxu0 %v22449_v12 }
 0x6af   : > { %4674 = vmatmul.mubr.bf16.gmra.mxu0 %v22447_v16 }
 0x6b0   : > { %4681 = vmatprep.mubr.bf16.mxu0 %v22452_v17  ;;  %v22467_v17 = vld [vmem:[%s28450_s5 + $0x6d4] ss:$8 sps:$4 sm:$0xff]  }
 0x6b7   : > { %4682 = vmatmul.mubr.bf16.gmra.mxu0 %v22450_v47 }
 0x6b8   : > { %4689 = vmatprep.mubr.bf16.mxu0 %v22455_v45 }
 0x6bf   : > { %v21015_v2 = vpop.f32.mrf.mxu0  ;;  %4690 = vmatmul.mubr.bf16.gmra.mxu0 %v22453_v33 }
 0x6c0   : > { %v24917_v28 = vadd.f32 %v21015_v2, %v24696_v42  ;;  %4697 = vmatprep.mubr.bf16.mxu0 %v22458_v43  ;;  %v22459_v42 = vld [vmem:[%s28450_s5 + $0x6b0] ss:$8 sps:$4 sm:$0xff]  }
 0x6c1   : > { %v4233_v29 = vpop.f32.mrf.mxu0 }
 0x6c2   : > { %v24920_v9 = vadd.f32 %v4233_v29, %v24699_v61  ;;  %v22464_v61 = vld [vmem:[%s28450_s5 + $0x6c4] ss:$8 sps:$4 sm:$0xff]   ;;  %v22468_v29 = vld [vmem:[%s28450_s5 + $0x6e0] ss:$8 sps:$4 sm:$0xff]  }
 0x6c3   : > { %v21016_v34 = vpop.f32.mrf.mxu0 }
 0x6c4   : > { %v24926_v49 = vadd.f32 %v21016_v34, %v24705_v40 }
 0x6c5   : > { %v24937_v10 = vpop.f32.mrf.mxu0 }
 0x6c6   : > { %28530 = vst [vmem:[#allocation38_spill] sm:$0xff] %v24937_v10 }
 0x6c7   : > { %4698 = vmatmul.mubr.bf16.gmra.mxu0 %v22456_v23  ;;  %v22473_v23 = vld [vmem:[%s28450_s5 + $0x6f4] ss:$8 sps:$4 sm:$0xff]  }
 0x6c8   : > { %4705 = vmatprep.mubr.bf16.mxu0 %v22461_v37 }
 0x6cf   : > { %v21019_v5 = vpop.f32.mrf.mxu0  ;;  %4706 = vmatmul.mubr.bf16.gmra.mxu0 %v22459_v42 }
 0x6d0   : > { %v24940_v40 = vadd.f32 %v21019_v5, %v24719_v58  ;;  %4713 = vmatprep.mubr.bf16.mxu0 %v22464_v61  ;;  %v22465_v58 = vld [vmem:[%s28450_s5 + $0x6d0] ss:$8 sps:$4 sm:$0xff]  }
 0x6d1   : > { %v4249_v63 = vpop.f32.mrf.mxu0 }
 0x6d2   : > { %v24943_v12 = vadd.f32 %v4249_v63, %v24722_v38  ;;  %v22470_v38 = vld [vmem:[%s28450_s5 + $0x6e4] ss:$8 sps:$4 sm:$0xff]  }
 0x6d3   : > { %v21020_v27 = vpop.f32.mrf.mxu0 }
 0x6d4   : > { %v24949_v16 = vadd.f32 %v21020_v27, %v24728_v26 }
 0x6d5   : > { %v24960_v47 = vpop.f32.mrf.mxu0 }
 0x6d6   : > { %28531 = vst [vmem:[#allocation39_spill] sm:$0xff] %v24960_v47 }
 0x6d7   : > { %4714 = vmatmul.mubr.bf16.gmra.mxu0 %v22462_v46 }
 0x6d8   : > { %4721 = vmatprep.mubr.bf16.mxu0 %v22467_v17 }
 0x6df   : > { %v21023_v45 = vpop.f32.mrf.mxu0  ;;  %4722 = vmatmul.mubr.bf16.gmra.mxu0 %v22465_v58 }
 0x6e0   : > { %v24963_v26 = vadd.f32 %v21023_v45, %v24742_v15  ;;  %4729 = vmatprep.mubr.bf16.mxu0 %v22470_v38  ;;  %v22471_v15 = vld [vmem:[%s28450_s5 + $0x6f0] ss:$8 sps:$4 sm:$0xff]  }
 0x6e1   : > { %v4265_v33 = vpop.f32.mrf.mxu0 }
 0x6e2   : > { %v24966_v43 = vadd.f32 %v4265_v33, %v24745_v50 }
 0x6e3   : > { %v21024_v2 = vpop.f32.mrf.mxu0 }
 0x6e4   : > { %v24972_v34 = vadd.f32 %v21024_v2, %v24751_v48 }
 0x6e5   : > { %v24980_v50 = vpop.f32.mrf.mxu0 }
 0x6e6   : > { %28532 = vst [vmem:[#allocation40_spill] sm:$0xff] %v24980_v50 }
 0x6e7   : > { %4730 = vmatmul.mubr.bf16.gmra.mxu0 %v22468_v29 }
 0x6e8   : > { %4737 = vmatprep.mubr.bf16.mxu0 %v22473_v23 }
 0x6ef   : > { %v21027_v37 = vpop.f32.mrf.mxu0  ;;  %4738 = vmatmul.mubr.bf16.gmra.mxu0 %v22471_v15 }
 0x6f0   : > { %v24983_v42 = vadd.f32 %v21027_v37, %v24762_v25 }
 0x6f1   : > { %v4281_v61 = vpop.f32.mrf.mxu0 }
 0x6f2   : > { %v24986_v48 = vadd.f32 %v4281_v61, %v24765_v21 }
 0x6f3   : > { %v21028_v5 = vpop.f32.mrf.mxu0 }
 0x6f4   : > { %v24989_v63 = vadd.f32 %v21028_v5, %v24768_v0 }
 0x6f5   : > { %v24991_v27 = vpop.f32.mrf.mxu0 }
 0x6f6   : > { %28533 = vst [vmem:[#allocation41_spill] sm:$0xff] %v24991_v27 }
 0x6ff   : > { %v21031_v46 = vpop.f32.mrf.mxu0 }
 0x700   : > { %v24994_v17 = vadd.f32 %v21031_v46, %v24773_v51 }
 0x701   : > { %v4297_v58 = vpop.f32.mrf.mxu0 }
 0x702   : > { %v24997_v38 = vadd.f32 %v4297_v58, %v24776_v14 }
 0x703   : > { %v21032_v25 = vpop.f32.mrf.mxu0 }
 0x704   : > { %v25000_v45 = vadd.f32 %v21032_v25, %v24779_v62 }
 0x705   : > { %v25002_v21 = vpop.f32.mrf.mxu0 }
 0x706   : > { %28534 = vst [vmem:[#allocation42_spill] sm:$0xff] %v25002_v21 }
 0x70f   : > { %v21035_v33 = vpop.f32.mrf.mxu0 }
 0x710   : > { %v25005_v0 = vadd.f32 %v21035_v33, %v24784_v18 }
 0x711   : > { %v4313_v2 = vpop.f32.mrf.mxu0 }
 0x712   : > { %v25008_v29 = vadd.f32 %v4313_v2, %v24787_v39 }
 0x713   : > { %v21036_v51 = vpop.f32.mrf.mxu0 }
 0x714   : > { %v25011_v23 = vadd.f32 %v21036_v51, %v24790_v30 }
 0x715   : > { %v25013_v14 = vpop.f32.mrf.mxu0 }
 0x716   : > { %28535 = vst [vmem:[#allocation43_spill] sm:$0xff] %v25013_v14 }
 0x71f   : > { %v21039_v15 = vpop.f32.mrf.mxu0 }
 0x720   : > { %v25016_v62 = vadd.f32 %v21039_v15, %v24795_v56 }
 0x721   : > { %v4329_v37 = vpop.f32.mrf.mxu0 }
 0x722   : > { %v25019_v61 = vadd.f32 %v4329_v37, %v24798_v20 }
 0x723   : > { %v21040_v18 = vpop.f32.mrf.mxu0 }
 0x724   : > { %v25022_v5 = vadd.f32 %v21040_v18, %v24801_v11 }
 0x725   : > { %v25024_v39 = vpop.f32.mrf.mxu0 }
 0x726   : > { %28536 = vst [vmem:[#allocation44_spill] sm:$0xff] %v25024_v39 }
 0x72f   : > { %v21043_v46 = vpop.f32.mrf.mxu0 }
 0x730   : > { %v25027_v30 = vadd.f32 %v21043_v46, %v24806_v35 }
 0x731   : > { %v4345_v58 = vpop.f32.mrf.mxu0 }
 0x732   : > { %v25030_v25 = vadd.f32 %v4345_v58, %v24809_v55 }
 0x733   : > { %v21044_v56 = vpop.f32.mrf.mxu0 }
 0x734   : > { %v25033_v33 = vadd.f32 %v21044_v56, %v24812_v1 }
 0x735   : > { %v25035_v20 = vpop.f32.mrf.mxu0 }
 0x736   : > { %28537 = vst [vmem:[#allocation45_spill] sm:$0xff] %v25035_v20 }
 0x737   : > { %v19660_v2 = vpop.f32.mrf.mxu0 }
 0x739   : > { %v19661_v51 = vpop.f32.mrf.mxu0 }
 0x73a   : > { %v19662_v37 = vadd.f32 %v19661_v51, %v19660_v2 }
 0x73b   : > { %v19663_v11 = vpop.f32.mrf.mxu0 }
 0x73d   : > { %v19664_v15 = vpop.f32.mrf.mxu0 }
 0x73e   : > { %v19665_v18 = vadd.f32 %v19664_v15, %v19663_v11 }
 0x73f   : > { %v19666_v10 = vpop.f32.mrf.mxu0 }
 0x740   : > { %v4746_v21 = vpack.c.bf16 %v19665_v18, %v19662_v37 }
 0x741   : > { %v19667_v35 = vpop.f32.mrf.mxu0 }
 0x742   : > { %21047 = vmatprep.mubr.msk.bf16.mxu1 %vm1502_vm1, %v4746_v21  ;;  %v19668_v58 = vadd.f32 %v19667_v35, %v19666_v10 }
 0x743   : > { %v19669_v46 = vpop.f32.mrf.mxu0 }
 0x745   : > { %v19670_v55 = vpop.f32.mrf.mxu0 }
 0x746   : > { %v19671_v47 = vadd.f32 %v19670_v55, %v19669_v46 }
 0x747   : > { %v19672_v14 = vpop.f32.mrf.mxu0 }
 0x748   : > { %v4747_v1 = vpack.c.bf16 %v19671_v47, %v19668_v58 }
 0x749   : > { %v19673_v56 = vpop.f32.mrf.mxu0 }
 0x74a   : > { %21048 = vmatmul.mubr.msk.bf16.vlgmr.msra.gmra.mxu1 %vm1502_vm1, %v4747_v1  ;;  %v19674_v51 = vadd.f32 %v19673_v56, %v19672_v14 }
 0x74b   : > { %v19675_v50 = vpop.f32.mrf.mxu0  ;;  %19774 = vmatpush3.bf16.msra.mxu1 %v23397_v8 }
 0x74c   : > { %19775 = vmatprep.subr.bf16.mxu1 %v28501_v41 }
 0x74d   : > { %v19676_v2 = vpop.f32.mrf.mxu0 }
 0x74e   : > { %v19677_v11 = vadd.f32 %v19676_v2, %v19675_v50 }
 0x74f   : > { %v19678_v15 = vpop.f32.mrf.mxu0  ;;  %19776 = vmatpush3.bf16.msra.mxu1 %v28502_v52 }
 0x750   : > { %v4748_v21 = vpack.c.bf16 %v19677_v11, %v19674_v51  ;;  %19777 = vmatprep.subr.bf16.mxu1 %v28503_v7 }
 0x751   : > { %v19679_v10 = vpop.f32.mrf.mxu0 }
 0x752   : > { %21051 = vmatprep.mubr.msk.bf16.mxu1 %vm1502_vm1, %v4748_v21  ;;  %v19680_v18 = vadd.f32 %v19679_v10, %v19678_v15 }
 0x753   : > { %v19681_v47 = vpop.f32.mrf.mxu0  ;;  %19778 = vmatpush3.bf16.msra.mxu1 %v28504_v36 }
 0x754   : > { %19779 = vmatprep.subr.bf16.mxu1 %v28505_v44 }
 0x755   : > { %v19682_v37 = vpop.f32.mrf.mxu0 }
 0x756   : > { %v19683_v35 = vadd.f32 %v19682_v37, %v19681_v47 }
 0x757   : > { %v19684_v46 = vpop.f32.mrf.mxu0  ;;  %19780 = vmatpush3.bf16.msra.mxu1 %v28506_v22 }
 0x758   : > { %v4749_v50 = vpack.c.bf16 %v19683_v35, %v19680_v18  ;;  %19781 = vmatprep.subr.bf16.mxu1 %v28507_v3 }
 0x759   : > { %v19685_v14 = vpop.f32.mrf.mxu0 }
 0x75a   : > { %21052 = vmatmul.mubr.msk.bf16.gmra.mxu1 %vm1502_vm1, %v4749_v50  ;;  %v19686_v1 = vadd.f32 %v19685_v14, %v19684_v46 }
 0x75b   : > { %v19687_v55 = vpop.f32.mrf.mxu0  ;;  %19782 = vmatpush3.bf16.msra.mxu1 %v28508_v60 }
 0x75c   : > { %19783 = vmatprep.subr.bf16.mxu1 %v28509_v59 }
 0x75d   : > { %v19688_v58 = vpop.f32.mrf.mxu0 }
 0x75e   : > { %v19689_v56 = vadd.f32 %v19688_v58, %v19687_v55 }
 0x75f   : > { %v19690_v2 = vpop.f32.mrf.mxu0  ;;  %19784 = vmatpush3.bf16.msra.mxu1 %v28510_v53 }
 0x760   : > { %v4750_v51 = vpack.c.bf16 %v19689_v56, %v19686_v1  ;;  %19785 = vmatprep.subr.bf16.mxu1 %v28511_v6 }
 0x761   : > { %v19691_v11 = vpop.f32.mrf.mxu0 }
 0x762   : > { %21055 = vmatprep.mubr.msk.bf16.mxu1 %vm1502_vm1, %v4750_v51  ;;  %v19692_v10 = vadd.f32 %v19691_v11, %v19690_v2 }
 0x763   : > { %v19693_v15 = vpop.f32.mrf.mxu0  ;;  %19786 = vmatpush3.bf16.msra.mxu1 %v28512_v24 }
 0x764   : > { %19787 = vmatprep.subr.bf16.mxu1 %v28513_v19 }
 0x765   : > { %v19694_v21 = vpop.f32.mrf.mxu0 }
 0x766   : > { %v19695_v47 = vadd.f32 %v19694_v21, %v19693_v15 }
 0x767   : > { %v19696_v37 = vpop.f32.mrf.mxu0  ;;  %19788 = vmatpush3.bf16.msra.mxu1 %v28514_v54 }
 0x768   : > { %v4751_v18 = vpack.c.bf16 %v19695_v47, %v19692_v10 }
 0x769   : > { %v19697_v35 = vpop.f32.mrf.mxu0 }
 0x76a   : > { %21056 = vmatmul.mubr.msk.bf16.gmra.mxu1 %vm1502_vm1, %v4751_v18  ;;  %v19698_v14 = vadd.f32 %v19697_v35, %v19696_v37 }
 0x76b   : > { %v19699_v46 = vpop.f32.mrf.mxu0 }
 0x76d   : > { %v19700_v50 = vpop.f32.mrf.mxu0 }
 0x76e   : > { %v19701_v55 = vadd.f32 %v19700_v50, %v19699_v46 }
 0x76f   : > { %v19702_v58 = vpop.f32.mrf.mxu0 }
 0x770   : > { %v4752_v1 = vpack.c.bf16 %v19701_v55, %v19698_v14 }
 0x771   : > { %v19703_v56 = vpop.f32.mrf.mxu0 }
 0x772   : > { %21059 = vmatprep.mubr.msk.bf16.mxu1 %vm1502_vm1, %v4752_v1  ;;  %v19704_v2 = vadd.f32 %v19703_v56, %v19702_v58 }
 0x773   : > { %v19705_v51 = vpop.f32.mrf.mxu0 }
 0x775   : > { %v19706_v39 = vpop.f32.mrf.mxu0 }
 0x776   : > { %v19707_v11 = vadd.f32 %v19706_v39, %v19705_v51 }
 0x777   : > { %v19708_v15 = vpop.f32.mrf.mxu0 }
 0x778   : > { %v4753_v21 = vpack.c.bf16 %v19707_v11, %v19704_v2 }
 0x779   : > { %v19709_v20 = vpop.f32.mrf.mxu0 }
 0x77a   : > { %21060 = vmatmul.mubr.msk.bf16.gmra.mxu1 %vm1502_vm1, %v4753_v21  ;;  %v19710_v18 = vadd.f32 %v19709_v20, %v19708_v15 }
 0x77b   : > { %v19711_v10 = vpop.f32.mrf.mxu0 }
 0x77d   : > { %v19712_v47 = vpop.f32.mrf.mxu0 }
 0x77e   : > { %v19713_v27 = vadd.f32 %v19712_v47, %v19711_v10 }
 0x77f   : > { %v19714_v37 = vpop.f32.mrf.mxu0 }
 0x780   : > { %v4754_v35 = vpack.c.bf16 %v19713_v27, %v19710_v18 }
 0x781   : > { %v19715_v46 = vpop.f32.mrf.mxu0 }
 0x782   : > { %21063 = vmatprep.mubr.msk.bf16.mxu1 %vm1502_vm1, %v4754_v35  ;;  %v19716_v55 = vadd.f32 %v19715_v46, %v19714_v37 }
 0x783   : > { %v19717_v50 = vpop.f32.mrf.mxu0 }
 0x785   : > { %v19718_v14 = vpop.f32.mrf.mxu0 }
 0x786   : > { %v19719_v1 = vadd.f32 %v19718_v14, %v19717_v50 }
 0x787   : > { %v19720_v58 = vpop.f32.mrf.mxu0 }
 0x788   : > { %v4755_v39 = vpack.c.bf16 %v19719_v1, %v19716_v55 }
 0x789   : > { %v19721_v56 = vpop.f32.mrf.mxu0 }
 0x78a   : > { %21064 = vmatmul.mubr.msk.bf16.gmra.mxu1 %vm1502_vm1, %v4755_v39  ;;  %v19722_v11 = vadd.f32 %v19721_v56, %v19720_v58 }
 0x78b   : > { %v19723_v51 = vpop.f32.mrf.mxu0 }
 0x78d   : > { %v19724_v2 = vpop.f32.mrf.mxu0 }
 0x78e   : > { %v19725_v21 = vadd.f32 %v19724_v2, %v19723_v51 }
 0x78f   : > { %v19726_v20 = vpop.f32.mrf.mxu0 }
 0x790   : > { %v4756_v15 = vpack.c.bf16 %v19725_v21, %v19722_v11 }
 0x791   : > { %v19727_v10 = vpop.f32.mrf.mxu0 }
 0x792   : > { %21067 = vmatprep.mubr.msk.bf16.mxu1 %vm1502_vm1, %v4756_v15  ;;  %v19728_v18 = vadd.f32 %v19727_v10, %v19726_v20 }
 0x793   : > { %v19729_v27 = vpop.f32.mrf.mxu0 }
 0x795   : > { %v19730_v47 = vpop.f32.mrf.mxu0 }
 0x796   : > { %v19731_v35 = vadd.f32 %v19730_v47, %v19729_v27 }
 0x797   : > { %v19732_v37 = vpop.f32.mrf.mxu0 }
 0x798   : > { %v4757_v46 = vpack.c.bf16 %v19731_v35, %v19728_v18 }
 0x799   : > { %v19733_v50 = vpop.f32.mrf.mxu0 }
 0x79a   : > { %21068 = vmatmul.mubr.msk.bf16.gmra.mxu1 %vm1502_vm1, %v4757_v46  ;;  %v19734_v1 = vadd.f32 %v19733_v50, %v19732_v37 }
 0x79b   : > { %v19735_v14 = vpop.f32.mrf.mxu0 }
 0x79d   : > { %v19736_v55 = vpop.f32.mrf.mxu0 }
 0x79e   : > { %v19737_v39 = vadd.f32 %v19736_v55, %v19735_v14 }
 0x79f   : > { %v19738_v58 = vpop.f32.mrf.mxu0 }
 0x7a0   : > { %v4758_v56 = vpack.c.bf16 %v19737_v39, %v19734_v1 }
 0x7a1   : > { %v19739_v51 = vpop.f32.mrf.mxu0 }
 0x7a2   : > { %21071 = vmatprep.mubr.msk.bf16.mxu1 %vm1502_vm1, %v4758_v56  ;;  %v19740_v21 = vadd.f32 %v19739_v51, %v19738_v58  ;;  %v22476_v58 = vld [vmem:[%s28450_s5 + $0x704] ss:$8 sps:$4 sm:$0xff]  }
 0x7a3   : > { %v19741_v2 = vpop.f32.mrf.mxu0 }
 0x7a5   : > { %v19742_v11 = vpop.f32.mrf.mxu0 }
 0x7a6   : > { %v19743_v15 = vadd.f32 %v19742_v11, %v19741_v2  ;;  %v22474_v2 = vld [vmem:[%s28450_s5 + $0x700] ss:$8 sps:$4 sm:$0xff]   ;;  %v22479_v11 = vld [vmem:[%s28450_s5 + $0x714] ss:$8 sps:$4 sm:$0xff]  }
 0x7a7   : > { %v19744_v20 = vpop.f32.mrf.mxu0 }
 0x7a8   : > { %v4759_v10 = vpack.c.bf16 %v19743_v15, %v19740_v21  ;;  %v22477_v21 = vld [vmem:[%s28450_s5 + $0x710] ss:$8 sps:$4 sm:$0xff]   ;;  %v22482_v15 = vld [vmem:[%s28450_s5 + $0x724] ss:$8 sps:$4 sm:$0xff]  }
 0x7a9   : > { %v19745_v27 = vpop.f32.mrf.mxu0 }
 0x7aa   : > { %21072 = vmatmul.mubr.msk.bf16.gmra.mxu1 %vm1502_vm1, %v4759_v10  ;;  %v19746_v35 = vadd.f32 %v19745_v27, %v19744_v20  ;;  %v22480_v20 = vld [vmem:[%s28450_s5 + $0x720] ss:$8 sps:$4 sm:$0xff]   ;;  %v22485_v10 = vld [vmem:[%s28450_s5 + $0x734] ss:$8 sps:$4 sm:$0xff]   ;;  %v22483_v27 = vld [vmem:[%s28450_s5 + $0x730] ss:$8 sps:$4 sm:$0xff]  }
 0x7ab   : > { %v19747_v47 = vpop.f32.mrf.mxu0 }
 0x7ad   : > { %v19748_v18 = vpop.f32.mrf.mxu0 }
 0x7ae   : > { %v19749_v46 = vadd.f32 %v19748_v18, %v19747_v47  ;;  %v22488_v47 = vld [vmem:[%s28450_s5 + $0x744] ss:$8 sps:$4 sm:$0xff]   ;;  %v22486_v18 = vld [vmem:[%s28450_s5 + $0x740] ss:$8 sps:$4 sm:$0xff]  }
 0x7af   : > { %v19750_v37 = vpop.f32.mrf.mxu0 }
 0x7b0   : > { %v4760_v50 = vpack.c.bf16 %v19749_v46, %v19746_v35  ;;  %v22491_v35 = vld [vmem:[%s28450_s5 + $0x754] ss:$8 sps:$4 sm:$0xff]   ;;  %v22489_v46 = vld [vmem:[%s28450_s5 + $0x750] ss:$8 sps:$4 sm:$0xff]  }
 0x7b1   : > { %v19751_v14 = vpop.f32.mrf.mxu0 }
 0x7b2   : > { %21075 = vmatprep.mubr.msk.bf16.mxu1 %vm1502_vm1, %v4760_v50  ;;  %v19752_v39 = vadd.f32 %v19751_v14, %v19750_v37  ;;  %v22494_v37 = vld [vmem:[%s28450_s5 + $0x764] ss:$8 sps:$4 sm:$0xff]   ;;  %v22492_v50 = vld [vmem:[%s28450_s5 + $0x760] ss:$8 sps:$4 sm:$0xff]   ;;  %v22497_v14 = vld [vmem:[%s28450_s5 + $0x774] ss:$8 sps:$4 sm:$0xff]  }
 0x7b3   : > { %v19753_v55 = vpop.f32.mrf.mxu0 }
 0x7b5   : > { %v19754_v1 = vpop.f32.mrf.mxu0 }
 0x7b6   : > { %v19755_v56 = vadd.f32 %v19754_v1, %v19753_v55  ;;  %v17259_v55 = vld [vmem:[%s28466_s11 + $0x1c] sm:$0xf] }
 0x7b7   : > { %22125 = vmatprep.subr.msk.bf16.mxu0 %vm1551_vm0, %v17259_v55  ;;  %v5429_v1 = vsel %vm1551_vm0, %v17259_v55, 0  ;;  %v22510_v55 = vld [vmem:[%s28450_s5 + $0x7c0] ss:$8 sps:$4 sm:$0xff]  }
 0x7b8   : > { %v4761_v51 = vpack.c.bf16 %v19755_v56, %v19752_v39  ;;  %21080 = vmatpush3.bf16.msra.mxu0 %v5429_v1  ;;  %v22495_v39 = vld [vmem:[%s28450_s5 + $0x770] ss:$8 sps:$4 sm:$0xff]   ;;  %v22500_v56 = vld [vmem:[%s28450_s5 + $0x784] ss:$8 sps:$4 sm:$0xff]  }
 0x7b9   : > { %19902 = vmatprep.subr.bf16.mxu0 %v23392_v4  ;;  %v22501_v4 = vld [vmem:[%s28450_s5 + $0x790] ss:$8 sps:$4 sm:$0xff]  }
 0x7ba   : > { %21076 = vmatmul.mubr.msk.bf16.gmra.mxu1 %vm1502_vm1, %v4761_v51  ;;  %v22503_v51 = vld [vmem:[%s28450_s5 + $0x794] ss:$8 sps:$4 sm:$0xff]  }
 0x7bb   : > { %5233 = vmatprep.mubr.bf16.mxu1 %v22476_v58  ;;  %v22498_v58 = vld [vmem:[%s28450_s5 + $0x780] ss:$8 sps:$4 sm:$0xff]  }
 0x7c2   : > { %5234 = vmatmul.mubr.bf16.vlgmr.msra.gmra.mxu1 %v22474_v2  ;;  %v22506_v2 = vld [vmem:[%s28450_s5 + $0x7a4] ss:$8 sps:$4 sm:$0xff]  }
 0x7c3   : > { %5241 = vmatprep.mubr.bf16.mxu1 %v22479_v11 }
 0x7ca   : > { %5242 = vmatmul.mubr.bf16.gmra.mxu1 %v22477_v21 }
 0x7cb   : > { %5249 = vmatprep.mubr.bf16.mxu1 %v22482_v15 }
 0x7d2   : > { %5250 = vmatmul.mubr.bf16.gmra.mxu1 %v22480_v20 }
 0x7d3   : > { %5257 = vmatprep.mubr.bf16.mxu1 %v22485_v10 }
 0x7da   : > { %5258 = vmatmul.mubr.bf16.gmra.mxu1 %v22483_v27  ;;  %v22504_v27 = vld [vmem:[%s28450_s5 + $0x7a0] ss:$8 sps:$4 sm:$0xff]  }
 0x7db   : > { %5265 = vmatprep.mubr.bf16.mxu1 %v22488_v47 }
 0x7e2   : > { %5266 = vmatmul.mubr.bf16.gmra.mxu1 %v22486_v18  ;;  %v22509_v18 = vld [vmem:[%s28450_s5 + $0x7b4] ss:$8 sps:$4 sm:$0xff]  }
 0x7e3   : > { %5273 = vmatprep.mubr.bf16.mxu1 %v22491_v35 }
 0x7ea   : > { %5274 = vmatmul.mubr.bf16.gmra.mxu1 %v22489_v46 }
 0x7eb   : > { %5281 = vmatprep.mubr.bf16.mxu1 %v22494_v37 }
 0x7f2   : > { %5282 = vmatmul.mubr.bf16.gmra.mxu1 %v22492_v50 }
 0x7f3   : > { %5289 = vmatprep.mubr.bf16.mxu1 %v22497_v14 }
 0x7fa   : > { %5290 = vmatmul.mubr.bf16.gmra.mxu1 %v22495_v39  ;;  %v22515_v39 = vld [vmem:[%s28450_s5 + $0x7d4] ss:$8 sps:$4 sm:$0xff]  }
 0x7fb   : > { %5297 = vmatprep.mubr.bf16.mxu1 %v22500_v56 }
 0x802   : > { %5298 = vmatmul.mubr.bf16.gmra.mxu1 %v22498_v58 }
 0x803   : > { %5305 = vmatprep.mubr.bf16.mxu1 %v22503_v51 }
 0x80a   : > { %v21049_v11 = vpop.f32.mrf.mxu1  ;;  %5306 = vmatmul.mubr.bf16.gmra.mxu1 %v22501_v4 }
 0x80b   : > { %v25138_v21 = vadd.f32 %v21049_v11, %v24917_v28  ;;  %5313 = vmatprep.mubr.bf16.mxu1 %v22506_v2  ;;  %v22507_v28 = vld [vmem:[%s28450_s5 + $0x7b0] ss:$8 sps:$4 sm:$0xff]   ;;  %v22516_v11 = vld [vmem:[%s28450_s5 + $0x7e0] ss:$8 sps:$4 sm:$0xff]  }
 0x80c   : > { %v4849_v15 = vpop.f32.mrf.mxu1 }
 0x80d   : > { %v25141_v20 = vadd.f32 %v4849_v15, %v24920_v9  ;;  %v22512_v9 = vld [vmem:[%s28450_s5 + $0x7c4] ss:$8 sps:$4 sm:$0xff]  }
 0x80e   : > { %v21050_v10 = vpop.f32.mrf.mxu1 }
 0x80f   : > { %v25147_v47 = vadd.f32 %v21050_v10, %v24926_v49  ;;  %v22521_v10 = vld [vmem:[%s28450_s5 + $0x7f4] ss:$8 sps:$4 sm:$0xff]  }
 0x810   : > { %v25158_v35 = vpop.f32.mrf.mxu1 }
 0x811   : > { %28538 = vst [vmem:[#allocation46_spill] sm:$0xff] %v25158_v35 }
 0x812   : > { %5314 = vmatmul.mubr.bf16.gmra.mxu1 %v22504_v27 }
 0x813   : > { %5321 = vmatprep.mubr.bf16.mxu1 %v22509_v18 }
 0x81a   : > { %v21053_v46 = vpop.f32.mrf.mxu1  ;;  %5322 = vmatmul.mubr.bf16.gmra.mxu1 %v22507_v28 }
 0x81b   : > { %v25161_v49 = vadd.f32 %v21053_v46, %v24940_v40  ;;  %5329 = vmatprep.mubr.bf16.mxu1 %v22512_v9  ;;  %v22513_v40 = vld [vmem:[%s28450_s5 + $0x7d0] ss:$8 sps:$4 sm:$0xff]  }
 0x81c   : > { %v4865_v37 = vpop.f32.mrf.mxu1 }
 0x81d   : > { %v25164_v50 = vadd.f32 %v4865_v37, %v24943_v12  ;;  %v22518_v12 = vld [vmem:[%s28450_s5 + $0x7e4] ss:$8 sps:$4 sm:$0xff]  }
 0x81e   : > { %v21054_v14 = vpop.f32.mrf.mxu1 }
 0x81f   : > { %v25170_v1 = vadd.f32 %v21054_v14, %v24949_v16 }
 0x820   : > { %v25181_v56 = vpop.f32.mrf.mxu1 }
 0x821   : > { %28539 = vst [vmem:[#allocation47_spill] sm:$0xff] %v25181_v56 }
 0x822   : > { %5330 = vmatmul.mubr.bf16.gmra.mxu1 %v22510_v55 }
 0x823   : > { %5337 = vmatprep.mubr.bf16.mxu1 %v22515_v39 }
 0x82a   : > { %v21057_v58 = vpop.f32.mrf.mxu1  ;;  %5338 = vmatmul.mubr.bf16.gmra.mxu1 %v22513_v40 }
 0x82b   : > { %v25184_v16 = vadd.f32 %v21057_v58, %v24963_v26  ;;  %5345 = vmatprep.mubr.bf16.mxu1 %v22518_v12  ;;  %v22519_v26 = vld [vmem:[%s28450_s5 + $0x7f0] ss:$8 sps:$4 sm:$0xff]  }
 0x82c   : > { %v4881_v51 = vpop.f32.mrf.mxu1 }
 0x82d   : > { %v25187_v4 = vadd.f32 %v4881_v51, %v24966_v43 }
 0x82e   : > { %v21058_v2 = vpop.f32.mrf.mxu1 }
 0x82f   : > { %v25193_v15 = vadd.f32 %v21058_v2, %v24972_v34 }
 0x830   : > { %v25201_v43 = vpop.f32.mrf.mxu1 }
 0x832   : > { %5346 = vmatmul.mubr.bf16.gmra.mxu1 %v22516_v11 }
 0x833   : > { %5353 = vmatprep.mubr.bf16.mxu1 %v22521_v10 }
 0x83a   : > { %v21061_v27 = vpop.f32.mrf.mxu1  ;;  %5354 = vmatmul.mubr.bf16.gmra.mxu1 %v22519_v26 }
 0x83b   : > { %v25204_v18 = vadd.f32 %v21061_v27, %v24983_v42 }
 0x83c   : > { %v4897_v28 = vpop.f32.mrf.mxu1 }
 0x83d   : > { %v25207_v34 = vadd.f32 %v4897_v28, %v24986_v48 }
 0x83e   : > { %v21062_v9 = vpop.f32.mrf.mxu1 }
 0x83f   : > { %v25210_v46 = vadd.f32 %v21062_v9, %v24989_v63 }
 0x840   : > { %v25212_v37 = vpop.f32.mrf.mxu1 }
 0x84a   : > { %v21065_v14 = vpop.f32.mrf.mxu1 }
 0x84b   : > { %v25215_v55 = vadd.f32 %v21065_v14, %v24994_v17 }
 0x84c   : > { %v4913_v39 = vpop.f32.mrf.mxu1 }
 0x84d   : > { %v25218_v40 = vadd.f32 %v4913_v39, %v24997_v38 }
 0x84e   : > { %v21066_v42 = vpop.f32.mrf.mxu1 }
 0x84f   : > { %v25221_v12 = vadd.f32 %v21066_v42, %v25000_v45 }
 0x850   : > { %v25223_v48 = vpop.f32.mrf.mxu1 }
 0x851   : > { %28540 = vst [vmem:[#allocation48_spill] sm:$0xff] %v25223_v48 }
 0x85a   : > { %v21069_v58 = vpop.f32.mrf.mxu1 }
 0x85b   : > { %v25226_v63 = vadd.f32 %v21069_v58, %v25005_v0 }
 0x85c   : > { %v4929_v51 = vpop.f32.mrf.mxu1 }
 0x85d   : > { %v25229_v2 = vadd.f32 %v4929_v51, %v25008_v29 }
 0x85e   : > { %v21070_v17 = vpop.f32.mrf.mxu1 }
 0x85f   : > { %v25232_v11 = vadd.f32 %v21070_v17, %v25011_v23 }
 0x860   : > { %v25234_v38 = vpop.f32.mrf.mxu1 }
 0x861   : > { %28541 = vst [vmem:[#allocation49_spill] sm:$0xff] %v25234_v38 }
 0x86a   : > { %v21073_v10 = vpop.f32.mrf.mxu1 }
 0x86b   : > { %v25237_v45 = vadd.f32 %v21073_v10, %v25016_v62 }
 0x86c   : > { %v4945_v26 = vpop.f32.mrf.mxu1 }
 0x86d   : > { %v25240_v27 = vadd.f32 %v4945_v26, %v25019_v61 }
 0x86e   : > { %v21074_v0 = vpop.f32.mrf.mxu1 }
 0x86f   : > { %v25243_v28 = vadd.f32 %v21074_v0, %v25022_v5 }
 0x870   : > { %v25245_v29 = vpop.f32.mrf.mxu1 }
 0x87a   : > { %v21077_v9 = vpop.f32.mrf.mxu1 }
 0x87b   : > { %v25248_v23 = vadd.f32 %v21077_v9, %v25027_v30 }
 0x87c   : > { %v4961_v14 = vpop.f32.mrf.mxu1 }
 0x87d   : > { %v25251_v39 = vadd.f32 %v4961_v14, %v25030_v25 }
 0x87e   : > { %v21078_v62 = vpop.f32.mrf.mxu1 }
 0x87f   : > { %v25254_v42 = vadd.f32 %v21078_v62, %v25033_v33 }
 0x880   : > { %v25256_v61 = vpop.f32.mrf.mxu1 }
 0x882   : > { %v19789_v58 = vpop.f32.mrf.mxu1 }
 0x884   : > { %v19790_v51 = vpop.f32.mrf.mxu1 }
 0x885   : > { %v19791_v10 = vadd.f32 %v19790_v51, %v19789_v58 }
 0x886   : > { %v19792_v5 = vpop.f32.mrf.mxu1 }
 0x888   : > { %v19793_v17 = vpop.f32.mrf.mxu1 }
 0x889   : > { %v19794_v26 = vadd.f32 %v19793_v17, %v19792_v5 }
 0x88a   : > { %v19795_v0 = vpop.f32.mrf.mxu1 }
 0x88b   : > { %v5362_v35 = vpack.c.bf16 %v19794_v26, %v19791_v10 }
 0x88c   : > { %v19796_v30 = vpop.f32.mrf.mxu1 }
 0x88d   : > { %21081 = vmatprep.mubr.msk.bf16.mxu0 %vm1502_vm1, %v5362_v35  ;;  %v19797_v14 = vadd.f32 %v19796_v30, %v19795_v0 }
 0x88e   : > { %v19798_v9 = vpop.f32.mrf.mxu1 }
 0x890   : > { %v19799_v25 = vpop.f32.mrf.mxu1 }
 0x891   : > { %v19800_v48 = vadd.f32 %v19799_v25, %v19798_v9 }
 0x892   : > { %v19801_v56 = vpop.f32.mrf.mxu1 }
 0x893   : > { %v5363_v33 = vpack.c.bf16 %v19800_v48, %v19797_v14 }
 0x894   : > { %v19802_v62 = vpop.f32.mrf.mxu1 }
 0x895   : > { %21082 = vmatmul.mubr.msk.bf16.vlgmr.msra.gmra.mxu0 %vm1502_vm1, %v5363_v33  ;;  %v19803_v51 = vadd.f32 %v19802_v62, %v19801_v56 }
 0x896   : > { %v19804_v38 = vpop.f32.mrf.mxu1  ;;  %19903 = vmatpush3.bf16.msra.mxu0 %v23397_v8 }
 0x897   : > { %19904 = vmatprep.subr.bf16.mxu0 %v28501_v41 }
 0x898   : > { %v19805_v58 = vpop.f32.mrf.mxu1 }
 0x899   : > { %v19806_v5 = vadd.f32 %v19805_v58, %v19804_v38 }
 0x89a   : > { %v19807_v17 = vpop.f32.mrf.mxu1  ;;  %19905 = vmatpush3.bf16.msra.mxu0 %v28502_v52 }
 0x89b   : > { %v5364_v35 = vpack.c.bf16 %v19806_v5, %v19803_v51  ;;  %19906 = vmatprep.subr.bf16.mxu0 %v28503_v7 }
 0x89c   : > { %v19808_v10 = vpop.f32.mrf.mxu1 }
 0x89d   : > { %21085 = vmatprep.mubr.msk.bf16.mxu0 %vm1502_vm1, %v5364_v35  ;;  %v19809_v26 = vadd.f32 %v19808_v10, %v19807_v17 }
 0x89e   : > { %v19810_v48 = vpop.f32.mrf.mxu1  ;;  %19907 = vmatpush3.bf16.msra.mxu0 %v28504_v36 }
 0x89f   : > { %19908 = vmatprep.subr.bf16.mxu0 %v28505_v44 }
 0x8a0   : > { %v19811_v8 = vpop.f32.mrf.mxu1 }
 0x8a1   : > { %v19812_v41 = vadd.f32 %v19811_v8, %v19810_v48 }
 0x8a2   : > { %v19813_v0 = vpop.f32.mrf.mxu1  ;;  %19909 = vmatpush3.bf16.msra.mxu0 %v28506_v22 }
 0x8a3   : > { %v5365_v56 = vpack.c.bf16 %v19812_v41, %v19809_v26  ;;  %19910 = vmatprep.subr.bf16.mxu0 %v28507_v3 }
 0x8a4   : > { %v19814_v52 = vpop.f32.mrf.mxu1 }
 0x8a5   : > { %21086 = vmatmul.mubr.msk.bf16.gmra.mxu0 %vm1502_vm1, %v5365_v56  ;;  %v19815_v38 = vadd.f32 %v19814_v52, %v19813_v0 }
 0x8a6   : > { %v19816_v7 = vpop.f32.mrf.mxu1  ;;  %19911 = vmatpush3.bf16.msra.mxu0 %v28508_v60 }
 0x8a7   : > { %19912 = vmatprep.subr.bf16.mxu0 %v28509_v59 }
 0x8a8   : > { %v19817_v36 = vpop.f32.mrf.mxu1 }
 0x8a9   : > { %v19818_v44 = vadd.f32 %v19817_v36, %v19816_v7 }
 0x8aa   : > { %v19819_v30 = vpop.f32.mrf.mxu1  ;;  %19913 = vmatpush3.bf16.msra.mxu0 %v28510_v53 }
 0x8ab   : > { %v5366_v9 = vpack.c.bf16 %v19818_v44, %v19815_v38  ;;  %19914 = vmatprep.subr.bf16.mxu0 %v28511_v6 }
 0x8ac   : > { %v19820_v22 = vpop.f32.mrf.mxu1 }
 0x8ad   : > { %21089 = vmatprep.mubr.msk.bf16.mxu0 %vm1502_vm1, %v5366_v9  ;;  %v19821_v25 = vadd.f32 %v19820_v22, %v19819_v30 }
 0x8ae   : > { %v19822_v3 = vpop.f32.mrf.mxu1  ;;  %19915 = vmatpush3.bf16.msra.mxu0 %v28512_v24 }
 0x8af   : > { %19916 = vmatprep.subr.bf16.mxu0 %v28513_v19 }
 0x8b0   : > { %v19823_v60 = vpop.f32.mrf.mxu1 }
 0x8b1   : > { %v19824_v59 = vadd.f32 %v19823_v60, %v19822_v3 }
 0x8b2   : > { %v19825_v14 = vpop.f32.mrf.mxu1  ;;  %19917 = vmatpush3.bf16.msra.mxu0 %v28514_v54 }
 0x8b3   : > { %v5367_v33 = vpack.c.bf16 %v19824_v59, %v19821_v25 }
 0x8b4   : > { %v19826_v62 = vpop.f32.mrf.mxu1 }
 0x8b5   : > { %21090 = vmatmul.mubr.msk.bf16.gmra.mxu0 %vm1502_vm1, %v5367_v33  ;;  %v19827_v58 = vadd.f32 %v19826_v62, %v19825_v14 }
 0x8b6   : > { %v19828_v53 = vpop.f32.mrf.mxu1 }
 0x8b8   : > { %v19829_v6 = vpop.f32.mrf.mxu1 }
 0x8b9   : > { %v19830_v51 = vadd.f32 %v19829_v6, %v19828_v53 }
 0x8ba   : > { %v19831_v5 = vpop.f32.mrf.mxu1 }
 0x8bb   : > { %v5368_v17 = vpack.c.bf16 %v19830_v51, %v19827_v58 }
 0x8bc   : > { %v19832_v35 = vpop.f32.mrf.mxu1 }
 0x8bd   : > { %21093 = vmatprep.mubr.msk.bf16.mxu0 %vm1502_vm1, %v5368_v17  ;;  %v19833_v10 = vadd.f32 %v19832_v35, %v19831_v5 }
 0x8be   : > { %v19834_v24 = vpop.f32.mrf.mxu1 }
 0x8c0   : > { %v19835_v19 = vpop.f32.mrf.mxu1 }
 0x8c1   : > { %v19836_v48 = vadd.f32 %v19835_v19, %v19834_v24 }
 0x8c2   : > { %v19837_v8 = vpop.f32.mrf.mxu1 }
 0x8c3   : > { %v5369_v26 = vpack.c.bf16 %v19836_v48, %v19833_v10 }
 0x8c4   : > { %v19838_v54 = vpop.f32.mrf.mxu1 }
 0x8c5   : > { %21094 = vmatmul.mubr.msk.bf16.gmra.mxu0 %vm1502_vm1, %v5369_v26  ;;  %v19839_v56 = vadd.f32 %v19838_v54, %v19837_v8 }
 0x8c6   : > { %v19840_v41 = vpop.f32.mrf.mxu1 }
 0x8c8   : > { %v19841_v0 = vpop.f32.mrf.mxu1 }
 0x8c9   : > { %v19842_v52 = vadd.f32 %v19841_v0, %v19840_v41 }
 0x8ca   : > { %v19843_v7 = vpop.f32.mrf.mxu1 }
 0x8cb   : > { %v5370_v36 = vpack.c.bf16 %v19842_v52, %v19839_v56 }
 0x8cc   : > { %v19844_v38 = vpop.f32.mrf.mxu1 }
 0x8cd   : > { %21097 = vmatprep.mubr.msk.bf16.mxu0 %vm1502_vm1, %v5370_v36  ;;  %v19845_v9 = vadd.f32 %v19844_v38, %v19843_v7 }
 0x8ce   : > { %v19846_v44 = vpop.f32.mrf.mxu1 }
 0x8d0   : > { %v19847_v30 = vpop.f32.mrf.mxu1 }
 0x8d1   : > { %v19848_v22 = vadd.f32 %v19847_v30, %v19846_v44 }
 0x8d2   : > { %v19849_v3 = vpop.f32.mrf.mxu1 }
 0x8d3   : > { %v5371_v60 = vpack.c.bf16 %v19848_v22, %v19845_v9 }
 0x8d4   : > { %v19850_v25 = vpop.f32.mrf.mxu1 }
 0x8d5   : > { %21098 = vmatmul.mubr.msk.bf16.gmra.mxu0 %vm1502_vm1, %v5371_v60  ;;  %v19851_v33 = vadd.f32 %v19850_v25, %v19849_v3 }
 0x8d6   : > { %v19852_v59 = vpop.f32.mrf.mxu1 }
 0x8d8   : > { %v19853_v14 = vpop.f32.mrf.mxu1 }
 0x8d9   : > { %v19854_v62 = vadd.f32 %v19853_v14, %v19852_v59 }
 0x8da   : > { %v19855_v53 = vpop.f32.mrf.mxu1 }
 0x8db   : > { %v5372_v6 = vpack.c.bf16 %v19854_v62, %v19851_v33 }
 0x8dc   : > { %v19856_v58 = vpop.f32.mrf.mxu1 }
 0x8dd   : > { %21101 = vmatprep.mubr.msk.bf16.mxu0 %vm1502_vm1, %v5372_v6  ;;  %v19857_v17 = vadd.f32 %v19856_v58, %v19855_v53 }
 0x8de   : > { %v19858_v51 = vpop.f32.mrf.mxu1 }
 0x8e0   : > { %v19859_v5 = vpop.f32.mrf.mxu1 }
 0x8e1   : > { %v19860_v35 = vadd.f32 %v19859_v5, %v19858_v51  ;;  %v22524_v51 = vld [vmem:[%s28450_s5 + $0x804] ss:$8 sps:$4 sm:$0xff]  }
 0x8e2   : > { %v19861_v24 = vpop.f32.mrf.mxu1 }
 0x8e3   : > { %v5373_v19 = vpack.c.bf16 %v19860_v35, %v19857_v17  ;;  %v22522_v17 = vld [vmem:[%s28450_s5 + $0x800] ss:$8 sps:$4 sm:$0xff]   ;;  %v22527_v35 = vld [vmem:[%s28450_s5 + $0x814] ss:$8 sps:$4 sm:$0xff]  }
 0x8e4   : > { %v19862_v10 = vpop.f32.mrf.mxu1 }
 0x8e5   : > { %21102 = vmatmul.mubr.msk.bf16.gmra.mxu0 %vm1502_vm1, %v5373_v19  ;;  %v19863_v26 = vadd.f32 %v19862_v10, %v19861_v24  ;;  %v22525_v24 = vld [vmem:[%s28450_s5 + $0x810] ss:$8 sps:$4 sm:$0xff]   ;;  %v22530_v19 = vld [vmem:[%s28450_s5 + $0x824] ss:$8 sps:$4 sm:$0xff]   ;;  %v22528_v10 = vld [vmem:[%s28450_s5 + $0x820] ss:$8 sps:$4 sm:$0xff]  }
 0x8e6   : > { %v19864_v48 = vpop.f32.mrf.mxu1 }
 0x8e8   : > { %v19865_v8 = vpop.f32.mrf.mxu1 }
 0x8e9   : > { %v19866_v54 = vadd.f32 %v19865_v8, %v19864_v48  ;;  %v22533_v48 = vld [vmem:[%s28450_s5 + $0x834] ss:$8 sps:$4 sm:$0xff]   ;;  %v22531_v8 = vld [vmem:[%s28450_s5 + $0x830] ss:$8 sps:$4 sm:$0xff]  }
 0x8ea   : > { %v19867_v41 = vpop.f32.mrf.mxu1 }
 0x8eb   : > { %v5374_v0 = vpack.c.bf16 %v19866_v54, %v19863_v26  ;;  %v22536_v26 = vld [vmem:[%s28450_s5 + $0x844] ss:$8 sps:$4 sm:$0xff]   ;;  %v22534_v54 = vld [vmem:[%s28450_s5 + $0x840] ss:$8 sps:$4 sm:$0xff]  }
 0x8ec   : > { %v19868_v56 = vpop.f32.mrf.mxu1 }
 0x8ed   : > { %21105 = vmatprep.mubr.msk.bf16.mxu0 %vm1502_vm1, %v5374_v0  ;;  %v19869_v36 = vadd.f32 %v19868_v56, %v19867_v41  ;;  %v22539_v41 = vld [vmem:[%s28450_s5 + $0x854] ss:$8 sps:$4 sm:$0xff]   ;;  %v22537_v0 = vld [vmem:[%s28450_s5 + $0x850] ss:$8 sps:$4 sm:$0xff]   ;;  %v22542_v56 = vld [vmem:[%s28450_s5 + $0x864] ss:$8 sps:$4 sm:$0xff]  }
 0x8ee   : > { %v19870_v52 = vpop.f32.mrf.mxu1 }
 0x8f0   : > { %v19871_v7 = vpop.f32.mrf.mxu1 }
 0x8f1   : > { %v19872_v38 = vadd.f32 %v19871_v7, %v19870_v52  ;;  %v22540_v52 = vld [vmem:[%s28450_s5 + $0x860] ss:$8 sps:$4 sm:$0xff]   ;;  %v22545_v7 = vld [vmem:[%s28450_s5 + $0x874] ss:$8 sps:$4 sm:$0xff]  }
 0x8f2   : > { %v19873_v44 = vpop.f32.mrf.mxu1 }
 0x8f3   : > { %v5375_v30 = vpack.c.bf16 %v19872_v38, %v19869_v36  ;;  %v17340_v36 = vld [vmem:[%s28466_s11 + $0x20] sm:$0xf] }
 0x8f4   : > { %v19874_v9 = vpop.f32.mrf.mxu1  ;;  %22126 = vmatprep.subr.msk.bf16.mxu1 %vm1551_vm0, %v17340_v36  ;;  %v6045_v38 = vsel %vm1551_vm0, %v17340_v36, 0 }
 0x8f5   : > { %21106 = vmatmul.mubr.msk.bf16.gmra.mxu0 %vm1502_vm1, %v5375_v30  ;;  %v19875_v60 = vadd.f32 %v19874_v9, %v19873_v44  ;;  %21114 = vmatpush3.bf16.msra.mxu1 %v6045_v38  ;;  %v22543_v44 = vld [vmem:[%s28450_s5 + $0x870] ss:$8 sps:$4 sm:$0xff]   ;;  %v22548_v30 = vld [vmem:[%s28450_s5 + $0x884] ss:$8 sps:$4 sm:$0xff]   ;;  %v22546_v9 = vld [vmem:[%s28450_s5 + $0x880] ss:$8 sps:$4 sm:$0xff]  }
 0x8f6   : > { %v19876_v22 = vpop.f32.mrf.mxu1 }
 0x8f8   : > { %v19877_v3 = vpop.f32.mrf.mxu1 }
 0x8f9   : > { %v19878_v25 = vadd.f32 %v19877_v3, %v19876_v22  ;;  %v22551_v22 = vld [vmem:[%s28450_s5 + $0x894] ss:$8 sps:$4 sm:$0xff]   ;;  %v22549_v3 = vld [vmem:[%s28450_s5 + $0x890] ss:$8 sps:$4 sm:$0xff]  }
 0x8fa   : > { %v19879_v59 = vpop.f32.mrf.mxu1 }
 0x8fb   : > { %v5376_v14 = vpack.c.bf16 %v19878_v25, %v19875_v60  ;;  %v22554_v60 = vld [vmem:[%s28450_s5 + $0x8a4] ss:$8 sps:$4 sm:$0xff]  }
 0x8fc   : > { %v19880_v33 = vpop.f32.mrf.mxu1 }
 0x8fd   : > { %21109 = vmatprep.mubr.msk.bf16.mxu0 %vm1502_vm1, %v5376_v14  ;;  %v19881_v6 = vadd.f32 %v19880_v33, %v19879_v59 }
 0x8fe   : > { %v19882_v62 = vpop.f32.mrf.mxu1 }
 0x900   : > { %v19883_v53 = vpop.f32.mrf.mxu1 }
 0x901   : > { %v19884_v58 = vadd.f32 %v19883_v53, %v19882_v62  ;;  %v22552_v53 = vld [vmem:[%s28450_s5 + $0x8a0] ss:$8 sps:$4 sm:$0xff]  }
 0x903   : > { %v5377_v5 = vpack.c.bf16 %v19884_v58, %v19881_v6  ;;  %v22557_v58 = vld [vmem:[%s28450_s5 + $0x8b4] ss:$8 sps:$4 sm:$0xff]  }
 0x905   : > { %21110 = vmatmul.mubr.msk.bf16.gmra.mxu0 %vm1502_vm1, %v5377_v5 }
 0x906   : > { %5849 = vmatprep.mubr.bf16.mxu0 %v22524_v51 }
 0x90d   : > { %5850 = vmatmul.mubr.bf16.vlgmr.msra.gmra.mxu0 %v22522_v17 }
 0x90e   : > { %5857 = vmatprep.mubr.bf16.mxu0 %v22527_v35 }
 0x915   : > { %5858 = vmatmul.mubr.bf16.gmra.mxu0 %v22525_v24 }
 0x916   : > { %5865 = vmatprep.mubr.bf16.mxu0 %v22530_v19  ;;  %v22558_v19 = vld [vmem:[%s28450_s5 + $0x8c0] ss:$8 sps:$4 sm:$0xff]  }
 0x91d   : > { %5866 = vmatmul.mubr.bf16.gmra.mxu0 %v22528_v10 }
 0x91e   : > { %5873 = vmatprep.mubr.bf16.mxu0 %v22533_v48  ;;  %v22563_v48 = vld [vmem:[%s28450_s5 + $0x8d4] ss:$8 sps:$4 sm:$0xff]  }
 0x925   : > { %5874 = vmatmul.mubr.bf16.gmra.mxu0 %v22531_v8 }
 0x926   : > { %5881 = vmatprep.mubr.bf16.mxu0 %v22536_v26 }
 0x92d   : > { %5882 = vmatmul.mubr.bf16.gmra.mxu0 %v22534_v54 }
 0x92e   : > { %5889 = vmatprep.mubr.bf16.mxu0 %v22539_v41 }
 0x935   : > { %5890 = vmatmul.mubr.bf16.gmra.mxu0 %v22537_v0 }
 0x936   : > { %5897 = vmatprep.mubr.bf16.mxu0 %v22542_v56  ;;  %v22564_v56 = vld [vmem:[%s28450_s5 + $0x8e0] ss:$8 sps:$4 sm:$0xff]  }
 0x93d   : > { %5898 = vmatmul.mubr.bf16.gmra.mxu0 %v22540_v52 }
 0x93e   : > { %5905 = vmatprep.mubr.bf16.mxu0 %v22545_v7  ;;  %v22569_v7 = vld [vmem:[%s28450_s5 + $0x8f4] ss:$8 sps:$4 sm:$0xff]  }
 0x945   : > { %5906 = vmatmul.mubr.bf16.gmra.mxu0 %v22543_v44 }
 0x946   : > { %5913 = vmatprep.mubr.bf16.mxu0 %v22548_v30 }
 0x94d   : > { %5914 = vmatmul.mubr.bf16.gmra.mxu0 %v22546_v9 }
 0x94e   : > { %5921 = vmatprep.mubr.bf16.mxu0 %v22551_v22 }
 0x955   : > { %v21083_v25 = vpop.f32.mrf.mxu0  ;;  %5922 = vmatmul.mubr.bf16.gmra.mxu0 %v22549_v3 }
 0x956   : > { %v25358_v59 = vadd.f32 %v21083_v25, %v25138_v21  ;;  %5929 = vmatprep.mubr.bf16.mxu0 %v22554_v60  ;;  %v22555_v21 = vld [vmem:[%s28450_s5 + $0x8b0] ss:$8 sps:$4 sm:$0xff]  }
 0x957   : > { %v5465_v14 = vpop.f32.mrf.mxu0 }
 0x958   : > { %v25361_v33 = vadd.f32 %v5465_v14, %v25141_v20  ;;  %v22560_v20 = vld [vmem:[%s28450_s5 + $0x8c4] ss:$8 sps:$4 sm:$0xff]  }
 0x959   : > { %v21084_v62 = vpop.f32.mrf.mxu0 }
 0x95a   : > { %v25367_v6 = vadd.f32 %v21084_v62, %v25147_v47 }
 0x95b   : > { %v25378_v51 = vpop.f32.mrf.mxu0 }
 0x95d   : > { %5930 = vmatmul.mubr.bf16.gmra.mxu0 %v22552_v53 }
 0x95e   : > { %5937 = vmatprep.mubr.bf16.mxu0 %v22557_v58 }
 0x965   : > { %v21087_v5 = vpop.f32.mrf.mxu0  ;;  %5938 = vmatmul.mubr.bf16.gmra.mxu0 %v22555_v21 }
 0x966   : > { %v25381_v47 = vadd.f32 %v21087_v5, %v25161_v49  ;;  %5945 = vmatprep.mubr.bf16.mxu0 %v22560_v20  ;;  %v22561_v49 = vld [vmem:[%s28450_s5 + $0x8d0] ss:$8 sps:$4 sm:$0xff]  }
 0x967   : > { %v5481_v17 = vpop.f32.mrf.mxu0 }
 0x968   : > { %v25384_v35 = vadd.f32 %v5481_v17, %v25164_v50  ;;  %v22566_v50 = vld [vmem:[%s28450_s5 + $0x8e4] ss:$8 sps:$4 sm:$0xff]  }
 0x969   : > { %v21088_v24 = vpop.f32.mrf.mxu0 }
 0x96a   : > { %v25390_v10 = vadd.f32 %v21088_v24, %v25170_v1 }
 0x96b   : > { %v25401_v8 = vpop.f32.mrf.mxu0 }
 0x96d   : > { %5946 = vmatmul.mubr.bf16.gmra.mxu0 %v22558_v19 }
 0x96e   : > { %5953 = vmatprep.mubr.bf16.mxu0 %v22563_v48 }
 0x975   : > { %v21091_v26 = vpop.f32.mrf.mxu0  ;;  %5954 = vmatmul.mubr.bf16.gmra.mxu0 %v22561_v49 }
 0x976   : > { %v25404_v1 = vadd.f32 %v21091_v26, %v25184_v16  ;;  %5961 = vmatprep.mubr.bf16.mxu0 %v22566_v50  ;;  %v22567_v16 = vld [vmem:[%s28450_s5 + $0x8f0] ss:$8 sps:$4 sm:$0xff]   ;;  %s28597_s5 = sld [smem:[#allocation58_spill]] }
 0x977   : > { %v5497_v54 = vpop.f32.mrf.mxu0 }
 0x978   : > { %v25407_v41 = vadd.f32 %v5497_v54, %v25187_v4 }
 0x979   : > { %v21092_v0 = vpop.f32.mrf.mxu0 }
 0x97a   : > { %v25413_v52 = vadd.f32 %v21092_v0, %v25193_v15 }
 0x97b   : > { %v25421_v4 = vpop.f32.mrf.mxu0 }
 0x97d   : > { %5962 = vmatmul.mubr.bf16.gmra.mxu0 %v22564_v56 }
 0x97e   : > { %5969 = vmatprep.mubr.bf16.mxu0 %v22569_v7 }
 0x985   : > { %v21095_v36 = vpop.f32.mrf.mxu0  ;;  %5970 = vmatmul.mubr.bf16.gmra.mxu0 %v22567_v16 }
 0x986   : > { %v25424_v38 = vadd.f32 %v21095_v36, %v25204_v18 }
 0x987   : > { %v5513_v44 = vpop.f32.mrf.mxu0 }
 0x988   : > { %v25427_v15 = vadd.f32 %v5513_v44, %v25207_v34 }
 0x989   : > { %v21096_v30 = vpop.f32.mrf.mxu0 }
 0x98a   : > { %v25430_v9 = vadd.f32 %v21096_v30, %v25210_v46 }
 0x98b   : > { %v25432_v22 = vpop.f32.mrf.mxu0 }
 0x995   : > { %v21099_v3 = vpop.f32.mrf.mxu0 }
 0x996   : > { %v25435_v60 = vadd.f32 %v21099_v3, %v25215_v55 }
 0x997   : > { %v5529_v25 = vpop.f32.mrf.mxu0 }
 0x998   : > { %v25438_v14 = vadd.f32 %v5529_v25, %v25218_v40 }
 0x999   : > { %v21100_v18 = vpop.f32.mrf.mxu0 }
 0x99a   : > { %v25441_v62 = vadd.f32 %v21100_v18, %v25221_v12 }
 0x99b   : > { %v25443_v34 = vpop.f32.mrf.mxu0 }
 0x9a5   : > { %v21103_v53 = vpop.f32.mrf.mxu0 }
 0x9a6   : > { %v25446_v46 = vadd.f32 %v21103_v53, %v25226_v63 }
 0x9a7   : > { %v5545_v58 = vpop.f32.mrf.mxu0 }
 0x9a8   : > { %v25449_v21 = vadd.f32 %v5545_v58, %v25229_v2 }
 0x9a9   : > { %v21104_v55 = vpop.f32.mrf.mxu0 }
 0x9aa   : > { %v25452_v20 = vadd.f32 %v21104_v55, %v25232_v11 }
 0x9ab   : > { %v25454_v40 = vpop.f32.mrf.mxu0 }
 0x9b5   : > { %v21107_v5 = vpop.f32.mrf.mxu0 }
 0x9b6   : > { %v25457_v12 = vadd.f32 %v21107_v5, %v25237_v45 }
 0x9b7   : > { %v5561_v17 = vpop.f32.mrf.mxu0 }
 0x9b8   : > { %v25460_v24 = vadd.f32 %v5561_v17, %v25240_v27 }
 0x9b9   : > { %v21108_v63 = vpop.f32.mrf.mxu0 }
 0x9ba   : > { %v25463_v19 = vadd.f32 %v21108_v63, %v25243_v28 }
 0x9bb   : > { %v25465_v2 = vpop.f32.mrf.mxu0 }
 0x9c5   : > { %v21111_v48 = vpop.f32.mrf.mxu0 }
 0x9c6   : > { %v25468_v11 = vadd.f32 %v21111_v48, %v25248_v23 }
 0x9c7   : > { %v5577_v49 = vpop.f32.mrf.mxu0 }
 0x9c8   : > { %v25471_v50 = vadd.f32 %v5577_v49, %v25251_v39 }
 0x9c9   : > { %v21112_v45 = vpop.f32.mrf.mxu0 }
 0x9ca   : > { %v25474_v26 = vadd.f32 %v21112_v45, %v25254_v42 }
 0x9cb   : > { %v25476_v27 = vpop.f32.mrf.mxu0 }
 0x9cd   : > { %v19918_v54 = vpop.f32.mrf.mxu0 }
 0x9cf   : > { %v19919_v0 = vpop.f32.mrf.mxu0 }
 0x9d0   : > { %v19920_v7 = vadd.f32 %v19919_v0, %v19918_v54 }
 0x9d1   : > { %v19921_v28 = vpop.f32.mrf.mxu0 }
 0x9d3   : > { %v19922_v56 = vpop.f32.mrf.mxu0 }
 0x9d4   : > { %v19923_v16 = vadd.f32 %v19922_v56, %v19921_v28 }
 0x9d5   : > { %v19924_v36 = vpop.f32.mrf.mxu0 }
 0x9d6   : > { %v5978_v44 = vpack.c.bf16 %v19923_v16, %v19920_v7 }
 0x9d7   : > { %v19925_v23 = vpop.f32.mrf.mxu0 }
 0x9d8   : > { %21115 = vmatprep.mubr.msk.bf16.mxu1 %vm1502_vm1, %v5978_v44  ;;  %v19926_v3 = vadd.f32 %v19925_v23, %v19924_v36 }
 0x9d9   : > { %v19927_v30 = vpop.f32.mrf.mxu0 }
 0x9db   : > { %v19928_v39 = vpop.f32.mrf.mxu0 }
 0x9dc   : > { %v19929_v25 = vadd.f32 %v19928_v39, %v19927_v30 }
 0x9dd   : > { %v19930_v18 = vpop.f32.mrf.mxu0 }
 0x9de   : > { %v5979_v42 = vpack.c.bf16 %v19929_v25, %v19926_v3 }
 0x9df   : > { %v19931_v53 = vpop.f32.mrf.mxu0 }
 0x9e0   : > { %21116 = vmatmul.mubr.msk.bf16.vlgmr.msra.gmra.mxu1 %vm1502_vm1, %v5979_v42  ;;  %v19932_v5 = vadd.f32 %v19931_v53, %v19930_v18 }
 0x9e1   : > { %v19933_v58 = vpop.f32.mrf.mxu0 }
 0x9e3   : > { %v19934_v55 = vpop.f32.mrf.mxu0 }
 0x9e4   : > { %v19935_v17 = vadd.f32 %v19934_v55, %v19933_v58 }
 0x9e5   : > { %v19936_v63 = vpop.f32.mrf.mxu0 }
 0x9e6   : > { %v5980_v48 = vpack.c.bf16 %v19935_v17, %v19932_v5 }
 0x9e7   : > { %v19937_v49 = vpop.f32.mrf.mxu0 }
 0x9e8   : > { %21119 = vmatprep.mubr.msk.bf16.mxu1 %vm1502_vm1, %v5980_v48  ;;  %v19938_v0 = vadd.f32 %v19937_v49, %v19936_v63 }
 0x9e9   : > { %v19939_v45 = vpop.f32.mrf.mxu0 }
 0x9eb   : > { %v19940_v54 = vpop.f32.mrf.mxu0 }
 0x9ec   : > { %v19941_v28 = vadd.f32 %v19940_v54, %v19939_v45 }
 0x9ed   : > { %v19942_v56 = vpop.f32.mrf.mxu0 }
 0x9ee   : > { %v5981_v7 = vpack.c.bf16 %v19941_v28, %v19938_v0 }
 0x9ef   : > { %v19943_v16 = vpop.f32.mrf.mxu0 }
 0x9f0   : > { %21120 = vmatmul.mubr.msk.bf16.gmra.mxu1 %vm1502_vm1, %v5981_v7  ;;  %v19944_v23 = vadd.f32 %v19943_v16, %v19942_v56 }
 0x9f1   : > { %v19945_v36 = vpop.f32.mrf.mxu0 }
 0x9f3   : > { %v19946_v44 = vpop.f32.mrf.mxu0 }
 0x9f4   : > { %v19947_v30 = vadd.f32 %v19946_v44, %v19945_v36 }
 0x9f5   : > { %v19948_v39 = vpop.f32.mrf.mxu0 }
 0x9f6   : > { %v5982_v3 = vpack.c.bf16 %v19947_v30, %v19944_v23 }
 0x9f7   : > { %v19949_v25 = vpop.f32.mrf.mxu0 }
 0x9f8   : > { %21123 = vmatprep.mubr.msk.bf16.mxu1 %vm1502_vm1, %v5982_v3  ;;  %v19950_v53 = vadd.f32 %v19949_v25, %v19948_v39 }
 0x9f9   : > { %v19951_v18 = vpop.f32.mrf.mxu0 }
 0x9fb   : > { %v19952_v42 = vpop.f32.mrf.mxu0 }
 0x9fc   : > { %v19953_v58 = vadd.f32 %v19952_v42, %v19951_v18 }
 0x9fd   : > { %v19954_v55 = vpop.f32.mrf.mxu0 }
 0x9fe   : > { %v5983_v5 = vpack.c.bf16 %v19953_v58, %v19950_v53 }
 0x9ff   : > { %v19955_v17 = vpop.f32.mrf.mxu0 }
 0xa00   : > { %21124 = vmatmul.mubr.msk.bf16.gmra.mxu1 %vm1502_vm1, %v5983_v5  ;;  %v19956_v49 = vadd.f32 %v19955_v17, %v19954_v55 }
 0xa01   : > { %v19957_v63 = vpop.f32.mrf.mxu0 }
 0xa03   : > { %v19958_v48 = vpop.f32.mrf.mxu0 }
 0xa04   : > { %v19959_v45 = vadd.f32 %v19958_v48, %v19957_v63 }
 0xa05   : > { %v19960_v54 = vpop.f32.mrf.mxu0 }
 0xa06   : > { %v5984_v0 = vpack.c.bf16 %v19959_v45, %v19956_v49 }
 0xa07   : > { %v19961_v28 = vpop.f32.mrf.mxu0 }
 0xa08   : > { %21127 = vmatprep.mubr.msk.bf16.mxu1 %vm1502_vm1, %v5984_v0  ;;  %v19962_v16 = vadd.f32 %v19961_v28, %v19960_v54 }
 0xa09   : > { %v19963_v56 = vpop.f32.mrf.mxu0 }
 0xa0b   : > { %v19964_v7 = vpop.f32.mrf.mxu0 }
 0xa0c   : > { %v19965_v36 = vadd.f32 %v19964_v7, %v19963_v56 }
 0xa0d   : > { %v19966_v44 = vpop.f32.mrf.mxu0 }
 0xa0e   : > { %v5985_v23 = vpack.c.bf16 %v19965_v36, %v19962_v16 }
 0xa0f   : > { %v19967_v30 = vpop.f32.mrf.mxu0 }
 0xa10   : > { %21128 = vmatmul.mubr.msk.bf16.gmra.mxu1 %vm1502_vm1, %v5985_v23  ;;  %v19968_v25 = vadd.f32 %v19967_v30, %v19966_v44 }
 0xa11   : > { %v19969_v39 = vpop.f32.mrf.mxu0 }
 0xa13   : > { %v19970_v3 = vpop.f32.mrf.mxu0 }
 0xa14   : > { %v19971_v18 = vadd.f32 %v19970_v3, %v19969_v39 }
 0xa15   : > { %v19972_v42 = vpop.f32.mrf.mxu0 }
 0xa16   : > { %v5986_v53 = vpack.c.bf16 %v19971_v18, %v19968_v25 }
 0xa17   : > { %v19973_v58 = vpop.f32.mrf.mxu0 }
 0xa18   : > { %21131 = vmatprep.mubr.msk.bf16.mxu1 %vm1502_vm1, %v5986_v53  ;;  %v19974_v17 = vadd.f32 %v19973_v58, %v19972_v42 }
 0xa19   : > { %v19975_v55 = vpop.f32.mrf.mxu0 }
 0xa1b   : > { %v19976_v5 = vpop.f32.mrf.mxu0 }
 0xa1c   : > { %v19977_v63 = vadd.f32 %v19976_v5, %v19975_v55 }
 0xa1d   : > { %v19978_v48 = vpop.f32.mrf.mxu0 }
 0xa1e   : > { %v5987_v49 = vpack.c.bf16 %v19977_v63, %v19974_v17 }
 0xa1f   : > { %v19979_v45 = vpop.f32.mrf.mxu0 }
 0xa20   : > { %21132 = vmatmul.mubr.msk.bf16.gmra.mxu1 %vm1502_vm1, %v5987_v49  ;;  %v19980_v28 = vadd.f32 %v19979_v45, %v19978_v48 }
 0xa21   : > { %v19981_v54 = vpop.f32.mrf.mxu0 }
 0xa23   : > { %v19982_v0 = vpop.f32.mrf.mxu0 }
 0xa24   : > { %v19983_v56 = vadd.f32 %v19982_v0, %v19981_v54 }
 0xa25   : > { %v19984_v7 = vpop.f32.mrf.mxu0 }
 0xa26   : > { %v5988_v16 = vpack.c.bf16 %v19983_v56, %v19980_v28 }
 0xa27   : > { %v19985_v36 = vpop.f32.mrf.mxu0 }
 0xa28   : > { %21135 = vmatprep.mubr.msk.bf16.mxu1 %vm1502_vm1, %v5988_v16  ;;  %v19986_v30 = vadd.f32 %v19985_v36, %v19984_v7 }
 0xa29   : > { %v19987_v44 = vpop.f32.mrf.mxu0 }
 0xa2b   : > { %v19988_v23 = vpop.f32.mrf.mxu0 }
 0xa2c   : > { %v19989_v39 = vadd.f32 %v19988_v23, %v19987_v44 }
 0xa2d   : > { %v19990_v3 = vpop.f32.mrf.mxu0 }
 0xa2e   : > { %v5989_v25 = vpack.c.bf16 %v19989_v39, %v19986_v30 }
 0xa2f   : > { %v19991_v18 = vpop.f32.mrf.mxu0 }
 0xa30   : > { %21136 = vmatmul.mubr.msk.bf16.gmra.mxu1 %vm1502_vm1, %v5989_v25  ;;  %v19992_v58 = vadd.f32 %v19991_v18, %v19990_v3 }
 0xa31   : > { %v19993_v42 = vpop.f32.mrf.mxu0 }
 0xa33   : > { %v19994_v53 = vpop.f32.mrf.mxu0 }
 0xa34   : > { %v19995_v55 = vadd.f32 %v19994_v53, %v19993_v42 }
 0xa35   : > { %v19996_v5 = vpop.f32.mrf.mxu0 }
 0xa36   : > { %v5990_v17 = vpack.c.bf16 %v19995_v55, %v19992_v58 }
 0xa37   : > { %v19997_v63 = vpop.f32.mrf.mxu0 }
 0xa38   : > { %21139 = vmatprep.mubr.msk.bf16.mxu1 %vm1502_vm1, %v5990_v17  ;;  %v19998_v45 = vadd.f32 %v19997_v63, %v19996_v5  ;;  %v25498_v5 = vld [vmem:[%s28542_s12] ss:$0 sm:$0xff] }
 0xa39   : > { %v19999_v48 = vpop.f32.mrf.mxu0 }
 0xa3b   : > { %v20000_v49 = vpop.f32.mrf.mxu0 }
 0xa3c   : > { %v20001_v54 = vadd.f32 %v20000_v49, %v19999_v48 }
 0xa3d   : > { %v20002_v0 = vpop.f32.mrf.mxu0 }
 0xa3e   : > { %v5991_v28 = vpack.c.bf16 %v20001_v54, %v19998_v45 }
 0xa3f   : > { %v20003_v56 = vpop.f32.mrf.mxu0 }
 0xa40   : > { %21140 = vmatmul.mubr.msk.bf16.gmra.mxu1 %vm1502_vm1, %v5991_v28  ;;  %v20004_v36 = vadd.f32 %v20003_v56, %v20002_v0 }
 0xa41   : > { %v20005_v7 = vpop.f32.mrf.mxu0 }
 0xa43   : > { %v20006_v16 = vpop.f32.mrf.mxu0 }
 0xa44   : > { %v20007_v44 = vadd.f32 %v20006_v16, %v20005_v7 }
 0xa45   : > { %v20008_v23 = vpop.f32.mrf.mxu0 }
 0xa46   : > { %v5992_v30 = vpack.c.bf16 %v20007_v44, %v20004_v36 }
 0xa47   : > { %v20009_v39 = vpop.f32.mrf.mxu0 }
 0xa48   : > { %21143 = vmatprep.mubr.msk.bf16.mxu1 %vm1502_vm1, %v5992_v30  ;;  %v20010_v18 = vadd.f32 %v20009_v39, %v20008_v23 }
 0xa49   : > { %v20011_v3 = vpop.f32.mrf.mxu0 }
 0xa4b   : > { %v20012_v25 = vpop.f32.mrf.mxu0 }
 0xa4c   : > { %v20013_v42 = vadd.f32 %v20012_v25, %v20011_v3  ;;  %v22572_v25 = vld [vmem:[%s28544_s29 + $0x4] ss:$8 sps:$4 sm:$0xff]  }
 0xa4e   : > { %v5993_v53 = vpack.c.bf16 %v20013_v42, %v20010_v18 }
 0xa50   : > { %21144 = vmatmul.mubr.msk.bf16.gmra.mxu1 %vm1502_vm1, %v5993_v53 }
 0xa51   : > { %6407 = vmatprep.mubr.bf16.mxu1 %v22572_v25 }
 0xaa0   : > { %v21117_v58 = vpop.f32.mrf.mxu1 }
 0xaa1   : > { %v6210_v55 = vadd.f32 %v21117_v58, %v25358_v59 }
 0xaa2   : > { %v6081_v17 = vpop.f32.mrf.mxu1 }
 0xaa3   : > { %v25501_v63 = vadd.f32 %v6081_v17, %v25361_v33  ;;  %v6249_v49 = vadd.f32 %v25498_v5, %v6210_v55 }
 0xaa4   : > { %v21118_v48 = vpop.f32.mrf.mxu1 }
 0xaa5   : > { %v6211_v45 = vadd.f32 %v21118_v48, %v25367_v6  ;;  %v6281_v0 = vmax.f32 %v6249_v49, 0.0 }
 0xaa6   : > { %v25508_v59 = vpop.f32.mrf.mxu1 }
 0xaa7   : > { %v6250_v54 = vadd.f32 %v25498_v5, %v6211_v45 }
 0xaa9   : > { %v6282_v28 = vmax.f32 %v6250_v54, 0.0 }
 0xaab   : > { %v25506_v56 = vpack.c.bf16 %v6282_v28, %v6281_v0 }
 0xaad   : > { %28543 = vst [vmem:[#allocation50_spill] sm:$0xff] %v25506_v56  ;;  %v28557_v56 = vld [vmem:[#allocation37_spill] sm:$0xff] }
 0xab0   : > { %v21121_v7 = vpop.f32.mrf.mxu1 }
 0xab1   : > { %v6214_v16 = vadd.f32 %v21121_v7, %v25381_v47 }
 0xab2   : > { %v6097_v36 = vpop.f32.mrf.mxu1 }
 0xab3   : > { %v25512_v33 = vadd.f32 %v6097_v36, %v25384_v35  ;;  %v6253_v23 = vadd.f32 %v25498_v5, %v6214_v16 }
 0xab4   : > { %v21122_v44 = vpop.f32.mrf.mxu1 }
 0xab5   : > { %v6215_v6 = vadd.f32 %v21122_v44, %v25390_v10  ;;  %v6285_v39 = vmax.f32 %v6253_v23, 0.0 }
 0xab6   : > { %v25522_v47 = vpop.f32.mrf.mxu1 }
 0xab7   : > { %v6254_v30 = vadd.f32 %v25498_v5, %v6215_v6 }
 0xab9   : > { %v6286_v3 = vmax.f32 %v6254_v30, 0.0  ;;  %v22587_v30 = vld [vmem:[%s28544_s29 + $0x84] ss:$8 sps:$4 sm:$0xff]  }
 0xaba   : > { %6643 = vmatprep.mubr.bf16.mxu0 %v22587_v30 }
 0xabb   : > { %v25520_v18 = vpack.c.bf16 %v6286_v3, %v6285_v39 }
 0xac0   : > { %v21125_v35 = vpop.f32.mrf.mxu1 }
 0xac1   : > { %v6218_v42 = vadd.f32 %v21125_v35, %v25404_v1 }
 0xac2   : > { %v25525_v53 = vpop.f32.mrf.mxu1 }
 0xac3   : > { %v6257_v10 = vadd.f32 %v25498_v5, %v6218_v42 }
 0xac4   : > { %v21126_v58 = vpop.f32.mrf.mxu1 }
 0xac5   : > { %v6219_v55 = vadd.f32 %v21126_v58, %v25413_v52  ;;  %v6289_v48 = vmax.f32 %v6257_v10, 0.0 }
 0xac6   : > { %v25532_v54 = vpop.f32.mrf.mxu1 }
 0xac7   : > { %v6258_v17 = vadd.f32 %v25498_v5, %v6219_v55 }
 0xac9   : > { %v6290_v49 = vmax.f32 %v6258_v17, 0.0 }
 0xacb   : > { %v25530_v45 = vpack.c.bf16 %v6290_v49, %v6289_v48 }
 0xad0   : > { %v21129_v0 = vpop.f32.mrf.mxu1 }
 0xad1   : > { %v6222_v28 = vadd.f32 %v21129_v0, %v25424_v38 }
 0xad2   : > { %v25535_v7 = vpop.f32.mrf.mxu1 }
 0xad3   : > { %v6261_v16 = vadd.f32 %v25498_v5, %v6222_v28 }
 0xad4   : > { %v21130_v1 = vpop.f32.mrf.mxu1 }
 0xad5   : > { %v6223_v36 = vadd.f32 %v21130_v1, %v25430_v9  ;;  %v6293_v44 = vmax.f32 %v6261_v16, 0.0 }
 0xad6   : > { %v25545_v39 = vpop.f32.mrf.mxu1 }
 0xad7   : > { %v6262_v52 = vadd.f32 %v25498_v5, %v6223_v36 }
 0xad9   : > { %v6294_v23 = vmax.f32 %v6262_v52, 0.0 }
 0xadb   : > { %v25540_v6 = vpack.c.bf16 %v6294_v23, %v6293_v44 }
 0xae0   : > { %v21133_v38 = vpop.f32.mrf.mxu1 }
 0xae1   : > { %v6226_v3 = vadd.f32 %v21133_v38, %v25435_v60 }
 0xae2   : > { %v25548_v25 = vpop.f32.mrf.mxu1 }
 0xae3   : > { %v6265_v9 = vadd.f32 %v25498_v5, %v6226_v3 }
 0xae4   : > { %v21134_v35 = vpop.f32.mrf.mxu1 }
 0xae5   : > { %v6227_v42 = vadd.f32 %v21134_v35, %v25441_v62  ;;  %v6297_v10 = vmax.f32 %v6265_v9, 0.0 }
 0xae6   : > { %v25555_v48 = vpop.f32.mrf.mxu1 }
 0xae7   : > { %v6266_v58 = vadd.f32 %v25498_v5, %v6227_v42  ;;  %v28545_v42 = vld [vmem:[#allocation19_spill] sm:$0xff] }
 0xae9   : > { %v6298_v55 = vmax.f32 %v6266_v58, 0.0 }
 0xaeb   : > { %v25553_v17 = vpack.c.bf16 %v6298_v55, %v6297_v10 }
 0xaf0   : > { %v21137_v49 = vpop.f32.mrf.mxu1 }
 0xaf1   : > { %v6230_v0 = vadd.f32 %v21137_v49, %v25446_v46  ;;  %v28547_v49 = vld [vmem:[#allocation23_spill] sm:$0xff] }
 0xaf2   : > { %v25558_v28 = vpop.f32.mrf.mxu1 }
 0xaf3   : > { %v6269_v1 = vadd.f32 %v25498_v5, %v6230_v0  ;;  %v1917_v0 = vadd.f32 %v24230_v31, %v28547_v49 }
 0xaf4   : > { %v21138_v60 = vpop.f32.mrf.mxu1 }
 0xaf5   : > { %v6231_v16 = vadd.f32 %v21138_v60, %v25452_v20  ;;  %v6301_v36 = vmax.f32 %v6269_v1, 0.0  ;;  %v28546_v20 = vld [vmem:[#allocation27_spill] sm:$0xff] }
 0xaf6   : > { %v25565_v23 = vpop.f32.mrf.mxu1  ;;  %v1853_v58 = vadd.f32 %v28546_v20, %v28545_v42  ;;  %v28552_v42 = vld [vmem:[#allocation8_spill] sm:$0xff]  ;;  %v28553_v20 = vld [vmem:[#allocation18_spill] sm:$0xff] }
 0xaf7   : > { %v6270_v62 = vadd.f32 %v25498_v5, %v6231_v16  ;;  %v28548_v16 = vld [vmem:[#allocation22_spill] sm:$0xff] }
 0xaf8   : > { %v2525_v55 = vadd.f32 %v24319_v57, %v1853_v58  ;;  %v28554_v58 = vld [vmem:[#allocation26_spill] sm:$0xff] }
 0xaf9   : > { %v6302_v52 = vmax.f32 %v6270_v62, 0.0  ;;  %v1901_v62 = vadd.f32 %v24148_v13, %v28548_v16  ;;  %v1837_v31 = vadd.f32 %v28554_v58, %v28553_v20  ;;  %v28558_v16 = vld [vmem:[#allocation32_spill] sm:$0xff] }
 0xafb   : > { %v25563_v44 = vpack.c.bf16 %v6302_v52, %v6301_v36  ;;  %v28549_v36 = vld [vmem:[#allocation36_spill] sm:$0xff] }
 0xafc   : > { %v2541_v52 = vadd.f32 %v28549_v36, %v1917_v0  ;;  %v2521_v0 = vadd.f32 %v28558_v16, %v1837_v31 }
 0xafe   : > { %v3157_v57 = vadd.f32 %v28552_v42, %v2541_v52  ;;  %v28562_v42 = vld [vmem:[#allocation29_spill] sm:$0xff] }
 0xb00   : > { %v21141_v30 = vpop.f32.mrf.mxu1  ;;  %v3773_v13 = vadd.f32 %v28557_v56, %v3157_v57  ;;  %v28564_v56 = vld [vmem:[#allocation44_spill] sm:$0xff] }
 0xb01   : > { %v6234_v38 = vadd.f32 %v21141_v30, %v25457_v12  ;;  %v3141_v12 = vadd.f32 %v24549_v32, %v2525_v55  ;;  %v28550_v30 = vld [vmem:[#allocation12_spill] sm:$0xff]  ;;  %v28556_v32 = vld [vmem:[#allocation7_spill] sm:$0xff] }
 0xb02   : > { %v25568_v3 = vpop.f32.mrf.mxu1 }
 0xb03   : > { %v6273_v35 = vadd.f32 %v25498_v5, %v6234_v38  ;;  %v3757_v38 = vadd.f32 %v28550_v30, %v3141_v12  ;;  %v28559_v12 = vld [vmem:[#allocation15_spill] sm:$0xff] }
 0xb04   : > { %v21142_v46 = vpop.f32.mrf.mxu1 }
 0xb05   : > { %v6235_v9 = vadd.f32 %v21142_v46, %v25463_v19  ;;  %v6305_v60 = vmax.f32 %v6273_v35, 0.0  ;;  %v28551_v46 = vld [vmem:[#allocation35_spill] sm:$0xff]  ;;  %v28555_v35 = vld [vmem:[#allocation41_spill] sm:$0xff] }
 0xb06   : > { %v6180_v49 = vpop.f32.mrf.mxu1 }
 0xb07   : > { %v6274_v10 = vadd.f32 %v25498_v5, %v6235_v9  ;;  %v2537_v9 = vadd.f32 %v28551_v46, %v1901_v62  ;;  %v28560_v62 = vld [vmem:[#allocation45_spill] sm:$0xff] }
 0xb08   : > { %v4389_v30 = vadd.f32 %v28560_v62, %v3773_v13  ;;  %v28561_v46 = vld [vmem:[#allocation21_spill] sm:$0xff]  ;;  %v28567_v13 = vld [vmem:[#allocation34_spill] sm:$0xff] }
 0xb09   : > { %v6306_v1 = vmax.f32 %v6274_v10, 0.0  ;;  %v4373_v10 = vadd.f32 %v28555_v35, %v3757_v38  ;;  %v3153_v55 = vadd.f32 %v28556_v32, %v2537_v9  ;;  %v1885_v20 = vadd.f32 %v28562_v42, %v28561_v46  ;;  %v28563_v38 = vld [vmem:[#allocation4_spill] sm:$0xff]  ;;  %v28566_v32 = vld [vmem:[#allocation25_spill] sm:$0xff]  ;;  %v28571_v46 = vld [vmem:[#allocation6_spill] sm:$0xff] }
 0xb0a   : > { %v3137_v58 = vadd.f32 %v28563_v38, %v2521_v0  ;;  %v5005_v31 = vadd.f32 %v25256_v61, %v4389_v30  ;;  %v28572_v38 = vld [vmem:[#allocation40_spill] sm:$0xff] }
 0xb0b   : > { %v25582_v19 = vpack.c.bf16 %v6306_v1, %v6305_v60  ;;  %v4989_v60 = vadd.f32 %v25212_v37, %v4373_v10  ;;  %v3769_v36 = vadd.f32 %v28559_v12, %v3153_v55  ;;  %v28565_v10 = vld [vmem:[#allocation17_spill] sm:$0xff]  ;;  %v2533_v16 = vadd.f32 %v28567_v13, %v1885_v20 }
 0xb0c   : > { %v1821_v55 = vadd.f32 %v28566_v32, %v28565_v10 }
 0xb0d   : > { %v5605_v9 = vadd.f32 %v25432_v22, %v4989_v60  ;;  %v4385_v57 = vadd.f32 %v28564_v56, %v3769_v36  ;;  %v5621_v22 = vadd.f32 %v25476_v27, %v5005_v31  ;;  %v28569_v36 = vld [vmem:[#allocation20_spill] sm:$0xff]  ;;  %v3149_v42 = vadd.f32 %v28571_v46, %v2533_v16  ;;  %v28574_v56 = vld [vmem:[#allocation14_spill] sm:$0xff]  ;;  %v28579_v46 = vld [vmem:[#allocation49_spill] sm:$0xff] }
 0xb0f   : > { %v6221_v12 = vadd.f32 %v25545_v39, %v5605_v9  ;;  %v5001_v0 = vadd.f32 %v25245_v29, %v4385_v57  ;;  %v3765_v57 = vadd.f32 %v28574_v56, %v3149_v42  ;;  %v28585_v56 = vld [vmem:[#allocation47_spill] sm:$0xff] }
 0xb10   : > { %v21145_v1 = vpop.f32.mrf.mxu1 }
 0xb11   : > { %v6238_v52 = vadd.f32 %v21145_v1, %v25468_v11  ;;  %v28568_v11 = vld [vmem:[#allocation11_spill] sm:$0xff]  ;;  %v5617_v9 = vadd.f32 %v25465_v2, %v5001_v0  ;;  %v6260_v10 = vadd.f32 %v25498_v5, %v6221_v12 }
 0xb12   : > { %v6193_v35 = vpop.f32.mrf.mxu1  ;;  %v3753_v1 = vadd.f32 %v28568_v11, %v3137_v58  ;;  %v6220_v58 = vadd.f32 %v25535_v7, %v25427_v15  ;;  %v28575_v7 = vld [vmem:[#allocation3_spill] sm:$0xff] }
 0xb13   : > { %v6236_v37 = vadd.f32 %v6193_v35, %v25471_v50  ;;  %v6277_v60 = vadd.f32 %v25498_v5, %v6238_v52  ;;  %v28570_v50 = vld [vmem:[#allocation28_spill] sm:$0xff]  ;;  %v28573_v35 = vld [vmem:[#allocation31_spill] sm:$0xff]  ;;  %v6233_v32 = vadd.f32 %v6180_v49, %v5617_v9  ;;  %v28577_v49 = vld [vmem:[#allocation33_spill] sm:$0xff] }
 0xb14   : > { %v21146_v62 = vpop.f32.mrf.mxu1  ;;  %v1869_v30 = vadd.f32 %v28570_v50, %v28569_v36  ;;  %v4369_v20 = vadd.f32 %v28572_v38, %v3753_v1  ;;  %v28576_v11 = vld [vmem:[#allocation43_spill] sm:$0xff]  ;;  %v6292_v50 = vmax.f32 %v6260_v10, 0.0  ;;  %v28583_v9 = vld [vmem:[#allocation5_spill] sm:$0xff] }
 0xb15   : > { %v6239_v61 = vadd.f32 %v21146_v62, %v25474_v26  ;;  %v6275_v29 = vadd.f32 %v25498_v5, %v6236_v37  ;;  %v2517_v26 = vadd.f32 %v28573_v35, %v1821_v55  ;;  %v6309_v13 = vmax.f32 %v6277_v60, 0.0  ;;  %v28578_v60 = vld [vmem:[#allocation10_spill] sm:$0xff] }
 0xb16   : > { %v6196_v39 = vpop.f32.mrf.mxu1  ;;  %v4985_v31 = vadd.f32 %v25201_v43, %v4369_v20  ;;  %v4381_v37 = vadd.f32 %v28576_v11, %v3765_v57  ;;  %v6259_v62 = vadd.f32 %v25498_v5, %v6220_v58  ;;  %v6232_v55 = vadd.f32 %v25568_v3, %v25460_v24  ;;  %v28580_v24 = vld [vmem:[#allocation16_spill] sm:$0xff]  ;;  %v28582_v58 = vld [vmem:[#allocation39_spill] sm:$0xff]  ;;  %v28584_v35 = vld [vmem:[#allocation30_spill] sm:$0xff] }
 0xb17   : > { %v6278_v27 = vadd.f32 %v25498_v5, %v6239_v61  ;;  %v6237_v52 = vadd.f32 %v6196_v39, %v5621_v22  ;;  %v3133_v2 = vadd.f32 %v28575_v7, %v2517_v26  ;;  %v6307_v0 = vmax.f32 %v6275_v29, 0.0  ;;  %v28581_v3 = vld [vmem:[#allocation24_spill] sm:$0xff] }
 0xb18   : > { %v5601_v1 = vadd.f32 %v25421_v4, %v4985_v31  ;;  %v2529_v22 = vadd.f32 %v28577_v49, %v1869_v30  ;;  %v4997_v42 = vadd.f32 %v28579_v46, %v4381_v37  ;;  %v6272_v4 = vadd.f32 %v25498_v5, %v6233_v32  ;;  %v28586_v31 = vld [vmem:[#allocation13_spill] sm:$0xff] }
 0xb19   : > { %v6310_v16 = vmax.f32 %v6278_v27, 0.0  ;;  %v6276_v15 = vadd.f32 %v25498_v5, %v6237_v52  ;;  %v3749_v61 = vadd.f32 %v28578_v60, %v3133_v2  ;;  %v1805_v20 = vadd.f32 %v28581_v3, %v28580_v24  ;;  %v28588_v2 = vld [vmem:[#allocation42_spill] sm:$0xff] }
 0xb1a   : > { %v6217_v36 = vadd.f32 %v25532_v54, %v5601_v1  ;;  %v6216_v39 = vadd.f32 %v25525_v53, %v25407_v41  ;;  %v6291_v54 = vmax.f32 %v6259_v62, 0.0  ;;  %v3145_v29 = vadd.f32 %v28583_v9, %v2529_v22  ;;  %v28591_v60 = vld [vmem:[#allocation38_spill] sm:$0xff] }
 0xb1b   : > { %v25633_v43 = vpack.c.bf16 %v6310_v16, %v6309_v13  ;;  %v6308_v12 = vmax.f32 %v6276_v15, 0.0  ;;  %v4365_v30 = vadd.f32 %v28582_v58, %v3749_v61  ;;  %v5613_v27 = vadd.f32 %v25454_v40, %v4997_v42  ;;  %v28587_v40 = vld [vmem:[#allocation2_spill] sm:$0xff] }
 0xb1c   : > { %v6271_v52 = vadd.f32 %v25498_v5, %v6232_v55  ;;  %v2513_v26 = vadd.f32 %v28584_v35, %v1805_v20  ;;  %v6256_v41 = vadd.f32 %v25498_v5, %v6217_v36  ;;  %v25659_v53 = vpack.c.bf16 %v6292_v50, %v6291_v54 }
 0xb1d   : > { %v25640_v38 = vpack.c.bf16 %v6308_v12, %v6307_v0  ;;  %20031 = vmatprep.subr.bf16.mxu1 %v25633_v43  ;;  %20111 = vmatprep.subr.bf16.mxu0 %v25633_v43  ;;  %v4981_v57 = vadd.f32 %v28585_v56, %v4365_v30  ;;  %v3761_v10 = vadd.f32 %v28586_v31, %v3145_v29  ;;  %v6304_v13 = vmax.f32 %v6272_v4, 0.0  ;;  %v28590_v0 = vld [vmem:[#allocation48_spill] sm:$0xff]  ;;  %v22585_v56 = vld [vmem:[%s28544_s29 + $0x80] ss:$8 sps:$4 sm:$0xff]  }
 0xb1e   : > { %20032 = vmatpush3.bf16.msra.mxu1 %v25540_v6  ;;  %20112 = vmatpush3.bf16.msra.mxu0 %v25540_v6  ;;  %v6229_v32 = vadd.f32 %v25565_v23, %v5613_v27  ;;  %v3129_v16 = vadd.f32 %v28587_v40, %v2513_v26  ;;  %v6255_v7 = vadd.f32 %v25498_v5, %v6216_v39  ;;  %v6303_v1 = vmax.f32 %v6271_v52, 0.0  ;;  %v28589_v23 = vld [vmem:[#allocation9_spill] sm:$0xff]  ;;  %v28593_v26 = vld [vmem:[#allocation50_spill] sm:$0xff] }
 0xb1f   : > { %20033 = vmatprep.subr.bf16.mxu1 %v25640_v38  ;;  %20113 = vmatprep.subr.bf16.mxu0 %v25640_v38  ;;  %v5597_v15 = vadd.f32 %v25401_v8, %v4981_v57  ;;  %v4377_v11 = vadd.f32 %v28588_v2, %v3761_v10  ;;  %v6228_v37 = vadd.f32 %v25558_v28, %v25449_v21  ;;  %v6288_v55 = vmax.f32 %v6256_v41, 0.0  ;;  %v22575_v57 = vld [vmem:[%s28544_s29 + $0x14] ss:$8 sps:$4 sm:$0xff]   ;;  %v22573_v31 = vld [vmem:[%s28544_s29 + $0x10] ss:$8 sps:$4 sm:$0xff]  }
 0xb20   : > { %v3745_v62 = vadd.f32 %v28589_v23, %v3129_v16  ;;  %v6268_v49 = vadd.f32 %v25498_v5, %v6229_v32  ;;  %v25677_v22 = vpack.c.bf16 %v6304_v13, %v6303_v1  ;;  %v6287_v36 = vmax.f32 %v6255_v7, 0.0  ;;  %v22593_v41 = vld [vmem:[%s28544_s29 + $0x94] ss:$8 sps:$4 sm:$0xff]   ;;  %v22591_v10 = vld [vmem:[%s28544_s29 + $0x90] ss:$8 sps:$4 sm:$0xff]  }
 0xb21   : > { %v6213_v8 = vadd.f32 %v25522_v47, %v5597_v15  ;;  %v4993_v12 = vadd.f32 %v28590_v0, %v4377_v11  ;;  %v6267_v28 = vadd.f32 %v25498_v5, %v6228_v37  ;;  %v28592_v47 = vld [vmem:[#allocation46_spill] sm:$0xff]  ;;  %v6224_v20 = vadd.f32 %v25548_v25, %v25438_v14  ;;  %v22581_v15 = vld [vmem:[%s28544_s29 + $0x34] ss:$8 sps:$4 sm:$0xff]   ;;  %v22579_v2 = vld [vmem:[%s28544_s29 + $0x30] ss:$8 sps:$4 sm:$0xff]  }
 0xb22   : > { %20034 = vmatpush3.bf16.msra.mxu1 %v25659_v53  ;;  %20114 = vmatpush3.bf16.msra.mxu0 %v25659_v53  ;;  %v4361_v61 = vadd.f32 %v28591_v60, %v3745_v62  ;;  %v25688_v42 = vpack.c.bf16 %v6288_v55, %v6287_v36  ;;  %v6300_v24 = vmax.f32 %v6268_v49, 0.0  ;;  %v6247_v9 = vadd.f32 %v25498_v5, %v25501_v63  ;;  %v22570_v63 = vld [vmem:[%s28544_s29] ss:$8 sps:$4 sm:$0xff]   ;;  %v22578_v32 = vld [vmem:[%s28544_s29 + $0x24] ss:$8 sps:$4 sm:$0xff]  }
 0xb23   : > { %20035 = vmatprep.subr.bf16.mxu1 %v25582_v19  ;;  %20115 = vmatprep.subr.bf16.mxu0 %v25582_v19  ;;  %v5609_v21 = vadd.f32 %v25443_v34, %v4993_v12  ;;  %v6252_v46 = vadd.f32 %v25498_v5, %v6213_v8  ;;  %v6251_v34 = vadd.f32 %v25498_v5, %v25512_v33  ;;  %v6299_v58 = vmax.f32 %v6267_v28, 0.0  ;;  %v22599_v13 = vld [vmem:[%s28544_s29 + $0xa4] ss:$8 sps:$4 sm:$0xff]   ;;  %v22576_v40 = vld [vmem:[%s28544_s29 + $0x20] ss:$8 sps:$4 sm:$0xff]  }
 0xb24   : > { %v4977_v50 = vadd.f32 %v28592_v47, %v4361_v61  ;;  %v6263_v54 = vadd.f32 %v25498_v5, %v6224_v20  ;;  %v6279_v35 = vmax.f32 %v6247_v9, 0.0  ;;  %v22597_v16 = vld [vmem:[%s28544_s29 + $0xa0] ss:$8 sps:$4 sm:$0xff]   ;;  %v22605_v7 = vld [vmem:[%s28544_s29 + $0xb4] ss:$8 sps:$4 sm:$0xff]  }
 0xb25   : > { %v6225_v4 = vadd.f32 %v25555_v48, %v5609_v21  ;;  %v6284_v30 = vmax.f32 %v6252_v46, 0.0  ;;  %v25702_v39 = vpack.c.bf16 %v6300_v24, %v6299_v58  ;;  %v6283_v33 = vmax.f32 %v6251_v34, 0.0  ;;  %v22603_v11 = vld [vmem:[%s28544_s29 + $0xb0] ss:$8 sps:$4 sm:$0xff]   ;;  %v22584_v37 = vld [vmem:[%s28544_s29 + $0x44] ss:$8 sps:$4 sm:$0xff]  }
 0xb26   : > { %20036 = vmatpush3.bf16.msra.mxu1 %v25530_v45  ;;  %20116 = vmatpush3.bf16.msra.mxu0 %v25530_v45  ;;  %v5593_v3 = vadd.f32 %v25378_v51, %v4977_v50  ;;  %v6295_v29 = vmax.f32 %v6263_v54, 0.0  ;;  %v22582_v1 = vld [vmem:[%s28544_s29 + $0x40] ss:$8 sps:$4 sm:$0xff]   ;;  %v22590_v23 = vld [vmem:[%s28544_s29 + $0x54] ss:$8 sps:$4 sm:$0xff]  }
 0xb27   : > { %20037 = vmatprep.subr.bf16.mxu1 %v25677_v22  ;;  %20117 = vmatprep.subr.bf16.mxu0 %v25677_v22  ;;  %v6264_v51 = vadd.f32 %v25498_v5, %v6225_v4  ;;  %v25710_v25 = vpack.c.bf16 %v6284_v30, %v6283_v33  ;;  %v22588_v62 = vld [vmem:[%s28544_s29 + $0x50] ss:$8 sps:$4 sm:$0xff]   ;;  %v22596_v8 = vld [vmem:[%s28544_s29 + $0x64] ss:$8 sps:$4 sm:$0xff]   ;;  %v22617_v55 = vld [vmem:[%s28544_s29 + $0xf4] ss:$8 sps:$4 sm:$0xff]  }
 0xb28   : > { %v6209_v48 = vadd.f32 %v25508_v59, %v5593_v3  ;;  %v22615_v0 = vld [vmem:[%s28544_s29 + $0xf0] ss:$8 sps:$4 sm:$0xff]   ;;  %v22618_v12 = vld [vmem:[%s28594_s26 + $0x20] sm:$0xff]  }
 0xb29   : > { %v6296_v59 = vmax.f32 %v6264_v51, 0.0  ;;  %v22619_v49 = vld [vmem:[%s28594_s26] sm:$0xff]  }
 0xb2a   : > { %20038 = vmatpush3.bf16.msra.mxu1 %v25688_v42  ;;  %20118 = vmatpush3.bf16.msra.mxu0 %v25688_v42  ;;  %v6248_v14 = vadd.f32 %v25498_v5, %v6209_v48 }
 0xb2b   : > { %20039 = vmatprep.subr.bf16.mxu1 %v25563_v44  ;;  %20119 = vmatprep.subr.bf16.mxu0 %v25563_v44  ;;  %v25718_v52 = vpack.c.bf16 %v6296_v59, %v6295_v29 }
 0xb2c   : > { %v6280_v27 = vmax.f32 %v6248_v14, 0.0 }
 0xb2e   : > { %20040 = vmatpush3.bf16.msra.mxu1 %v25520_v18  ;;  %20120 = vmatpush3.bf16.msra.mxu0 %v25520_v18  ;;  %v25724_v5 = vpack.c.bf16 %v6280_v27, %v6279_v35 }
 0xb2f   : > { %20041 = vmatprep.subr.bf16.mxu1 %v25702_v39  ;;  %20121 = vmatprep.subr.bf16.mxu0 %v25702_v39 }
 0xb32   : > { %20042 = vmatpush3.bf16.msra.mxu1 %v25710_v25  ;;  %20122 = vmatpush3.bf16.msra.mxu0 %v25710_v25 }
 0xb33   : > { %20043 = vmatprep.subr.bf16.mxu1 %v25553_v17  ;;  %20123 = vmatprep.subr.bf16.mxu0 %v25553_v17 }
 0xb36   : > { %20044 = vmatpush3.bf16.msra.mxu1 %v28593_v26  ;;  %20124 = vmatpush3.bf16.msra.mxu0 %v28593_v26 }
 0xb37   : > { %20045 = vmatprep.subr.bf16.mxu1 %v25718_v52  ;;  %20125 = vmatprep.subr.bf16.mxu0 %v25718_v52 }
 0xb3a   : > { %20046 = vmatpush3.bf16.msra.mxu1 %v25724_v5  ;;  %20126 = vmatpush3.bf16.msra.mxu0 %v25724_v5 }
 0xb3b   : > { %20071 = vmatprep.subr.bf16.mxu1 %v25633_v43 }
 0xb3d   : > { %6408 = vmatmul.mubr.bf16.vlgmr.msra.gmra.mxu1 %v22570_v63  ;;  %6644 = vmatmul.mubr.bf16.vlgmr.msra.gmra.mxu0 %v22585_v56 }
 0xb3e   : > { %20072 = vmatpush3.bf16.msra.mxu1 %v25540_v6  ;;  %6415 = vmatprep.mubr.bf16.mxu1 %v22575_v57 }
 0xb3f   : > { %20073 = vmatprep.subr.bf16.mxu1 %v25640_v38  ;;  %6651 = vmatprep.mubr.bf16.mxu0 %v22593_v41 }
 0xb42   : > { %20074 = vmatpush3.bf16.msra.mxu1 %v25659_v53 }
 0xb43   : > { %20075 = vmatprep.subr.bf16.mxu1 %v25582_v19 }
 0xb45   : > { %6416 = vmatmul.mubr.bf16.gmra.mxu1 %v22573_v31  ;;  %6652 = vmatmul.mubr.bf16.gmra.mxu0 %v22591_v10 }
 0xb46   : > { %20076 = vmatpush3.bf16.msra.mxu1 %v25530_v45  ;;  %6423 = vmatprep.mubr.bf16.mxu1 %v22578_v32 }
 0xb47   : > { %20077 = vmatprep.subr.bf16.mxu1 %v25677_v22  ;;  %6659 = vmatprep.mubr.bf16.mxu0 %v22599_v13 }
 0xb4a   : > { %20078 = vmatpush3.bf16.msra.mxu1 %v25688_v42 }
 0xb4b   : > { %20079 = vmatprep.subr.bf16.mxu1 %v25563_v44 }
 0xb4d   : > { %6424 = vmatmul.mubr.bf16.gmra.mxu1 %v22576_v40  ;;  %6660 = vmatmul.mubr.bf16.gmra.mxu0 %v22597_v16 }
 0xb4e   : > { %20080 = vmatpush3.bf16.msra.mxu1 %v25520_v18  ;;  %6431 = vmatprep.mubr.bf16.mxu1 %v22581_v15 }
 0xb4f   : > { %20081 = vmatprep.subr.bf16.mxu1 %v25702_v39  ;;  %6667 = vmatprep.mubr.bf16.mxu0 %v22605_v7 }
 0xb52   : > { %20082 = vmatpush3.bf16.msra.mxu1 %v25710_v25 }
 0xb53   : > { %20083 = vmatprep.subr.bf16.mxu1 %v25553_v17 }
 0xb55   : > { %6432 = vmatmul.mubr.bf16.gmra.mxu1 %v22579_v2  ;;  %6668 = vmatmul.mubr.bf16.gmra.mxu0 %v22603_v11 }
 0xb56   : > { %20084 = vmatpush3.bf16.msra.mxu1 %v28593_v26  ;;  %6521 = vmatprep.mubr.bf16.mxu1 %v22584_v37 }
 0xb57   : > { %20085 = vmatprep.subr.bf16.mxu1 %v25718_v52  ;;  %21155 = vmatprep.mubr.msk.bf16.mxu0 %vm6838_vm2, %v22619_v49 }
 0xb5a   : > { %20086 = vmatpush3.bf16.msra.mxu1 %v25724_v5 }
 0xb5b   : > { %20151 = vmatprep.subr.bf16.mxu1 %v25633_v43  ;;  %v22602_v43 = vld [vmem:[%s28544_s29 + $0x74] ss:$8 sps:$4 sm:$0xff]  }
 0xb5d   : > { %6522 = vmatmul.mubr.bf16.vlgmr.msra.gmra.mxu1 %v22582_v1 }
 0xb5e   : > { %20152 = vmatpush3.bf16.msra.mxu1 %v25540_v6  ;;  %6529 = vmatprep.mubr.bf16.mxu1 %v22590_v23  ;;  %v22594_v6 = vld [vmem:[%s28544_s29 + $0x60] ss:$8 sps:$4 sm:$0xff]  }
 0xb5f   : > { %20153 = vmatprep.subr.bf16.mxu1 %v25640_v38  ;;  %v22614_v38 = vld [vmem:[%s28544_s29 + $0xe4] ss:$8 sps:$4 sm:$0xff]  }
 0xb62   : > { %20154 = vmatpush3.bf16.msra.mxu1 %v25659_v53  ;;  %v22612_v53 = vld [vmem:[%s28544_s29 + $0xe0] ss:$8 sps:$4 sm:$0xff]  }
 0xb63   : > { %20155 = vmatprep.subr.bf16.mxu1 %v25582_v19  ;;  %v22608_v19 = vld [vmem:[%s28544_s29 + $0xc4] ss:$8 sps:$4 sm:$0xff]  }
 0xb65   : > { %6530 = vmatmul.mubr.bf16.gmra.mxu1 %v22588_v62 }
 0xb66   : > { %20156 = vmatpush3.bf16.msra.mxu1 %v25530_v45  ;;  %6537 = vmatprep.mubr.bf16.mxu1 %v22596_v8  ;;  %v22600_v45 = vld [vmem:[%s28544_s29 + $0x70] ss:$8 sps:$4 sm:$0xff]  }
 0xb67   : > { %20157 = vmatprep.subr.bf16.mxu1 %v25677_v22 }
 0xb6a   : > { %20158 = vmatpush3.bf16.msra.mxu1 %v25688_v42 }
 0xb6b   : > { %20159 = vmatprep.subr.bf16.mxu1 %v25563_v44  ;;  %v22611_v44 = vld [vmem:[%s28544_s29 + $0xd4] ss:$8 sps:$4 sm:$0xff]  }
 0xb6d   : > { %6538 = vmatmul.mubr.bf16.gmra.mxu1 %v22594_v6 }
 0xb6e   : > { %20160 = vmatpush3.bf16.msra.mxu1 %v25520_v18  ;;  %6545 = vmatprep.mubr.bf16.mxu1 %v22602_v43  ;;  %v22606_v18 = vld [vmem:[%s28544_s29 + $0xc0] ss:$8 sps:$4 sm:$0xff]  }
 0xb6f   : > { %20161 = vmatprep.subr.bf16.mxu1 %v25702_v39 }
 0xb72   : > { %20162 = vmatpush3.bf16.msra.mxu1 %v25710_v25 }
 0xb73   : > { %20163 = vmatprep.subr.bf16.mxu1 %v25553_v17  ;;  %v22609_v17 = vld [vmem:[%s28544_s29 + $0xd0] ss:$8 sps:$4 sm:$0xff]  }
 0xb75   : > { %6546 = vmatmul.mubr.bf16.gmra.mxu1 %v22600_v45 }
 0xb76   : > { %20164 = vmatpush3.bf16.msra.mxu1 %v28593_v26  ;;  %6765 = vmatprep.mubr.bf16.mxu1 %v22608_v19 }
 0xb77   : > { %20165 = vmatprep.subr.bf16.mxu1 %v25718_v52 }
 0xb7a   : > { %20166 = vmatpush3.bf16.msra.mxu1 %v25724_v5 }
 0xb7d   : > { %6766 = vmatmul.mubr.bf16.vlgmr.msra.gmra.mxu1 %v22606_v18 }
 0xb7e   : > { %6773 = vmatprep.mubr.bf16.mxu1 %v22611_v44 }
 0xb85   : > { %6774 = vmatmul.mubr.bf16.gmra.mxu1 %v22609_v17 }
 0xb86   : > { %6781 = vmatprep.mubr.bf16.mxu1 %v22614_v38 }
 0xb8d   : > { %6782 = vmatmul.mubr.bf16.gmra.mxu1 %v22612_v53 }
 0xb8e   : > { %6789 = vmatprep.mubr.bf16.mxu1 %v22617_v55 }
 0xb95   : > { %6790 = vmatmul.mubr.bf16.gmra.mxu1 %v22615_v0 }
 0xb96   : > { %21171 = vmatprep.mubr.msk.bf16.mxu1 %vm6838_vm2, %v22618_v12 }
 0xbfd   : > { %v20047_v22 = vpop.f32.mrf.mxu1  ;;  %v20127_v39 = vpop.f32.mrf.mxu0 }
 0xbff   : > { %v20048_v60 = vpop.f32.mrf.mxu1  ;;  %v20128_v14 = vpop.f32.mrf.mxu0 }
 0xc00   : > { %v20049_v61 = vadd.f32 %v20048_v60, %v20047_v22  ;;  %v20129_v43 = vadd.f32 %v20128_v14, %v20127_v39 }
 0xc01   : > { %v20050_v36 = vpop.f32.mrf.mxu1  ;;  %v20130_v29 = vpop.f32.mrf.mxu0 }
 0xc03   : > { %v20051_v21 = vpop.f32.mrf.mxu1  ;;  %v20131_v63 = vpop.f32.mrf.mxu0 }
 0xc04   : > { %v20052_v35 = vadd.f32 %v20051_v21, %v20050_v36  ;;  %v20132_v19 = vadd.f32 %v20131_v63, %v20130_v29 }
 0xc05   : > { %v20053_v28 = vpop.f32.mrf.mxu1  ;;  %v20133_v41 = vpop.f32.mrf.mxu0 }
 0xc07   : > { %v20054_v47 = vpop.f32.mrf.mxu1  ;;  %v20134_v32 = vpop.f32.mrf.mxu0 }
 0xc08   : > { %v25858_v50 = vadd.f32 %v20054_v47, %v20053_v28  ;;  %v20135_v28 = vadd.f32 %v20134_v32, %v20133_v41 }
 0xc09   : > { %v20056_v46 = vpop.f32.mrf.mxu1  ;;  %v20136_v16 = vpop.f32.mrf.mxu0 }
 0xc0b   : > { %v20057_v42 = vpop.f32.mrf.mxu1  ;;  %v20137_v2 = vpop.f32.mrf.mxu0 }
 0xc0d   : > { %v20059_v4 = vpop.f32.mrf.mxu1  ;;  %v20139_v1 = vpop.f32.mrf.mxu0 }
 0xc0f   : > { %v20060_v24 = vpop.f32.mrf.mxu1  ;;  %v20140_v8 = vpop.f32.mrf.mxu0 }
 0xc10   : > { %v25860_v3 = vadd.f32 %v20060_v24, %v20059_v4  ;;  %v20141_v63 = vadd.f32 %v20140_v8, %v20139_v1 }
 0xc11   : > { %v25862_v34 = vpop.f32.mrf.mxu1  ;;  %v20142_v18 = vpop.f32.mrf.mxu0 }
 0xc13   : > { %v25864_v20 = vpop.f32.mrf.mxu1  ;;  %v20143_v22 = vpop.f32.mrf.mxu0 }
 0xc14   : > { %v20144_v41 = vadd.f32 %v20143_v22, %v20142_v18  ;;  %v22623_v22 = vld [vmem:[%s28390_s13 + $0x30] sm:$0xff]  }
 0xc15   : > { %v20065_v58 = vpop.f32.mrf.mxu1  ;;  %v20145_v39 = vpop.f32.mrf.mxu0 }
 0xc17   : > { %v20066_v48 = vpop.f32.mrf.mxu1 }
 0xc18   : > { %v25866_v30 = vadd.f32 %v20066_v48, %v20065_v58  ;;  %v20138_v58 = vadd.f32 %v20137_v2, %v20136_v16 }
 0xc19   : > { %v25868_v51 = vpop.f32.mrf.mxu1 }
 0xc1b   : > { %v25870_v33 = vpop.f32.mrf.mxu1 }
 0xc1d   : > { %v20087_v54 = vpop.f32.mrf.mxu1 }
 0xc1f   : > { %v20088_v25 = vpop.f32.mrf.mxu1 }
 0xc20   : > { %v20089_v59 = vadd.f32 %v20088_v25, %v20087_v54 }
 0xc21   : > { %v20090_v9 = vpop.f32.mrf.mxu1 }
 0xc22   : > { %v6554_v27 = vmax.f32 %v20049_v61, %v20089_v59  ;;  %v20058_v61 = vadd.f32 %v20057_v42, %v20056_v46  ;;  %v20146_v46 = vpop.f32.mrf.mxu0 }
 0xc23   : > { %v20091_v52 = vpop.f32.mrf.mxu1 }
 0xc24   : > { %v20092_v26 = vadd.f32 %v20091_v52, %v20090_v9  ;;  %v6676_v38 = vmax.f32 %v6554_v27, %v20129_v43  ;;  %v20147_v43 = vadd.f32 %v20146_v46, %v20145_v39 }
 0xc25   : > { %v20093_v5 = vpop.f32.mrf.mxu1 }
 0xc26   : > { %v6555_v56 = vmax.f32 %v20052_v35, %v20092_v26  ;;  %v20064_v35 = vadd.f32 %v25864_v20, %v25862_v34 }
 0xc27   : > { %v20094_v57 = vpop.f32.mrf.mxu1 }
 0xc28   : > { %v6677_v55 = vmax.f32 %v6555_v56, %v20132_v19  ;;  %v20095_v0 = vadd.f32 %v20094_v57, %v20093_v5 }
 0xc29   : > { %v20096_v31 = vpop.f32.mrf.mxu1 }
 0xc2a   : > { %v6556_v4 = vmax.f32 %v25858_v50, %v20095_v0 }
 0xc2b   : > { %v20097_v10 = vpop.f32.mrf.mxu1 }
 0xc2c   : > { %v20098_v12 = vadd.f32 %v20097_v10, %v20096_v31  ;;  %v6678_v9 = vmax.f32 %v6556_v4, %v20135_v28  ;;  %v20148_v10 = vpop.f32.mrf.mxu0  ;;  %v22627_v28 = vld [vmem:[%s28390_s13 + $0x20] sm:$0xff]   ;;  %v22631_v4 = vld [vmem:[%s28390_s13 + $0x10] sm:$0xff]  }
 0xc2d   : > { %v20099_v13 = vpop.f32.mrf.mxu1 }
 0xc2e   : > { %v6557_v24 = vmax.f32 %v20058_v61, %v20098_v12  ;;  %v20149_v34 = vpop.f32.mrf.mxu0  ;;  %v22626_v61 = vld [vmem:[%s28390_s13 + $0x28] sm:$0xff]  }
 0xc2f   : > { %v20100_v40 = vpop.f32.mrf.mxu1 }
 0xc30   : > { %v20101_v25 = vadd.f32 %v20100_v40, %v20099_v13  ;;  %v6679_v29 = vmax.f32 %v6557_v24, %v20138_v58  ;;  %v22632_v24 = vld [vmem:[%s28390_s13 + $0x8] sm:$0xff]   ;;  %v22633_v58 = vld [vmem:[%s28390_s13] sm:$0xff]  }
 0xc31   : > { %v20102_v15 = vpop.f32.mrf.mxu1 }
 0xc32   : > { %v6558_v5 = vmax.f32 %v25860_v3, %v20101_v25  ;;  %v20070_v3 = vadd.f32 %v25870_v33, %v25868_v51  ;;  %v22620_v51 = vld [vmem:[%s28594_s26 + $0x28] sm:$0xff]  }
 0xc33   : > { %v20103_v7 = vpop.f32.mrf.mxu1  ;;  %v22622_v33 = vld [vmem:[%s28594_s26 + $0x8] sm:$0xff]  }
 0xc34   : > { %v20104_v27 = vadd.f32 %v20103_v7, %v20102_v15  ;;  %v6680_v40 = vmax.f32 %v6558_v5, %v20141_v63 }
 0xc35   : > { %v20105_v11 = vpop.f32.mrf.mxu1 }
 0xc36   : > { %v6559_v57 = vmax.f32 %v20064_v35, %v20104_v27 }
 0xc37   : > { %v20106_v37 = vpop.f32.mrf.mxu1 }
 0xc38   : > { %v6681_v15 = vmax.f32 %v6559_v57, %v20144_v41  ;;  %v20107_v7 = vadd.f32 %v20106_v37, %v20105_v11 }
 0xc39   : > { %v20108_v23 = vpop.f32.mrf.mxu1 }
 0xc3a   : > { %v6560_v19 = vmax.f32 %v25866_v30, %v20107_v7  ;;  %v22621_v30 = vld [vmem:[%s28390_s13 + $0x38] sm:$0xff]   ;;  %v22635_v7 = vld [vmem:[%s28594_s26 + $0x48] sm:$0xff]  }
 0xc3b   : > { %v20109_v62 = vpop.f32.mrf.mxu1 }
 0xc3c   : > { %v20110_v2 = vadd.f32 %v20109_v62, %v20108_v23  ;;  %v6682_v37 = vmax.f32 %v6560_v19, %v20147_v43  ;;  %v22643_v43 = vld [vmem:[%s28594_s26 + $0x88] sm:$0xff]   ;;  %v22645_v19 = vld [vmem:[%s28594_s26 + $0x98] sm:$0xff]  }
 0xc3d   : > { %v20167_v6 = vpop.f32.mrf.mxu1 }
 0xc3e   : > { %v6561_v18 = vmax.f32 %v20070_v3, %v20110_v2  ;;  %v22636_v2 = vld [vmem:[%s28594_s26 + $0x50] sm:$0xff]  }
 0xc3f   : > { %v20168_v45 = vpop.f32.mrf.mxu1  ;;  %v22640_v3 = vld [vmem:[%s28594_s26 + $0x70] sm:$0xff]  }
 0xc40   : > { %v20169_v17 = vadd.f32 %v20168_v45, %v20167_v6 }
 0xc41   : > { %v20170_v44 = vpop.f32.mrf.mxu1 }
 0xc42   : > { %v6798_v36 = vmax.f32 %v6676_v38, %v20169_v17 }
 0xc43   : > { %v20171_v53 = vpop.f32.mrf.mxu1 }
 0xc44   : > { %v20172_v49 = vadd.f32 %v20171_v53, %v20170_v44  ;;  %v20150_v44 = vadd.f32 %v20149_v34, %v20148_v10  ;;  %v22638_v34 = vld [vmem:[%s28594_s26 + $0x60] sm:$0xff]  }
 0xc45   : > { %v20173_v60 = vpop.f32.mrf.mxu1 }
 0xc46   : > { %v6799_v21 = vmax.f32 %v6677_v55, %v20172_v49  ;;  %v6683_v23 = vmax.f32 %v6561_v18, %v20150_v44  ;;  %v22624_v49 = vld [vmem:[%s28594_s26 + $0x30] sm:$0xff]   ;;  %v22646_v18 = vld [vmem:[%s28594_s26 + $0xa0] sm:$0xff]   ;;  %v22647_v44 = vld [vmem:[%s28594_s26 + $0xa8] sm:$0xff]  }
 0xc47   : > { %v20174_v47 = vpop.f32.mrf.mxu1 }
 0xc48   : > { %v25873_v48 = vpack.c.bf16 %v6799_v21, %v6798_v36  ;;  %v20175_v14 = vadd.f32 %v20174_v47, %v20173_v60  ;;  %v22628_v60 = vld [vmem:[%s28594_s26 + $0x10] sm:$0xff]   ;;  %v22625_v36 = vld [vmem:[%s28594_s26 + $0x38] sm:$0xff]  }
 0xc49   : > { %v20176_v54 = vpop.f32.mrf.mxu1  ;;  %v22629_v21 = vld [vmem:[%s28594_s26 + $0x18] sm:$0xff]  }
 0xc4a   : > { %v6800_v26 = vmax.f32 %v6678_v9, %v20175_v14  ;;  %v22630_v47 = vld [vmem:[%s28390_s13 + $0x18] sm:$0xff]  }
 0xc4b   : > { %v20177_v59 = vpop.f32.mrf.mxu1 }
 0xc4c   : > { %v20178_v52 = vadd.f32 %v20177_v59, %v20176_v54 }
 0xc4d   : > { %v20179_v42 = vpop.f32.mrf.mxu1 }
 0xc4e   : > { %v6801_v50 = vmax.f32 %v6679_v29, %v20178_v52 }
 0xc4f   : > { %v20180_v56 = vpop.f32.mrf.mxu1 }
 0xc50   : > { %v25878_v31 = vpack.c.bf16 %v6801_v50, %v6800_v26  ;;  %v20181_v13 = vadd.f32 %v20180_v56, %v20179_v42 }
 0xc51   : > { %v20182_v32 = vpop.f32.mrf.mxu1 }
 0xc52   : > { %v6802_v1 = vmax.f32 %v6680_v40, %v20181_v13  ;;  %v22634_v40 = vld [vmem:[%s28594_s26 + $0x40] sm:$0xff]  }
 0xc53   : > { %v20183_v16 = vpop.f32.mrf.mxu1 }
 0xc54   : > { %v20184_v6 = vadd.f32 %v20183_v16, %v20182_v32 }
 0xc55   : > { %v20185_v20 = vpop.f32.mrf.mxu1 }
 0xc56   : > { %v6803_v8 = vmax.f32 %v6681_v15, %v20184_v6  ;;  %v22637_v6 = vld [vmem:[%s28594_s26 + $0x58] sm:$0xff]  }
 0xc57   : > { %v20186_v45 = vpop.f32.mrf.mxu1 }
 0xc58   : > { %v25883_v17 = vpack.c.bf16 %v6803_v8, %v6802_v1  ;;  %v20187_v53 = vadd.f32 %v20186_v45, %v20185_v20  ;;  %v22639_v20 = vld [vmem:[%s28594_s26 + $0x68] sm:$0xff]   ;;  %v22641_v1 = vld [vmem:[%s28594_s26 + $0x78] sm:$0xff]   ;;  %v22642_v8 = vld [vmem:[%s28594_s26 + $0x80] sm:$0xff]  }
 0xc59   : > { %v20188_v38 = vpop.f32.mrf.mxu1  ;;  %v22644_v45 = vld [vmem:[%s28594_s26 + $0x90] sm:$0xff]  }
 0xc5a   : > { %v6804_v55 = vmax.f32 %v6682_v37, %v20187_v53  ;;  %v22649_v53 = vld [vmem:[%s28594_s26 + $0xb8] sm:$0xff]  }
 0xc5b   : > { %v20189_v11 = vpop.f32.mrf.mxu1  ;;  %v22662_v37 = vld [vmem:[%s28390_s13 + $0x58] sm:$0xff]  }
 0xc5c   : > { %v20190_v62 = vadd.f32 %v20189_v11, %v20188_v38  ;;  %v22648_v38 = vld [vmem:[%s28594_s26 + $0xb0] sm:$0xff]   ;;  %v22650_v11 = vld [vmem:[%s28594_s26 + $0xc0] sm:$0xff]  }
 0xc5e   : > { %v6805_v0 = vmax.f32 %v6683_v23, %v20190_v62  ;;  %v22651_v23 = vld [vmem:[%s28594_s26 + $0xc8] sm:$0xff]   ;;  %v22652_v62 = vld [vmem:[%s28594_s26 + $0xd0] sm:$0xff]  }
 0xc60   : > { %v25885_v12 = vpack.c.bf16 %v6805_v0, %v6804_v55  ;;  %v22663_v55 = vld [vmem:[%s28390_s13 + $0x50] sm:$0xff]   ;;  %v22664_v0 = vld [vmem:[%s28390_s13 + $0x48] sm:$0xff]  }
 0xc62   : > { %21147 = vmatprep.subr.bf16.mxu0 %v25885_v12  ;;  %21163 = vmatprep.subr.bf16.mxu1 %v25885_v12 }
 0xc63   : > { %21148 = vmatpush3.bf16.msra.mxu0 %v25885_v12  ;;  %21164 = vmatpush3.bf16.msra.mxu1 %v25885_v12 }
 0xc64   : > { %21149 = vmatprep.subr.bf16.mxu0 %v25883_v17  ;;  %21165 = vmatprep.subr.bf16.mxu1 %v25883_v17 }
 0xc67   : > { %21150 = vmatpush3.bf16.msra.mxu0 %v25883_v17  ;;  %21166 = vmatpush3.bf16.msra.mxu1 %v25883_v17 }
 0xc68   : > { %21151 = vmatprep.subr.bf16.mxu0 %v25878_v31  ;;  %21167 = vmatprep.subr.bf16.mxu1 %v25878_v31 }
 0xc6b   : > { %21152 = vmatpush3.bf16.msra.mxu0 %v25878_v31  ;;  %21168 = vmatpush3.bf16.msra.mxu1 %v25878_v31 }
 0xc6c   : > { %21153 = vmatprep.subr.bf16.mxu0 %v25873_v48  ;;  %21169 = vmatprep.subr.bf16.mxu1 %v25873_v48 }
 0xc6f   : > { %21154 = vmatpush3.bf16.msra.mxu0 %v25873_v48  ;;  %21170 = vmatpush3.bf16.msra.mxu1 %v25873_v48 }
 0xc70   : > { %21179 = vmatprep.subr.bf16.mxu0 %v22621_v30  ;;  %21195 = vmatprep.subr.bf16.mxu1 %v22630_v47 }
 0xc72   : > { %21172 = vmatmul.mubr.msk.bf16.vlgmr.msra.gmra.mxu1 %vm6838_vm2, %v22620_v51  ;;  %21156 = vmatmul.mubr.msk.bf16.vlgmr.msra.gmra.mxu0 %vm6838_vm2, %v22622_v33  ;;  %v22654_v51 = vld [vmem:[%s28594_s26 + $0xe0] sm:$0xff]  }
 0xc73   : > { %21180 = vmatpush3.bf16.msra.mxu0 %v22621_v30  ;;  %21175 = vmatprep.mubr.msk.bf16.mxu1 %vm6838_vm2, %v22624_v49  ;;  %v22653_v30 = vld [vmem:[%s28594_s26 + $0xd8] sm:$0xff]   ;;  %v22665_v33 = vld [vmem:[%s28390_s13 + $0x40] sm:$0xff]  }
 0xc74   : > { %21181 = vmatprep.subr.bf16.mxu0 %v22623_v22  ;;  %21159 = vmatprep.mubr.msk.bf16.mxu0 %vm6838_vm2, %v22628_v60  ;;  %v22666_v49 = vld [vmem:[%s28390_s13 + $0x78] sm:$0xff]   ;;  %v22656_v60 = vld [vmem:[%s28594_s26 + $0xf0] sm:$0xff]  }
 0xc75   : > { %21196 = vmatpush3.bf16.msra.mxu1 %v22630_v47 }
 0xc76   : > { %21197 = vmatprep.subr.bf16.mxu1 %v22631_v4 }
 0xc77   : > { %21182 = vmatpush3.bf16.msra.mxu0 %v22623_v22  ;;  %v22655_v22 = vld [vmem:[%s28594_s26 + $0xe8] sm:$0xff]  }
 0xc78   : > { %21183 = vmatprep.subr.bf16.mxu0 %v22626_v61 }
 0xc79   : > { %21198 = vmatpush3.bf16.msra.mxu1 %v22631_v4 }
 0xc7a   : > { %21176 = vmatmul.mubr.msk.bf16.gmra.mxu1 %vm6838_vm2, %v22625_v36  ;;  %21160 = vmatmul.mubr.msk.bf16.gmra.mxu0 %vm6838_vm2, %v22629_v21  ;;  %v22658_v36 = vld [vmem:[%s28594_s26 + $0x100] sm:$0xff]  }
 0xc7b   : > { %21184 = vmatpush3.bf16.msra.mxu0 %v22626_v61  ;;  %21199 = vmatprep.subr.bf16.mxu1 %v22632_v24  ;;  %v22657_v61 = vld [vmem:[%s28594_s26 + $0xf8] sm:$0xff]  }
 0xc7c   : > { %21185 = vmatprep.subr.bf16.mxu0 %v22627_v28 }
 0xc7d   : > { %21200 = vmatpush3.bf16.msra.mxu1 %v22632_v24 }
 0xc7e   : > { %21201 = vmatprep.subr.bf16.mxu1 %v22633_v58 }
 0xc7f   : > { %21186 = vmatpush3.bf16.msra.mxu0 %v22627_v28 }
 0xc80   : > { %21211 = vmatprep.subr.bf16.mxu0 %v25885_v12 }
 0xc81   : > { %21202 = vmatpush3.bf16.msra.mxu1 %v22633_v58 }
 0xc82   : > { %21227 = vmatprep.subr.bf16.mxu1 %v22662_v37 }
 0xd32   : > { %v21173_v39 = vpop.f32.mrf.mxu1  ;;  %v21157_v54 = vpop.f32.mrf.mxu0 }
 0xd34   : > { %v7003_v14 = vpop.f32.mrf.mxu1  ;;  %v6885_v25 = vpop.f32.mrf.mxu0 }
 0xd36   : > { %v21174_v59 = vpop.f32.mrf.mxu1  ;;  %v21158_v9 = vpop.f32.mrf.mxu0 }
 0xd37   : > { %v6917_v27 = vpack.c.bf16 %v21158_v9, %v21157_v54  ;;  %v7035_v35 = vpack.c.bf16 %v21174_v59, %v21173_v39 }
 0xd38   : > { %v7006_v29 = vpop.f32.mrf.mxu1  ;;  %v6888_v52 = vpop.f32.mrf.mxu0 }
 0xd39   : > { %v7034_v46 = vpack.c.bf16 %v7006_v29, %v7003_v14  ;;  %v6916_v42 = vpack.c.bf16 %v6888_v52, %v6885_v25 }
 0xd3a   : > { %v21177_v26 = vpop.f32.mrf.mxu1  ;;  %v21161_v50 = vpop.f32.mrf.mxu0 }
 0xd3b   : > { %21187 = vmatprep.mubr.msk.bf16.mxu0 %vm6838_vm2, %v7034_v46  ;;  %21203 = vmatprep.mubr.msk.bf16.mxu1 %vm6838_vm2, %v6916_v42 }
 0xd3c   : > { %v7019_v5 = vpop.f32.mrf.mxu1  ;;  %21188 = vmatmul.mubr.msk.bf16.vlgmr.msra.gmra.mxu0 %vm6838_vm2, %v7035_v35  ;;  %v6901_v63 = vpop.f32.mrf.mxu0  ;;  %21204 = vmatmul.mubr.msk.bf16.vlgmr.msra.gmra.mxu1 %vm6838_vm2, %v6917_v27 }
 0xd3d   : > { %21212 = vmatpush3.bf16.msra.mxu0 %v25885_v12  ;;  %21228 = vmatpush3.bf16.msra.mxu1 %v22662_v37 }
 0xd3e   : > { %21213 = vmatprep.subr.bf16.mxu0 %v25883_v17  ;;  %v21178_v56 = vpop.f32.mrf.mxu1  ;;  %v21162_v57 = vpop.f32.mrf.mxu0  ;;  %21229 = vmatprep.subr.bf16.mxu1 %v22663_v55 }
 0xd3f   : > { %v6919_v10 = vpack.c.bf16 %v21162_v57, %v21161_v50  ;;  %v7037_v15 = vpack.c.bf16 %v21178_v56, %v21177_v26 }
 0xd40   : > { %v7022_v41 = vpop.f32.mrf.mxu1  ;;  %v6904_v32 = vpop.f32.mrf.mxu0 }
 0xd41   : > { %v7036_v13 = vpack.c.bf16 %v7022_v41, %v7019_v5  ;;  %21214 = vmatpush3.bf16.msra.mxu0 %v25883_v17  ;;  %v6918_v16 = vpack.c.bf16 %v6904_v32, %v6901_v63  ;;  %21230 = vmatpush3.bf16.msra.mxu1 %v22663_v55 }
 0xd42   : > { %21215 = vmatprep.subr.bf16.mxu0 %v25878_v31  ;;  %21231 = vmatprep.subr.bf16.mxu1 %v22664_v0 }
 0xd43   : > { %21191 = vmatprep.mubr.msk.bf16.mxu0 %vm6838_vm2, %v7036_v13  ;;  %21207 = vmatprep.mubr.msk.bf16.mxu1 %vm6838_vm2, %v6918_v16  ;;  %v22667_v13 = vld [vmem:[%s28390_s13 + $0x70] sm:$0xff]  }
 0xd44   : > { %21192 = vmatmul.mubr.msk.bf16.gmra.mxu0 %vm6838_vm2, %v7037_v15  ;;  %21208 = vmatmul.mubr.msk.bf16.gmra.mxu1 %vm6838_vm2, %v6919_v10  ;;  %v22668_v15 = vld [vmem:[%s28390_s13 + $0x68] sm:$0xff]  }
 0xd45   : > { %21216 = vmatpush3.bf16.msra.mxu0 %v25878_v31  ;;  %21219 = vmatprep.mubr.msk.bf16.mxu0 %vm6838_vm2, %v22634_v40 }
 0xd46   : > { %21217 = vmatprep.subr.bf16.mxu0 %v25873_v48  ;;  %21232 = vmatpush3.bf16.msra.mxu1 %v22664_v0  ;;  %v22673_v0 = vld [vmem:[%s28390_s13 + $0x80] sm:$0xff]  }
 0xd47   : > { %21233 = vmatprep.subr.bf16.mxu1 %v22665_v33 }
 0xd49   : > { %21218 = vmatpush3.bf16.msra.mxu0 %v25873_v48 }
 0xd4a   : > { %21243 = vmatprep.subr.bf16.mxu0 %v25885_v12  ;;  %21234 = vmatpush3.bf16.msra.mxu1 %v22665_v33  ;;  %v22674_v33 = vld [vmem:[%s28390_s13 + $0xb8] sm:$0xff]  }
 0xd4b   : > { %21259 = vmatprep.subr.bf16.mxu1 %v22666_v49 }
 0xd4c   : > { %21220 = vmatmul.mubr.msk.bf16.vlgmr.msra.gmra.mxu0 %vm6838_vm2, %v22635_v7 }
 0xd4d   : > { %21244 = vmatpush3.bf16.msra.mxu0 %v25885_v12  ;;  %21223 = vmatprep.mubr.msk.bf16.mxu0 %vm6838_vm2, %v22636_v2 }
 0xd4e   : > { %21245 = vmatprep.subr.bf16.mxu0 %v25883_v17 }
 0xd51   : > { %21246 = vmatpush3.bf16.msra.mxu0 %v25883_v17 }
 0xd52   : > { %21247 = vmatprep.subr.bf16.mxu0 %v25878_v31 }
 0xd54   : > { %21224 = vmatmul.mubr.msk.bf16.gmra.mxu0 %vm6838_vm2, %v22637_v6 }
 0xd55   : > { %21248 = vmatpush3.bf16.msra.mxu0 %v25878_v31  ;;  %21251 = vmatprep.mubr.msk.bf16.mxu0 %vm6838_vm2, %v22638_v34 }
 0xd56   : > { %21249 = vmatprep.subr.bf16.mxu0 %v25873_v48 }
 0xd59   : > { %21250 = vmatpush3.bf16.msra.mxu0 %v25873_v48 }
 0xd5a   : > { %21275 = vmatprep.subr.bf16.mxu0 %v25885_v12 }
 0xd5c   : > { %21252 = vmatmul.mubr.msk.bf16.vlgmr.msra.gmra.mxu0 %vm6838_vm2, %v22639_v20  ;;  %v22669_v20 = vld [vmem:[%s28390_s13 + $0x60] sm:$0xff]  }
 0xd5d   : > { %21276 = vmatpush3.bf16.msra.mxu0 %v25885_v12  ;;  %21255 = vmatprep.mubr.msk.bf16.mxu0 %vm6838_vm2, %v22640_v3 }
 0xd5e   : > { %21277 = vmatprep.subr.bf16.mxu0 %v25883_v17 }
 0xd61   : > { %21278 = vmatpush3.bf16.msra.mxu0 %v25883_v17 }
 0xd62   : > { %21279 = vmatprep.subr.bf16.mxu0 %v25878_v31 }
 0xd64   : > { %21256 = vmatmul.mubr.msk.bf16.gmra.mxu0 %vm6838_vm2, %v22641_v1 }
 0xd65   : > { %21280 = vmatpush3.bf16.msra.mxu0 %v25878_v31  ;;  %21283 = vmatprep.mubr.msk.bf16.mxu0 %vm6838_vm2, %v22642_v8  ;;  %v22670_v8 = vld [vmem:[%s28390_s13 + $0x98] sm:$0xff]  }
 0xd66   : > { %21281 = vmatprep.subr.bf16.mxu0 %v25873_v48 }
 0xd69   : > { %21282 = vmatpush3.bf16.msra.mxu0 %v25873_v48 }
 0xd6a   : > { %21307 = vmatprep.subr.bf16.mxu0 %v25885_v12 }
 0xd6c   : > { %21284 = vmatmul.mubr.msk.bf16.vlgmr.msra.gmra.mxu0 %vm6838_vm2, %v22643_v43 }
 0xd6d   : > { %21308 = vmatpush3.bf16.msra.mxu0 %v25885_v12  ;;  %21287 = vmatprep.mubr.msk.bf16.mxu0 %vm6838_vm2, %v22644_v45 }
 0xd6e   : > { %21309 = vmatprep.subr.bf16.mxu0 %v25883_v17 }
 0xd71   : > { %21310 = vmatpush3.bf16.msra.mxu0 %v25883_v17 }
 0xd72   : > { %21311 = vmatprep.subr.bf16.mxu0 %v25878_v31 }
 0xd74   : > { %21288 = vmatmul.mubr.msk.bf16.gmra.mxu0 %vm6838_vm2, %v22645_v19 }
 0xd75   : > { %21312 = vmatpush3.bf16.msra.mxu0 %v25878_v31  ;;  %21315 = vmatprep.mubr.msk.bf16.mxu0 %vm6838_vm2, %v22646_v18 }
 0xd76   : > { %21313 = vmatprep.subr.bf16.mxu0 %v25873_v48 }
 0xd79   : > { %21314 = vmatpush3.bf16.msra.mxu0 %v25873_v48 }
 0xd7a   : > { %21339 = vmatprep.subr.bf16.mxu0 %v25885_v12 }
 0xd7c   : > { %21316 = vmatmul.mubr.msk.bf16.vlgmr.msra.gmra.mxu0 %vm6838_vm2, %v22647_v44  ;;  %v22671_v44 = vld [vmem:[%s28390_s13 + $0x90] sm:$0xff]  }
 0xd7d   : > { %21340 = vmatpush3.bf16.msra.mxu0 %v25885_v12  ;;  %21319 = vmatprep.mubr.msk.bf16.mxu0 %vm6838_vm2, %v22648_v38 }
 0xd7e   : > { %21341 = vmatprep.subr.bf16.mxu0 %v25883_v17 }
 0xd81   : > { %21342 = vmatpush3.bf16.msra.mxu0 %v25883_v17 }
 0xd82   : > { %21343 = vmatprep.subr.bf16.mxu0 %v25878_v31 }
 0xd84   : > { %21320 = vmatmul.mubr.msk.bf16.gmra.mxu0 %vm6838_vm2, %v22649_v53 }
 0xd85   : > { %21344 = vmatpush3.bf16.msra.mxu0 %v25878_v31  ;;  %21347 = vmatprep.mubr.msk.bf16.mxu0 %vm6838_vm2, %v22650_v11  ;;  %v22672_v11 = vld [vmem:[%s28390_s13 + $0x88] sm:$0xff]  }
 0xd86   : > { %21345 = vmatprep.subr.bf16.mxu0 %v25873_v48 }
 0xd89   : > { %21346 = vmatpush3.bf16.msra.mxu0 %v25873_v48 }
 0xd8a   : > { %21371 = vmatprep.subr.bf16.mxu0 %v25885_v12 }
 0xd8c   : > { %21348 = vmatmul.mubr.msk.bf16.vlgmr.msra.gmra.mxu0 %vm6838_vm2, %v22651_v23 }
 0xd8d   : > { %21372 = vmatpush3.bf16.msra.mxu0 %v25885_v12  ;;  %21351 = vmatprep.mubr.msk.bf16.mxu0 %vm6838_vm2, %v22652_v62 }
 0xd8e   : > { %21373 = vmatprep.subr.bf16.mxu0 %v25883_v17 }
 0xd91   : > { %21374 = vmatpush3.bf16.msra.mxu0 %v25883_v17 }
 0xd92   : > { %21375 = vmatprep.subr.bf16.mxu0 %v25878_v31 }
 0xd94   : > { %21352 = vmatmul.mubr.msk.bf16.gmra.mxu0 %vm6838_vm2, %v22653_v30 }
 0xd95   : > { %21376 = vmatpush3.bf16.msra.mxu0 %v25878_v31  ;;  %21379 = vmatprep.mubr.msk.bf16.mxu0 %vm6838_vm2, %v22654_v51 }
 0xd96   : > { %21377 = vmatprep.subr.bf16.mxu0 %v25873_v48 }
 0xd99   : > { %21378 = vmatpush3.bf16.msra.mxu0 %v25873_v48 }
 0xd9a   : > { %21403 = vmatprep.subr.bf16.mxu0 %v25885_v12 }
 0xd9c   : > { %21380 = vmatmul.mubr.msk.bf16.vlgmr.msra.gmra.mxu0 %vm6838_vm2, %v22655_v22 }
 0xd9d   : > { %21404 = vmatpush3.bf16.msra.mxu0 %v25885_v12  ;;  %21383 = vmatprep.mubr.msk.bf16.mxu0 %vm6838_vm2, %v22656_v60  ;;  %v22659_v12 = vld [vmem:[%s28594_s26 + $0x108] sm:$0xff]  }
 0xd9e   : > { %21405 = vmatprep.subr.bf16.mxu0 %v25883_v17 }
 0xda1   : > { %21406 = vmatpush3.bf16.msra.mxu0 %v25883_v17  ;;  %v22660_v17 = vld [vmem:[%s28594_s26 + $0x110] sm:$0xff]  }
 0xda2   : > { %21407 = vmatprep.subr.bf16.mxu0 %v25878_v31 }
 0xda4   : > { %21384 = vmatmul.mubr.msk.bf16.gmra.mxu0 %vm6838_vm2, %v22657_v61 }
 0xda5   : > { %21408 = vmatpush3.bf16.msra.mxu0 %v25878_v31  ;;  %21411 = vmatprep.mubr.msk.bf16.mxu0 %vm6838_vm2, %v22658_v36  ;;  %v22661_v31 = vld [vmem:[%s28594_s26 + $0x118] sm:$0xff]   ;;  %v22675_v36 = vld [vmem:[%s28390_s13 + $0xb0] sm:$0xff]  }
 0xda6   : > { %21409 = vmatprep.subr.bf16.mxu0 %v25873_v48 }
 0xda9   : > { %21410 = vmatpush3.bf16.msra.mxu0 %v25873_v48 }
 0xdac   : > { %21412 = vmatmul.mubr.msk.bf16.vlgmr.msra.gmra.mxu0 %vm6838_vm2, %v22659_v12 }
 0xdad   : > { %21415 = vmatprep.mubr.msk.bf16.mxu0 %vm6838_vm2, %v22660_v17 }
 0xdb4   : > { %21416 = vmatmul.mubr.msk.bf16.gmra.mxu0 %vm6838_vm2, %v22661_v31  ;;  %v22676_v31 = vld [vmem:[%s28390_s13 + $0xa8] sm:$0xff]  }
 0xdfc   : > { %v21189_v21 = vpop.f32.mrf.mxu0  ;;  %v21205_v28 = vpop.f32.mrf.mxu1 }
 0xdfd   : > { %v26142_v47 = vadd.f32 %v21205_v28, %v21189_v21 }
 0xdfe   : > { %v7117_v4 = vpop.f32.mrf.mxu0  ;;  %v7218_v48 = vpop.f32.mrf.mxu1 }
 0xdff   : > { %v26144_v24 = vadd.f32 %v7218_v48, %v7117_v4 }
 0xe00   : > { %v21190_v58 = vpop.f32.mrf.mxu0  ;;  %v21206_v39 = vpop.f32.mrf.mxu1 }
 0xe01   : > { %v26146_v54 = vadd.f32 %v21206_v39, %v21190_v58  ;;  %v22677_v58 = vld [vmem:[%s28390_s13 + $0xa0] sm:$0xff]  }
 0xe02   : > { %v26148_v14 = vpop.f32.mrf.mxu0  ;;  %v26150_v25 = vpop.f32.mrf.mxu1 }
 0xe04   : > { %v21193_v59 = vpop.f32.mrf.mxu0  ;;  %v21209_v9 = vpop.f32.mrf.mxu1 }
 0xe05   : > { %v26152_v29 = vadd.f32 %v21209_v9, %v21193_v59  ;;  %v22678_v9 = vld [vmem:[%s28390_s13 + $0xd8] sm:$0xff]  }
 0xe06   : > { %v7133_v27 = vpop.f32.mrf.mxu0  ;;  %v7234_v52 = vpop.f32.mrf.mxu1 }
 0xe07   : > { %v26154_v46 = vadd.f32 %v7234_v52, %v7133_v27 }
 0xe08   : > { %v21194_v42 = vpop.f32.mrf.mxu0  ;;  %v21210_v35 = vpop.f32.mrf.mxu1 }
 0xe09   : > { %v26156_v26 = vadd.f32 %v21210_v35, %v21194_v42 }
 0xe0a   : > { %v26158_v50 = vpop.f32.mrf.mxu0 }
 0xe0c   : > { %v21221_v5 = vpop.f32.mrf.mxu0 }
 0xe0e   : > { %v7324_v63 = vpop.f32.mrf.mxu0 }
 0xe10   : > { %v21222_v56 = vpop.f32.mrf.mxu0 }
 0xe11   : > { %v7356_v10 = vpack.c.bf16 %v21222_v56, %v21221_v5  ;;  %v22679_v5 = vld [vmem:[%s28390_s13 + $0xd0] sm:$0xff]  }
 0xe12   : > { %v7327_v57 = vpop.f32.mrf.mxu0 }
 0xe13   : > { %v7355_v41 = vpack.c.bf16 %v7327_v57, %v7324_v63  ;;  %v22680_v57 = vld [vmem:[%s28390_s13 + $0xc8] sm:$0xff]  }
 0xe14   : > { %v21225_v32 = vpop.f32.mrf.mxu0 }
 0xe15   : > { %21235 = vmatprep.mubr.msk.bf16.mxu1 %vm6838_vm2, %v7355_v41 }
 0xe16   : > { %v7340_v40 = vpop.f32.mrf.mxu0  ;;  %21236 = vmatmul.mubr.msk.bf16.vlgmr.msra.gmra.mxu1 %vm6838_vm2, %v7356_v10 }
 0xe17   : > { %21260 = vmatpush3.bf16.msra.mxu1 %v22666_v49 }
 0xe18   : > { %v21226_v16 = vpop.f32.mrf.mxu0  ;;  %21261 = vmatprep.subr.bf16.mxu1 %v22667_v13 }
 0xe19   : > { %v7358_v6 = vpack.c.bf16 %v21226_v16, %v21225_v32 }
 0xe1a   : > { %v7343_v7 = vpop.f32.mrf.mxu0 }
 0xe1b   : > { %v7357_v2 = vpack.c.bf16 %v7343_v7, %v7340_v40  ;;  %21262 = vmatpush3.bf16.msra.mxu1 %v22667_v13  ;;  %v22681_v40 = vld [vmem:[%s28390_s13 + $0xc0] sm:$0xff]   ;;  %v22682_v7 = vld [vmem:[%s28390_s13 + $0xf8] sm:$0xff]  }
 0xe1c   : > { %v21253_v34 = vpop.f32.mrf.mxu0  ;;  %21263 = vmatprep.subr.bf16.mxu1 %v22668_v15 }
 0xe1d   : > { %21239 = vmatprep.mubr.msk.bf16.mxu1 %vm6838_vm2, %v7357_v2 }
 0xe1e   : > { %21240 = vmatmul.mubr.msk.bf16.gmra.mxu1 %vm6838_vm2, %v7358_v6  ;;  %v7552_v3 = vpop.f32.mrf.mxu0 }
 0xe1f   : > { %21264 = vmatpush3.bf16.msra.mxu1 %v22668_v15 }
 0xe20   : > { %v21254_v1 = vpop.f32.mrf.mxu0  ;;  %21265 = vmatprep.subr.bf16.mxu1 %v22669_v20 }
 0xe21   : > { %v7584_v19 = vpack.c.bf16 %v21254_v1, %v21253_v34 }
 0xe22   : > { %v7555_v43 = vpop.f32.mrf.mxu0 }
 0xe23   : > { %v7583_v45 = vpack.c.bf16 %v7555_v43, %v7552_v3  ;;  %21266 = vmatpush3.bf16.msra.mxu1 %v22669_v20  ;;  %v22683_v3 = vld [vmem:[%s28390_s13 + $0xf0] sm:$0xff]   ;;  %v22684_v43 = vld [vmem:[%s28390_s13 + $0xe8] sm:$0xff]  }
 0xe24   : > { %v21257_v18 = vpop.f32.mrf.mxu0  ;;  %21291 = vmatprep.subr.bf16.mxu1 %v22670_v8 }
 0xe25   : > { %21267 = vmatprep.mubr.msk.bf16.mxu1 %vm6838_vm2, %v7583_v45 }
 0xe26   : > { %v7568_v38 = vpop.f32.mrf.mxu0  ;;  %21268 = vmatmul.mubr.msk.bf16.vlgmr.msra.gmra.mxu1 %vm6838_vm2, %v7584_v19 }
 0xe27   : > { %21292 = vmatpush3.bf16.msra.mxu1 %v22670_v8 }
 0xe28   : > { %v21258_v53 = vpop.f32.mrf.mxu0  ;;  %21293 = vmatprep.subr.bf16.mxu1 %v22671_v44 }
 0xe29   : > { %v7586_v62 = vpack.c.bf16 %v21258_v53, %v21257_v18 }
 0xe2a   : > { %v7571_v37 = vpop.f32.mrf.mxu0 }
 0xe2b   : > { %v7585_v23 = vpack.c.bf16 %v7571_v37, %v7568_v38  ;;  %21294 = vmatpush3.bf16.msra.mxu1 %v22671_v44  ;;  %v22685_v38 = vld [vmem:[%s28390_s13 + $0xe0] sm:$0xff]   ;;  %v22686_v37 = vld [vmem:[%s28390_s13 + $0x118] sm:$0xff]  }
 0xe2c   : > { %v21285_v55 = vpop.f32.mrf.mxu0  ;;  %21295 = vmatprep.subr.bf16.mxu1 %v22672_v11 }
 0xe2d   : > { %21271 = vmatprep.mubr.msk.bf16.mxu1 %vm6838_vm2, %v7585_v23 }
 0xe2e   : > { %21272 = vmatmul.mubr.msk.bf16.gmra.mxu1 %vm6838_vm2, %v7586_v62  ;;  %v7780_v30 = vpop.f32.mrf.mxu0 }
 0xe2f   : > { %21296 = vmatpush3.bf16.msra.mxu1 %v22672_v11 }
 0xe30   : > { %v21286_v51 = vpop.f32.mrf.mxu0  ;;  %21297 = vmatprep.subr.bf16.mxu1 %v22673_v0 }
 0xe31   : > { %v7812_v60 = vpack.c.bf16 %v21286_v51, %v21285_v55 }
 0xe32   : > { %v7783_v49 = vpop.f32.mrf.mxu0 }
 0xe33   : > { %v7811_v22 = vpack.c.bf16 %v7783_v49, %v7780_v30  ;;  %21298 = vmatpush3.bf16.msra.mxu1 %v22673_v0  ;;  %v22687_v30 = vld [vmem:[%s28390_s13 + $0x110] sm:$0xff]   ;;  %v22688_v49 = vld [vmem:[%s28390_s13 + $0x108] sm:$0xff]  }
 0xe34   : > { %v21289_v61 = vpop.f32.mrf.mxu0  ;;  %21323 = vmatprep.subr.bf16.mxu1 %v22674_v33 }
 0xe35   : > { %21299 = vmatprep.mubr.msk.bf16.mxu1 %vm6838_vm2, %v7811_v22 }
 0xe36   : > { %v7796_v12 = vpop.f32.mrf.mxu0  ;;  %21300 = vmatmul.mubr.msk.bf16.vlgmr.msra.gmra.mxu1 %vm6838_vm2, %v7812_v60 }
 0xe37   : > { %21324 = vmatpush3.bf16.msra.mxu1 %v22674_v33 }
 0xe38   : > { %v21290_v17 = vpop.f32.mrf.mxu0  ;;  %21325 = vmatprep.subr.bf16.mxu1 %v22675_v36 }
 0xe39   : > { %v7814_v4 = vpack.c.bf16 %v21290_v17, %v21289_v61 }
 0xe3a   : > { %v7799_v21 = vpop.f32.mrf.mxu0 }
 0xe3b   : > { %v7813_v28 = vpack.c.bf16 %v7799_v21, %v7796_v12  ;;  %21326 = vmatpush3.bf16.msra.mxu1 %v22675_v36  ;;  %v22689_v12 = vld [vmem:[%s28390_s13 + $0x100] sm:$0xff]  }
 0xe3c   : > { %v21317_v48 = vpop.f32.mrf.mxu0  ;;  %21327 = vmatprep.subr.bf16.mxu1 %v22676_v31 }
 0xe3d   : > { %21303 = vmatprep.mubr.msk.bf16.mxu1 %vm6838_vm2, %v7813_v28 }
 0xe3e   : > { %21304 = vmatmul.mubr.msk.bf16.gmra.mxu1 %vm6838_vm2, %v7814_v4  ;;  %v8008_v39 = vpop.f32.mrf.mxu0 }
 0xe3f   : > { %21328 = vmatpush3.bf16.msra.mxu1 %v22676_v31 }
 0xe40   : > { %v21318_v59 = vpop.f32.mrf.mxu0  ;;  %21329 = vmatprep.subr.bf16.mxu1 %v22677_v58 }
 0xe41   : > { %v8040_v42 = vpack.c.bf16 %v21318_v59, %v21317_v48 }
 0xe42   : > { %v8011_v27 = vpop.f32.mrf.mxu0 }
 0xe43   : > { %v8039_v52 = vpack.c.bf16 %v8011_v27, %v8008_v39  ;;  %21330 = vmatpush3.bf16.msra.mxu1 %v22677_v58 }
 0xe44   : > { %v21321_v35 = vpop.f32.mrf.mxu0  ;;  %21355 = vmatprep.subr.bf16.mxu1 %v22678_v9 }
 0xe45   : > { %21331 = vmatprep.mubr.msk.bf16.mxu1 %vm6838_vm2, %v8039_v52  ;;  %v23245_v52 = vmov 0.0  }
 0xe46   : > { %v8024_v63 = vpop.f32.mrf.mxu0  ;;  %21332 = vmatmul.mubr.msk.bf16.vlgmr.msra.gmra.mxu1 %vm6838_vm2, %v8040_v42  ;;  %21435 = vmatprep.subr.bf16.mxu0 %v23245_v52  ;;  %v26259_v42 = vpop.f32.mrf.mxu1 }
 0xe47   : > { %21356 = vmatpush3.bf16.msra.mxu1 %v22678_v9  ;;  %21443 = vmatprep.mubr.msk.bf16.mxu0 %vm23246_vm3, %v23245_v52 }
 0xe48   : > { %v21322_v56 = vpop.f32.mrf.mxu0  ;;  %21357 = vmatprep.subr.bf16.mxu1 %v22679_v5 }
 0xe49   : > { %v8042_v32 = vpack.c.bf16 %v21322_v56, %v21321_v35 }
 0xe4a   : > { %v8027_v41 = vpop.f32.mrf.mxu0 }
 0xe4b   : > { %v8041_v10 = vpack.c.bf16 %v8027_v41, %v8024_v63  ;;  %21358 = vmatpush3.bf16.msra.mxu1 %v22679_v5 }
 0xe4c   : > { %v21349_v13 = vpop.f32.mrf.mxu0  ;;  %21359 = vmatprep.subr.bf16.mxu1 %v22680_v57 }
 0xe4d   : > { %21335 = vmatprep.mubr.msk.bf16.mxu1 %vm6838_vm2, %v8041_v10 }
 0xe4e   : > { %21336 = vmatmul.mubr.msk.bf16.gmra.mxu1 %vm6838_vm2, %v8042_v32  ;;  %v8236_v16 = vpop.f32.mrf.mxu0 }
 0xe4f   : > { %21360 = vmatpush3.bf16.msra.mxu1 %v22680_v57 }
 0xe50   : > { %v21350_v15 = vpop.f32.mrf.mxu0  ;;  %21361 = vmatprep.subr.bf16.mxu1 %v22681_v40 }
 0xe51   : > { %v8268_v34 = vpack.c.bf16 %v21350_v15, %v21349_v13 }
 0xe52   : > { %v8239_v2 = vpop.f32.mrf.mxu0 }
 0xe53   : > { %v8267_v6 = vpack.c.bf16 %v8239_v2, %v8236_v16  ;;  %21362 = vmatpush3.bf16.msra.mxu1 %v22681_v40 }
 0xe54   : > { %v21353_v20 = vpop.f32.mrf.mxu0  ;;  %21387 = vmatprep.subr.bf16.mxu1 %v22682_v7 }
 0xe55   : > { %21363 = vmatprep.mubr.msk.bf16.mxu1 %vm6838_vm2, %v8267_v6 }
 0xe56   : > { %v8252_v1 = vpop.f32.mrf.mxu0  ;;  %21364 = vmatmul.mubr.msk.bf16.vlgmr.msra.gmra.mxu1 %vm6838_vm2, %v8268_v34 }
 0xe57   : > { %21388 = vmatpush3.bf16.msra.mxu1 %v22682_v7 }
 0xe58   : > { %v21354_v8 = vpop.f32.mrf.mxu0  ;;  %21389 = vmatprep.subr.bf16.mxu1 %v22683_v3 }
 0xe59   : > { %v8270_v18 = vpack.c.bf16 %v21354_v8, %v21353_v20 }
 0xe5a   : > { %v8255_v45 = vpop.f32.mrf.mxu0 }
 0xe5b   : > { %v8269_v19 = vpack.c.bf16 %v8255_v45, %v8252_v1  ;;  %21390 = vmatpush3.bf16.msra.mxu1 %v22683_v3 }
 0xe5c   : > { %v21381_v44 = vpop.f32.mrf.mxu0  ;;  %21391 = vmatprep.subr.bf16.mxu1 %v22684_v43 }
 0xe5d   : > { %21367 = vmatprep.mubr.msk.bf16.mxu1 %vm6838_vm2, %v8269_v19 }
 0xe5e   : > { %21368 = vmatmul.mubr.msk.bf16.gmra.mxu1 %vm6838_vm2, %v8270_v18  ;;  %v8464_v53 = vpop.f32.mrf.mxu0 }
 0xe5f   : > { %21392 = vmatpush3.bf16.msra.mxu1 %v22684_v43 }
 0xe60   : > { %v21382_v11 = vpop.f32.mrf.mxu0  ;;  %21393 = vmatprep.subr.bf16.mxu1 %v22685_v38 }
 0xe61   : > { %v8496_v55 = vpack.c.bf16 %v21382_v11, %v21381_v44 }
 0xe62   : > { %v8467_v23 = vpop.f32.mrf.mxu0 }
 0xe63   : > { %v8495_v62 = vpack.c.bf16 %v8467_v23, %v8464_v53  ;;  %21394 = vmatpush3.bf16.msra.mxu1 %v22685_v38 }
 0xe64   : > { %v21385_v0 = vpop.f32.mrf.mxu0  ;;  %21419 = vmatprep.subr.bf16.mxu1 %v22686_v37 }
 0xe65   : > { %21395 = vmatprep.mubr.msk.bf16.mxu1 %vm6838_vm2, %v8495_v62 }
 0xe66   : > { %v8480_v51 = vpop.f32.mrf.mxu0  ;;  %21396 = vmatmul.mubr.msk.bf16.vlgmr.msra.gmra.mxu1 %vm6838_vm2, %v8496_v55 }
 0xe67   : > { %21420 = vmatpush3.bf16.msra.mxu1 %v22686_v37 }
 0xe68   : > { %v21386_v33 = vpop.f32.mrf.mxu0  ;;  %21421 = vmatprep.subr.bf16.mxu1 %v22687_v30 }
 0xe69   : > { %v8498_v61 = vpack.c.bf16 %v21386_v33, %v21385_v0 }
 0xe6a   : > { %v8483_v22 = vpop.f32.mrf.mxu0 }
 0xe6b   : > { %v8497_v60 = vpack.c.bf16 %v8483_v22, %v8480_v51  ;;  %21422 = vmatpush3.bf16.msra.mxu1 %v22687_v30 }
 0xe6c   : > { %v21413_v36 = vpop.f32.mrf.mxu0  ;;  %21423 = vmatprep.subr.bf16.mxu1 %v22688_v49 }
 0xe6d   : > { %21399 = vmatprep.mubr.msk.bf16.mxu1 %vm6838_vm2, %v8497_v60 }
 0xe6e   : > { %21400 = vmatmul.mubr.msk.bf16.gmra.mxu1 %vm6838_vm2, %v8498_v61  ;;  %v8692_v17 = vpop.f32.mrf.mxu0 }
 0xe6f   : > { %21424 = vmatpush3.bf16.msra.mxu1 %v22688_v49 }
 0xe70   : > { %v21414_v31 = vpop.f32.mrf.mxu0  ;;  %21425 = vmatprep.subr.bf16.mxu1 %v22689_v12 }
 0xe71   : > { %v8724_v4 = vpack.c.bf16 %v21414_v31, %v21413_v36 }
 0xe72   : > { %v8695_v21 = vpop.f32.mrf.mxu0 }
 0xe73   : > { %v8723_v28 = vpack.c.bf16 %v8695_v21, %v8692_v17  ;;  %21426 = vmatpush3.bf16.msra.mxu1 %v22689_v12 }
 0xe74   : > { %v21417_v48 = vpop.f32.mrf.mxu0  ;;  %21447 = vmatprep.subr.bf16.mxu1 %v23245_v52 }
 0xe75   : > { %21427 = vmatprep.mubr.msk.bf16.mxu1 %vm6838_vm2, %v8723_v28 }
 0xe76   : > { %v8708_v58 = vpop.f32.mrf.mxu0  ;;  %21428 = vmatmul.mubr.msk.bf16.vlgmr.msra.gmra.mxu1 %vm6838_vm2, %v8724_v4 }
 0xe78   : > { %v21418_v39 = vpop.f32.mrf.mxu0 }
 0xe79   : > { %v8726_v27 = vpack.c.bf16 %v21418_v39, %v21417_v48 }
 0xe7a   : > { %v8711_v59 = vpop.f32.mrf.mxu0 }
 0xe7b   : > { %v8725_v9 = vpack.c.bf16 %v8711_v59, %v8708_v58 }
 0xe7d   : > { %21431 = vmatprep.mubr.msk.bf16.mxu1 %vm6838_vm2, %v8725_v9 }
 0xe7e   : > { %21432 = vmatmul.mubr.msk.bf16.gmra.mxu1 %vm6838_vm2, %v8726_v27 }
 0xe7f   : > { %21455 = vmatprep.mubr.msk.bf16.mxu1 %vm23246_vm3, %v23245_v52 }
 0xed6   : > { %v21237_v35 = vpop.f32.mrf.mxu1 }
 0xed7   : > { %v7471_v5 = vadd.f32 %v21237_v35, %v26142_v47 }
 0xed8   : > { %v7438_v63 = vpop.f32.mrf.mxu1 }
 0xed9   : > { %v7469_v56 = vadd.f32 %v7438_v63, %v26144_v24 }
 0xeda   : > { %v21238_v57 = vpop.f32.mrf.mxu1 }
 0xedb   : > { %v7472_v41 = vadd.f32 %v21238_v57, %v26146_v54 }
 0xedc   : > { %v26268_v10 = vpop.f32.mrf.mxu1 }
 0xede   : > { %v21241_v32 = vpop.f32.mrf.mxu1 }
 0xedf   : > { %v7475_v13 = vadd.f32 %v21241_v32, %v26152_v29 }
 0xee0   : > { %v7454_v40 = vpop.f32.mrf.mxu1 }
 0xee1   : > { %v7473_v47 = vadd.f32 %v7454_v40, %v26154_v46 }
 0xee2   : > { %v21242_v16 = vpop.f32.mrf.mxu1 }
 0xee3   : > { %v7476_v15 = vadd.f32 %v21242_v16, %v26156_v26 }
 0xee4   : > { %v7457_v7 = vpop.f32.mrf.mxu1 }
 0xee6   : > { %v21269_v2 = vpop.f32.mrf.mxu1 }
 0xee7   : > { %v7699_v6 = vadd.f32 %v21269_v2, %v7471_v5 }
 0xee8   : > { %v7666_v34 = vpop.f32.mrf.mxu1 }
 0xee9   : > { %v7697_v20 = vadd.f32 %v7666_v34, %v7469_v56 }
 0xeea   : > { %v21270_v24 = vpop.f32.mrf.mxu1 }
 0xeeb   : > { %v7700_v3 = vadd.f32 %v21270_v24, %v7472_v41 }
 0xeec   : > { %v26273_v1 = vpop.f32.mrf.mxu1 }
 0xeee   : > { %v21273_v54 = vpop.f32.mrf.mxu1 }
 0xeef   : > { %v7703_v8 = vadd.f32 %v21273_v54, %v7475_v13 }
 0xef0   : > { %v7682_v43 = vpop.f32.mrf.mxu1 }
 0xef1   : > { %v7701_v45 = vadd.f32 %v7682_v43, %v7473_v47  ;;  %v7238_v47 = vadd.f32 %v26259_v42, %v26158_v50  ;;  %v7222_v43 = vadd.f32 %v26150_v25, %v26148_v14 }
 0xef2   : > { %v21274_v29 = vpop.f32.mrf.mxu1 }
 0xef3   : > { %v7704_v19 = vadd.f32 %v21274_v29, %v7476_v15  ;;  %v7474_v34 = vadd.f32 %v7457_v7, %v7238_v47 }
 0xef4   : > { %v7685_v18 = vpop.f32.mrf.mxu1 }
 0xef5   : > { %v7702_v29 = vadd.f32 %v7685_v18, %v7474_v34  ;;  %v22691_v34 = vld [vmem:[%s28595_s28 + $0x8] sm:$0xff]  }
 0xef6   : > { %v21301_v46 = vpop.f32.mrf.mxu1 }
 0xef7   : > { %v7927_v44 = vadd.f32 %v21301_v46, %v7699_v6 }
 0xef8   : > { %v7894_v38 = vpop.f32.mrf.mxu1 }
 0xef9   : > { %v7925_v26 = vadd.f32 %v7894_v38, %v7697_v20  ;;  %v17686_v20 = vld [vmem:[%s28391_s14] ss:$0 sm:$0xff] }
 0xefa   : > { %v21302_v53 = vpop.f32.mrf.mxu1 }
 0xefb   : > { %v7928_v11 = vadd.f32 %v21302_v53, %v7700_v3 }
 0xefc   : > { %v26275_v37 = vpop.f32.mrf.mxu1 }
 0xefe   : > { %v21305_v23 = vpop.f32.mrf.mxu1 }
 0xeff   : > { %v7931_v15 = vadd.f32 %v21305_v23, %v7703_v8 }
 0xf00   : > { %v7910_v62 = vpop.f32.mrf.mxu1 }
 0xf01   : > { %v7929_v46 = vadd.f32 %v7910_v62, %v7701_v45 }
 0xf02   : > { %v21306_v55 = vpop.f32.mrf.mxu1 }
 0xf03   : > { %v7932_v38 = vadd.f32 %v21306_v55, %v7704_v19 }
 0xf04   : > { %v7913_v0 = vpop.f32.mrf.mxu1 }
 0xf05   : > { %v7930_v7 = vadd.f32 %v7913_v0, %v7702_v29 }
 0xf06   : > { %v21333_v30 = vpop.f32.mrf.mxu1 }
 0xf07   : > { %v8155_v56 = vadd.f32 %v21333_v30, %v7927_v44 }
 0xf08   : > { %v8122_v51 = vpop.f32.mrf.mxu1 }
 0xf09   : > { %v26277_v33 = vadd.f32 %v8122_v51, %v7925_v26  ;;  %v7470_v26 = vadd.f32 %v26268_v10, %v7222_v43 }
 0xf0a   : > { %v21334_v49 = vpop.f32.mrf.mxu1 }
 0xf0b   : > { %v8156_v13 = vadd.f32 %v21334_v49, %v7928_v11  ;;  %v7698_v49 = vadd.f32 %v26273_v1, %v7470_v26 }
 0xf0c   : > { %v26279_v22 = vpop.f32.mrf.mxu1 }
 0xf0d   : > { %v7926_v62 = vadd.f32 %v26275_v37, %v7698_v49 }
 0xf0e   : > { %v21337_v60 = vpop.f32.mrf.mxu1 }
 0xf0f   : > { %v8159_v3 = vadd.f32 %v21337_v60, %v7931_v15 }
 0xf10   : > { %v8138_v61 = vpop.f32.mrf.mxu1 }
 0xf11   : > { %v8157_v53 = vadd.f32 %v8138_v61, %v7929_v46 }
 0xf12   : > { %v21338_v36 = vpop.f32.mrf.mxu1 }
 0xf13   : > { %v8160_v23 = vadd.f32 %v21338_v36, %v7932_v38  ;;  %v8154_v36 = vadd.f32 %v26279_v22, %v7926_v62  ;;  %v22694_v62 = vld [vmem:[%s28596_s25 + $0x8] sm:$0xff]  }
 0xf14   : > { %v8141_v12 = vpop.f32.mrf.mxu1 }
 0xf15   : > { %v8158_v60 = vadd.f32 %v8141_v12, %v7930_v7 }
 0xf16   : > { %v21365_v17 = vpop.f32.mrf.mxu1 }
 0xf17   : > { %v8383_v41 = vadd.f32 %v21365_v17, %v8155_v56 }
 0xf18   : > { %v26281_v31 = vpop.f32.mrf.mxu1 }
 0xf1a   : > { %v21366_v21 = vpop.f32.mrf.mxu1 }
 0xf1b   : > { %v8384_v2 = vadd.f32 %v21366_v21, %v8156_v13 }
 0xf1c   : > { %v8353_v28 = vpop.f32.mrf.mxu1 }
 0xf1e   : > { %v21369_v4 = vpop.f32.mrf.mxu1 }
 0xf1f   : > { %v8387_v50 = vadd.f32 %v21369_v4, %v8159_v3 }
 0xf20   : > { %v8366_v48 = vpop.f32.mrf.mxu1 }
 0xf21   : > { %v8385_v17 = vadd.f32 %v8366_v48, %v8157_v53  ;;  %v8382_v48 = vadd.f32 %v8353_v28, %v8154_v36  ;;  %v22699_v36 = vld [vmem:[%s28392_s15 + $0xe0] ss:$8 sps:$4 sm:$0xff]  }
 0xf22   : > { %v21370_v58 = vpop.f32.mrf.mxu1 }
 0xf23   : > { %v8388_v25 = vadd.f32 %v21370_v58, %v8160_v23 }
 0xf24   : > { %v8369_v39 = vpop.f32.mrf.mxu1 }
 0xf25   : > { %v8386_v21 = vadd.f32 %v8369_v39, %v8158_v60 }
 0xf26   : > { %v21397_v59 = vpop.f32.mrf.mxu1 }
 0xf27   : > { %v8611_v40 = vadd.f32 %v21397_v59, %v8383_v41  ;;  %v8381_v41 = vadd.f32 %v26281_v31, %v26277_v33 }
 0xf28   : > { %v26283_v9 = vpop.f32.mrf.mxu1 }
 0xf2a   : > { %v21398_v27 = vpop.f32.mrf.mxu1 }
 0xf2b   : > { %v8612_v54 = vadd.f32 %v21398_v27, %v8384_v2 }
 0xf2c   : > { %v8581_v35 = vpop.f32.mrf.mxu1 }
 0xf2d   : > { %v8610_v37 = vadd.f32 %v8581_v35, %v8382_v48  ;;  %v22710_v48 = vld [vmem:[%s28392_s15 + $0xb4] ss:$8 sps:$4 sm:$0xff]  }
 0xf2e   : > { %v21401_v5 = vpop.f32.mrf.mxu1 }
 0xf2f   : > { %v8615_v30 = vadd.f32 %v21401_v5, %v8387_v50 }
 0xf30   : > { %v8594_v63 = vpop.f32.mrf.mxu1 }
 0xf31   : > { %v8613_v10 = vadd.f32 %v8594_v63, %v8385_v17 }
 0xf32   : > { %v21402_v57 = vpop.f32.mrf.mxu1 }
 0xf33   : > { %v8616_v0 = vadd.f32 %v21402_v57, %v8388_v25 }
 0xf34   : > { %v8597_v32 = vpop.f32.mrf.mxu1 }
 0xf35   : > { %v8614_v59 = vadd.f32 %v8597_v32, %v8386_v21  ;;  %v22696_v21 = vld [vmem:[%s28392_s15 + $0xf0] ss:$8 sps:$4 sm:$0xff]  }
 0xf36   : > { %v21429_v16 = vpop.f32.mrf.mxu1 }
 0xf37   : > { %v8839_v6 = vadd.f32 %v21429_v16, %v8611_v40  ;;  %v8609_v40 = vadd.f32 %v26283_v9, %v8381_v41  ;;  %v22719_v41 = vld [vmem:[%s28392_s15 + $0x94] ss:$8 sps:$4 sm:$0xff]  }
 0xf38   : > { %v8806_v24 = vpop.f32.mrf.mxu1 }
 0xf39   : > { %v8854_v42 = vadd.f32 %v17686_v20, %v8839_v6  ;;  %v8837_v16 = vadd.f32 %v8806_v24, %v8609_v40  ;;  %v22690_v6 = vld [vmem:[%s28595_s28] sm:$0xff]   ;;  %v22693_v24 = vld [vmem:[%s28595_s28 + $0x18] sm:$0xff]  }
 0xf3a   : > { %v21430_v44 = vpop.f32.mrf.mxu1  ;;  %v22734_v40 = vld [vmem:[%s28392_s15 + $0x34] ss:$8 sps:$4 sm:$0xff]  }
 0xf3b   : > { %v8840_v8 = vadd.f32 %v21430_v44, %v8612_v54  ;;  %v8862_v45 = vmax.f32 %v8854_v42, 0.0  ;;  %v8852_v31 = vadd.f32 %v17686_v20, %v8837_v16  ;;  %v22741_v16 = vld [vmem:[%s28392_s15 + $0x14] ss:$8 sps:$4 sm:$0xff]  }
 0xf3c   : > { %v8809_v11 = vpop.f32.mrf.mxu1 }
 0xf3d   : > { %v8855_v51 = vadd.f32 %v17686_v20, %v8840_v8  ;;  %v8838_v22 = vadd.f32 %v8809_v11, %v8610_v37  ;;  %v8860_v35 = vmax.f32 %v8852_v31, 0.0  ;;  %v22717_v37 = vld [vmem:[%s28392_s15 + $0x90] ss:$8 sps:$4 sm:$0xff]   ;;  %v22744_v31 = vld [vmem:[%s28392_s15 + $0x4] ss:$8 sps:$4 sm:$0xff]  }
 0xf3e   : > { %v21433_v14 = vpop.f32.mrf.mxu1 }
 0xf3f   : > { %v8863_v18 = vmax.f32 %v8855_v51, 0.0  ;;  %v8843_v19 = vadd.f32 %v21433_v14, %v8615_v30  ;;  %v8853_v28 = vadd.f32 %v17686_v20, %v8838_v22  ;;  %v22732_v22 = vld [vmem:[%s28392_s15 + $0x30] ss:$8 sps:$4 sm:$0xff]  }
 0xf40   : > { %v8822_v55 = vpop.f32.mrf.mxu1 }
 0xf41   : > { %v8869_v61 = vpack.c.bf16 %v8863_v18, %v8862_v45  ;;  %v8858_v27 = vadd.f32 %v17686_v20, %v8843_v19  ;;  %v8841_v1 = vadd.f32 %v8822_v55, %v8613_v10  ;;  %v8861_v9 = vmax.f32 %v8853_v28, 0.0  ;;  %v22698_v45 = vld [vmem:[%s28392_s15 + $0xf4] ss:$8 sps:$4 sm:$0xff]   ;;  %v22695_v55 = vld [vmem:[%s28596_s25] sm:$0xff]   ;;  %v22714_v10 = vld [vmem:[%s28392_s15 + $0x70] ss:$8 sps:$4 sm:$0xff]  }
 0xf42   : > { %v21434_v4 = vpop.f32.mrf.mxu1  ;;  %v22716_v18 = vld [vmem:[%s28392_s15 + $0x74] ss:$8 sps:$4 sm:$0xff]   ;;  %v22725_v28 = vld [vmem:[%s28392_s15 + $0x84] ss:$8 sps:$4 sm:$0xff]  }
 0xf43   : > { %v8844_v12 = vadd.f32 %v21434_v4, %v8616_v0  ;;  %v8866_v13 = vmax.f32 %v8858_v27, 0.0  ;;  %v8856_v39 = vadd.f32 %v17686_v20, %v8841_v1  ;;  %v8868_v2 = vpack.c.bf16 %v8861_v9, %v8860_v35  ;;  %v22701_v0 = vld [vmem:[%s28392_s15 + $0xe4] ss:$8 sps:$4 sm:$0xff]   ;;  %v22720_v4 = vld [vmem:[%s28392_s15 + $0x60] ss:$8 sps:$4 sm:$0xff]  }
 0xf44   : > { %v8825_v5 = vpop.f32.mrf.mxu1  ;;  %v22702_v27 = vld [vmem:[%s28392_s15 + $0xd0] ss:$8 sps:$4 sm:$0xff]   ;;  %v22707_v1 = vld [vmem:[%s28392_s15 + $0xc4] ss:$8 sps:$4 sm:$0xff]   ;;  %v22742_v9 = vld [vmem:[%s28392_s15] ss:$8 sps:$4 sm:$0xff]  }
 0xf45   : > { %v8859_v58 = vadd.f32 %v17686_v20, %v8844_v12  ;;  %v8842_v56 = vadd.f32 %v8825_v5, %v8614_v59  ;;  %v8864_v15 = vmax.f32 %v8856_v39, 0.0  ;;  %v22704_v59 = vld [vmem:[%s28392_s15 + $0xd4] ss:$8 sps:$4 sm:$0xff]   ;;  %v22705_v12 = vld [vmem:[%s28392_s15 + $0xc0] ss:$8 sps:$4 sm:$0xff]   ;;  %v23247_v35 = vmov 0  }
 0xf46   : > { %v22708_v5 = vld [vmem:[%s28392_s15 + $0xb0] ss:$8 sps:$4 sm:$0xff]  }
 0xf47   : > { %v8867_v63 = vmax.f32 %v8859_v58, 0.0  ;;  %v8857_v57 = vadd.f32 %v17686_v20, %v8842_v56  ;;  %v22692_v20 = vld [vmem:[%s28595_s28 + $0x10] sm:$0xff]   ;;  %v22713_v58 = vld [vmem:[%s28392_s15 + $0xa4] ss:$8 sps:$4 sm:$0xff]   ;;  %v22711_v56 = vld [vmem:[%s28392_s15 + $0xa0] ss:$8 sps:$4 sm:$0xff]  }
 0xf48   : > { %v22726_v39 = vld [vmem:[%s28392_s15 + $0x50] ss:$8 sps:$4 sm:$0xff]  }
 0xf49   : > { %v8871_v47 = vpack.c.bf16 %v8867_v63, %v8866_v13  ;;  %v8865_v32 = vmax.f32 %v8857_v57, 0.0  ;;  %v22728_v13 = vld [vmem:[%s28392_s15 + $0x54] ss:$8 sps:$4 sm:$0xff]   ;;  %v22731_v63 = vld [vmem:[%s28392_s15 + $0x44] ss:$8 sps:$4 sm:$0xff]  }
 0xf4a   : > { %v22729_v57 = vld [vmem:[%s28392_s15 + $0x40] ss:$8 sps:$4 sm:$0xff]  }
 0xf4b   : > { %21436 = vmatpush3.bf16.msra.mxu0 %v8871_v47  ;;  %21448 = vmatpush3.bf16.msra.mxu1 %v8871_v47  ;;  %v8870_v33 = vpack.c.bf16 %v8865_v32, %v8864_v15  ;;  %v22735_v32 = vld [vmem:[%s28392_s15 + $0x20] ss:$8 sps:$4 sm:$0xff]   ;;  %v22739_v15 = vld [vmem:[%s28392_s15 + $0x10] ss:$8 sps:$4 sm:$0xff]  }
 0xf4c   : > { %21437 = vmatprep.subr.bf16.mxu0 %v23245_v52  ;;  %21449 = vmatprep.subr.bf16.mxu1 %v23245_v52 }
 0xf4f   : > { %21438 = vmatpush3.bf16.msra.mxu0 %v8870_v33  ;;  %21450 = vmatpush3.bf16.msra.mxu1 %v8870_v33 }
 0xf50   : > { %21439 = vmatprep.subr.bf16.mxu0 %v23245_v52  ;;  %21451 = vmatprep.subr.bf16.mxu1 %v23245_v52 }
 0xf53   : > { %21440 = vmatpush3.bf16.msra.mxu0 %v8869_v61  ;;  %21452 = vmatpush3.bf16.msra.mxu1 %v8869_v61 }
 0xf54   : > { %21441 = vmatprep.subr.bf16.mxu0 %v23245_v52  ;;  %21453 = vmatprep.subr.bf16.mxu1 %v23245_v52 }
 0xf57   : > { %21442 = vmatpush3.bf16.msra.mxu0 %v8868_v2  ;;  %21454 = vmatpush3.bf16.msra.mxu1 %v8868_v2 }
 0xf58   : > { %21459 = vmatprep.subr.bf16.mxu0 %v23245_v52  ;;  %21471 = vmatprep.subr.bf16.mxu1 %v23245_v52 }
 0xf5a   : > { %21444 = vmatmul.mubr.msk.bf16.vlgmr.msra.gmra.mxu0 %vm6838_vm2, %v22690_v6  ;;  %21456 = vmatmul.mubr.msk.bf16.vlgmr.msra.gmra.mxu1 %vm6838_vm2, %v22691_v34 }
 0xf5b   : > { %21460 = vmatpush3.bf16.msra.mxu0 %v8871_v47  ;;  %21472 = vmatpush3.bf16.msra.mxu1 %v8871_v47  ;;  %v22737_v47 = vld [vmem:[%s28392_s15 + $0x24] ss:$8 sps:$4 sm:$0xff]  }
 0xf5c   : > { %21461 = vmatprep.subr.bf16.mxu0 %v23245_v52  ;;  %21473 = vmatprep.subr.bf16.mxu1 %v23245_v52 }
 0xf5d   : > { %21467 = vmatprep.mubr.msk.bf16.mxu0 %vm23246_vm3, %v23245_v52  ;;  %21479 = vmatprep.mubr.msk.bf16.mxu1 %vm23246_vm3, %v23245_v52 }
 0xf5f   : > { %21462 = vmatpush3.bf16.msra.mxu0 %v8870_v33  ;;  %21474 = vmatpush3.bf16.msra.mxu1 %v8870_v33  ;;  %v22723_v33 = vld [vmem:[%s28392_s15 + $0x80] ss:$8 sps:$4 sm:$0xff]  }
 0xf60   : > { %21463 = vmatprep.subr.bf16.mxu0 %v23245_v52  ;;  %21475 = vmatprep.subr.bf16.mxu1 %v23245_v52 }
 0xf63   : > { %21464 = vmatpush3.bf16.msra.mxu0 %v8869_v61  ;;  %21476 = vmatpush3.bf16.msra.mxu1 %v8869_v61  ;;  %v22722_v61 = vld [vmem:[%s28392_s15 + $0x64] ss:$8 sps:$4 sm:$0xff]  }
 0xf64   : > { %21465 = vmatprep.subr.bf16.mxu0 %v23245_v52  ;;  %21477 = vmatprep.subr.bf16.mxu1 %v23245_v52 }
 0xf67   : > { %21466 = vmatpush3.bf16.msra.mxu0 %v8868_v2  ;;  %21478 = vmatpush3.bf16.msra.mxu1 %v8868_v2  ;;  %v22748_v2 = vld [vmem:[%s28392_s15 + $0x174] ss:$8 sps:$4 sm:$0xff]  }
 0xf68   : > { %21489 = vmatprep.subr.bf16.mxu1 %v23245_v52  ;;  %21483 = vmatprep.subr.bf16.mxu0 %v23245_v52 }
 0xf6a   : > { %21468 = vmatmul.mubr.msk.bf16.vlgmr.msra.gmra.mxu0 %vm6838_vm2, %v22692_v20  ;;  %21480 = vmatmul.mubr.msk.bf16.vlgmr.msra.gmra.mxu1 %vm6838_vm2, %v22693_v24 }
 0xf6b   : > { %21491 = vmatprep.mubr.msk.bf16.mxu1 %vm23246_vm3, %v23245_v52  ;;  %21485 = vmatprep.mubr.msk.bf16.mxu0 %vm23246_vm3, %v23245_v52 }
0x101a   : > { %v8916_v3 = vpop.f32.mrf.mxu0  ;;  %v8968_v54 = vpop.f32.mrf.mxu1 }
0x101b   : > { %v8975_v26 = vmax.f32 %v8916_v3, %v8968_v54 }
0x101c   : > { %v21445_v43 = vpop.f32.mrf.mxu0  ;;  %v21457_v29 = vpop.f32.mrf.mxu1 }
0x101e   : > { %v8919_v46 = vpop.f32.mrf.mxu0  ;;  %v8971_v44 = vpop.f32.mrf.mxu1 }
0x101f   : > { %v8976_v11 = vmax.f32 %v8919_v46, %v8971_v44  ;;  %v22746_v46 = vld [vmem:[%s28392_s15 + $0x170] ss:$8 sps:$4 sm:$0xff]  }
0x1020   : > { %v21446_v38 = vpop.f32.mrf.mxu0  ;;  %v21458_v50 = vpop.f32.mrf.mxu1 }
0x1021   : > { %v22751_v38 = vld [vmem:[%s28392_s15 + $0x164] ss:$8 sps:$4 sm:$0xff]  }
0x102a   : > { %v9022_v42 = vpop.f32.mrf.mxu0  ;;  %v9076_v8 = vpop.f32.mrf.mxu1 }
0x102b   : > { %v9029_v23 = vmax.f32 %v8975_v26, %v9022_v42  ;;  %v22749_v42 = vld [vmem:[%s28392_s15 + $0x160] ss:$8 sps:$4 sm:$0xff]   ;;  %v22738_v26 = vld [vmem:[%s28596_s25 + $0x10] sm:$0xff]  }
0x102c   : > { %v21469_v7 = vpop.f32.mrf.mxu0  ;;  %v21481_v53 = vpop.f32.mrf.mxu1 }
0x102d   : > { %v9083_v14 = vmax.f32 %v9029_v23, %v9076_v8  ;;  %v22754_v8 = vld [vmem:[%s28392_s15 + $0x154] ss:$8 sps:$4 sm:$0xff]   ;;  %v22752_v7 = vld [vmem:[%s28392_s15 + $0x150] ss:$8 sps:$4 sm:$0xff]   ;;  %v22758_v23 = vld [vmem:[%s28392_s15 + $0x140] ss:$8 sps:$4 sm:$0xff]  }
0x102e   : > { %v9025_v30 = vpop.f32.mrf.mxu0  ;;  %v9079_v51 = vpop.f32.mrf.mxu1  ;;  %v22757_v53 = vld [vmem:[%s28392_s15 + $0x1f4] ss:$8 sps:$4 sm:$0xff]  }
0x102f   : > { %v9030_v49 = vmax.f32 %v8976_v11, %v9025_v30  ;;  %v22760_v11 = vld [vmem:[%s28392_s15 + $0x144] ss:$8 sps:$4 sm:$0xff]   ;;  %v22766_v30 = vld [vmem:[%s28392_s15 + $0x134] ss:$8 sps:$4 sm:$0xff]  }
0x1030   : > { %v21470_v60 = vpop.f32.mrf.mxu0  ;;  %v21482_v17 = vpop.f32.mrf.mxu1 }
0x1031   : > { %v9084_v25 = vmax.f32 %v9030_v49, %v9079_v51  ;;  %v22745_v51 = vld [vmem:[%s28596_s25 + $0x18] sm:$0xff]   ;;  %v22763_v60 = vld [vmem:[%s28392_s15 + $0x1e4] ss:$8 sps:$4 sm:$0xff]  }
0x1032   : > { %v22755_v49 = vld [vmem:[%s28392_s15 + $0x1f0] ss:$8 sps:$4 sm:$0xff]  }
0x1033   : > { %v26345_v19 = vpack.c.bf16 %v9084_v25, %v9083_v14  ;;  %v22764_v17 = vld [vmem:[%s28392_s15 + $0x130] ss:$8 sps:$4 sm:$0xff]   ;;  %v22761_v14 = vld [vmem:[%s28392_s15 + $0x1e0] ss:$8 sps:$4 sm:$0xff]   ;;  %v22769_v25 = vld [vmem:[%s28392_s15 + $0x1d4] ss:$8 sps:$4 sm:$0xff]  }
0x1035   : > { %21490 = vmatpush3.bf16.msra.mxu1 %v26345_v19  ;;  %21484 = vmatpush3.bf16.msra.mxu0 %v26345_v19 }
0x1036   : > { %9305 = vmatprep.subr.bf16.mxu0 %v22698_v45  ;;  %9428 = vmatprep.subr.bf16.mxu1 %v22716_v18  ;;  %v22767_v45 = vld [vmem:[%s28392_s15 + $0x1d0] ss:$8 sps:$4 sm:$0xff]   ;;  %v22772_v18 = vld [vmem:[%s28392_s15 + $0x124] ss:$8 sps:$4 sm:$0xff]  }
0x1038   : > { %21492 = vmatmul.mubr.msk.bf16.vlgmr.msra.gmra.mxu1 %vm9093_vm4, %v22694_v62  ;;  %21486 = vmatmul.mubr.msk.bf16.vlgmr.msra.gmra.mxu0 %vm9093_vm4, %v22695_v55  ;;  %v22775_v62 = vld [vmem:[%s28392_s15 + $0x1c4] ss:$8 sps:$4 sm:$0xff]   ;;  %v22770_v55 = vld [vmem:[%s28392_s15 + $0x120] ss:$8 sps:$4 sm:$0xff]  }
0x1039   : > { %9306 = vmatpush1.bf16.msra.mxu0 %v22696_v21  ;;  %9429 = vmatpush1.bf16.msra.mxu1 %v22714_v10  ;;  %v22773_v21 = vld [vmem:[%s28392_s15 + $0x1c0] ss:$8 sps:$4 sm:$0xff]   ;;  %v22778_v10 = vld [vmem:[%s28392_s15 + $0x114] ss:$8 sps:$4 sm:$0xff]  }
0x103a   : > { %9307 = vmatprep.subr.bf16.mxu0 %v22701_v0  ;;  %9430 = vmatprep.subr.bf16.mxu1 %v22722_v61  ;;  %v22781_v0 = vld [vmem:[%s28392_s15 + $0x1b4] ss:$8 sps:$4 sm:$0xff]   ;;  %v22776_v61 = vld [vmem:[%s28392_s15 + $0x110] ss:$8 sps:$4 sm:$0xff]  }
0x103b   : > { %9337 = vmatprep.mubr.bf16.mxu0 %v23247_v35  ;;  %9460 = vmatprep.mubr.bf16.mxu1 %v23247_v35 }
0x103d   : > { %9308 = vmatpush1.bf16.msra.mxu0 %v22699_v36  ;;  %9431 = vmatpush1.bf16.msra.mxu1 %v22720_v4  ;;  %v22779_v36 = vld [vmem:[%s28392_s15 + $0x1b0] ss:$8 sps:$4 sm:$0xff]   ;;  %v22784_v4 = vld [vmem:[%s28392_s15 + $0x104] ss:$8 sps:$4 sm:$0xff]  }
0x103e   : > { %9309 = vmatprep.subr.bf16.mxu0 %v22704_v59  ;;  %9432 = vmatprep.subr.bf16.mxu1 %v22728_v13  ;;  %v22787_v59 = vld [vmem:[%s28392_s15 + $0x1a4] ss:$8 sps:$4 sm:$0xff]  }
0x1041   : > { %9310 = vmatpush1.bf16.msra.mxu0 %v22702_v27  ;;  %9433 = vmatpush1.bf16.msra.mxu1 %v22726_v39  ;;  %v22782_v27 = vld [vmem:[%s28392_s15 + $0x100] ss:$8 sps:$4 sm:$0xff]  }
0x1042   : > { %9311 = vmatprep.subr.bf16.mxu0 %v22707_v1  ;;  %9434 = vmatprep.subr.bf16.mxu1 %v22731_v63  ;;  %v22785_v1 = vld [vmem:[%s28392_s15 + $0x1a0] ss:$8 sps:$4 sm:$0xff]  }
0x1045   : > { %9312 = vmatpush1.bf16.msra.mxu0 %v22705_v12  ;;  %9435 = vmatpush1.bf16.msra.mxu1 %v22729_v57  ;;  %v22790_v12 = vld [vmem:[%s28392_s15 + $0x194] ss:$8 sps:$4 sm:$0xff]  }
0x1046   : > { %9313 = vmatprep.subr.bf16.mxu0 %v22710_v48  ;;  %9436 = vmatprep.subr.bf16.mxu1 %v22734_v40  ;;  %v22788_v48 = vld [vmem:[%s28392_s15 + $0x190] ss:$8 sps:$4 sm:$0xff]  }
0x1049   : > { %9314 = vmatpush1.bf16.msra.mxu0 %v22708_v5  ;;  %9437 = vmatpush1.bf16.msra.mxu1 %v22732_v22  ;;  %v22793_v5 = vld [vmem:[%s28392_s15 + $0x184] ss:$8 sps:$4 sm:$0xff]  }
0x104a   : > { %9315 = vmatprep.subr.bf16.mxu0 %v22713_v58  ;;  %9438 = vmatprep.subr.bf16.mxu1 %v22737_v47  ;;  %v22791_v58 = vld [vmem:[%s28392_s15 + $0x180] ss:$8 sps:$4 sm:$0xff]  }
0x104d   : > { %9316 = vmatpush1.bf16.msra.mxu0 %v22711_v56  ;;  %9439 = vmatpush1.bf16.msra.mxu1 %v22735_v32 }
0x104e   : > { %9317 = vmatprep.subr.bf16.mxu0 %v22719_v41  ;;  %9440 = vmatprep.subr.bf16.mxu1 %v22741_v16 }
0x1051   : > { %9318 = vmatpush1.bf16.msra.mxu0 %v22717_v37  ;;  %9441 = vmatpush1.bf16.msra.mxu1 %v22739_v15 }
0x1052   : > { %9319 = vmatprep.subr.bf16.mxu0 %v22725_v28  ;;  %9442 = vmatprep.subr.bf16.mxu1 %v22744_v31 }
0x1055   : > { %9320 = vmatpush1.bf16.msra.mxu0 %v22723_v33  ;;  %9443 = vmatpush1.bf16.msra.mxu1 %v22742_v9  ;;  %v22798_v33 = vld [vmem:[%s28392_s15 + $0x274] ss:$8 sps:$4 sm:$0xff]  }
0x1056   : > { %21495 = vmatprep.subr.bf16.mxu0 %v23245_v52  ;;  %9621 = vmatprep.subr.bf16.mxu1 %v22748_v2 }
0x10f8   : > { %v9200_v6 = vpop.f32.mrf.mxu1  ;;  %v9131_v34 = vpop.f32.mrf.mxu0 }
0x10fa   : > { %v21493_v20 = vpop.f32.mrf.mxu1  ;;  %v21487_v24 = vpop.f32.mrf.mxu0 }
0x10fb   : > { %v22796_v24 = vld [vmem:[%s28392_s15 + $0x270] ss:$8 sps:$4 sm:$0xff]  }
0x10fc   : > { %v9203_v3 = vpop.f32.mrf.mxu1  ;;  %v9134_v54 = vpop.f32.mrf.mxu0 }
0x10fd   : > { %v9207_v43 = vpack.c.bf16 %v9203_v3, %v9200_v6  ;;  %v9138_v29 = vpack.c.bf16 %v9134_v54, %v9131_v34  ;;  %v22794_v6 = vld [vmem:[%s28596_s25 + $0x20] sm:$0xff]   ;;  %v22807_v3 = vld [vmem:[%s28392_s15 + $0x2f4] ss:$8 sps:$4 sm:$0xff]  }
0x10fe   : > { %v21494_v44 = vpop.f32.mrf.mxu1  ;;  %v21488_v50 = vpop.f32.mrf.mxu0  ;;  %v22801_v54 = vld [vmem:[%s28392_s15 + $0x264] ss:$8 sps:$4 sm:$0xff]  }
0x10ff   : > { %9338 = vmatmul.mubr.bf16.vlgmr.msra.gmra.mxu0 %v9207_v43  ;;  %9461 = vmatmul.mubr.bf16.vlgmr.msra.gmra.mxu1 %v9138_v29  ;;  %v22799_v29 = vld [vmem:[%s28392_s15 + $0x260] ss:$8 sps:$4 sm:$0xff]   ;;  %v22802_v50 = vld [vmem:[%s28392_s15 + $0x250] ss:$8 sps:$4 sm:$0xff]  }
0x1100   : > { %21496 = vmatpush3.bf16.msra.mxu0 %v26345_v19  ;;  %21497 = vmatprep.mubr.msk.bf16.mxu0 %vm23246_vm3, %v23245_v52  ;;  %v22795_v44 = vld [vmem:[%s28596_s25 + $0x28] sm:$0xff]  }
0x1101   : > { %21501 = vmatprep.subr.bf16.mxu0 %v23245_v52  ;;  %9622 = vmatpush1.bf16.msra.mxu1 %v22746_v46  ;;  %v22804_v46 = vld [vmem:[%s28392_s15 + $0x254] ss:$8 sps:$4 sm:$0xff]  }
0x1102   : > { %9623 = vmatprep.subr.bf16.mxu1 %v22751_v38  ;;  %9653 = vmatprep.mubr.bf16.mxu1 %v23247_v35  ;;  %v22805_v38 = vld [vmem:[%s28392_s15 + $0x2f0] ss:$8 sps:$4 sm:$0xff]  }
0x1105   : > { %9624 = vmatpush1.bf16.msra.mxu1 %v22749_v42  ;;  %v22813_v42 = vld [vmem:[%s28392_s15 + $0x2e4] ss:$8 sps:$4 sm:$0xff]  }
0x1106   : > { %9625 = vmatprep.subr.bf16.mxu1 %v22754_v8  ;;  %v22810_v8 = vld [vmem:[%s28392_s15 + $0x244] ss:$8 sps:$4 sm:$0xff]  }
0x1107   : > { %21498 = vmatmul.mubr.msk.bf16.vlgmr.msra.gmra.mxu0 %vm9093_vm4, %v22738_v26  ;;  %v22811_v26 = vld [vmem:[%s28392_s15 + $0x2e0] ss:$8 sps:$4 sm:$0xff]  }
0x1108   : > { %21502 = vmatpush3.bf16.msra.mxu0 %v26345_v19  ;;  %21503 = vmatprep.mubr.msk.bf16.mxu0 %vm23246_vm3, %v23245_v52 }
0x1109   : > { %9818 = vmatprep.subr.bf16.mxu0 %v22757_v53  ;;  %9626 = vmatpush1.bf16.msra.mxu1 %v22752_v7  ;;  %v22808_v7 = vld [vmem:[%s28392_s15 + $0x240] ss:$8 sps:$4 sm:$0xff]   ;;  %v22819_v53 = vld [vmem:[%s28392_s15 + $0x2d4] ss:$8 sps:$4 sm:$0xff]  }
0x110a   : > { %9627 = vmatprep.subr.bf16.mxu1 %v22760_v11  ;;  %v22816_v11 = vld [vmem:[%s28392_s15 + $0x234] ss:$8 sps:$4 sm:$0xff]  }
0x110d   : > { %9628 = vmatpush1.bf16.msra.mxu1 %v22758_v23  ;;  %v22817_v23 = vld [vmem:[%s28392_s15 + $0x2d0] ss:$8 sps:$4 sm:$0xff]  }
0x110e   : > { %9629 = vmatprep.subr.bf16.mxu1 %v22766_v30  ;;  %v22814_v30 = vld [vmem:[%s28392_s15 + $0x230] ss:$8 sps:$4 sm:$0xff]  }
0x110f   : > { %21504 = vmatmul.mubr.msk.bf16.vlgmr.msra.gmra.mxu0 %vm9093_vm4, %v22745_v51  ;;  %v22822_v51 = vld [vmem:[%s28392_s15 + $0x224] ss:$8 sps:$4 sm:$0xff]  }
0x1110   : > { %9819 = vmatpush1.bf16.msra.mxu0 %v22755_v49  ;;  %9850 = vmatprep.mubr.bf16.mxu0 %v23247_v35  ;;  %v22825_v49 = vld [vmem:[%s28392_s15 + $0x2c4] ss:$8 sps:$4 sm:$0xff]  }
0x1111   : > { %9820 = vmatprep.subr.bf16.mxu0 %v22763_v60  ;;  %9630 = vmatpush1.bf16.msra.mxu1 %v22764_v17  ;;  %v22820_v60 = vld [vmem:[%s28392_s15 + $0x220] ss:$8 sps:$4 sm:$0xff]  }
0x1112   : > { %9631 = vmatprep.subr.bf16.mxu1 %v22772_v18  ;;  %v22823_v17 = vld [vmem:[%s28392_s15 + $0x2c0] ss:$8 sps:$4 sm:$0xff]   ;;  %v22829_v18 = vld [vmem:[%s28392_s15 + $0x2b0] ss:$8 sps:$4 sm:$0xff]  }
0x1114   : > { %9821 = vmatpush1.bf16.msra.mxu0 %v22761_v14  ;;  %v22828_v14 = vld [vmem:[%s28392_s15 + $0x214] ss:$8 sps:$4 sm:$0xff]  }
0x1115   : > { %9822 = vmatprep.subr.bf16.mxu0 %v22769_v25  ;;  %9632 = vmatpush1.bf16.msra.mxu1 %v22770_v55  ;;  %v22831_v25 = vld [vmem:[%s28392_s15 + $0x2b4] ss:$8 sps:$4 sm:$0xff]   ;;  %v22837_v55 = vld [vmem:[%s28392_s15 + $0x2a4] ss:$8 sps:$4 sm:$0xff]  }
0x1116   : > { %9633 = vmatprep.subr.bf16.mxu1 %v22778_v10  ;;  %v22835_v10 = vld [vmem:[%s28392_s15 + $0x2a0] ss:$8 sps:$4 sm:$0xff]  }
0x1118   : > { %9823 = vmatpush1.bf16.msra.mxu0 %v22767_v45  ;;  %v22826_v45 = vld [vmem:[%s28392_s15 + $0x210] ss:$8 sps:$4 sm:$0xff]  }
0x1119   : > { %9824 = vmatprep.subr.bf16.mxu0 %v22775_v62  ;;  %9634 = vmatpush1.bf16.msra.mxu1 %v22776_v61  ;;  %v22834_v62 = vld [vmem:[%s28392_s15 + $0x204] ss:$8 sps:$4 sm:$0xff]   ;;  %v22838_v61 = vld [vmem:[%s28392_s15 + $0x290] ss:$8 sps:$4 sm:$0xff]  }
0x111a   : > { %9635 = vmatprep.subr.bf16.mxu1 %v22784_v4  ;;  %v22841_v4 = vld [vmem:[%s28392_s15 + $0x280] ss:$8 sps:$4 sm:$0xff]  }
0x111c   : > { %9825 = vmatpush1.bf16.msra.mxu0 %v22773_v21  ;;  %v22832_v21 = vld [vmem:[%s28392_s15 + $0x200] ss:$8 sps:$4 sm:$0xff]  }
0x111d   : > { %9826 = vmatprep.subr.bf16.mxu0 %v22781_v0  ;;  %9636 = vmatpush1.bf16.msra.mxu1 %v22782_v27  ;;  %v22840_v0 = vld [vmem:[%s28392_s15 + $0x294] ss:$8 sps:$4 sm:$0xff]  }
0x111e   : > { %21507 = vmatprep.subr.bf16.mxu1 %v23245_v52 }
0x1120   : > { %9827 = vmatpush1.bf16.msra.mxu0 %v22779_v36  ;;  %v22843_v36 = vld [vmem:[%s28392_s15 + $0x284] ss:$8 sps:$4 sm:$0xff]  }
0x1121   : > { %9828 = vmatprep.subr.bf16.mxu0 %v22787_v59 }
0x1124   : > { %9829 = vmatpush1.bf16.msra.mxu0 %v22785_v1 }
0x1125   : > { %9830 = vmatprep.subr.bf16.mxu0 %v22790_v12 }
0x1128   : > { %9831 = vmatpush1.bf16.msra.mxu0 %v22788_v48 }
0x1129   : > { %9832 = vmatprep.subr.bf16.mxu0 %v22793_v5 }
0x112c   : > { %9833 = vmatpush1.bf16.msra.mxu0 %v22791_v58 }
0x112d   : > { %21513 = vmatprep.subr.bf16.mxu0 %v23245_v52 }
0x11bf   : > { %v9339_v56 = vpop.f32.mrf.mxu0  ;;  %v9462_v41 = vpop.f32.mrf.mxu1 }
0x11c0   : > { %v26565_v37 = vadd.f32 %v9462_v41, %v9339_v56 }
0x11c1   : > { %v9341_v13 = vpop.f32.mrf.mxu0  ;;  %v9464_v39 = vpop.f32.mrf.mxu1 }
0x11c2   : > { %v26567_v63 = vadd.f32 %v9464_v39, %v9341_v13 }
0x11c3   : > { %v9343_v57 = vpop.f32.mrf.mxu0  ;;  %v9466_v40 = vpop.f32.mrf.mxu1 }
0x11c4   : > { %v26569_v22 = vadd.f32 %v9466_v40, %v9343_v57 }
0x11c5   : > { %v26571_v47 = vpop.f32.mrf.mxu0  ;;  %v26687_v59 = vpop.f32.mrf.mxu1 }
0x11c7   : > { %v9516_v32 = vpop.f32.mrf.mxu0 }
0x11c9   : > { %v21499_v16 = vpop.f32.mrf.mxu0 }
0x11cb   : > { %v9519_v15 = vpop.f32.mrf.mxu0 }
0x11cc   : > { %v9523_v28 = vpack.c.bf16 %v9519_v15, %v9516_v32 }
0x11cd   : > { %v21500_v31 = vpop.f32.mrf.mxu0 }
0x11ce   : > { %9654 = vmatmul.mubr.bf16.vlgmr.msra.gmra.mxu1 %v9523_v28 }
0x11cf   : > { %21508 = vmatpush3.bf16.msra.mxu1 %v26345_v19  ;;  %v9713_v9 = vpop.f32.mrf.mxu0  ;;  %21509 = vmatprep.mubr.msk.bf16.mxu1 %vm23246_vm3, %v23245_v52 }
0x11d0   : > { %10015 = vmatprep.subr.bf16.mxu1 %v22798_v33 }
0x11d1   : > { %v21505_v2 = vpop.f32.mrf.mxu0 }
0x11d2   : > { %v22844_v2 = vld [vmem:[%s28596_s25 + $0x30] sm:$0xff]  }
0x11d3   : > { %v9716_v34 = vpop.f32.mrf.mxu0 }
0x11d4   : > { %v9720_v20 = vpack.c.bf16 %v9716_v34, %v9713_v9 }
0x11d5   : > { %v21506_v43 = vpop.f32.mrf.mxu0 }
0x11d6   : > { %9851 = vmatmul.mubr.bf16.vlgmr.msra.gmra.mxu0 %v9720_v20  ;;  %21510 = vmatmul.mubr.msk.bf16.vlgmr.msra.gmra.mxu1 %vm9093_vm4, %v22794_v6  ;;  %v22846_v20 = vld [vmem:[%s28392_s15 + $0x370] ss:$8 sps:$4 sm:$0xff]   ;;  %v22849_v43 = vld [vmem:[%s28392_s15 + $0x360] ss:$8 sps:$4 sm:$0xff]  }
0x11d7   : > { %21514 = vmatpush3.bf16.msra.mxu0 %v26345_v19  ;;  %21515 = vmatprep.mubr.msk.bf16.mxu0 %vm23246_vm3, %v23245_v52 }
0x11d8   : > { %10016 = vmatpush1.bf16.msra.mxu1 %v22796_v24  ;;  %10212 = vmatprep.subr.bf16.mxu0 %v22807_v3  ;;  %v22857_v24 = vld [vmem:[%s28392_s15 + $0x3f4] ss:$8 sps:$4 sm:$0xff]   ;;  %v22851_v3 = vld [vmem:[%s28392_s15 + $0x364] ss:$8 sps:$4 sm:$0xff]  }
0x11d9   : > { %10017 = vmatprep.subr.bf16.mxu1 %v22801_v54  ;;  %10047 = vmatprep.mubr.bf16.mxu1 %v23247_v35 }
0x11dc   : > { %10018 = vmatpush1.bf16.msra.mxu1 %v22799_v29  ;;  %v22854_v29 = vld [vmem:[%s28392_s15 + $0x354] ss:$8 sps:$4 sm:$0xff]  }
0x11dd   : > { %10019 = vmatprep.subr.bf16.mxu1 %v22804_v46  ;;  %v22845_v46 = vld [vmem:[%s28596_s25 + $0x38] sm:$0xff]  }
0x11de   : > { %21516 = vmatmul.mubr.msk.bf16.vlgmr.msra.gmra.mxu0 %vm9093_vm4, %v22795_v44  ;;  %v22855_v44 = vld [vmem:[%s28392_s15 + $0x3f0] ss:$8 sps:$4 sm:$0xff]  }
0x11df   : > { %10213 = vmatpush1.bf16.msra.mxu0 %v22805_v38  ;;  %10244 = vmatprep.mubr.bf16.mxu0 %v23247_v35  ;;  %v22852_v38 = vld [vmem:[%s28392_s15 + $0x350] ss:$8 sps:$4 sm:$0xff]  }
0x11e0   : > { %10020 = vmatpush1.bf16.msra.mxu1 %v22802_v50  ;;  %10214 = vmatprep.subr.bf16.mxu0 %v22813_v42  ;;  %v22863_v50 = vld [vmem:[%s28392_s15 + $0x3e4] ss:$8 sps:$4 sm:$0xff]  }
0x11e1   : > { %10021 = vmatprep.subr.bf16.mxu1 %v22810_v8  ;;  %v22860_v42 = vld [vmem:[%s28392_s15 + $0x344] ss:$8 sps:$4 sm:$0xff]   ;;  %v22861_v8 = vld [vmem:[%s28392_s15 + $0x3e0] ss:$8 sps:$4 sm:$0xff]  }
0x11e3   : > { %10215 = vmatpush1.bf16.msra.mxu0 %v22811_v26  ;;  %v22858_v26 = vld [vmem:[%s28392_s15 + $0x340] ss:$8 sps:$4 sm:$0xff]  }
0x11e4   : > { %10022 = vmatpush1.bf16.msra.mxu1 %v22808_v7  ;;  %10216 = vmatprep.subr.bf16.mxu0 %v22819_v53  ;;  %v22869_v7 = vld [vmem:[%s28392_s15 + $0x3d4] ss:$8 sps:$4 sm:$0xff]  }
0x11e5   : > { %10023 = vmatprep.subr.bf16.mxu1 %v22816_v11  ;;  %v22866_v53 = vld [vmem:[%s28392_s15 + $0x334] ss:$8 sps:$4 sm:$0xff]   ;;  %v22867_v11 = vld [vmem:[%s28392_s15 + $0x3d0] ss:$8 sps:$4 sm:$0xff]  }
0x11e7   : > { %10217 = vmatpush1.bf16.msra.mxu0 %v22817_v23  ;;  %v22864_v23 = vld [vmem:[%s28392_s15 + $0x330] ss:$8 sps:$4 sm:$0xff]  }
0x11e8   : > { %10024 = vmatpush1.bf16.msra.mxu1 %v22814_v30  ;;  %10218 = vmatprep.subr.bf16.mxu0 %v22825_v49  ;;  %v22872_v30 = vld [vmem:[%s28392_s15 + $0x324] ss:$8 sps:$4 sm:$0xff]  }
0x11e9   : > { %10025 = vmatprep.subr.bf16.mxu1 %v22822_v51  ;;  %v22870_v51 = vld [vmem:[%s28392_s15 + $0x320] ss:$8 sps:$4 sm:$0xff]   ;;  %v22875_v49 = vld [vmem:[%s28392_s15 + $0x3c4] ss:$8 sps:$4 sm:$0xff]  }
0x11eb   : > { %10219 = vmatpush1.bf16.msra.mxu0 %v22823_v17  ;;  %v22878_v17 = vld [vmem:[%s28392_s15 + $0x314] ss:$8 sps:$4 sm:$0xff]  }
0x11ec   : > { %10026 = vmatpush1.bf16.msra.mxu1 %v22820_v60  ;;  %10220 = vmatprep.subr.bf16.mxu0 %v22831_v25  ;;  %v22873_v60 = vld [vmem:[%s28392_s15 + $0x3c0] ss:$8 sps:$4 sm:$0xff]   ;;  %v22881_v25 = vld [vmem:[%s28392_s15 + $0x3b4] ss:$8 sps:$4 sm:$0xff]  }
0x11ed   : > { %10027 = vmatprep.subr.bf16.mxu1 %v22828_v14  ;;  %v22876_v14 = vld [vmem:[%s28392_s15 + $0x310] ss:$8 sps:$4 sm:$0xff]  }
0x11ef   : > { %10221 = vmatpush1.bf16.msra.mxu0 %v22829_v18  ;;  %v22884_v18 = vld [vmem:[%s28392_s15 + $0x304] ss:$8 sps:$4 sm:$0xff]  }
0x11f0   : > { %10028 = vmatpush1.bf16.msra.mxu1 %v22826_v45  ;;  %10222 = vmatprep.subr.bf16.mxu0 %v22837_v55  ;;  %v22879_v45 = vld [vmem:[%s28392_s15 + $0x3b0] ss:$8 sps:$4 sm:$0xff]   ;;  %v22887_v55 = vld [vmem:[%s28392_s15 + $0x3a4] ss:$8 sps:$4 sm:$0xff]  }
0x11f1   : > { %10029 = vmatprep.subr.bf16.mxu1 %v22834_v62  ;;  %v22882_v62 = vld [vmem:[%s28392_s15 + $0x300] ss:$8 sps:$4 sm:$0xff]  }
0x11f3   : > { %10223 = vmatpush1.bf16.msra.mxu0 %v22835_v10  ;;  %v22890_v10 = vld [vmem:[%s28392_s15 + $0x394] ss:$8 sps:$4 sm:$0xff]  }
0x11f4   : > { %10030 = vmatpush1.bf16.msra.mxu1 %v22832_v21  ;;  %10224 = vmatprep.subr.bf16.mxu0 %v22840_v0  ;;  %v22885_v21 = vld [vmem:[%s28392_s15 + $0x3a0] ss:$8 sps:$4 sm:$0xff]   ;;  %v22888_v0 = vld [vmem:[%s28392_s15 + $0x390] ss:$8 sps:$4 sm:$0xff]  }
0x11f5   : > { %21519 = vmatprep.subr.bf16.mxu1 %v23245_v52 }
0x11f7   : > { %10225 = vmatpush1.bf16.msra.mxu0 %v22838_v61  ;;  %v22891_v61 = vld [vmem:[%s28392_s15 + $0x380] ss:$8 sps:$4 sm:$0xff]  }
0x11f8   : > { %10226 = vmatprep.subr.bf16.mxu0 %v22843_v36  ;;  %v22893_v36 = vld [vmem:[%s28392_s15 + $0x384] ss:$8 sps:$4 sm:$0xff]  }
0x11fb   : > { %10227 = vmatpush1.bf16.msra.mxu0 %v22841_v4 }
0x11fc   : > { %21525 = vmatprep.subr.bf16.mxu0 %v23245_v52 }
0x128e   : > { %v9655_v27 = vpop.f32.mrf.mxu1 }
0x128f   : > { %v9664_v1 = vadd.f32 %v9655_v27, %v26565_v37 }
0x1290   : > { %v9657_v12 = vpop.f32.mrf.mxu1 }
0x1291   : > { %v9665_v48 = vadd.f32 %v9657_v12, %v26567_v63  ;;  %v22848_v63 = vld [vmem:[%s28392_s15 + $0x374] ss:$8 sps:$4 sm:$0xff]  }
0x1292   : > { %v9659_v5 = vpop.f32.mrf.mxu1 }
0x1293   : > { %v9666_v58 = vadd.f32 %v9659_v5, %v26569_v22 }
0x1294   : > { %v26692_v56 = vpop.f32.mrf.mxu1 }
0x1296   : > { %v9852_v41 = vpop.f32.mrf.mxu0  ;;  %v9910_v13 = vpop.f32.mrf.mxu1 }
0x1297   : > { %v26694_v39 = vadd.f32 %v9852_v41, %v9664_v1 }
0x1298   : > { %v9854_v57 = vpop.f32.mrf.mxu0  ;;  %v21511_v40 = vpop.f32.mrf.mxu1 }
0x1299   : > { %v26696_v32 = vadd.f32 %v9854_v57, %v9665_v48 }
0x129a   : > { %v9856_v16 = vpop.f32.mrf.mxu0  ;;  %v9913_v15 = vpop.f32.mrf.mxu1 }
0x129b   : > { %v26698_v28 = vadd.f32 %v9856_v16, %v9666_v58  ;;  %v9917_v37 = vpack.c.bf16 %v9913_v15, %v9910_v13 }
0x129c   : > { %v26703_v22 = vpop.f32.mrf.mxu0  ;;  %v21512_v33 = vpop.f32.mrf.mxu1 }
0x129d   : > { %10048 = vmatmul.mubr.bf16.vlgmr.msra.gmra.mxu1 %v9917_v37 }
0x129e   : > { %21520 = vmatpush3.bf16.msra.mxu1 %v26345_v19  ;;  %v10107_v31 = vpop.f32.mrf.mxu0  ;;  %21521 = vmatprep.mubr.msk.bf16.mxu1 %vm23246_vm3, %v23245_v52 }
0x129f   : > { %10409 = vmatprep.subr.bf16.mxu1 %v22848_v63 }
0x12a0   : > { %v21517_v9 = vpop.f32.mrf.mxu0 }
0x12a2   : > { %v10110_v6 = vpop.f32.mrf.mxu0 }
0x12a3   : > { %v10114_v34 = vpack.c.bf16 %v10110_v6, %v10107_v31  ;;  %v22894_v6 = vld [vmem:[%s28596_s25 + $0x40] sm:$0xff]  }
0x12a4   : > { %v21518_v54 = vpop.f32.mrf.mxu0 }
0x12a5   : > { %10245 = vmatmul.mubr.bf16.vlgmr.msra.gmra.mxu0 %v10114_v34  ;;  %21522 = vmatmul.mubr.msk.bf16.vlgmr.msra.gmra.mxu1 %vm9093_vm4, %v22844_v2  ;;  %v22898_v54 = vld [vmem:[%s28392_s15 + $0x460] ss:$8 sps:$4 sm:$0xff]  }
0x12a6   : > { %21526 = vmatpush3.bf16.msra.mxu0 %v26345_v19  ;;  %21527 = vmatprep.mubr.msk.bf16.mxu0 %vm23246_vm3, %v23245_v52 }
0x12a7   : > { %10410 = vmatpush1.bf16.msra.mxu1 %v22846_v20  ;;  %10606 = vmatprep.subr.bf16.mxu0 %v22857_v24  ;;  %v22895_v20 = vld [vmem:[%s28392_s15 + $0x470] ss:$8 sps:$4 sm:$0xff]  }
0x12a8   : > { %10411 = vmatprep.subr.bf16.mxu1 %v22851_v3  ;;  %10441 = vmatprep.mubr.bf16.mxu1 %v23247_v35 }
0x12ab   : > { %10412 = vmatpush1.bf16.msra.mxu1 %v22849_v43  ;;  %v22903_v43 = vld [vmem:[%s28392_s15 + $0x454] ss:$8 sps:$4 sm:$0xff]  }
0x12ac   : > { %10413 = vmatprep.subr.bf16.mxu1 %v22854_v29  ;;  %v22901_v29 = vld [vmem:[%s28392_s15 + $0x450] ss:$8 sps:$4 sm:$0xff]  }
0x12ad   : > { %21528 = vmatmul.mubr.msk.bf16.vlgmr.msra.gmra.mxu0 %vm9093_vm4, %v22845_v46  ;;  %v22906_v46 = vld [vmem:[%s28392_s15 + $0x444] ss:$8 sps:$4 sm:$0xff]  }
0x12ae   : > { %10607 = vmatpush1.bf16.msra.mxu0 %v22855_v44  ;;  %10638 = vmatprep.mubr.bf16.mxu0 %v23247_v35  ;;  %v22904_v44 = vld [vmem:[%s28392_s15 + $0x440] ss:$8 sps:$4 sm:$0xff]  }
0x12af   : > { %10414 = vmatpush1.bf16.msra.mxu1 %v22852_v38  ;;  %10608 = vmatprep.subr.bf16.mxu0 %v22863_v50  ;;  %v22909_v38 = vld [vmem:[%s28392_s15 + $0x434] ss:$8 sps:$4 sm:$0xff]   ;;  %v22907_v50 = vld [vmem:[%s28392_s15 + $0x430] ss:$8 sps:$4 sm:$0xff]  }
0x12b0   : > { %10415 = vmatprep.subr.bf16.mxu1 %v22860_v42  ;;  %v22912_v42 = vld [vmem:[%s28392_s15 + $0x424] ss:$8 sps:$4 sm:$0xff]  }
0x12b2   : > { %10609 = vmatpush1.bf16.msra.mxu0 %v22861_v8  ;;  %v22910_v8 = vld [vmem:[%s28392_s15 + $0x420] ss:$8 sps:$4 sm:$0xff]  }
0x12b3   : > { %10416 = vmatpush1.bf16.msra.mxu1 %v22858_v26  ;;  %10610 = vmatprep.subr.bf16.mxu0 %v22869_v7  ;;  %v22915_v26 = vld [vmem:[%s28392_s15 + $0x414] ss:$8 sps:$4 sm:$0xff]   ;;  %v22913_v7 = vld [vmem:[%s28392_s15 + $0x410] ss:$8 sps:$4 sm:$0xff]  }
0x12b4   : > { %10417 = vmatprep.subr.bf16.mxu1 %v22866_v53  ;;  %v22918_v53 = vld [vmem:[%s28392_s15 + $0x404] ss:$8 sps:$4 sm:$0xff]  }
0x12b6   : > { %10611 = vmatpush1.bf16.msra.mxu0 %v22867_v11  ;;  %v22916_v11 = vld [vmem:[%s28392_s15 + $0x400] ss:$8 sps:$4 sm:$0xff]  }
0x12b7   : > { %10418 = vmatpush1.bf16.msra.mxu1 %v22864_v23  ;;  %10612 = vmatprep.subr.bf16.mxu0 %v22875_v49 }
0x12b8   : > { %10419 = vmatprep.subr.bf16.mxu1 %v22872_v30 }
0x12ba   : > { %10613 = vmatpush1.bf16.msra.mxu0 %v22873_v60 }
0x12bb   : > { %10420 = vmatpush1.bf16.msra.mxu1 %v22870_v51  ;;  %10614 = vmatprep.subr.bf16.mxu0 %v22881_v25 }
0x12bc   : > { %10421 = vmatprep.subr.bf16.mxu1 %v22878_v17 }
0x12be   : > { %10615 = vmatpush1.bf16.msra.mxu0 %v22879_v45 }
0x12bf   : > { %10422 = vmatpush1.bf16.msra.mxu1 %v22876_v14  ;;  %10616 = vmatprep.subr.bf16.mxu0 %v22887_v55 }
0x12c0   : > { %10423 = vmatprep.subr.bf16.mxu1 %v22884_v18 }
0x12c2   : > { %10617 = vmatpush1.bf16.msra.mxu0 %v22885_v21  ;;  %v10852_v21 = vlaneseq }
0x12c3   : > { %10424 = vmatpush1.bf16.msra.mxu1 %v22882_v62  ;;  %10618 = vmatprep.subr.bf16.mxu0 %v22890_v10 }
0x12c4   : > { %21531 = vmatprep.subr.bf16.mxu1 %v23245_v52 }
0x12c6   : > { %10619 = vmatpush1.bf16.msra.mxu0 %v22888_v0  ;;  %v9469_v0 = vadd.f32 %v26687_v59, %v26571_v47 }
0x12c7   : > { %10620 = vmatprep.subr.bf16.mxu0 %v22893_v36 }
0x12ca   : > { %10621 = vmatpush1.bf16.msra.mxu0 %v22891_v61  ;;  %v10853_v61 = vshrl.u32 %v10852_v21, 7 }
0x135d   : > { %v10049_v4 = vpop.f32.mrf.mxu1 }
0x135e   : > { %v10058_v27 = vadd.f32 %v10049_v4, %v26694_v39  ;;  %v22897_v39 = vld [vmem:[%s28392_s15 + $0x474] ss:$8 sps:$4 sm:$0xff]   ;;  %v9667_v4 = vadd.f32 %v26692_v56, %v9469_v0 }
0x135f   : > { %v10051_v1 = vpop.f32.mrf.mxu1 }
0x1360   : > { %v10059_v12 = vadd.f32 %v10051_v1, %v26696_v32  ;;  %v10854_v1 = vsub.s32 0, %v10853_v61 }
0x1361   : > { %v10053_v48 = vpop.f32.mrf.mxu1 }
0x1362   : > { %v10060_v5 = vadd.f32 %v10053_v48, %v26698_v28  ;;  %v10850_v48 = vld [vmem:[%s28393_s16] sm:$0x3] }
0x1363   : > { %v26818_v58 = vpop.f32.mrf.mxu1 }
0x1365   : > { %v10246_v41 = vpop.f32.mrf.mxu0  ;;  %v10304_v13 = vpop.f32.mrf.mxu1 }
0x1366   : > { %v10255_v57 = vadd.f32 %v10246_v41, %v10058_v27  ;;  %v9864_v27 = vadd.f32 %v26703_v22, %v9667_v4  ;;  %v22935_v4 = vld [vmem:[%s28394_s17 + $0x78] sm:$0xff]  }
0x1367   : > { %v10248_v40 = vpop.f32.mrf.mxu0  ;;  %v21523_v16 = vpop.f32.mrf.mxu1 }
0x1368   : > { %v10256_v15 = vadd.f32 %v10248_v40, %v10059_v12  ;;  %v10855_v16 = vrot.slane %v10850_v48, %v10854_v1 }
0x1369   : > { %v10250_v37 = vpop.f32.mrf.mxu0  ;;  %v10307_v63 = vpop.f32.mrf.mxu1 }
0x136a   : > { %v10257_v33 = vadd.f32 %v10250_v37, %v10060_v5  ;;  %v10311_v31 = vpack.c.bf16 %v10307_v63, %v10304_v13  ;;  %v10061_v5 = vadd.f32 %v26818_v58, %v9864_v27  ;;  %v10858_v13 = vsub.s32 1, %v10853_v61 }
0x136b   : > { %v26823_v32 = vpop.f32.mrf.mxu0  ;;  %v21524_v9 = vpop.f32.mrf.mxu1 }
0x136c   : > { %10442 = vmatmul.mubr.bf16.vlgmr.msra.gmra.mxu1 %v10311_v31  ;;  %v10258_v40 = vadd.f32 %v26823_v32, %v10061_v5  ;;  %v22920_v5 = vld [vmem:[%s28394_s17 + $0xb8] sm:$0xff]  }
0x136d   : > { %21532 = vmatpush3.bf16.msra.mxu1 %v26345_v19  ;;  %v10501_v28 = vpop.f32.mrf.mxu0  ;;  %21533 = vmatprep.mubr.msk.bf16.mxu1 %vm23246_vm3, %v23245_v52  ;;  %v22900_v19 = vld [vmem:[%s28392_s15 + $0x464] ss:$8 sps:$4 sm:$0xff]  }
0x136e   : > { %10803 = vmatprep.subr.bf16.mxu1 %v22897_v39 }
0x136f   : > { %v21529_v2 = vpop.f32.mrf.mxu0 }
0x1371   : > { %v10504_v34 = vpop.f32.mrf.mxu0 }
0x1372   : > { %v10508_v24 = vpack.c.bf16 %v10504_v34, %v10501_v28 }
0x1373   : > { %v21530_v3 = vpop.f32.mrf.mxu0 }
0x1374   : > { %10639 = vmatmul.mubr.bf16.vlgmr.msra.gmra.mxu0 %v10508_v24  ;;  %21534 = vmatmul.mubr.msk.bf16.vlgmr.msra.gmra.mxu1 %vm9093_vm4, %v22894_v6 }
0x1375   : > { %10804 = vmatpush1.bf16.msra.mxu1 %v22895_v20  ;;  %10835 = vmatprep.mubr.bf16.mxu1 %v23247_v35 }
0x1376   : > { %10805 = vmatprep.subr.bf16.mxu1 %v22900_v19  ;;  %10908 = vmatprep.mubr.bf16.mxu0 %v23247_v35 }
0x1379   : > { %10806 = vmatpush1.bf16.msra.mxu1 %v22898_v54 }
0x137a   : > { %10807 = vmatprep.subr.bf16.mxu1 %v22903_v43 }
0x137d   : > { %10808 = vmatpush1.bf16.msra.mxu1 %v22901_v29  ;;  %v10872_v29 = vld [vmem:[%s28597_s5] sm:$0xf] }
0x137e   : > { %10809 = vmatprep.subr.bf16.mxu1 %v22906_v46  ;;  %v18008_v46 = vld [vmem:[%s28597_s5 + $0x4] sm:$0xf] }
0x1381   : > { %10810 = vmatpush1.bf16.msra.mxu1 %v22904_v44  ;;  %v18010_v44 = vld [vmem:[%s28597_s5 + $0x8] sm:$0xf] }
0x1382   : > { %10811 = vmatprep.subr.bf16.mxu1 %v22909_v38  ;;  %v18012_v38 = vld [vmem:[%s28597_s5 + $0xc] sm:$0xf]  ;;  %s28599_s5 = sshll.u32 %s28601_s30, 8 }
0x1383   : > { %s28308_s11 = scalar_lea.vmem %s28400_s23, %s28599_s5 }
0x1385   : > { %10812 = vmatpush1.bf16.msra.mxu1 %v22907_v50 }
0x1386   : > { %10813 = vmatprep.subr.bf16.mxu1 %v22912_v42 }
0x1389   : > { %10814 = vmatpush1.bf16.msra.mxu1 %v22910_v8 }
0x138a   : > { %10815 = vmatprep.subr.bf16.mxu1 %v22915_v26 }
0x138d   : > { %10816 = vmatpush1.bf16.msra.mxu1 %v22913_v7 }
0x138e   : > { %10817 = vmatprep.subr.bf16.mxu1 %v22918_v53 }
0x1391   : > { %10818 = vmatpush1.bf16.msra.mxu1 %v22916_v11 }
0x142c   : > { %v10443_v23 = vpop.f32.mrf.mxu1 }
0x142d   : > { %v10452_v30 = vadd.f32 %v10443_v23, %v10255_v57 }
0x142e   : > { %v10445_v51 = vpop.f32.mrf.mxu1 }
0x142f   : > { %v10453_v49 = vadd.f32 %v10445_v51, %v10256_v15 }
0x1430   : > { %v10447_v60 = vpop.f32.mrf.mxu1 }
0x1431   : > { %v10454_v17 = vadd.f32 %v10447_v60, %v10257_v33  ;;  %v10859_v33 = vrot.slane %v10850_v48, %v10858_v13  ;;  %v18016_v48 = vld [vmem:[%s28598_s6 + $0x4] sm:$0xf]  ;;  %v22921_v13 = vld [vmem:[%s28394_s17 + $0xf0] sm:$0xff]  }
0x1432   : > { %v10449_v14 = vpop.f32.mrf.mxu1 }
0x1433   : > { %v10455_v37 = vadd.f32 %v10449_v14, %v10258_v40  ;;  %v22922_v40 = vld [vmem:[%s28394_s17 + $0xb0] sm:$0xff]  }
0x1434   : > { %v10698_v25 = vpop.f32.mrf.mxu1  ;;  %v10640_v10 = vpop.f32.mrf.mxu0 }
0x1435   : > { %v10649_v41 = vadd.f32 %v10640_v10, %v10452_v30 }
0x1436   : > { %v21535_v45 = vpop.f32.mrf.mxu1  ;;  %v10642_v36 = vpop.f32.mrf.mxu0 }
0x1437   : > { %v10650_v47 = vadd.f32 %v10642_v36, %v10453_v49  ;;  %v22919_v36 = vld [vmem:[%s28394_s17 + $0xf8] sm:$0xff]  }
0x1438   : > { %v10701_v18 = vpop.f32.mrf.mxu1  ;;  %v10644_v12 = vpop.f32.mrf.mxu0 }
0x1439   : > { %v10705_v62 = vpack.c.bf16 %v10701_v18, %v10698_v25  ;;  %v10651_v22 = vadd.f32 %v10644_v12, %v10454_v17  ;;  %v11063_v12 = vld [vmem:[%s28598_s6] sm:$0xf] }
0x143a   : > { %v21536_v55 = vpop.f32.mrf.mxu1  ;;  %v10646_v15 = vpop.f32.mrf.mxu0 }
0x143b   : > { %10836 = vmatmul.mubr.bf16.vlgmr.msra.gmra.mxu1 %v10705_v62  ;;  %v10652_v39 = vadd.f32 %v10646_v15, %v10455_v37  ;;  %v22924_v15 = vld [vmem:[%s28394_s17 + $0xa8] sm:$0xff]   ;;  %v22925_v37 = vld [vmem:[%s28394_s17 + $0xe0] sm:$0xff]  }
0x143c   : > { %11105 = vmatprep.mubr.bf16.mxu1 %v23247_v35 }
0x14fb   : > { %v10837_v57 = vpop.f32.mrf.mxu1 }
0x14fc   : > { %v10846_v59 = vadd.f32 %v10837_v57, %v10649_v41  ;;  %v22936_v41 = vld [vmem:[%s28394_s17 + $0x38] sm:$0xff]   ;;  %v22937_v57 = vld [vmem:[%s28394_s17 + $0x70] sm:$0xff]  }
0x14fd   : > { %v10839_v56 = vpop.f32.mrf.mxu1 }
0x14fe   : > { %v10847_v63 = vadd.f32 %v10839_v56, %v10650_v47  ;;  %v10862_v9 = vadd.f32 %v10855_v16, %v10846_v59  ;;  %v22938_v47 = vld [vmem:[%s28394_s17 + $0x30] sm:$0xff]   ;;  %v22923_v59 = vld [vmem:[%s28394_s17 + $0xe8] sm:$0xff]  }
0x14ff   : > { %v10841_v31 = vpop.f32.mrf.mxu1  ;;  %v22940_v56 = vld [vmem:[%s28394_s17 + $0x28] sm:$0xff]  }
0x1500   : > { %v10848_v28 = vadd.f32 %v10841_v31, %v10651_v22  ;;  %v10863_v58 = vadd.f32 %v10859_v33, %v10847_v63  ;;  %v10866_v20 = vmax.f32 %v10862_v9, 0.0  ;;  %v22941_v22 = vld [vmem:[%s28394_s17 + $0x60] sm:$0xff]   ;;  %v22927_v31 = vld [vmem:[%s28394_s17 + $0xd8] sm:$0xff]  }
0x1501   : > { %v10843_v2 = vpop.f32.mrf.mxu1  ;;  %v22926_v63 = vld [vmem:[%s28394_s17 + $0xa0] sm:$0xff]   ;;  %v22928_v9 = vld [vmem:[%s28394_s17 + $0x98] sm:$0xff]  }
0x1502   : > { %v10864_v6 = vadd.f32 %v10855_v16, %v10848_v28  ;;  %v10849_v34 = vadd.f32 %v10843_v2, %v10652_v39  ;;  %v10867_v19 = vmax.f32 %v10863_v58, 0.0  ;;  %v22939_v16 = vld [vmem:[%s28394_s17 + $0x68] sm:$0xff]   ;;  %v22943_v39 = vld [vmem:[%s28394_s17 + $0x58] sm:$0xff]   ;;  %v22929_v2 = vld [vmem:[%s28394_s17 + $0xd0] sm:$0xff]  }
0x1503   : > { %v22944_v28 = vld [vmem:[%s28394_s17 + $0x18] sm:$0xff]   ;;  %v22945_v58 = vld [vmem:[%s28394_s17 + $0x50] sm:$0xff]  }
0x1504   : > { %v10868_v24 = vmax.f32 %v10864_v6, 0.0  ;;  %v10865_v32 = vadd.f32 %v10859_v33, %v10849_v34  ;;  %v22942_v33 = vld [vmem:[%s28394_s17 + $0x20] sm:$0xff]   ;;  %v22930_v6 = vld [vmem:[%s28394_s17 + $0x90] sm:$0xff]  }
0x1505   : > { %v22946_v34 = vld [vmem:[%s28394_s17 + $0x10] sm:$0xff]  }
0x1506   : > { %v10870_v3 = vpack.c.bf16 %v10868_v24, %v10866_v20  ;;  %v10869_v54 = vmax.f32 %v10865_v32, 0.0  ;;  %v22931_v20 = vld [vmem:[%s28394_s17 + $0xc8] sm:$0xff]  }
0x1507   : > { %v22947_v24 = vld [vmem:[%s28394_s17 + $0x48] sm:$0xff]  }
0x1508   : > { %v10871_v43 = vpack.c.bf16 %v10869_v54, %v10867_v19  ;;  %v22932_v32 = vld [vmem:[%s28394_s17 + $0x88] sm:$0xff]   ;;  %v22934_v54 = vld [vmem:[%s28394_s17 + $0x80] sm:$0xff]  }
0x1509   : > { %v22948_v19 = vld [vmem:[%s28394_s17 + $0x8] sm:$0xff]  }
0x150a   : > { %10890 = vmatprep.subr.bf16.mxu0 %v10871_v43 }
0x150b   : > { %10891 = vmatpush1.bf16.msra.mxu0 %v10870_v3 }
0x150c   : > { %10936 = vmatprep.subr.bf16.mxu0 %v10871_v43 }
0x150e   : > { %18007 = vmatmul.mubr.msk.bf16.vlgmr.msra.gmra.mxu0 %vm9093_vm4, %v10872_v29  ;;  %v22950_v29 = vld [vmem:[%s28394_s17] sm:$0xff]  }
0x150f   : > { %10937 = vmatpush1.bf16.msra.mxu0 %v10870_v3  ;;  %10954 = vmatprep.mubr.bf16.mxu0 %v23247_v35 }
0x1510   : > { %10984 = vmatprep.subr.bf16.mxu0 %v10871_v43 }
0x1516   : > { %18009 = vmatmul.mubr.msk.bf16.vlgmr.msra.gmra.mxu0 %vm9093_vm4, %v18008_v46  ;;  %v22951_v46 = vld [vmem:[%s28394_s17 + $0x178] sm:$0xff]  }
0x1517   : > { %10985 = vmatpush1.bf16.msra.mxu0 %v10870_v3  ;;  %11002 = vmatprep.mubr.bf16.mxu0 %v23247_v35 }
0x1518   : > { %11032 = vmatprep.subr.bf16.mxu0 %v10871_v43  ;;  %v22949_v43 = vld [vmem:[%s28394_s17 + $0x40] sm:$0xff]  }
0x151e   : > { %18011 = vmatmul.mubr.msk.bf16.vlgmr.msra.gmra.mxu0 %vm9093_vm4, %v18010_v44 }
0x151f   : > { %11033 = vmatpush1.bf16.msra.mxu0 %v10870_v3  ;;  %11050 = vmatprep.mubr.bf16.mxu0 %v23247_v35  ;;  %v22933_v3 = vld [vmem:[%s28394_s17 + $0xc0] sm:$0xff]  }
0x1526   : > { %18013 = vmatmul.mubr.msk.bf16.vlgmr.msra.gmra.mxu0 %vm9093_vm4, %v18012_v38 }
0x1527   : > { %11185 = vmatprep.mubr.bf16.mxu0 %v23247_v35 }
0x15ce   : > { %v10910_v50 = vpop.f32.mrf.mxu0 }
0x15d0   : > { %v10912_v42 = vpop.f32.mrf.mxu0 }
0x15d2   : > { %v10914_v8 = vpop.f32.mrf.mxu0 }
0x15d4   : > { %v10915_v26 = vpop.f32.mrf.mxu0 }
0x15d6   : > { %v10956_v7 = vpop.f32.mrf.mxu0 }
0x15d7   : > { %v10963_v60 = vmax.f32 %v10910_v50, %v10956_v7 }
0x15d8   : > { %v10958_v53 = vpop.f32.mrf.mxu0 }
0x15d9   : > { %v10964_v14 = vmax.f32 %v10912_v42, %v10958_v53  ;;  %v22952_v53 = vld [vmem:[%s28394_s17 + $0x138] sm:$0xff]  }
0x15da   : > { %v10960_v11 = vpop.f32.mrf.mxu0 }
0x15dc   : > { %v10961_v23 = vpop.f32.mrf.mxu0 }
0x15dd   : > { %v22953_v23 = vld [vmem:[%s28394_s17 + $0x170] sm:$0xff]  }
0x15de   : > { %v11004_v30 = vpop.f32.mrf.mxu0 }
0x15df   : > { %v11011_v25 = vmax.f32 %v10963_v60, %v11004_v30 }
0x15e0   : > { %v11006_v51 = vpop.f32.mrf.mxu0 }
0x15e1   : > { %v11012_v18 = vmax.f32 %v10964_v14, %v11006_v51  ;;  %v22955_v14 = vld [vmem:[%s28394_s17 + $0x168] sm:$0xff]  }
0x15e2   : > { %v11008_v49 = vpop.f32.mrf.mxu0 }
0x15e4   : > { %v11009_v17 = vpop.f32.mrf.mxu0 }
0x15e5   : > { %v22954_v17 = vld [vmem:[%s28394_s17 + $0x130] sm:$0xff]  }
0x15e6   : > { %v11052_v45 = vpop.f32.mrf.mxu0 }
0x15e7   : > { %v11059_v62 = vmax.f32 %v11011_v25, %v11052_v45  ;;  %v18083_v25 = vld [vmem:[%s28598_s6 + $0x8] sm:$0xf] }
0x15e8   : > { %v11054_v55 = vpop.f32.mrf.mxu0  ;;  %v22956_v45 = vld [vmem:[%s28394_s17 + $0x128] sm:$0xff]  }
0x15e9   : > { %v11061_v21 = vpack.c.bf16 %v11059_v62, %v11059_v62  ;;  %v11060_v10 = vmax.f32 %v11012_v18, %v11054_v55  ;;  %v22957_v18 = vld [vmem:[%s28394_s17 + $0x160] sm:$0xff]   ;;  %v22960_v62 = vld [vmem:[%s28394_s17 + $0x1f8] sm:$0xff]  }
0x15ea   : > { %v11056_v0 = vpop.f32.mrf.mxu0  ;;  %v22958_v55 = vld [vmem:[%s28394_s17 + $0x120] sm:$0xff]  }
0x15eb   : > { %v26909_v61 = vpack.c.bf16 %v11060_v10, %v11060_v10  ;;  %v26918_v1 = vsel %vm1551_vm0, %v11061_v21, 0  ;;  %v22959_v21 = vld [vmem:[%s28394_s17 + $0x158] sm:$0xff]   ;;  %v18134_v0 = vld [vmem:[%s28598_s6 + $0xc] sm:$0xf] }
0x15ec   : > { %v11057_v27 = vpop.f32.mrf.mxu0  ;;  %v22961_v10 = vld [vmem:[%s28394_s17 + $0x118] sm:$0xff]  }
0x15ed   : > { %18014 = vmatprep.subr.msk.bf16.mxu1 %vm1551_vm0, %v26909_v61  ;;  %18017 = vmatprep.subr.msk.bf16.mxu0 %vm1551_vm0, %v26909_v61  ;;  %v22964_v27 = vld [vmem:[%s28394_s17 + $0x1f0] sm:$0xff]  }
0x15ee   : > { %11088 = vmatpush1.bf16.msra.mxu1 %v26918_v1  ;;  %11168 = vmatpush1.bf16.msra.mxu0 %v26918_v1 }
0x15ef   : > { %20373 = vmatprep.subr.bf16.mxu1 %v22919_v36  ;;  %20395 = vmatprep.subr.bf16.mxu0 %v22935_v4  ;;  %v22962_v36 = vld [vmem:[%s28394_s17 + $0x1b8] sm:$0xff]   ;;  %v22963_v4 = vld [vmem:[%s28394_s17 + $0x150] sm:$0xff]  }
0x15f1   : > { %18015 = vmatmul.mubr.msk.bf16.vlgmr.msra.gmra.mxu1 %vm1502_vm1, %v11063_v12  ;;  %18018 = vmatmul.mubr.msk.bf16.vlgmr.msra.gmra.mxu0 %vm1502_vm1, %v18016_v48  ;;  %v22965_v12 = vld [vmem:[%s28394_s17 + $0x110] sm:$0xff]  }
0x15f2   : > { %20374 = vmatpush3.bf16.msra.mxu1 %v22920_v5  ;;  %20396 = vmatpush3.bf16.msra.mxu0 %v22936_v41  ;;  %v22966_v48 = vld [vmem:[%s28394_s17 + $0x1b0] sm:$0xff]   ;;  %v22967_v5 = vld [vmem:[%s28394_s17 + $0x148] sm:$0xff]  }
0x15f3   : > { %20375 = vmatprep.subr.bf16.mxu1 %v22921_v13  ;;  %20397 = vmatprep.subr.bf16.mxu0 %v22937_v57  ;;  %v22968_v41 = vld [vmem:[%s28394_s17 + $0x1e8] sm:$0xff]  }
0x15f4   : > { %v22969_v13 = vld [vmem:[%s28394_s17 + $0x108] sm:$0xff]  }
0x15f5   : > { %v22970_v57 = vld [vmem:[%s28394_s17 + $0x1a8] sm:$0xff]  }
0x15f6   : > { %20376 = vmatpush3.bf16.msra.mxu1 %v22922_v40  ;;  %20398 = vmatpush3.bf16.msra.mxu0 %v22938_v47  ;;  %v22971_v40 = vld [vmem:[%s28394_s17 + $0x140] sm:$0xff]  }
0x15f7   : > { %20377 = vmatprep.subr.bf16.mxu1 %v22923_v59  ;;  %20399 = vmatprep.subr.bf16.mxu0 %v22939_v16  ;;  %v22972_v47 = vld [vmem:[%s28394_s17 + $0x1e0] sm:$0xff]  }
0x15f8   : > { %v22973_v59 = vld [vmem:[%s28394_s17 + $0x100] sm:$0xff]  }
0x15f9   : > { %v22974_v16 = vld [vmem:[%s28394_s17 + $0x1a0] sm:$0xff]  }
0x15fa   : > { %20378 = vmatpush3.bf16.msra.mxu1 %v22924_v15  ;;  %20400 = vmatpush3.bf16.msra.mxu0 %v22940_v56  ;;  %v22975_v15 = vld [vmem:[%s28394_s17 + $0x1d8] sm:$0xff]  }
0x15fb   : > { %20379 = vmatprep.subr.bf16.mxu1 %v22925_v37  ;;  %20401 = vmatprep.subr.bf16.mxu0 %v22941_v22  ;;  %v22976_v56 = vld [vmem:[%s28394_s17 + $0x198] sm:$0xff]   ;;  %v22977_v37 = vld [vmem:[%s28394_s17 + $0x1d0] sm:$0xff]  }
0x15fc   : > { %v22978_v22 = vld [vmem:[%s28394_s17 + $0x190] sm:$0xff]  }
0x15fe   : > { %20380 = vmatpush3.bf16.msra.mxu1 %v22926_v63  ;;  %20402 = vmatpush3.bf16.msra.mxu0 %v22942_v33  ;;  %v22979_v63 = vld [vmem:[%s28394_s17 + $0x1c8] sm:$0xff]  }
0x15ff   : > { %20381 = vmatprep.subr.bf16.mxu1 %v22927_v31  ;;  %20403 = vmatprep.subr.bf16.mxu0 %v22943_v39  ;;  %v22980_v33 = vld [vmem:[%s28394_s17 + $0x188] sm:$0xff]   ;;  %v22981_v31 = vld [vmem:[%s28394_s17 + $0x1c0] sm:$0xff]  }
0x1600   : > { %v22982_v39 = vld [vmem:[%s28394_s17 + $0x180] sm:$0xff]  }
0x1602   : > { %20382 = vmatpush3.bf16.msra.mxu1 %v22928_v9  ;;  %20404 = vmatpush3.bf16.msra.mxu0 %v22944_v28 }
0x1603   : > { %20383 = vmatprep.subr.bf16.mxu1 %v22929_v2  ;;  %20405 = vmatprep.subr.bf16.mxu0 %v22945_v58 }
0x1606   : > { %20384 = vmatpush3.bf16.msra.mxu1 %v22930_v6  ;;  %20406 = vmatpush3.bf16.msra.mxu0 %v22946_v34 }
0x1607   : > { %20385 = vmatprep.subr.bf16.mxu1 %v22931_v20  ;;  %20407 = vmatprep.subr.bf16.mxu0 %v22947_v24 }
0x160a   : > { %20386 = vmatpush3.bf16.msra.mxu1 %v22932_v32  ;;  %20408 = vmatpush3.bf16.msra.mxu0 %v22948_v19 }
0x160b   : > { %20387 = vmatprep.subr.bf16.mxu1 %v22933_v3  ;;  %20409 = vmatprep.subr.bf16.mxu0 %v22949_v43 }
0x160e   : > { %20388 = vmatpush3.bf16.msra.mxu1 %v22934_v54  ;;  %20410 = vmatpush3.bf16.msra.mxu0 %v22950_v29 }
0x160f   : > { %18084 = vmatprep.subr.msk.bf16.mxu1 %vm1551_vm0, %v26909_v61  ;;  %20417 = vmatprep.subr.bf16.mxu0 %v22951_v46 }
0x16b1   : > { %v11107_v44 = vpop.f32.mrf.mxu1  ;;  %v11187_v38 = vpop.f32.mrf.mxu0 }
0x16b2   : > { %v11114_v50 = vpack.c.bf16 %v11107_v44, %v11107_v44  ;;  %v11194_v11 = vpack.c.bf16 %v11187_v38, %v11187_v38  ;;  %v22983_v38 = vld [vmem:[%s28394_s17 + $0x278] sm:$0xff]  }
0x16b3   : > { %v11109_v42 = vpop.f32.mrf.mxu1  ;;  %v11189_v8 = vpop.f32.mrf.mxu0 }
0x16b4   : > { %v11115_v26 = vpack.c.bf16 %v11109_v42, %v11109_v42  ;;  %v11195_v7 = vpack.c.bf16 %v11189_v8, %v11189_v8 }
0x16b5   : > { %v11191_v30 = vpop.f32.mrf.mxu0  ;;  %v11111_v51 = vpop.f32.mrf.mxu1 }
0x16b6   : > { %11357 = vmatprep.mubr.bf16.mxu1 %v11195_v7  ;;  %11493 = vmatprep.mubr.bf16.mxu0 %v11115_v26  ;;  %v22988_v51 = vld [vmem:[%s28394_s17 + $0x2f8] sm:$0xff]  }
0x16b7   : > { %11358 = vmatmul.mubr.bf16.vlgmr.msra.gmra.mxu1 %v11194_v11  ;;  %11494 = vmatmul.mubr.bf16.vlgmr.msra.gmra.mxu0 %v11114_v50  ;;  %v11192_v49 = vpop.f32.mrf.mxu0  ;;  %v11112_v60 = vpop.f32.mrf.mxu1  ;;  %v22984_v11 = vld [vmem:[%s28394_s17 + $0x238] sm:$0xff]  }
0x16b8   : > { %11521 = vmatpush1.bf16.msra.mxu1 %v26918_v1  ;;  %20418 = vmatpush3.bf16.msra.mxu0 %v22952_v53  ;;  %v18185_v53 = vld [vmem:[%s28598_s6 + $0x10] sm:$0xf] }
0x16b9   : > { %18135 = vmatprep.subr.msk.bf16.mxu1 %vm1551_vm0, %v26909_v61  ;;  %20419 = vmatprep.subr.bf16.mxu0 %v22953_v23  ;;  %v22985_v23 = vld [vmem:[%s28394_s17 + $0x270] sm:$0xff]  }
0x16ba   : > { %11538 = vmatprep.mubr.bf16.mxu1 %v23247_v35  ;;  %v22986_v60 = vld [vmem:[%s28394_s17 + $0x230] sm:$0xff]  }
0x16bc   : > { %20420 = vmatpush3.bf16.msra.mxu0 %v22954_v17  ;;  %v22987_v17 = vld [vmem:[%s28394_s17 + $0x268] sm:$0xff]  }
0x16bd   : > { %20421 = vmatprep.subr.bf16.mxu0 %v22955_v14  ;;  %v22989_v14 = vld [vmem:[%s28394_s17 + $0x228] sm:$0xff]  }
0x16bf   : > { %18085 = vmatmul.mubr.msk.bf16.vlgmr.msra.gmra.mxu1 %vm1502_vm1, %v18083_v25  ;;  %v18236_v25 = vld [vmem:[%s28598_s6 + $0x14] sm:$0xf] }
0x16c0   : > { %20422 = vmatpush3.bf16.msra.mxu0 %v22956_v45  ;;  %11739 = vmatpush1.bf16.msra.mxu1 %v26918_v1  ;;  %v22990_v45 = vld [vmem:[%s28394_s17 + $0x2b8] sm:$0xff]  }
0x16c1   : > { %20423 = vmatprep.subr.bf16.mxu0 %v22957_v18  ;;  %11756 = vmatprep.mubr.bf16.mxu1 %v23247_v35  ;;  %v22991_v18 = vld [vmem:[%s28394_s17 + $0x260] sm:$0xff]  }
0x16c2   : > { %20439 = vmatprep.subr.bf16.mxu1 %v22960_v62  ;;  %v22992_v62 = vld [vmem:[%s28394_s17 + $0x2f0] sm:$0xff]  }
0x16c4   : > { %20424 = vmatpush3.bf16.msra.mxu0 %v22958_v55  ;;  %v22993_v55 = vld [vmem:[%s28394_s17 + $0x220] sm:$0xff]  }
0x16c5   : > { %20425 = vmatprep.subr.bf16.mxu0 %v22959_v21  ;;  %v22994_v21 = vld [vmem:[%s28394_s17 + $0x2b0] sm:$0xff]  }
0x16c7   : > { %18136 = vmatmul.mubr.msk.bf16.vlgmr.msra.gmra.mxu1 %vm1502_vm1, %v18134_v0  ;;  %v22996_v0 = vld [vmem:[%s28394_s17 + $0x2e8] sm:$0xff]  }
0x16c8   : > { %20426 = vmatpush3.bf16.msra.mxu0 %v22961_v10  ;;  %20440 = vmatpush3.bf16.msra.mxu1 %v22962_v36  ;;  %v22995_v10 = vld [vmem:[%s28394_s17 + $0x258] sm:$0xff]  }
0x16c9   : > { %20427 = vmatprep.subr.bf16.mxu0 %v22963_v4  ;;  %20441 = vmatprep.subr.bf16.mxu1 %v22964_v27  ;;  %v22997_v36 = vld [vmem:[%s28394_s17 + $0x218] sm:$0xff]   ;;  %v22998_v4 = vld [vmem:[%s28394_s17 + $0x2a8] sm:$0xff]   ;;  %v22999_v27 = vld [vmem:[%s28394_s17 + $0x250] sm:$0xff]  }
0x16cc   : > { %20428 = vmatpush3.bf16.msra.mxu0 %v22965_v12  ;;  %20442 = vmatpush3.bf16.msra.mxu1 %v22966_v48  ;;  %v23000_v12 = vld [vmem:[%s28394_s17 + $0x2e0] sm:$0xff]   ;;  %v23001_v48 = vld [vmem:[%s28394_s17 + $0x210] sm:$0xff]  }
0x16cd   : > { %20429 = vmatprep.subr.bf16.mxu0 %v22967_v5  ;;  %20443 = vmatprep.subr.bf16.mxu1 %v22968_v41  ;;  %v23002_v5 = vld [vmem:[%s28394_s17 + $0x2a0] sm:$0xff]   ;;  %v23003_v41 = vld [vmem:[%s28394_s17 + $0x248] sm:$0xff]  }
0x16d0   : > { %20430 = vmatpush3.bf16.msra.mxu0 %v22969_v13  ;;  %20444 = vmatpush3.bf16.msra.mxu1 %v22970_v57  ;;  %v23004_v13 = vld [vmem:[%s28394_s17 + $0x2d8] sm:$0xff]   ;;  %v23005_v57 = vld [vmem:[%s28394_s17 + $0x208] sm:$0xff]  }
0x16d1   : > { %20431 = vmatprep.subr.bf16.mxu0 %v22971_v40  ;;  %20445 = vmatprep.subr.bf16.mxu1 %v22972_v47  ;;  %v23006_v40 = vld [vmem:[%s28394_s17 + $0x298] sm:$0xff]   ;;  %v23007_v47 = vld [vmem:[%s28394_s17 + $0x240] sm:$0xff]  }
0x16d4   : > { %20432 = vmatpush3.bf16.msra.mxu0 %v22973_v59  ;;  %20446 = vmatpush3.bf16.msra.mxu1 %v22974_v16  ;;  %v23008_v59 = vld [vmem:[%s28394_s17 + $0x2d0] sm:$0xff]   ;;  %v23009_v16 = vld [vmem:[%s28394_s17 + $0x200] sm:$0xff]  }
0x16d5   : > { %18186 = vmatprep.subr.msk.bf16.mxu0 %vm1551_vm0, %v26909_v61  ;;  %20447 = vmatprep.subr.bf16.mxu1 %v22975_v15  ;;  %v23010_v15 = vld [vmem:[%s28394_s17 + $0x290] sm:$0xff]  }
0x16d8   : > { %20448 = vmatpush3.bf16.msra.mxu1 %v22976_v56  ;;  %v23011_v56 = vld [vmem:[%s28394_s17 + $0x2c8] sm:$0xff]  }
0x16d9   : > { %20449 = vmatprep.subr.bf16.mxu1 %v22977_v37  ;;  %v23012_v37 = vld [vmem:[%s28394_s17 + $0x288] sm:$0xff]  }
0x16dc   : > { %20450 = vmatpush3.bf16.msra.mxu1 %v22978_v22  ;;  %v23013_v22 = vld [vmem:[%s28394_s17 + $0x2c0] sm:$0xff]  }
0x16dd   : > { %20451 = vmatprep.subr.bf16.mxu1 %v22979_v63  ;;  %v23014_v63 = vld [vmem:[%s28394_s17 + $0x280] sm:$0xff]  }
0x16e0   : > { %20452 = vmatpush3.bf16.msra.mxu1 %v22980_v33 }
0x16e1   : > { %20453 = vmatprep.subr.bf16.mxu1 %v22981_v31 }
0x16e4   : > { %20454 = vmatpush3.bf16.msra.mxu1 %v22982_v39 }
0x16e5   : > { %18237 = vmatprep.subr.msk.bf16.mxu1 %vm1551_vm0, %v26909_v61 }
0x1777   : > { %v20389_v9 = vpop.f32.mrf.mxu1  ;;  %v20411_v28 = vpop.f32.mrf.mxu0 }
0x1779   : > { %v20390_v2 = vpop.f32.mrf.mxu1  ;;  %v20412_v58 = vpop.f32.mrf.mxu0 }
0x177a   : > { %v20391_v6 = vadd.f32 %v20390_v2, %v20389_v9  ;;  %v20413_v34 = vadd.f32 %v20412_v58, %v20411_v28 }
0x177b   : > { %v20392_v20 = vpop.f32.mrf.mxu1  ;;  %v20414_v24 = vpop.f32.mrf.mxu0 }
0x177c   : > { %v27140_v32 = vadd.f32 %v20413_v34, %v20391_v6 }
0x177d   : > { %v20393_v19 = vpop.f32.mrf.mxu1  ;;  %v20415_v3 = vpop.f32.mrf.mxu0 }
0x177f   : > { %v11540_v54 = vpop.f32.mrf.mxu1 }
0x1780   : > { %v11547_v46 = vpack.c.bf16 %v11540_v54, %v11540_v54 }
0x1781   : > { %v11542_v43 = vpop.f32.mrf.mxu1 }
0x1782   : > { %v11548_v29 = vpack.c.bf16 %v11542_v43, %v11542_v43  ;;  %v23015_v43 = vld [vmem:[%s28394_s17 + $0x378] sm:$0xff]  }
0x1783   : > { %v11544_v44 = vpop.f32.mrf.mxu1 }
0x1784   : > { %11710 = vmatprep.mubr.bf16.mxu0 %v11548_v29 }
0x1785   : > { %v11545_v50 = vpop.f32.mrf.mxu1  ;;  %11711 = vmatmul.mubr.bf16.vlgmr.msra.gmra.mxu0 %v11547_v46 }
0x1786   : > { %11957 = vmatpush1.bf16.msra.mxu0 %v26918_v1  ;;  %11974 = vmatprep.mubr.bf16.mxu0 %v23247_v35 }
0x1787   : > { %v11758_v42 = vpop.f32.mrf.mxu1  ;;  %20461 = vmatprep.subr.bf16.mxu0 %v22983_v38 }
0x1788   : > { %v11765_v8 = vpack.c.bf16 %v11758_v42, %v11758_v42 }
0x1789   : > { %v11760_v26 = vpop.f32.mrf.mxu1 }
0x178a   : > { %v11766_v7 = vpack.c.bf16 %v11760_v26, %v11760_v26  ;;  %v18287_v26 = vld [vmem:[%s28598_s6 + $0x18] sm:$0xf] }
0x178b   : > { %v11762_v30 = vpop.f32.mrf.mxu1 }
0x178c   : > { %11928 = vmatprep.mubr.bf16.mxu1 %v11766_v7  ;;  %v23016_v7 = vld [vmem:[%s28394_s17 + $0x338] sm:$0xff]  }
0x178d   : > { %11929 = vmatmul.mubr.bf16.vlgmr.msra.gmra.mxu1 %v11765_v8  ;;  %18187 = vmatmul.mubr.msk.bf16.vlgmr.msra.gmra.mxu0 %vm1502_vm1, %v18185_v53  ;;  %v11763_v49 = vpop.f32.mrf.mxu1  ;;  %v23017_v53 = vld [vmem:[%s28394_s17 + $0x370] sm:$0xff]  }
0x178e   : > { %20462 = vmatpush3.bf16.msra.mxu0 %v22984_v11  ;;  %12175 = vmatpush1.bf16.msra.mxu1 %v26918_v1  ;;  %v23019_v49 = vld [vmem:[%s28394_s17 + $0x368] sm:$0xff]  }
0x178f   : > { %20463 = vmatprep.subr.bf16.mxu0 %v22985_v23  ;;  %12192 = vmatprep.mubr.bf16.mxu1 %v23247_v35  ;;  %v23031_v23 = vld [vmem:[%s28394_s17 + $0x3f8] sm:$0xff]  }
0x1790   : > { %20483 = vmatprep.subr.bf16.mxu1 %v22988_v51  ;;  %v23018_v51 = vld [vmem:[%s28394_s17 + $0x330] sm:$0xff]  }
0x1792   : > { %20464 = vmatpush3.bf16.msra.mxu0 %v22986_v60  ;;  %v23020_v60 = vld [vmem:[%s28394_s17 + $0x328] sm:$0xff]  }
0x1793   : > { %20465 = vmatprep.subr.bf16.mxu0 %v22987_v17  ;;  %v18338_v17 = vld [vmem:[%s28598_s6 + $0x1c] sm:$0xf] }
0x1795   : > { %18238 = vmatmul.mubr.msk.bf16.vlgmr.msra.gmra.mxu1 %vm1502_vm1, %v18236_v25  ;;  %v23021_v25 = vld [vmem:[%s28394_s17 + $0x360] sm:$0xff]  }
0x1796   : > { %20466 = vmatpush3.bf16.msra.mxu0 %v22989_v14  ;;  %20484 = vmatpush3.bf16.msra.mxu1 %v22990_v45  ;;  %v23032_v14 = vld [vmem:[%s28394_s17 + $0x3b8] sm:$0xff]   ;;  %v23033_v45 = vld [vmem:[%s28394_s17 + $0x3f0] sm:$0xff]  }
0x1797   : > { %20467 = vmatprep.subr.bf16.mxu0 %v22991_v18  ;;  %20485 = vmatprep.subr.bf16.mxu1 %v22992_v62  ;;  %v23022_v18 = vld [vmem:[%s28394_s17 + $0x320] sm:$0xff]   ;;  %v23034_v62 = vld [vmem:[%s28394_s17 + $0x3b0] sm:$0xff]  }
0x179a   : > { %20468 = vmatpush3.bf16.msra.mxu0 %v22993_v55  ;;  %20486 = vmatpush3.bf16.msra.mxu1 %v22994_v21  ;;  %v23023_v55 = vld [vmem:[%s28394_s17 + $0x358] sm:$0xff]   ;;  %v23035_v21 = vld [vmem:[%s28394_s17 + $0x3e8] sm:$0xff]  }
0x179b   : > { %20469 = vmatprep.subr.bf16.mxu0 %v22995_v10  ;;  %20487 = vmatprep.subr.bf16.mxu1 %v22996_v0  ;;  %v23024_v10 = vld [vmem:[%s28394_s17 + $0x318] sm:$0xff]   ;;  %v23036_v0 = vld [vmem:[%s28394_s17 + $0x3a8] sm:$0xff]  }
0x179e   : > { %20470 = vmatpush3.bf16.msra.mxu0 %v22997_v36  ;;  %20488 = vmatpush3.bf16.msra.mxu1 %v22998_v4  ;;  %v23025_v36 = vld [vmem:[%s28394_s17 + $0x350] sm:$0xff]  }
0x179f   : > { %20471 = vmatprep.subr.bf16.mxu0 %v22999_v27  ;;  %20489 = vmatprep.subr.bf16.mxu1 %v23000_v12  ;;  %v23026_v4 = vld [vmem:[%s28394_s17 + $0x310] sm:$0xff]   ;;  %v23027_v27 = vld [vmem:[%s28394_s17 + $0x348] sm:$0xff]  }
0x17a0   : > { %v23028_v12 = vld [vmem:[%s28394_s17 + $0x308] sm:$0xff]  }
0x17a2   : > { %20472 = vmatpush3.bf16.msra.mxu0 %v23001_v48  ;;  %20490 = vmatpush3.bf16.msra.mxu1 %v23002_v5  ;;  %v23029_v48 = vld [vmem:[%s28394_s17 + $0x340] sm:$0xff]  }
0x17a3   : > { %20473 = vmatprep.subr.bf16.mxu0 %v23003_v41  ;;  %20491 = vmatprep.subr.bf16.mxu1 %v23004_v13  ;;  %v23030_v5 = vld [vmem:[%s28394_s17 + $0x300] sm:$0xff]  }
0x17a4   : > { %v23037_v41 = vld [vmem:[%s28394_s17 + $0x3e0] sm:$0xff]  }
0x17a5   : > { %v23038_v13 = vld [vmem:[%s28394_s17 + $0x3a0] sm:$0xff]  }
0x17a6   : > { %20474 = vmatpush3.bf16.msra.mxu0 %v23005_v57  ;;  %20492 = vmatpush3.bf16.msra.mxu1 %v23006_v40  ;;  %v23039_v57 = vld [vmem:[%s28394_s17 + $0x3d8] sm:$0xff]  }
0x17a7   : > { %20475 = vmatprep.subr.bf16.mxu0 %v23007_v47  ;;  %20493 = vmatprep.subr.bf16.mxu1 %v23008_v59  ;;  %v23040_v40 = vld [vmem:[%s28394_s17 + $0x398] sm:$0xff]   ;;  %v23042_v47 = vld [vmem:[%s28394_s17 + $0x390] sm:$0xff]   ;;  %v23043_v59 = vld [vmem:[%s28394_s17 + $0x3c8] sm:$0xff]  }
0x17aa   : > { %20476 = vmatpush3.bf16.msra.mxu0 %v23009_v16  ;;  %20494 = vmatpush3.bf16.msra.mxu1 %v23010_v15  ;;  %v23044_v16 = vld [vmem:[%s28394_s17 + $0x388] sm:$0xff]   ;;  %v23045_v15 = vld [vmem:[%s28394_s17 + $0x3c0] sm:$0xff]  }
0x17ab   : > { %18288 = vmatprep.subr.msk.bf16.mxu0 %vm1551_vm0, %v26909_v61  ;;  %20495 = vmatprep.subr.bf16.mxu1 %v23011_v56  ;;  %v23046_v56 = vld [vmem:[%s28394_s17 + $0x380] sm:$0xff]  }
0x17ae   : > { %20496 = vmatpush3.bf16.msra.mxu1 %v23012_v37 }
0x17af   : > { %20497 = vmatprep.subr.bf16.mxu1 %v23013_v22 }
0x17b2   : > { %20498 = vmatpush3.bf16.msra.mxu1 %v23014_v63 }
0x17b3   : > { %18339 = vmatprep.subr.msk.bf16.mxu1 %vm1551_vm0, %v26909_v61 }
0x1845   : > { %v20433_v33 = vpop.f32.mrf.mxu0 }
0x1847   : > { %v20434_v31 = vpop.f32.mrf.mxu0 }
0x1848   : > { %v20435_v39 = vadd.f32 %v20434_v31, %v20433_v33 }
0x1849   : > { %v20436_v9 = vpop.f32.mrf.mxu0 }
0x184a   : > { %v11718_v28 = vadd.f32 %v20435_v39, %v27140_v32 }
0x184b   : > { %v20437_v2 = vpop.f32.mrf.mxu0 }
0x184d   : > { %v20455_v58 = vpop.f32.mrf.mxu1  ;;  %v11976_v6 = vpop.f32.mrf.mxu0 }
0x184e   : > { %v11983_v3 = vpack.c.bf16 %v11976_v6, %v11976_v6 }
0x184f   : > { %v20456_v34 = vpop.f32.mrf.mxu1  ;;  %v11978_v20 = vpop.f32.mrf.mxu0 }
0x1850   : > { %v20457_v24 = vadd.f32 %v20456_v34, %v20455_v58  ;;  %v11984_v19 = vpack.c.bf16 %v11978_v20, %v11978_v20 }
0x1851   : > { %v20458_v54 = vpop.f32.mrf.mxu1  ;;  %v11980_v29 = vpop.f32.mrf.mxu0 }
0x1852   : > { %v27258_v46 = vadd.f32 %v20457_v24, %v11718_v28  ;;  %12146 = vmatprep.mubr.bf16.mxu0 %v11984_v19 }
0x1853   : > { %v20459_v44 = vpop.f32.mrf.mxu1  ;;  %12147 = vmatmul.mubr.bf16.vlgmr.msra.gmra.mxu0 %v11983_v3  ;;  %v11981_v32 = vpop.f32.mrf.mxu0  ;;  %v23047_v3 = vld [vmem:[%s28394_s17 + $0x478] sm:$0xff]  }
0x1854   : > { %12393 = vmatpush1.bf16.msra.mxu0 %v26918_v1  ;;  %12410 = vmatprep.mubr.bf16.mxu0 %v23247_v35 }
0x1855   : > { %v12194_v38 = vpop.f32.mrf.mxu1  ;;  %20505 = vmatprep.subr.bf16.mxu0 %v23015_v43 }
0x1856   : > { %v12201_v50 = vpack.c.bf16 %v12194_v38, %v12194_v38 }
0x1857   : > { %v12196_v42 = vpop.f32.mrf.mxu1 }
0x1858   : > { %v12202_v8 = vpack.c.bf16 %v12196_v42, %v12196_v42  ;;  %v23048_v42 = vld [vmem:[%s28394_s17 + $0x438] sm:$0xff]  }
0x1859   : > { %v12198_v11 = vpop.f32.mrf.mxu1 }
0x185a   : > { %12364 = vmatprep.mubr.bf16.mxu1 %v12202_v8  ;;  %v23049_v8 = vld [vmem:[%s28394_s17 + $0x470] sm:$0xff]   ;;  %v23053_v11 = vld [vmem:[%s28394_s17 + $0x460] sm:$0xff]  }
0x185b   : > { %12365 = vmatmul.mubr.bf16.vlgmr.msra.gmra.mxu1 %v12201_v50  ;;  %18289 = vmatmul.mubr.msk.bf16.vlgmr.msra.gmra.mxu0 %vm1502_vm1, %v18287_v26  ;;  %v12199_v30 = vpop.f32.mrf.mxu1  ;;  %v18389_v50 = vld [vmem:[%s28598_s6 + $0x20] sm:$0xf]  ;;  %v23050_v26 = vld [vmem:[%s28394_s17 + $0x430] sm:$0xff]  }
0x185c   : > { %20506 = vmatpush3.bf16.msra.mxu0 %v23016_v7  ;;  %12611 = vmatpush1.bf16.msra.mxu1 %v26918_v1  ;;  %v23051_v7 = vld [vmem:[%s28394_s17 + $0x468] sm:$0xff]   ;;  %v23055_v30 = vld [vmem:[%s28394_s17 + $0x458] sm:$0xff]  }
0x185d   : > { %20507 = vmatprep.subr.bf16.mxu0 %v23017_v53  ;;  %12628 = vmatprep.mubr.bf16.mxu1 %v23247_v35  ;;  %v23052_v53 = vld [vmem:[%s28394_s17 + $0x428] sm:$0xff]  }
0x185e   : > { %20527 = vmatprep.subr.bf16.mxu1 %v23031_v23  ;;  %v23054_v23 = vld [vmem:[%s28394_s17 + $0x420] sm:$0xff]  }
0x1860   : > { %20508 = vmatpush3.bf16.msra.mxu0 %v23018_v51  ;;  %v23056_v51 = vld [vmem:[%s28394_s17 + $0x418] sm:$0xff]  }
0x1861   : > { %20509 = vmatprep.subr.bf16.mxu0 %v23019_v49  ;;  %v23057_v49 = vld [vmem:[%s28394_s17 + $0x450] sm:$0xff]  }
0x1863   : > { %18340 = vmatmul.mubr.msk.bf16.vlgmr.msra.gmra.mxu1 %vm1502_vm1, %v18338_v17  ;;  %v23059_v17 = vld [vmem:[%s28394_s17 + $0x448] sm:$0xff]  }
0x1864   : > { %20510 = vmatpush3.bf16.msra.mxu0 %v23020_v60  ;;  %20528 = vmatpush3.bf16.msra.mxu1 %v23032_v14  ;;  %v23058_v60 = vld [vmem:[%s28394_s17 + $0x410] sm:$0xff]   ;;  %v23060_v14 = vld [vmem:[%s28394_s17 + $0x408] sm:$0xff]  }
0x1865   : > { %20511 = vmatprep.subr.bf16.mxu0 %v23021_v25  ;;  %20529 = vmatprep.subr.bf16.mxu1 %v23033_v45  ;;  %v23061_v25 = vld [vmem:[%s28394_s17 + $0x440] sm:$0xff]  }
0x1866   : > { %v23062_v45 = vld [vmem:[%s28394_s17 + $0x400] sm:$0xff]  }
0x1868   : > { %20512 = vmatpush3.bf16.msra.mxu0 %v23022_v18  ;;  %20530 = vmatpush3.bf16.msra.mxu1 %v23034_v62 }
0x1869   : > { %20513 = vmatprep.subr.bf16.mxu0 %v23023_v55  ;;  %20531 = vmatprep.subr.bf16.mxu1 %v23035_v21 }
0x186c   : > { %20514 = vmatpush3.bf16.msra.mxu0 %v23024_v10  ;;  %20532 = vmatpush3.bf16.msra.mxu1 %v23036_v0 }
0x186d   : > { %20515 = vmatprep.subr.bf16.mxu0 %v23025_v36  ;;  %20533 = vmatprep.subr.bf16.mxu1 %v23037_v41 }
0x1870   : > { %20516 = vmatpush3.bf16.msra.mxu0 %v23026_v4  ;;  %20534 = vmatpush3.bf16.msra.mxu1 %v23038_v13 }
0x1871   : > { %20517 = vmatprep.subr.bf16.mxu0 %v23027_v27  ;;  %20535 = vmatprep.subr.bf16.mxu1 %v23039_v57 }
0x1874   : > { %20518 = vmatpush3.bf16.msra.mxu0 %v23028_v12  ;;  %20536 = vmatpush3.bf16.msra.mxu1 %v23040_v40 }
0x1875   : > { %20519 = vmatprep.subr.bf16.mxu0 %v23029_v48 }
0x1878   : > { %20520 = vmatpush3.bf16.msra.mxu0 %v23030_v5 }
0x1879   : > { %18390 = vmatprep.subr.msk.bf16.mxu0 %vm1551_vm0, %v26909_v61  ;;  %v23041_v61 = vld [vmem:[%s28394_s17 + $0x3d0] sm:$0xff]  }
0x187a   : > { %20537 = vmatprep.subr.bf16.mxu1 %v23041_v61 }
0x187b   : > { %20538 = vmatpush3.bf16.msra.mxu1 %v23042_v47 }
0x187c   : > { %20539 = vmatprep.subr.bf16.mxu1 %v23043_v59 }
0x187f   : > { %20540 = vmatpush3.bf16.msra.mxu1 %v23044_v16 }
0x1880   : > { %20541 = vmatprep.subr.bf16.mxu1 %v23045_v15 }
0x1883   : > { %20542 = vmatpush3.bf16.msra.mxu1 %v23046_v56  ;;  %v18440_v56 = vld [vmem:[%s28395_s18] ss:$0 sm:$0xff] }
0x1884   : > { %21537 = vmatprep.subr.bf16.mxu1 %v23245_v52 }
0x1913   : > { %v20477_v37 = vpop.f32.mrf.mxu0 }
0x1915   : > { %v20478_v22 = vpop.f32.mrf.mxu0 }
0x1916   : > { %v20479_v63 = vadd.f32 %v20478_v22, %v20477_v37 }
0x1917   : > { %v20480_v33 = vpop.f32.mrf.mxu0 }
0x1918   : > { %v12154_v31 = vadd.f32 %v20479_v63, %v27258_v46 }
0x1919   : > { %v20481_v39 = vpop.f32.mrf.mxu0 }
0x191b   : > { %v20499_v9 = vpop.f32.mrf.mxu1  ;;  %v12412_v28 = vpop.f32.mrf.mxu0 }
0x191c   : > { %v12419_v20 = vpack.c.bf16 %v12412_v28, %v12412_v28  ;;  %v23063_v28 = vld [vmem:[%s28385_s8] sm:$0xff]  }
0x191d   : > { %v20500_v2 = vpop.f32.mrf.mxu1  ;;  %v12414_v58 = vpop.f32.mrf.mxu0 }
0x191e   : > { %v20501_v6 = vadd.f32 %v20500_v2, %v20499_v9  ;;  %v12420_v34 = vpack.c.bf16 %v12414_v58, %v12414_v58  ;;  %v23068_v2 = vld [vmem:[%s28396_s19 + $0x38] sm:$0xff]  }
0x191f   : > { %v20502_v24 = vpop.f32.mrf.mxu1  ;;  %v12416_v19 = vpop.f32.mrf.mxu0 }
0x1920   : > { %v12372_v54 = vadd.f32 %v20501_v6, %v12154_v31  ;;  %12582 = vmatprep.mubr.bf16.mxu0 %v12420_v34  ;;  %v23192_v19 = vld [vmem:[%s28596_s25] sm:$0xff]  }
0x1921   : > { %v20503_v43 = vpop.f32.mrf.mxu1  ;;  %12583 = vmatmul.mubr.bf16.vlgmr.msra.gmra.mxu0 %v12419_v20  ;;  %v12417_v29 = vpop.f32.mrf.mxu0 }
0x1922   : > { %12829 = vmatpush1.bf16.msra.mxu0 %v26918_v1  ;;  %12846 = vmatprep.mubr.bf16.mxu0 %v23247_v35  ;;  %v23065_v43 = vld [vmem:[%s28396_s19 + $0x70] sm:$0xff]   ;;  %v23066_v29 = vld [vmem:[%s28396_s19 + $0x68] sm:$0xff]  }
0x1923   : > { %v12630_v46 = vpop.f32.mrf.mxu1  ;;  %20549 = vmatprep.subr.bf16.mxu0 %v23047_v3  ;;  %v23064_v3 = vld [vmem:[%s28396_s19 + $0x78] sm:$0xff]  }
0x1924   : > { %v12637_v44 = vpack.c.bf16 %v12630_v46, %v12630_v46  ;;  %v23067_v46 = vld [vmem:[%s28396_s19 + $0x60] sm:$0xff]  }
0x1925   : > { %v12632_v32 = vpop.f32.mrf.mxu1 }
0x1926   : > { %v12638_v38 = vpack.c.bf16 %v12632_v32, %v12632_v32  ;;  %v23070_v32 = vld [vmem:[%s28396_s19 + $0x30] sm:$0xff]  }
0x1927   : > { %v12634_v1 = vpop.f32.mrf.mxu1 }
0x1928   : > { %12800 = vmatprep.mubr.bf16.mxu1 %v12638_v38  ;;  %v23072_v38 = vld [vmem:[%s28396_s19 + $0x28] sm:$0xff]  }
0x1929   : > { %12801 = vmatmul.mubr.bf16.vlgmr.msra.gmra.mxu1 %v12637_v44  ;;  %18391 = vmatmul.mubr.msk.bf16.vlgmr.msra.gmra.mxu0 %vm1502_vm1, %v18389_v50  ;;  %v12635_v35 = vpop.f32.mrf.mxu1  ;;  %v23069_v44 = vld [vmem:[%s28396_s19 + $0x58] sm:$0xff]   ;;  %v23074_v50 = vld [vmem:[%s28396_s19 + $0x20] sm:$0xff]   ;;  %v23078_v1 = vld [vmem:[%s28396_s19 + $0x8] sm:$0xff]  }
0x192a   : > { %20550 = vmatpush3.bf16.msra.mxu0 %v23048_v42  ;;  %21539 = vmatprep.mubr.msk.bf16.mxu1 %vm23246_vm3, %v23245_v52  ;;  %v23076_v42 = vld [vmem:[%s28396_s19 + $0x18] sm:$0xff]   ;;  %v23071_v35 = vld [vmem:[%s28396_s19 + $0x50] sm:$0xff]  }
0x192b   : > { %20551 = vmatprep.subr.bf16.mxu0 %v23049_v8  ;;  %v23077_v8 = vld [vmem:[%s28396_s19 + $0x10] sm:$0xff]  }
0x192e   : > { %20552 = vmatpush3.bf16.msra.mxu0 %v23050_v26  ;;  %v23079_v26 = vld [vmem:[%s28396_s19] sm:$0xff]  }
0x192f   : > { %20553 = vmatprep.subr.bf16.mxu0 %v23051_v7  ;;  %v23073_v7 = vld [vmem:[%s28396_s19 + $0x48] sm:$0xff]  }
0x1932   : > { %20554 = vmatpush3.bf16.msra.mxu0 %v23052_v53  ;;  %v23075_v53 = vld [vmem:[%s28396_s19 + $0x40] sm:$0xff]  }
0x1933   : > { %20555 = vmatprep.subr.bf16.mxu0 %v23053_v11 }
0x1936   : > { %20556 = vmatpush3.bf16.msra.mxu0 %v23054_v23 }
0x1937   : > { %20557 = vmatprep.subr.bf16.mxu0 %v23055_v30 }
0x193a   : > { %20558 = vmatpush3.bf16.msra.mxu0 %v23056_v51  ;;  %v23080_v51 = vld [vmem:[%s28396_s19 + $0xb8] sm:$0xff]  }
0x193b   : > { %20559 = vmatprep.subr.bf16.mxu0 %v23057_v49 }
0x193e   : > { %20560 = vmatpush3.bf16.msra.mxu0 %v23058_v60 }
0x193f   : > { %20561 = vmatprep.subr.bf16.mxu0 %v23059_v17 }
0x1942   : > { %20562 = vmatpush3.bf16.msra.mxu0 %v23060_v14  ;;  %v23081_v14 = vld [vmem:[%s28396_s19 + $0xb0] sm:$0xff]  }
0x1943   : > { %20563 = vmatprep.subr.bf16.mxu0 %v23061_v25 }
0x1946   : > { %20564 = vmatpush3.bf16.msra.mxu0 %v23062_v45 }
0x1947   : > { %21575 = vmatprep.subr.bf16.mxu0 %v23245_v52 }
0x19e1   : > { %v20521_v18 = vpop.f32.mrf.mxu0 }
0x19e3   : > { %v20522_v62 = vpop.f32.mrf.mxu0 }
0x19e4   : > { %v20523_v55 = vadd.f32 %v20522_v62, %v20521_v18  ;;  %v23082_v62 = vld [vmem:[%s28396_s19 + $0xa8] sm:$0xff]  }
0x19e5   : > { %v20524_v21 = vpop.f32.mrf.mxu0 }
0x19e6   : > { %v12590_v10 = vadd.f32 %v20523_v55, %v12372_v54  ;;  %v23193_v54 = vld [vmem:[%s28596_s25 + $0x8] sm:$0xff]   ;;  %v23084_v21 = vld [vmem:[%s28396_s19 + $0xa0] sm:$0xff]  }
0x19e7   : > { %v20525_v0 = vpop.f32.mrf.mxu0 }
0x19e8   : > { %v23194_v0 = vld [vmem:[%s28596_s25 + $0x10] sm:$0xff]  }
0x19e9   : > { %v20543_v36 = vpop.f32.mrf.mxu1  ;;  %v12848_v4 = vpop.f32.mrf.mxu0 }
0x19ea   : > { %v12855_v41 = vpack.c.bf16 %v12848_v4, %v12848_v4  ;;  %v23195_v4 = vld [vmem:[%s28596_s25 + $0x18] sm:$0xff]  }
0x19eb   : > { %v20544_v27 = vpop.f32.mrf.mxu1  ;;  %v12850_v12 = vpop.f32.mrf.mxu0 }
0x19ec   : > { %v20545_v48 = vadd.f32 %v20544_v27, %v20543_v36  ;;  %v12856_v5 = vpack.c.bf16 %v12850_v12, %v12850_v12  ;;  %v23083_v36 = vld [vmem:[%s28396_s19 + $0xf8] sm:$0xff]   ;;  %v23085_v27 = vld [vmem:[%s28396_s19 + $0xf0] sm:$0xff]   ;;  %v23087_v12 = vld [vmem:[%s28396_s19 + $0xe8] sm:$0xff]  }
0x19ed   : > { %v12852_v13 = vpop.f32.mrf.mxu0  ;;  %v20546_v57 = vpop.f32.mrf.mxu1 }
0x19ee   : > { %v12808_v40 = vadd.f32 %v20545_v48, %v12590_v10  ;;  %13018 = vmatprep.mubr.bf16.mxu0 %v12856_v5  ;;  %v23086_v10 = vld [vmem:[%s28396_s19 + $0x98] sm:$0xff]   ;;  %v23088_v48 = vld [vmem:[%s28396_s19 + $0x90] sm:$0xff]   ;;  %v23089_v5 = vld [vmem:[%s28396_s19 + $0xe0] sm:$0xff]  }
0x19ef   : > { %13019 = vmatmul.mubr.bf16.vlgmr.msra.gmra.mxu0 %v12855_v41  ;;  %v12853_v61 = vpop.f32.mrf.mxu0  ;;  %v20547_v47 = vpop.f32.mrf.mxu1  ;;  %v23090_v41 = vld [vmem:[%s28396_s19 + $0x88] sm:$0xff]   ;;  %v23091_v13 = vld [vmem:[%s28396_s19 + $0xd8] sm:$0xff]   ;;  %v23092_v57 = vld [vmem:[%s28396_s19 + $0x80] sm:$0xff]  }
0x19f0   : > { %21591 = vmatprep.mubr.msk.bf16.mxu0 %vm23246_vm3, %v23245_v52  ;;  %21576 = vmatpush3.bf16.msra.mxu0 %v23068_v2  ;;  %v23094_v61 = vld [vmem:[%s28396_s19 + $0xc8] sm:$0xff]   ;;  %v23095_v47 = vld [vmem:[%s28396_s19 + $0xc0] sm:$0xff]  }
0x19f1   : > { %21577 = vmatprep.subr.bf16.mxu0 %v23245_v52 }
0x19f4   : > { %21578 = vmatpush3.bf16.msra.mxu0 %v23070_v32  ;;  %v23098_v32 = vld [vmem:[%s28396_s19 + $0x128] sm:$0xff]  }
0x19f5   : > { %21579 = vmatprep.subr.bf16.mxu0 %v23245_v52 }
0x19f8   : > { %21580 = vmatpush3.bf16.msra.mxu0 %v23072_v38  ;;  %v23197_v38 = vld [vmem:[%s28596_s25 + $0x28] sm:$0xff]  }
0x19f9   : > { %21581 = vmatprep.subr.bf16.mxu0 %v23245_v52 }
0x19fc   : > { %21582 = vmatpush3.bf16.msra.mxu0 %v23074_v50  ;;  %v23101_v50 = vld [vmem:[%s28396_s19 + $0x170] sm:$0xff]  }
0x19fd   : > { %21583 = vmatprep.subr.bf16.mxu0 %v23245_v52 }
0x1a00   : > { %21584 = vmatpush3.bf16.msra.mxu0 %v23076_v42  ;;  %v23100_v42 = vld [vmem:[%s28396_s19 + $0x120] sm:$0xff]  }
0x1a01   : > { %21585 = vmatprep.subr.bf16.mxu0 %v23245_v52 }
0x1a04   : > { %21586 = vmatpush3.bf16.msra.mxu0 %v23077_v8  ;;  %v23103_v8 = vld [vmem:[%s28396_s19 + $0x168] sm:$0xff]  }
0x1a05   : > { %21587 = vmatprep.subr.bf16.mxu0 %v23245_v52 }
0x1a08   : > { %21588 = vmatpush3.bf16.msra.mxu0 %v23078_v1  ;;  %v23102_v1 = vld [vmem:[%s28396_s19 + $0x118] sm:$0xff]  }
0x1a09   : > { %21589 = vmatprep.subr.bf16.mxu0 %v23245_v52 }
0x1a0c   : > { %21590 = vmatpush3.bf16.msra.mxu0 %v23079_v26  ;;  %v23105_v26 = vld [vmem:[%s28396_s19 + $0x160] sm:$0xff]  }
0x1a0d   : > { %21601 = vmatprep.subr.bf16.mxu0 %v23245_v52 }
0x1aaf   : > { %v20565_v59 = vpop.f32.mrf.mxu0 }
0x1ab1   : > { %v20566_v16 = vpop.f32.mrf.mxu0 }
0x1ab2   : > { %v20567_v15 = vadd.f32 %v20566_v16, %v20565_v59 }
0x1ab3   : > { %v20568_v37 = vpop.f32.mrf.mxu0 }
0x1ab4   : > { %v13026_v22 = vadd.f32 %v20567_v15, %v12808_v40  ;;  %v23093_v40 = vld [vmem:[%s28396_s19 + $0xd0] sm:$0xff]  }
0x1ab5   : > { %v20569_v63 = vpop.f32.mrf.mxu0 }
0x1ab6   : > { %v13034_v33 = vadd.f32 %v18440_v56, %v13026_v22 }
0x1ab8   : > { %v13035_v31 = vmax.f32 %v13034_v33, 0.0 }
0x1aba   : > { %v13038_v39 = vpack.c.bf16 %v13035_v31, %v13035_v31 }
0x1abc   : > { %v13048_v9 = vsel %vm1551_vm0, %v13038_v39, 0 }
0x1abd   : > { %21538 = vmatpush3.bf16.msra.mxu1 %v13048_v9 }
0x1abe   : > { %21543 = vmatprep.subr.bf16.mxu1 %v23245_v52 }
0x1ac0   : > { %21540 = vmatmul.mubr.msk.bf16.vlgmr.msra.gmra.mxu1 %vm1502_vm1, %v23063_v28 }
0x1ac1   : > { %21545 = vmatprep.mubr.msk.bf16.mxu1 %vm23246_vm3, %v23245_v52 }
0x1b80   : > { %v13084_v58 = vpop.f32.mrf.mxu1 }
0x1b82   : > { %v21541_v6 = vpop.f32.mrf.mxu1 }
0x1b84   : > { %v13087_v34 = vpop.f32.mrf.mxu1 }
0x1b85   : > { %v27443_v20 = vpack.c.bf16 %v13087_v34, %v13084_v58 }
0x1b86   : > { %v21542_v24 = vpop.f32.mrf.mxu1 }
0x1b87   : > { %21544 = vmatpush3.bf16.msra.mxu1 %v27443_v20 }
0x1b88   : > { %21549 = vmatprep.subr.bf16.mxu1 %v23245_v52 }
0x1b8a   : > { %21546 = vmatmul.mubr.msk.bf16.vlgmr.msra.gmra.mxu1 %vm9093_vm4, %v23192_v19 }
0x1b8b   : > { %21550 = vmatpush3.bf16.msra.mxu1 %v27443_v20  ;;  %21551 = vmatprep.mubr.msk.bf16.mxu1 %vm23246_vm3, %v23245_v52 }
0x1b8c   : > { %21555 = vmatprep.subr.bf16.mxu1 %v23245_v52 }
0x1b92   : > { %21552 = vmatmul.mubr.msk.bf16.vlgmr.msra.gmra.mxu1 %vm9093_vm4, %v23193_v54  ;;  %v23096_v54 = vld [vmem:[%s28396_s19 + $0x138] sm:$0xff]  }
0x1b93   : > { %21556 = vmatpush3.bf16.msra.mxu1 %v23064_v3  ;;  %21571 = vmatprep.mubr.msk.bf16.mxu1 %vm23246_vm3, %v23245_v52 }
0x1b94   : > { %21557 = vmatprep.subr.bf16.mxu1 %v23245_v52 }
0x1b97   : > { %21558 = vmatpush3.bf16.msra.mxu1 %v23065_v43 }
0x1b98   : > { %21559 = vmatprep.subr.bf16.mxu1 %v23245_v52 }
0x1b9b   : > { %21560 = vmatpush3.bf16.msra.mxu1 %v23066_v29  ;;  %v23196_v29 = vld [vmem:[%s28596_s25 + $0x20] sm:$0xff]  }
0x1b9c   : > { %21561 = vmatprep.subr.bf16.mxu1 %v23245_v52 }
0x1b9f   : > { %21562 = vmatpush3.bf16.msra.mxu1 %v23067_v46  ;;  %v23097_v46 = vld [vmem:[%s28396_s19 + $0x130] sm:$0xff]  }
0x1ba0   : > { %21563 = vmatprep.subr.bf16.mxu1 %v23245_v52 }
0x1ba3   : > { %21564 = vmatpush3.bf16.msra.mxu1 %v23069_v44  ;;  %v23099_v44 = vld [vmem:[%s28396_s19 + $0x178] sm:$0xff]  }
0x1ba4   : > { %21565 = vmatprep.subr.bf16.mxu1 %v23245_v52 }
0x1ba7   : > { %21566 = vmatpush3.bf16.msra.mxu1 %v23071_v35  ;;  %v23104_v35 = vld [vmem:[%s28396_s19 + $0x110] sm:$0xff]  }
0x1ba8   : > { %21567 = vmatprep.subr.bf16.mxu1 %v23245_v52 }
0x1bab   : > { %21568 = vmatpush3.bf16.msra.mxu1 %v23073_v7  ;;  %v23106_v7 = vld [vmem:[%s28396_s19 + $0x108] sm:$0xff]  }
0x1bac   : > { %21569 = vmatprep.subr.bf16.mxu1 %v23245_v52 }
0x1baf   : > { %21570 = vmatpush3.bf16.msra.mxu1 %v23075_v53  ;;  %v23107_v53 = vld [vmem:[%s28396_s19 + $0x158] sm:$0xff]  }
0x1bb0   : > { %21595 = vmatprep.subr.bf16.mxu1 %v23245_v52 }
0x1c4a   : > { %v13126_v11 = vpop.f32.mrf.mxu1 }
0x1c4c   : > { %v21547_v23 = vpop.f32.mrf.mxu1 }
0x1c4d   : > { %v23109_v23 = vld [vmem:[%s28396_s19 + $0x150] sm:$0xff]  }
0x1c4e   : > { %v13129_v30 = vpop.f32.mrf.mxu1 }
0x1c4f   : > { %v13133_v49 = vpack.c.bf16 %v13129_v30, %v13126_v11  ;;  %v23108_v11 = vld [vmem:[%s28396_s19 + $0x100] sm:$0xff]   ;;  %v23110_v30 = vld [vmem:[%s28396_s19 + $0x148] sm:$0xff]  }
0x1c50   : > { %v21548_v60 = vpop.f32.mrf.mxu1 }
0x1c51   : > { %21592 = vmatmul.mubr.bf16.vlgmr.msra.gmra.mxu0 %v13133_v49 }
0x1c52   : > { %v13184_v17 = vpop.f32.mrf.mxu1  ;;  %21602 = vmatpush3.bf16.msra.mxu0 %v23080_v51  ;;  %21617 = vmatprep.mubr.msk.bf16.mxu0 %vm23246_vm3, %v23245_v52  ;;  %v23111_v51 = vld [vmem:[%s28396_s19 + $0x140] sm:$0xff]  }
0x1c53   : > { %21603 = vmatprep.subr.bf16.mxu0 %v23245_v52 }
0x1c54   : > { %v21553_v25 = vpop.f32.mrf.mxu1 }
0x1c56   : > { %v13187_v45 = vpop.f32.mrf.mxu1  ;;  %21604 = vmatpush3.bf16.msra.mxu0 %v23081_v14 }
0x1c57   : > { %v13191_v18 = vpack.c.bf16 %v13187_v45, %v13184_v17  ;;  %21605 = vmatprep.subr.bf16.mxu0 %v23245_v52 }
0x1c58   : > { %v21554_v55 = vpop.f32.mrf.mxu1 }
0x1c59   : > { %21572 = vmatmul.mubr.bf16.vlgmr.msra.gmra.mxu1 %v13191_v18 }
0x1c5a   : > { %21596 = vmatpush3.bf16.msra.mxu1 %v27443_v20  ;;  %21597 = vmatprep.mubr.msk.bf16.mxu1 %vm23246_vm3, %v23245_v52 }
0x1c5b   : > { %21621 = vmatprep.subr.bf16.mxu1 %v23245_v52  ;;  %21606 = vmatpush3.bf16.msra.mxu0 %v23082_v62 }
0x1c5c   : > { %21607 = vmatprep.subr.bf16.mxu0 %v23245_v52 }
0x1c5f   : > { %21608 = vmatpush3.bf16.msra.mxu0 %v23084_v21 }
0x1c60   : > { %21609 = vmatprep.subr.bf16.mxu0 %v23245_v52 }
0x1c61   : > { %21598 = vmatmul.mubr.msk.bf16.vlgmr.msra.gmra.mxu1 %vm9093_vm4, %v23194_v0 }
0x1c62   : > { %21622 = vmatpush3.bf16.msra.mxu1 %v27443_v20  ;;  %21623 = vmatprep.mubr.msk.bf16.mxu1 %vm23246_vm3, %v23245_v52 }
0x1c63   : > { %21627 = vmatprep.subr.bf16.mxu1 %v23245_v52  ;;  %21610 = vmatpush3.bf16.msra.mxu0 %v23086_v10 }
0x1c64   : > { %21611 = vmatprep.subr.bf16.mxu0 %v23245_v52 }
0x1c67   : > { %21612 = vmatpush3.bf16.msra.mxu0 %v23088_v48 }
0x1c68   : > { %21613 = vmatprep.subr.bf16.mxu0 %v23245_v52 }
0x1c69   : > { %21624 = vmatmul.mubr.msk.bf16.vlgmr.msra.gmra.mxu1 %vm9093_vm4, %v23195_v4 }
0x1c6a   : > { %21628 = vmatpush3.bf16.msra.mxu1 %v23083_v36  ;;  %21643 = vmatprep.mubr.msk.bf16.mxu1 %vm23246_vm3, %v23245_v52 }
0x1c6b   : > { %21629 = vmatprep.subr.bf16.mxu1 %v23245_v52  ;;  %21614 = vmatpush3.bf16.msra.mxu0 %v23090_v41 }
0x1c6c   : > { %21615 = vmatprep.subr.bf16.mxu0 %v23245_v52 }
0x1c6e   : > { %21630 = vmatpush3.bf16.msra.mxu1 %v23085_v27 }
0x1c6f   : > { %21631 = vmatprep.subr.bf16.mxu1 %v23245_v52  ;;  %21616 = vmatpush3.bf16.msra.mxu0 %v23092_v57 }
0x1c70   : > { %21647 = vmatprep.subr.bf16.mxu0 %v23245_v52 }
0x1c72   : > { %21632 = vmatpush3.bf16.msra.mxu1 %v23087_v12 }
0x1c73   : > { %21633 = vmatprep.subr.bf16.mxu1 %v23245_v52 }
0x1c76   : > { %21634 = vmatpush3.bf16.msra.mxu1 %v23089_v5 }
0x1c77   : > { %21635 = vmatprep.subr.bf16.mxu1 %v23245_v52 }
0x1c7a   : > { %21636 = vmatpush3.bf16.msra.mxu1 %v23091_v13 }
0x1c7b   : > { %21637 = vmatprep.subr.bf16.mxu1 %v23245_v52 }
0x1c7e   : > { %21638 = vmatpush3.bf16.msra.mxu1 %v23093_v40  ;;  %v23112_v40 = vld [vmem:[%s28396_s19 + $0x1b8] sm:$0xff]  }
0x1c7f   : > { %21639 = vmatprep.subr.bf16.mxu1 %v23245_v52 }
0x1c82   : > { %21640 = vmatpush3.bf16.msra.mxu1 %v23094_v61 }
0x1c83   : > { %21641 = vmatprep.subr.bf16.mxu1 %v23245_v52 }
0x1c86   : > { %21642 = vmatpush3.bf16.msra.mxu1 %v23095_v47  ;;  %v23198_v47 = vld [vmem:[%s28596_s25 + $0x30] sm:$0xff]  }
0x1c87   : > { %21673 = vmatprep.subr.bf16.mxu1 %v23245_v52 }
0x1d11   : > { %v13380_v59 = vpop.f32.mrf.mxu0 }
0x1d13   : > { %v21593_v16 = vpop.f32.mrf.mxu0 }
0x1d14   : > { %v23115_v16 = vld [vmem:[%s28396_s19 + $0x1f8] sm:$0xff]  }
0x1d15   : > { %v13383_v15 = vpop.f32.mrf.mxu0 }
0x1d17   : > { %v21594_v56 = vpop.f32.mrf.mxu0 }
0x1d18   : > { %v23199_v56 = vld [vmem:[%s28596_s25 + $0x38] sm:$0xff]  }
0x1d19   : > { %v13291_v37 = vpop.f32.mrf.mxu1 }
0x1d1a   : > { %v27605_v22 = vadd.f32 %v13380_v59, %v13291_v37  ;;  %v23113_v59 = vld [vmem:[%s28396_s19 + $0x1b0] sm:$0xff]  }
0x1d1b   : > { %v21573_v63 = vpop.f32.mrf.mxu1  ;;  %v23117_v37 = vld [vmem:[%s28396_s19 + $0x1f0] sm:$0xff]  }
0x1d1c   : > { %v23118_v63 = vld [vmem:[%s28396_s19 + $0x198] sm:$0xff]  }
0x1d1d   : > { %v13294_v33 = vpop.f32.mrf.mxu1 }
0x1d1e   : > { %v27607_v31 = vadd.f32 %v13383_v15, %v13294_v33  ;;  %v23114_v15 = vld [vmem:[%s28396_s19 + $0x1a8] sm:$0xff]  }
0x1d1f   : > { %v21574_v39 = vpop.f32.mrf.mxu1  ;;  %v23119_v33 = vld [vmem:[%s28396_s19 + $0x1e8] sm:$0xff]  }
0x1d20   : > { %v23121_v39 = vld [vmem:[%s28396_s19 + $0x1e0] sm:$0xff]  }
0x1d21   : > { %v13421_v9 = vpop.f32.mrf.mxu1 }
0x1d23   : > { %v21599_v28 = vpop.f32.mrf.mxu1 }
0x1d24   : > { %v23123_v28 = vld [vmem:[%s28396_s19 + $0x1d8] sm:$0xff]  }
0x1d25   : > { %v13424_v2 = vpop.f32.mrf.mxu1 }
0x1d26   : > { %v13428_v58 = vpack.c.bf16 %v13424_v2, %v13421_v9  ;;  %v23122_v9 = vld [vmem:[%s28396_s19 + $0x188] sm:$0xff]   ;;  %v23124_v2 = vld [vmem:[%s28396_s19 + $0x180] sm:$0xff]  }
0x1d27   : > { %v21600_v6 = vpop.f32.mrf.mxu1 }
0x1d28   : > { %21618 = vmatmul.mubr.bf16.vlgmr.msra.gmra.mxu0 %v13428_v58  ;;  %v23125_v58 = vld [vmem:[%s28396_s19 + $0x1d0] sm:$0xff]   ;;  %v23126_v6 = vld [vmem:[%s28396_s19 + $0x1c8] sm:$0xff]  }
0x1d29   : > { %21648 = vmatpush3.bf16.msra.mxu0 %v27443_v20  ;;  %v13571_v34 = vpop.f32.mrf.mxu1  ;;  %21649 = vmatprep.mubr.msk.bf16.mxu0 %vm23246_vm3, %v23245_v52 }
0x1d2a   : > { %21653 = vmatprep.subr.bf16.mxu0 %v23245_v52 }
0x1d2b   : > { %v21625_v24 = vpop.f32.mrf.mxu1 }
0x1d2d   : > { %v13574_v19 = vpop.f32.mrf.mxu1 }
0x1d2e   : > { %v13578_v3 = vpack.c.bf16 %v13574_v19, %v13571_v34  ;;  %v23127_v34 = vld [vmem:[%s28396_s19 + $0x1c0] sm:$0xff]  }
0x1d2f   : > { %v21626_v43 = vpop.f32.mrf.mxu1 }
0x1d30   : > { %21644 = vmatmul.mubr.bf16.vlgmr.msra.gmra.mxu1 %v13578_v3  ;;  %21650 = vmatmul.mubr.msk.bf16.vlgmr.msra.gmra.mxu0 %vm9093_vm4, %v23196_v29 }
0x1d31   : > { %21674 = vmatpush3.bf16.msra.mxu1 %v27443_v20  ;;  %21675 = vmatprep.mubr.msk.bf16.mxu1 %vm23246_vm3, %v23245_v52 }
0x1d32   : > { %21654 = vmatpush3.bf16.msra.mxu0 %v23096_v54  ;;  %21679 = vmatprep.subr.bf16.mxu1 %v23245_v52 }
0x1d33   : > { %21655 = vmatprep.subr.bf16.mxu0 %v23245_v52  ;;  %21669 = vmatprep.mubr.msk.bf16.mxu0 %vm23246_vm3, %v23245_v52 }
0x1d36   : > { %21656 = vmatpush3.bf16.msra.mxu0 %v23097_v46 }
0x1d37   : > { %21657 = vmatprep.subr.bf16.mxu0 %v23245_v52 }
0x1d38   : > { %21676 = vmatmul.mubr.msk.bf16.vlgmr.msra.gmra.mxu1 %vm9093_vm4, %v23197_v38 }
0x1d39   : > { %21680 = vmatpush3.bf16.msra.mxu1 %v23099_v44  ;;  %21695 = vmatprep.mubr.msk.bf16.mxu1 %vm23246_vm3, %v23245_v52 }
0x1d3a   : > { %21658 = vmatpush3.bf16.msra.mxu0 %v23098_v32  ;;  %21681 = vmatprep.subr.bf16.mxu1 %v23245_v52 }
0x1d3b   : > { %21659 = vmatprep.subr.bf16.mxu0 %v23245_v52 }
0x1d3d   : > { %21682 = vmatpush3.bf16.msra.mxu1 %v23101_v50 }
0x1d3e   : > { %21660 = vmatpush3.bf16.msra.mxu0 %v23100_v42  ;;  %21683 = vmatprep.subr.bf16.mxu1 %v23245_v52 }
0x1d3f   : > { %21661 = vmatprep.subr.bf16.mxu0 %v23245_v52 }
0x1d41   : > { %21684 = vmatpush3.bf16.msra.mxu1 %v23103_v8 }
0x1d42   : > { %21662 = vmatpush3.bf16.msra.mxu0 %v23102_v1  ;;  %21685 = vmatprep.subr.bf16.mxu1 %v23245_v52 }
0x1d43   : > { %21663 = vmatprep.subr.bf16.mxu0 %v23245_v52 }
0x1d45   : > { %21686 = vmatpush3.bf16.msra.mxu1 %v23105_v26 }
0x1d46   : > { %21664 = vmatpush3.bf16.msra.mxu0 %v23104_v35  ;;  %21687 = vmatprep.subr.bf16.mxu1 %v23245_v52 }
0x1d47   : > { %21665 = vmatprep.subr.bf16.mxu0 %v23245_v52 }
0x1d49   : > { %21688 = vmatpush3.bf16.msra.mxu1 %v23107_v53 }
0x1d4a   : > { %21666 = vmatpush3.bf16.msra.mxu0 %v23106_v7  ;;  %21689 = vmatprep.subr.bf16.mxu1 %v23245_v52 }
0x1d4b   : > { %21667 = vmatprep.subr.bf16.mxu0 %v23245_v52 }
0x1d4d   : > { %21690 = vmatpush3.bf16.msra.mxu1 %v23109_v23 }
0x1d4e   : > { %21668 = vmatpush3.bf16.msra.mxu0 %v23108_v11  ;;  %21691 = vmatprep.subr.bf16.mxu1 %v23245_v52 }
0x1d4f   : > { %21699 = vmatprep.subr.bf16.mxu0 %v23245_v52 }
0x1d51   : > { %21692 = vmatpush3.bf16.msra.mxu1 %v23110_v30  ;;  %v23128_v30 = vld [vmem:[%s28396_s19 + $0x238] sm:$0xff]  }
0x1d52   : > { %21693 = vmatprep.subr.bf16.mxu1 %v23245_v52 }
0x1d55   : > { %21694 = vmatpush3.bf16.msra.mxu1 %v23111_v51 }
0x1d56   : > { %21725 = vmatprep.subr.bf16.mxu1 %v23245_v52 }
0x1de8   : > { %v13528_v49 = vpop.f32.mrf.mxu0 }
0x1de9   : > { %v13535_v60 = vadd.f32 %v13528_v49, %v27605_v22  ;;  %v23116_v22 = vld [vmem:[%s28396_s19 + $0x1a0] sm:$0xff]  }
0x1dea   : > { %v21619_v17 = vpop.f32.mrf.mxu0 }
0x1deb   : > { %v23130_v17 = vld [vmem:[%s28396_s19 + $0x228] sm:$0xff]  }
0x1dec   : > { %v13531_v14 = vpop.f32.mrf.mxu0 }
0x1ded   : > { %v13536_v25 = vadd.f32 %v13531_v14, %v27607_v31  ;;  %v23120_v31 = vld [vmem:[%s28396_s19 + $0x190] sm:$0xff]   ;;  %v23131_v14 = vld [vmem:[%s28396_s19 + $0x220] sm:$0xff]  }
0x1dee   : > { %v21620_v45 = vpop.f32.mrf.mxu0 }
0x1def   : > { %v23133_v45 = vld [vmem:[%s28396_s19 + $0x210] sm:$0xff]  }
0x1df0   : > { %v13678_v18 = vpop.f32.mrf.mxu1  ;;  %v13721_v62 = vpop.f32.mrf.mxu0 }
0x1df1   : > { %v27695_v55 = vadd.f32 %v13678_v18, %v13535_v60  ;;  %v23200_v60 = vld [vmem:[%s28596_s25 + $0x40] sm:$0xff]   ;;  %v23134_v18 = vld [vmem:[%s28396_s19 + $0x208] sm:$0xff]  }
0x1df2   : > { %v21645_v21 = vpop.f32.mrf.mxu1  ;;  %v21651_v10 = vpop.f32.mrf.mxu0 }
0x1df4   : > { %v13681_v0 = vpop.f32.mrf.mxu1  ;;  %v13724_v36 = vpop.f32.mrf.mxu0 }
0x1df5   : > { %v27697_v4 = vadd.f32 %v13681_v0, %v13536_v25  ;;  %v13728_v27 = vpack.c.bf16 %v13724_v36, %v13721_v62  ;;  %v23132_v25 = vld [vmem:[%s28396_s19 + $0x218] sm:$0xff]   ;;  %v23135_v62 = vld [vmem:[%s28396_s19 + $0x200] sm:$0xff]  }
0x1df6   : > { %v21646_v12 = vpop.f32.mrf.mxu1  ;;  %v21652_v48 = vpop.f32.mrf.mxu0 }
0x1df7   : > { %21670 = vmatmul.mubr.bf16.vlgmr.msra.gmra.mxu0 %v13728_v27 }
0x1df8   : > { %21700 = vmatpush3.bf16.msra.mxu0 %v27443_v20  ;;  %v13871_v5 = vpop.f32.mrf.mxu1  ;;  %21701 = vmatprep.mubr.msk.bf16.mxu0 %vm23246_vm3, %v23245_v52 }
0x1df9   : > { %21705 = vmatprep.subr.bf16.mxu0 %v23245_v52 }
0x1dfa   : > { %v21677_v41 = vpop.f32.mrf.mxu1 }
0x1dfc   : > { %v13874_v13 = vpop.f32.mrf.mxu1 }
0x1dfd   : > { %v13878_v57 = vpack.c.bf16 %v13874_v13, %v13871_v5 }
0x1dfe   : > { %v21678_v61 = vpop.f32.mrf.mxu1 }
0x1dff   : > { %21696 = vmatmul.mubr.bf16.vlgmr.msra.gmra.mxu1 %v13878_v57  ;;  %21702 = vmatmul.mubr.msk.bf16.vlgmr.msra.gmra.mxu0 %vm9093_vm4, %v23198_v47 }
0x1e00   : > { %21726 = vmatpush3.bf16.msra.mxu1 %v27443_v20  ;;  %21727 = vmatprep.mubr.msk.bf16.mxu1 %vm23246_vm3, %v23245_v52 }
0x1e01   : > { %21706 = vmatpush3.bf16.msra.mxu0 %v23112_v40  ;;  %21731 = vmatprep.subr.bf16.mxu1 %v23245_v52 }
0x1e02   : > { %21707 = vmatprep.subr.bf16.mxu0 %v23245_v52  ;;  %21721 = vmatprep.mubr.msk.bf16.mxu0 %vm23246_vm3, %v23245_v52 }
0x1e05   : > { %21708 = vmatpush3.bf16.msra.mxu0 %v23113_v59  ;;  %v23136_v59 = vld [vmem:[%s28386_s9] sm:$0xff]  }
0x1e06   : > { %21709 = vmatprep.subr.bf16.mxu0 %v23245_v52 }
0x1e07   : > { %21728 = vmatmul.mubr.msk.bf16.vlgmr.msra.gmra.mxu1 %vm9093_vm4, %v23199_v56  ;;  %v18652_v56 = vld [vmem:[%s28397_s20] ss:$0 sm:$0xff] }
0x1e08   : > { %21732 = vmatpush3.bf16.msra.mxu1 %v23115_v16  ;;  %21747 = vmatprep.mubr.msk.bf16.mxu1 %vm23246_vm3, %v23245_v52 }
0x1e09   : > { %21710 = vmatpush3.bf16.msra.mxu0 %v23114_v15  ;;  %21733 = vmatprep.subr.bf16.mxu1 %v23245_v52 }
0x1e0a   : > { %21711 = vmatprep.subr.bf16.mxu0 %v23245_v52 }
0x1e0c   : > { %21734 = vmatpush3.bf16.msra.mxu1 %v23117_v37 }
0x1e0d   : > { %21712 = vmatpush3.bf16.msra.mxu0 %v23116_v22  ;;  %21735 = vmatprep.subr.bf16.mxu1 %v23245_v52 }
0x1e0e   : > { %21713 = vmatprep.subr.bf16.mxu0 %v23245_v52 }
0x1e10   : > { %21736 = vmatpush3.bf16.msra.mxu1 %v23119_v33 }
0x1e11   : > { %21714 = vmatpush3.bf16.msra.mxu0 %v23118_v63  ;;  %21737 = vmatprep.subr.bf16.mxu1 %v23245_v52 }
0x1e12   : > { %21715 = vmatprep.subr.bf16.mxu0 %v23245_v52 }
0x1e14   : > { %21738 = vmatpush3.bf16.msra.mxu1 %v23121_v39 }
0x1e15   : > { %21716 = vmatpush3.bf16.msra.mxu0 %v23120_v31  ;;  %21739 = vmatprep.subr.bf16.mxu1 %v23245_v52 }
0x1e16   : > { %21717 = vmatprep.subr.bf16.mxu0 %v23245_v52 }
0x1e18   : > { %21740 = vmatpush3.bf16.msra.mxu1 %v23123_v28 }
0x1e19   : > { %21718 = vmatpush3.bf16.msra.mxu0 %v23122_v9  ;;  %21741 = vmatprep.subr.bf16.mxu1 %v23245_v52 }
0x1e1a   : > { %21719 = vmatprep.subr.bf16.mxu0 %v23245_v52 }
0x1e1c   : > { %21742 = vmatpush3.bf16.msra.mxu1 %v23125_v58  ;;  %v23137_v58 = vld [vmem:[%s28386_s9 + $0x8] sm:$0xff]  }
0x1e1d   : > { %21720 = vmatpush3.bf16.msra.mxu0 %v23124_v2  ;;  %21743 = vmatprep.subr.bf16.mxu1 %v23245_v52 }
0x1e1e   : > { %21751 = vmatprep.subr.bf16.mxu0 %v23245_v52 }
0x1e20   : > { %21744 = vmatpush3.bf16.msra.mxu1 %v23126_v6  ;;  %v23138_v6 = vld [vmem:[%s28386_s9 + $0x10] sm:$0xff]  }
0x1e21   : > { %21745 = vmatprep.subr.bf16.mxu1 %v23245_v52 }
0x1e24   : > { %21746 = vmatpush3.bf16.msra.mxu1 %v23127_v34  ;;  %v23139_v34 = vld [vmem:[%s28386_s9 + $0x18] sm:$0xff]  }
0x1eb7   : > { %v13828_v24 = vpop.f32.mrf.mxu0 }
0x1eb8   : > { %v13835_v19 = vadd.f32 %v13828_v24, %v27695_v55  ;;  %v23201_v24 = vld [vmem:[%s28594_s26] sm:$0xff]  }
0x1eb9   : > { %v21671_v3 = vpop.f32.mrf.mxu0 }
0x1eba   : > { %v23141_v3 = vld [vmem:[%s28398_s21 + $0x30] sm:$0xff]  }
0x1ebb   : > { %v13831_v54 = vpop.f32.mrf.mxu0 }
0x1ebc   : > { %v13836_v43 = vadd.f32 %v13831_v54, %v27697_v4  ;;  %v23142_v54 = vld [vmem:[%s28398_s21 + $0x28] sm:$0xff]  }
0x1ebd   : > { %v21672_v29 = vpop.f32.mrf.mxu0 }
0x1ebf   : > { %v13978_v46 = vpop.f32.mrf.mxu1  ;;  %v14021_v44 = vpop.f32.mrf.mxu0 }
0x1ec0   : > { %v13985_v32 = vadd.f32 %v13978_v46, %v13835_v19  ;;  %v23140_v19 = vld [vmem:[%s28398_s21 + $0x38] sm:$0xff]  }
0x1ec1   : > { %v21697_v38 = vpop.f32.mrf.mxu1  ;;  %v21703_v50 = vpop.f32.mrf.mxu0 }
0x1ec3   : > { %v13981_v42 = vpop.f32.mrf.mxu1  ;;  %v14024_v8 = vpop.f32.mrf.mxu0 }
0x1ec4   : > { %v13986_v1 = vadd.f32 %v13981_v42, %v13836_v43  ;;  %v14028_v35 = vpack.c.bf16 %v14024_v8, %v14021_v44  ;;  %v23143_v43 = vld [vmem:[%s28398_s21 + $0x20] sm:$0xff]  }
0x1ec5   : > { %v21698_v26 = vpop.f32.mrf.mxu1  ;;  %v21704_v7 = vpop.f32.mrf.mxu0 }
0x1ec6   : > { %21722 = vmatmul.mubr.bf16.vlgmr.msra.gmra.mxu0 %v14028_v35 }
0x1ec7   : > { %21752 = vmatpush3.bf16.msra.mxu0 %v27443_v20  ;;  %v14171_v53 = vpop.f32.mrf.mxu1  ;;  %21753 = vmatprep.mubr.msk.bf16.mxu0 %vm23246_vm3, %v23245_v52  ;;  %v23129_v20 = vld [vmem:[%s28396_s19 + $0x230] sm:$0xff]  }
0x1ec8   : > { %21757 = vmatprep.subr.bf16.mxu0 %v23245_v52 }
0x1ec9   : > { %v21729_v11 = vpop.f32.mrf.mxu1 }
0x1eca   : > { %v23203_v11 = vld [vmem:[%s28594_s26 + $0x10] sm:$0xff]  }
0x1ecb   : > { %v14174_v23 = vpop.f32.mrf.mxu1 }
0x1ecc   : > { %v14178_v51 = vpack.c.bf16 %v14174_v23, %v14171_v53  ;;  %v23202_v53 = vld [vmem:[%s28594_s26 + $0x8] sm:$0xff]   ;;  %v23204_v23 = vld [vmem:[%s28594_s26 + $0x18] sm:$0xff]  }
0x1ecd   : > { %v21730_v49 = vpop.f32.mrf.mxu1 }
0x1ece   : > { %21748 = vmatmul.mubr.bf16.vlgmr.msra.gmra.mxu1 %v14178_v51  ;;  %21754 = vmatmul.mubr.msk.bf16.vlgmr.msra.gmra.mxu0 %vm9093_vm4, %v23200_v60  ;;  %v23206_v51 = vld [vmem:[%s28594_s26 + $0x28] sm:$0xff]   ;;  %v23207_v49 = vld [vmem:[%s28594_s26 + $0x30] sm:$0xff]   ;;  %v23208_v60 = vld [vmem:[%s28594_s26 + $0x38] sm:$0xff]  }
0x1ecf   : > { %21758 = vmatpush3.bf16.msra.mxu0 %v23128_v30  ;;  %21773 = vmatprep.mubr.msk.bf16.mxu0 %vm23246_vm3, %v23245_v52  ;;  %v23205_v30 = vld [vmem:[%s28594_s26 + $0x20] sm:$0xff]  }
0x1ed0   : > { %21759 = vmatprep.subr.bf16.mxu0 %v23245_v52  ;;  %21779 = vmatprep.mubr.msk.bf16.mxu1 %vm9093_vm4, %v23136_v59 }
0x1ed3   : > { %21760 = vmatpush3.bf16.msra.mxu0 %v23129_v20  ;;  %v23144_v20 = vld [vmem:[%s28398_s21 + $0x18] sm:$0xff]  }
0x1ed4   : > { %21761 = vmatprep.subr.bf16.mxu0 %v23245_v52 }
0x1ed7   : > { %21762 = vmatpush3.bf16.msra.mxu0 %v23130_v17  ;;  %v23145_v17 = vld [vmem:[%s28398_s21 + $0x10] sm:$0xff]  }
0x1ed8   : > { %21763 = vmatprep.subr.bf16.mxu0 %v23245_v52 }
0x1edb   : > { %21764 = vmatpush3.bf16.msra.mxu0 %v23131_v14  ;;  %v23146_v14 = vld [vmem:[%s28398_s21 + $0x8] sm:$0xff]  }
0x1edc   : > { %21765 = vmatprep.subr.bf16.mxu0 %v23245_v52 }
0x1edf   : > { %21766 = vmatpush3.bf16.msra.mxu0 %v23132_v25  ;;  %v23147_v25 = vld [vmem:[%s28398_s21] sm:$0xff]  }
0x1ee0   : > { %21767 = vmatprep.subr.bf16.mxu0 %v23245_v52 }
0x1ee3   : > { %21768 = vmatpush3.bf16.msra.mxu0 %v23133_v45 }
0x1ee4   : > { %21769 = vmatprep.subr.bf16.mxu0 %v23245_v52 }
0x1ee7   : > { %21770 = vmatpush3.bf16.msra.mxu0 %v23134_v18 }
0x1ee8   : > { %21771 = vmatprep.subr.bf16.mxu0 %v23245_v52 }
0x1eeb   : > { %21772 = vmatpush3.bf16.msra.mxu0 %v23135_v62 }
0x1eec   : > { %21819 = vmatprep.subr.bf16.mxu0 %v23140_v19 }
0x1f86   : > { %v14128_v55 = vpop.f32.mrf.mxu0 }
0x1f87   : > { %v14135_v21 = vadd.f32 %v14128_v55, %v13985_v32 }
0x1f88   : > { %v21723_v10 = vpop.f32.mrf.mxu0 }
0x1f8a   : > { %v14131_v0 = vpop.f32.mrf.mxu0 }
0x1f8b   : > { %v14136_v36 = vadd.f32 %v14131_v0, %v13986_v1 }
0x1f8c   : > { %v21724_v4 = vpop.f32.mrf.mxu0 }
0x1f8e   : > { %v14278_v27 = vpop.f32.mrf.mxu1  ;;  %v14321_v12 = vpop.f32.mrf.mxu0 }
0x1f8f   : > { %v14285_v48 = vadd.f32 %v14278_v27, %v14135_v21 }
0x1f90   : > { %v21749_v5 = vpop.f32.mrf.mxu1  ;;  %v21755_v41 = vpop.f32.mrf.mxu0 }
0x1f92   : > { %v14281_v13 = vpop.f32.mrf.mxu1  ;;  %v14324_v57 = vpop.f32.mrf.mxu0 }
0x1f93   : > { %v14286_v40 = vadd.f32 %v14281_v13, %v14136_v36  ;;  %v14328_v52 = vpack.c.bf16 %v14324_v57, %v14321_v12 }
0x1f94   : > { %v21756_v61 = vpop.f32.mrf.mxu0  ;;  %v21750_v47 = vpop.f32.mrf.mxu1 }
0x1f95   : > { %21774 = vmatmul.mubr.bf16.vlgmr.msra.gmra.mxu0 %v14328_v52 }
0x1f96   : > { %21820 = vmatpush3.bf16.msra.mxu0 %v23140_v19  ;;  %v23222_v19 = vld [vmem:[%s28594_s26 + $0xa8] sm:$0xff]  }
0x1f97   : > { %21821 = vmatprep.subr.bf16.mxu0 %v23141_v3 }
0x1f9a   : > { %21822 = vmatpush3.bf16.msra.mxu0 %v23141_v3  ;;  %v23223_v3 = vld [vmem:[%s28594_s26 + $0xb0] sm:$0xff]  }
0x1f9b   : > { %21823 = vmatprep.subr.bf16.mxu0 %v23142_v54 }
0x1f9e   : > { %21824 = vmatpush3.bf16.msra.mxu0 %v23142_v54  ;;  %v23224_v54 = vld [vmem:[%s28594_s26 + $0xb8] sm:$0xff]  }
0x1f9f   : > { %21825 = vmatprep.subr.bf16.mxu0 %v23143_v43 }
0x1fa2   : > { %21826 = vmatpush3.bf16.msra.mxu0 %v23143_v43  ;;  %v23225_v43 = vld [vmem:[%s28594_s26 + $0xc0] sm:$0xff]  }
0x2055   : > { %v14428_v16 = vpop.f32.mrf.mxu0 }
0x2056   : > { %v14435_v15 = vadd.f32 %v14428_v16, %v14285_v48 }
0x2057   : > { %v21775_v37 = vpop.f32.mrf.mxu0 }
0x2058   : > { %v14444_v63 = vadd.f32 %v18652_v56, %v14435_v15  ;;  %v23209_v37 = vld [vmem:[%s28594_s26 + $0x40] sm:$0xff]  }
0x2059   : > { %v14431_v22 = vpop.f32.mrf.mxu0 }
0x205a   : > { %v14436_v33 = vadd.f32 %v14431_v22, %v14286_v40  ;;  %v14446_v9 = vmax.f32 %v14444_v63, 0.0  ;;  %v23210_v22 = vld [vmem:[%s28594_s26 + $0x48] sm:$0xff]   ;;  %v23211_v63 = vld [vmem:[%s28594_s26 + $0x50] sm:$0xff]  }
0x205b   : > { %v21776_v31 = vpop.f32.mrf.mxu0 }
0x205c   : > { %v14445_v39 = vadd.f32 %v18652_v56, %v14436_v33  ;;  %v23212_v33 = vld [vmem:[%s28594_s26 + $0x58] sm:$0xff]   ;;  %v23213_v31 = vld [vmem:[%s28594_s26 + $0x60] sm:$0xff]  }
0x205e   : > { %v14447_v28 = vmax.f32 %v14445_v39, 0.0  ;;  %v23214_v39 = vld [vmem:[%s28594_s26 + $0x68] sm:$0xff]  }
0x2060   : > { %v14456_v2 = vpack.c.bf16 %v14447_v28, %v14446_v9  ;;  %v23215_v9 = vld [vmem:[%s28594_s26 + $0x70] sm:$0xff]   ;;  %v23216_v28 = vld [vmem:[%s28594_s26 + $0x78] sm:$0xff]  }
0x2062   : > { %21777 = vmatprep.subr.bf16.mxu1 %v14456_v2 }
0x2063   : > { %21778 = vmatpush3.bf16.msra.mxu1 %v14456_v2  ;;  %v23217_v2 = vld [vmem:[%s28594_s26 + $0x80] sm:$0xff]  }
0x2066   : > { %21780 = vmatmul.mubr.msk.bf16.vlgmr.msra.gmra.mxu1 %vm9093_vm4, %v23137_v58  ;;  %v23218_v58 = vld [vmem:[%s28594_s26 + $0x88] sm:$0xff]  }
0x2067   : > { %21783 = vmatprep.mubr.msk.bf16.mxu1 %vm9093_vm4, %v23138_v6  ;;  %v23219_v6 = vld [vmem:[%s28594_s26 + $0x90] sm:$0xff]  }
0x206e   : > { %21784 = vmatmul.mubr.msk.bf16.gmra.mxu1 %vm9093_vm4, %v23139_v34  ;;  %v23220_v34 = vld [vmem:[%s28594_s26 + $0x98] sm:$0xff]  }
0x206f   : > { %21795 = vmatprep.mubr.msk.bf16.mxu1 %vm6838_vm2, %v23201_v24  ;;  %v23221_v24 = vld [vmem:[%s28594_s26 + $0xa0] sm:$0xff]  }
0x2126   : > { %v21781_v29 = vpop.f32.mrf.mxu1 }
0x2128   : > { %v14523_v46 = vpop.f32.mrf.mxu1 }
0x212a   : > { %v21782_v44 = vpop.f32.mrf.mxu1 }
0x212b   : > { %v27868_v26 = vpack.c.bf16 %v21782_v44, %v21781_v29  ;;  %v23148_v29 = vld [vmem:[%s28398_s21 + $0x58] sm:$0xff]   ;;  %v23226_v44 = vld [vmem:[%s28594_s26 + $0xc8] sm:$0xff]  }
0x212c   : > { %v14526_v32 = vpop.f32.mrf.mxu1 }
0x212d   : > { %v27872_v7 = vpack.c.bf16 %v14526_v32, %v14523_v46  ;;  %v23149_v46 = vld [vmem:[%s28398_s21 + $0x50] sm:$0xff]  }
0x212e   : > { %v21785_v38 = vpop.f32.mrf.mxu1  ;;  %v23227_v32 = vld [vmem:[%s28594_s26 + $0xd0] sm:$0xff]  }
0x2130   : > { %v14539_v50 = vpop.f32.mrf.mxu1 }
0x2132   : > { %v21786_v42 = vpop.f32.mrf.mxu1 }
0x2133   : > { %v27860_v8 = vpack.c.bf16 %v21786_v42, %v21785_v38  ;;  %v23150_v38 = vld [vmem:[%s28398_s21 + $0x48] sm:$0xff]   ;;  %v23228_v42 = vld [vmem:[%s28594_s26 + $0xd8] sm:$0xff]  }
0x2134   : > { %v14542_v1 = vpop.f32.mrf.mxu1 }
0x2135   : > { %21787 = vmatprep.subr.bf16.mxu1 %v27860_v8  ;;  %v27863_v35 = vpack.c.bf16 %v14542_v1, %v14539_v50  ;;  %21851 = vmatprep.subr.bf16.mxu0 %v27860_v8  ;;  %v23151_v50 = vld [vmem:[%s28398_s21 + $0x40] sm:$0xff]  }
0x2136   : > { %21788 = vmatpush3.bf16.msra.mxu1 %v27860_v8  ;;  %v23229_v1 = vld [vmem:[%s28594_s26 + $0xe0] sm:$0xff]  }
0x2137   : > { %21789 = vmatprep.subr.bf16.mxu1 %v27863_v35 }
0x213a   : > { %21790 = vmatpush3.bf16.msra.mxu1 %v27863_v35 }
0x213b   : > { %21791 = vmatprep.subr.bf16.mxu1 %v27868_v26 }
0x213e   : > { %21792 = vmatpush3.bf16.msra.mxu1 %v27868_v26 }
0x213f   : > { %21793 = vmatprep.subr.bf16.mxu1 %v27872_v7 }
0x2142   : > { %21794 = vmatpush3.bf16.msra.mxu1 %v27872_v7 }
0x2143   : > { %21803 = vmatprep.subr.bf16.mxu1 %v27860_v8 }
0x2145   : > { %21796 = vmatmul.mubr.msk.bf16.vlgmr.msra.gmra.mxu1 %vm6838_vm2, %v23202_v53  ;;  %v23152_v53 = vld [vmem:[%s28398_s21 + $0x78] sm:$0xff]  }
0x2146   : > { %21804 = vmatpush3.bf16.msra.mxu1 %v27860_v8  ;;  %21799 = vmatprep.mubr.msk.bf16.mxu1 %vm6838_vm2, %v23203_v11  ;;  %v23230_v11 = vld [vmem:[%s28594_s26 + $0xe8] sm:$0xff]  }
0x2147   : > { %21805 = vmatprep.subr.bf16.mxu1 %v27863_v35 }
0x214a   : > { %21806 = vmatpush3.bf16.msra.mxu1 %v27863_v35 }
0x214b   : > { %21807 = vmatprep.subr.bf16.mxu1 %v27868_v26 }
0x214d   : > { %21800 = vmatmul.mubr.msk.bf16.gmra.mxu1 %vm6838_vm2, %v23204_v23  ;;  %v23231_v23 = vld [vmem:[%s28594_s26 + $0xf0] sm:$0xff]  }
0x214e   : > { %21808 = vmatpush3.bf16.msra.mxu1 %v27868_v26  ;;  %21811 = vmatprep.mubr.msk.bf16.mxu1 %vm6838_vm2, %v23205_v30  ;;  %v23232_v30 = vld [vmem:[%s28594_s26 + $0xf8] sm:$0xff]  }
0x214f   : > { %21809 = vmatprep.subr.bf16.mxu1 %v27872_v7 }
0x2152   : > { %21810 = vmatpush3.bf16.msra.mxu1 %v27872_v7 }
0x2153   : > { %21835 = vmatprep.subr.bf16.mxu1 %v23144_v20 }
0x2155   : > { %21812 = vmatmul.mubr.msk.bf16.vlgmr.msra.gmra.mxu1 %vm6838_vm2, %v23206_v51  ;;  %v23236_v51 = vld [vmem:[%s28594_s26 + $0x118] sm:$0xff]  }
0x2156   : > { %21815 = vmatprep.mubr.msk.bf16.mxu1 %vm6838_vm2, %v23207_v49  ;;  %21836 = vmatpush3.bf16.msra.mxu1 %v23144_v20 }
0x2157   : > { %21837 = vmatprep.subr.bf16.mxu1 %v23145_v17 }
0x215a   : > { %21838 = vmatpush3.bf16.msra.mxu1 %v23145_v17 }
0x215b   : > { %21839 = vmatprep.subr.bf16.mxu1 %v23146_v14 }
0x215d   : > { %21816 = vmatmul.mubr.msk.bf16.gmra.mxu1 %vm6838_vm2, %v23208_v60 }
0x215e   : > { %21840 = vmatpush3.bf16.msra.mxu1 %v23146_v14 }
0x215f   : > { %21841 = vmatprep.subr.bf16.mxu1 %v23147_v25 }
0x2162   : > { %21842 = vmatpush3.bf16.msra.mxu1 %v23147_v25 }
0x2163   : > { %21867 = vmatprep.subr.bf16.mxu1 %v23148_v29 }
0x2205   : > { %v21797_v45 = vpop.f32.mrf.mxu1 }
0x2207   : > { %v14592_v18 = vpop.f32.mrf.mxu1 }
0x2209   : > { %v21798_v62 = vpop.f32.mrf.mxu1 }
0x220a   : > { %v14624_v10 = vpack.c.bf16 %v21798_v62, %v21797_v45 }
0x220b   : > { %v14595_v55 = vpop.f32.mrf.mxu1 }
0x220c   : > { %v14623_v21 = vpack.c.bf16 %v14595_v55, %v14592_v18 }
0x220d   : > { %v21801_v0 = vpop.f32.mrf.mxu1 }
0x220e   : > { %21843 = vmatprep.mubr.msk.bf16.mxu1 %vm6838_vm2, %v14623_v21 }
0x220f   : > { %v14608_v36 = vpop.f32.mrf.mxu1  ;;  %21844 = vmatmul.mubr.msk.bf16.vlgmr.msra.gmra.mxu1 %vm6838_vm2, %v14624_v10 }
0x2210   : > { %21868 = vmatpush3.bf16.msra.mxu1 %v23148_v29  ;;  %v23158_v29 = vld [vmem:[%s28398_s21 + $0x88] sm:$0xff]  }
0x2211   : > { %v21802_v4 = vpop.f32.mrf.mxu1  ;;  %21869 = vmatprep.subr.bf16.mxu1 %v23149_v46 }
0x2212   : > { %v14626_v48 = vpack.c.bf16 %v21802_v4, %v21801_v0 }
0x2213   : > { %v14611_v27 = vpop.f32.mrf.mxu1 }
0x2214   : > { %v14625_v12 = vpack.c.bf16 %v14611_v27, %v14608_v36  ;;  %21870 = vmatpush3.bf16.msra.mxu1 %v23149_v46 }
0x2215   : > { %v21813_v5 = vpop.f32.mrf.mxu1  ;;  %21871 = vmatprep.subr.bf16.mxu1 %v23150_v38 }
0x2216   : > { %21847 = vmatprep.mubr.msk.bf16.mxu1 %vm6838_vm2, %v14625_v12 }
0x2217   : > { %v14669_v41 = vpop.f32.mrf.mxu1  ;;  %21848 = vmatmul.mubr.msk.bf16.gmra.mxu1 %vm6838_vm2, %v14626_v48 }
0x2218   : > { %21872 = vmatpush3.bf16.msra.mxu1 %v23150_v38 }
0x2219   : > { %v21814_v13 = vpop.f32.mrf.mxu1  ;;  %21873 = vmatprep.subr.bf16.mxu1 %v23151_v50 }
0x221a   : > { %v14701_v52 = vpack.c.bf16 %v21814_v13, %v21813_v5 }
0x221b   : > { %v14672_v57 = vpop.f32.mrf.mxu1 }
0x221c   : > { %v14700_v40 = vpack.c.bf16 %v14672_v57, %v14669_v41  ;;  %21874 = vmatpush3.bf16.msra.mxu1 %v23151_v50  ;;  %v23159_v50 = vld [vmem:[%s28398_s21 + $0x80] sm:$0xff]  }
0x221d   : > { %v21817_v61 = vpop.f32.mrf.mxu1  ;;  %21899 = vmatprep.subr.bf16.mxu1 %v23152_v53 }
0x221e   : > { %21827 = vmatprep.mubr.msk.bf16.mxu0 %vm6838_vm2, %v14700_v40 }
0x221f   : > { %v14685_v47 = vpop.f32.mrf.mxu1  ;;  %21828 = vmatmul.mubr.msk.bf16.vlgmr.msra.gmra.mxu0 %vm6838_vm2, %v14701_v52 }
0x2220   : > { %21852 = vmatpush3.bf16.msra.mxu0 %v27860_v8 }
0x2221   : > { %21853 = vmatprep.subr.bf16.mxu0 %v27863_v35  ;;  %v21818_v59 = vpop.f32.mrf.mxu1 }
0x2222   : > { %v14703_v56 = vpack.c.bf16 %v21818_v59, %v21817_v61 }
0x2223   : > { %v14688_v16 = vpop.f32.mrf.mxu1 }
0x2224   : > { %v14702_v15 = vpack.c.bf16 %v14688_v16, %v14685_v47  ;;  %21854 = vmatpush3.bf16.msra.mxu0 %v27863_v35 }
0x2225   : > { %21855 = vmatprep.subr.bf16.mxu0 %v27868_v26 }
0x2226   : > { %21831 = vmatprep.mubr.msk.bf16.mxu0 %vm6838_vm2, %v14702_v15  ;;  %v23153_v15 = vld [vmem:[%s28398_s21 + $0x70] sm:$0xff]  }
0x2227   : > { %21832 = vmatmul.mubr.msk.bf16.gmra.mxu0 %vm6838_vm2, %v14703_v56 }
0x2228   : > { %21856 = vmatpush3.bf16.msra.mxu0 %v27868_v26  ;;  %21859 = vmatprep.mubr.msk.bf16.mxu0 %vm6838_vm2, %v23209_v37 }
0x2229   : > { %21857 = vmatprep.subr.bf16.mxu0 %v27872_v7 }
0x222c   : > { %21858 = vmatpush3.bf16.msra.mxu0 %v27872_v7 }
0x222d   : > { %21883 = vmatprep.subr.bf16.mxu0 %v27860_v8 }
0x222f   : > { %21860 = vmatmul.mubr.msk.bf16.vlgmr.msra.gmra.mxu0 %vm6838_vm2, %v23210_v22  ;;  %v23154_v22 = vld [vmem:[%s28398_s21 + $0x68] sm:$0xff]  }
0x2230   : > { %21884 = vmatpush3.bf16.msra.mxu0 %v27860_v8  ;;  %21863 = vmatprep.mubr.msk.bf16.mxu0 %vm6838_vm2, %v23211_v63 }
0x2231   : > { %21885 = vmatprep.subr.bf16.mxu0 %v27863_v35 }
0x2234   : > { %21886 = vmatpush3.bf16.msra.mxu0 %v27863_v35 }
0x2235   : > { %21887 = vmatprep.subr.bf16.mxu0 %v27868_v26 }
0x2237   : > { %21864 = vmatmul.mubr.msk.bf16.gmra.mxu0 %vm6838_vm2, %v23212_v33 }
0x2238   : > { %21888 = vmatpush3.bf16.msra.mxu0 %v27868_v26  ;;  %21891 = vmatprep.mubr.msk.bf16.mxu0 %vm6838_vm2, %v23213_v31 }
0x2239   : > { %21889 = vmatprep.subr.bf16.mxu0 %v27872_v7 }
0x223c   : > { %21890 = vmatpush3.bf16.msra.mxu0 %v27872_v7 }
0x223d   : > { %21915 = vmatprep.subr.bf16.mxu0 %v27860_v8 }
0x223f   : > { %21892 = vmatmul.mubr.msk.bf16.vlgmr.msra.gmra.mxu0 %vm6838_vm2, %v23214_v39 }
0x2240   : > { %21916 = vmatpush3.bf16.msra.mxu0 %v27860_v8  ;;  %21895 = vmatprep.mubr.msk.bf16.mxu0 %vm6838_vm2, %v23215_v9  ;;  %v23155_v9 = vld [vmem:[%s28398_s21 + $0x60] sm:$0xff]  }
0x2241   : > { %21917 = vmatprep.subr.bf16.mxu0 %v27863_v35 }
0x2244   : > { %21918 = vmatpush3.bf16.msra.mxu0 %v27863_v35 }
0x2245   : > { %21919 = vmatprep.subr.bf16.mxu0 %v27868_v26 }
0x2247   : > { %21896 = vmatmul.mubr.msk.bf16.gmra.mxu0 %vm6838_vm2, %v23216_v28 }
0x2248   : > { %21920 = vmatpush3.bf16.msra.mxu0 %v27868_v26  ;;  %21923 = vmatprep.mubr.msk.bf16.mxu0 %vm6838_vm2, %v23217_v2 }
0x2249   : > { %21921 = vmatprep.subr.bf16.mxu0 %v27872_v7 }
0x224c   : > { %21922 = vmatpush3.bf16.msra.mxu0 %v27872_v7 }
0x224d   : > { %21947 = vmatprep.subr.bf16.mxu0 %v27860_v8 }
0x224f   : > { %21924 = vmatmul.mubr.msk.bf16.vlgmr.msra.gmra.mxu0 %vm6838_vm2, %v23218_v58  ;;  %v23156_v58 = vld [vmem:[%s28398_s21 + $0x98] sm:$0xff]  }
0x2250   : > { %21948 = vmatpush3.bf16.msra.mxu0 %v27860_v8  ;;  %21927 = vmatprep.mubr.msk.bf16.mxu0 %vm6838_vm2, %v23219_v6 }
0x2251   : > { %21949 = vmatprep.subr.bf16.mxu0 %v27863_v35 }
0x2254   : > { %21950 = vmatpush3.bf16.msra.mxu0 %v27863_v35 }
0x2255   : > { %21951 = vmatprep.subr.bf16.mxu0 %v27868_v26 }
0x2257   : > { %21928 = vmatmul.mubr.msk.bf16.gmra.mxu0 %vm6838_vm2, %v23220_v34 }
0x2258   : > { %21952 = vmatpush3.bf16.msra.mxu0 %v27868_v26  ;;  %21955 = vmatprep.mubr.msk.bf16.mxu0 %vm6838_vm2, %v23221_v24 }
0x2259   : > { %21953 = vmatprep.subr.bf16.mxu0 %v27872_v7 }
0x225c   : > { %21954 = vmatpush3.bf16.msra.mxu0 %v27872_v7 }
0x225d   : > { %21979 = vmatprep.subr.bf16.mxu0 %v27860_v8 }
0x225f   : > { %21956 = vmatmul.mubr.msk.bf16.vlgmr.msra.gmra.mxu0 %vm6838_vm2, %v23222_v19 }
0x2260   : > { %21980 = vmatpush3.bf16.msra.mxu0 %v27860_v8  ;;  %21959 = vmatprep.mubr.msk.bf16.mxu0 %vm6838_vm2, %v23223_v3  ;;  %v23157_v3 = vld [vmem:[%s28398_s21 + $0x90] sm:$0xff]  }
0x2261   : > { %21981 = vmatprep.subr.bf16.mxu0 %v27863_v35 }
0x2264   : > { %21982 = vmatpush3.bf16.msra.mxu0 %v27863_v35 }
0x2265   : > { %21983 = vmatprep.subr.bf16.mxu0 %v27868_v26 }
0x2267   : > { %21960 = vmatmul.mubr.msk.bf16.gmra.mxu0 %vm6838_vm2, %v23224_v54 }
0x2268   : > { %21984 = vmatpush3.bf16.msra.mxu0 %v27868_v26  ;;  %21987 = vmatprep.mubr.msk.bf16.mxu0 %vm6838_vm2, %v23225_v43 }
0x2269   : > { %21985 = vmatprep.subr.bf16.mxu0 %v27872_v7 }
0x226c   : > { %21986 = vmatpush3.bf16.msra.mxu0 %v27872_v7 }
0x226d   : > { %22011 = vmatprep.subr.bf16.mxu0 %v27860_v8 }
0x226f   : > { %21988 = vmatmul.mubr.msk.bf16.vlgmr.msra.gmra.mxu0 %vm6838_vm2, %v23226_v44 }
0x2270   : > { %22012 = vmatpush3.bf16.msra.mxu0 %v27860_v8  ;;  %21991 = vmatprep.mubr.msk.bf16.mxu0 %vm6838_vm2, %v23227_v32 }
0x2271   : > { %22013 = vmatprep.subr.bf16.mxu0 %v27863_v35 }
0x2274   : > { %22014 = vmatpush3.bf16.msra.mxu0 %v27863_v35 }
0x2275   : > { %22015 = vmatprep.subr.bf16.mxu0 %v27868_v26 }
0x2277   : > { %21992 = vmatmul.mubr.msk.bf16.gmra.mxu0 %vm6838_vm2, %v23228_v42 }
0x2278   : > { %22016 = vmatpush3.bf16.msra.mxu0 %v27868_v26  ;;  %22019 = vmatprep.mubr.msk.bf16.mxu0 %vm6838_vm2, %v23229_v1 }
0x2279   : > { %22017 = vmatprep.subr.bf16.mxu0 %v27872_v7 }
0x227c   : > { %22018 = vmatpush3.bf16.msra.mxu0 %v27872_v7 }
0x227d   : > { %22043 = vmatprep.subr.bf16.mxu0 %v27860_v8 }
0x227f   : > { %22020 = vmatmul.mubr.msk.bf16.vlgmr.msra.gmra.mxu0 %vm6838_vm2, %v23230_v11 }
0x2280   : > { %22044 = vmatpush3.bf16.msra.mxu0 %v27860_v8  ;;  %22023 = vmatprep.mubr.msk.bf16.mxu0 %vm6838_vm2, %v23231_v23  ;;  %v23233_v8 = vld [vmem:[%s28594_s26 + $0x100] sm:$0xff]  }
0x2281   : > { %22045 = vmatprep.subr.bf16.mxu0 %v27863_v35 }
0x2284   : > { %22046 = vmatpush3.bf16.msra.mxu0 %v27863_v35  ;;  %v23234_v35 = vld [vmem:[%s28594_s26 + $0x108] sm:$0xff]  }
0x2285   : > { %22047 = vmatprep.subr.bf16.mxu0 %v27868_v26 }
0x2287   : > { %22024 = vmatmul.mubr.msk.bf16.gmra.mxu0 %vm6838_vm2, %v23232_v30 }
0x2288   : > { %22048 = vmatpush3.bf16.msra.mxu0 %v27868_v26  ;;  %22051 = vmatprep.mubr.msk.bf16.mxu0 %vm6838_vm2, %v23233_v8  ;;  %v23235_v26 = vld [vmem:[%s28594_s26 + $0x110] sm:$0xff]  }
0x2289   : > { %22049 = vmatprep.subr.bf16.mxu0 %v27872_v7 }
0x228c   : > { %22050 = vmatpush3.bf16.msra.mxu0 %v27872_v7 }
0x228f   : > { %22052 = vmatmul.mubr.msk.bf16.vlgmr.msra.gmra.mxu0 %vm6838_vm2, %v23234_v35  ;;  %v23161_v35 = vld [vmem:[%s28398_s21 + $0xb0] sm:$0xff]  }
0x2290   : > { %22055 = vmatprep.mubr.msk.bf16.mxu0 %vm6838_vm2, %v23235_v26 }
0x2297   : > { %22056 = vmatmul.mubr.msk.bf16.gmra.mxu0 %vm6838_vm2, %v23236_v51 }
0x22cf   : > { %v21845_v49 = vpop.f32.mrf.mxu1 }
0x22d1   : > { %v14884_v7 = vpop.f32.mrf.mxu1 }
0x22d3   : > { %v21846_v60 = vpop.f32.mrf.mxu1 }
0x22d5   : > { %v14887_v17 = vpop.f32.mrf.mxu1 }
0x22d7   : > { %v21849_v62 = vpop.f32.mrf.mxu1 }
0x22d9   : > { %v14900_v36 = vpop.f32.mrf.mxu1 }
0x22db   : > { %v21850_v5 = vpop.f32.mrf.mxu1 }
0x22df   : > { %v21829_v20 = vpop.f32.mrf.mxu0 }
0x22e0   : > { %v28115_v14 = vadd.f32 %v21845_v49, %v21829_v20  ;;  %v23162_v49 = vld [vmem:[%s28398_s21 + $0xa8] sm:$0xff]  }
0x22e1   : > { %v14783_v25 = vpop.f32.mrf.mxu0 }
0x22e2   : > { %v28117_v45 = vadd.f32 %v14884_v7, %v14783_v25  ;;  %v23163_v25 = vld [vmem:[%s28398_s21 + $0xa0] sm:$0xff]  }
0x22e3   : > { %v21830_v18 = vpop.f32.mrf.mxu0 }
0x22e4   : > { %v28119_v55 = vadd.f32 %v21846_v60, %v21830_v18 }
0x22e5   : > { %v14786_v21 = vpop.f32.mrf.mxu0 }
0x22e6   : > { %v28121_v10 = vadd.f32 %v14887_v17, %v14786_v21  ;;  %v23164_v21 = vld [vmem:[%s28398_s21 + $0xd8] sm:$0xff]  }
0x22e7   : > { %v21833_v0 = vpop.f32.mrf.mxu0 }
0x22e8   : > { %v28123_v4 = vadd.f32 %v21849_v62, %v21833_v0 }
0x22e9   : > { %v14799_v27 = vpop.f32.mrf.mxu0 }
0x22ea   : > { %v28125_v12 = vadd.f32 %v14900_v36, %v14799_v27 }
0x22eb   : > { %v21834_v48 = vpop.f32.mrf.mxu0 }
0x22ec   : > { %v28127_v41 = vadd.f32 %v21850_v5, %v21834_v48  ;;  %v23165_v5 = vld [vmem:[%s28398_s21 + $0xd0] sm:$0xff]  }
0x22ed   : > { %v28129_v13 = vpop.f32.mrf.mxu0 }
0x22ef   : > { %v21861_v57 = vpop.f32.mrf.mxu0 }
0x22f1   : > { %v14949_v40 = vpop.f32.mrf.mxu0 }
0x22f3   : > { %v21862_v52 = vpop.f32.mrf.mxu0 }
0x22f4   : > { %v14981_v59 = vpack.c.bf16 %v21862_v52, %v21861_v57  ;;  %v23166_v52 = vld [vmem:[%s28398_s21 + $0xc8] sm:$0xff]  }
0x22f5   : > { %v14952_v61 = vpop.f32.mrf.mxu0 }
0x22f6   : > { %v14980_v47 = vpack.c.bf16 %v14952_v61, %v14949_v40 }
0x22f7   : > { %v21865_v16 = vpop.f32.mrf.mxu0 }
0x22f8   : > { %21875 = vmatprep.mubr.msk.bf16.mxu1 %vm6838_vm2, %v14980_v47 }
0x22f9   : > { %v14965_v56 = vpop.f32.mrf.mxu0  ;;  %21876 = vmatmul.mubr.msk.bf16.vlgmr.msra.gmra.mxu1 %vm6838_vm2, %v14981_v59 }
0x22fa   : > { %21900 = vmatpush3.bf16.msra.mxu1 %v23152_v53  ;;  %v23160_v53 = vld [vmem:[%s28398_s21 + $0xb8] sm:$0xff]  }
0x22fb   : > { %v21866_v37 = vpop.f32.mrf.mxu0  ;;  %21901 = vmatprep.subr.bf16.mxu1 %v23153_v15 }
0x22fc   : > { %v14983_v31 = vpack.c.bf16 %v21866_v37, %v21865_v16 }
0x22fd   : > { %v14968_v63 = vpop.f32.mrf.mxu0 }
0x22fe   : > { %v14982_v33 = vpack.c.bf16 %v14968_v63, %v14965_v56  ;;  %21902 = vmatpush3.bf16.msra.mxu1 %v23153_v15  ;;  %v23167_v15 = vld [vmem:[%s28398_s21 + $0xc0] sm:$0xff]  }
0x22ff   : > { %v21893_v39 = vpop.f32.mrf.mxu0  ;;  %21903 = vmatprep.subr.bf16.mxu1 %v23154_v22 }
0x2300   : > { %21879 = vmatprep.mubr.msk.bf16.mxu1 %vm6838_vm2, %v14982_v33 }
0x2301   : > { %21880 = vmatmul.mubr.msk.bf16.gmra.mxu1 %vm6838_vm2, %v14983_v31  ;;  %v15136_v28 = vpop.f32.mrf.mxu0 }
0x2302   : > { %21904 = vmatpush3.bf16.msra.mxu1 %v23154_v22  ;;  %v23168_v22 = vld [vmem:[%s28398_s21 + $0xf8] sm:$0xff]  }
0x2303   : > { %v21894_v2 = vpop.f32.mrf.mxu0  ;;  %21905 = vmatprep.subr.bf16.mxu1 %v23155_v9 }
0x2304   : > { %v15168_v24 = vpack.c.bf16 %v21894_v2, %v21893_v39 }
0x2305   : > { %v15139_v6 = vpop.f32.mrf.mxu0 }
0x2306   : > { %v15167_v34 = vpack.c.bf16 %v15139_v6, %v15136_v28  ;;  %21906 = vmatpush3.bf16.msra.mxu1 %v23155_v9  ;;  %v23169_v9 = vld [vmem:[%s28398_s21 + $0xf0] sm:$0xff]  }
0x2307   : > { %v21897_v19 = vpop.f32.mrf.mxu0  ;;  %21931 = vmatprep.subr.bf16.mxu1 %v23156_v58 }
0x2308   : > { %21907 = vmatprep.mubr.msk.bf16.mxu1 %vm6838_vm2, %v15167_v34 }
0x2309   : > { %v15152_v54 = vpop.f32.mrf.mxu0  ;;  %21908 = vmatmul.mubr.msk.bf16.vlgmr.msra.gmra.mxu1 %vm6838_vm2, %v15168_v24 }
0x230a   : > { %21932 = vmatpush3.bf16.msra.mxu1 %v23156_v58  ;;  %v23170_v58 = vld [vmem:[%s28398_s21 + $0xe8] sm:$0xff]  }
0x230b   : > { %v21898_v43 = vpop.f32.mrf.mxu0  ;;  %21933 = vmatprep.subr.bf16.mxu1 %v23157_v3 }
0x230c   : > { %v15170_v32 = vpack.c.bf16 %v21898_v43, %v21897_v19 }
0x230d   : > { %v15155_v46 = vpop.f32.mrf.mxu0 }
0x230e   : > { %v15169_v44 = vpack.c.bf16 %v15155_v46, %v15152_v54  ;;  %21934 = vmatpush3.bf16.msra.mxu1 %v23157_v3  ;;  %v23171_v3 = vld [vmem:[%s28398_s21 + $0xe0] sm:$0xff]  }
0x230f   : > { %v21925_v38 = vpop.f32.mrf.mxu0  ;;  %21935 = vmatprep.subr.bf16.mxu1 %v23158_v29 }
0x2310   : > { %21911 = vmatprep.mubr.msk.bf16.mxu1 %vm6838_vm2, %v15169_v44 }
0x2311   : > { %21912 = vmatmul.mubr.msk.bf16.gmra.mxu1 %vm6838_vm2, %v15170_v32  ;;  %v15323_v42 = vpop.f32.mrf.mxu0 }
0x2312   : > { %21936 = vmatpush3.bf16.msra.mxu1 %v23158_v29  ;;  %v23172_v29 = vld [vmem:[%s28398_s21 + $0x118] sm:$0xff]  }
0x2313   : > { %v21926_v1 = vpop.f32.mrf.mxu0  ;;  %21937 = vmatprep.subr.bf16.mxu1 %v23159_v50 }
0x2314   : > { %v15355_v30 = vpack.c.bf16 %v21926_v1, %v21925_v38 }
0x2315   : > { %v15326_v11 = vpop.f32.mrf.mxu0 }
0x2316   : > { %v15354_v23 = vpack.c.bf16 %v15326_v11, %v15323_v42  ;;  %21938 = vmatpush3.bf16.msra.mxu1 %v23159_v50  ;;  %v23173_v50 = vld [vmem:[%s28398_s21 + $0x110] sm:$0xff]  }
0x2317   : > { %v21929_v8 = vpop.f32.mrf.mxu0  ;;  %21963 = vmatprep.subr.bf16.mxu1 %v23160_v53 }
0x2318   : > { %21939 = vmatprep.mubr.msk.bf16.mxu1 %vm6838_vm2, %v15354_v23 }
0x2319   : > { %v15339_v26 = vpop.f32.mrf.mxu0  ;;  %21940 = vmatmul.mubr.msk.bf16.vlgmr.msra.gmra.mxu1 %vm6838_vm2, %v15355_v30 }
0x231a   : > { %21964 = vmatpush3.bf16.msra.mxu1 %v23160_v53  ;;  %v23174_v53 = vld [vmem:[%s28398_s21 + $0x108] sm:$0xff]  }
0x231b   : > { %v21930_v51 = vpop.f32.mrf.mxu0  ;;  %21965 = vmatprep.subr.bf16.mxu1 %v23161_v35 }
0x231c   : > { %v15357_v20 = vpack.c.bf16 %v21930_v51, %v21929_v8 }
0x231d   : > { %v15342_v7 = vpop.f32.mrf.mxu0 }
0x231e   : > { %v15356_v60 = vpack.c.bf16 %v15342_v7, %v15339_v26  ;;  %21966 = vmatpush3.bf16.msra.mxu1 %v23161_v35  ;;  %v23175_v35 = vld [vmem:[%s28398_s21 + $0x100] sm:$0xff]  }
0x231f   : > { %v21957_v17 = vpop.f32.mrf.mxu0  ;;  %21967 = vmatprep.subr.bf16.mxu1 %v23162_v49 }
0x2320   : > { %21943 = vmatprep.mubr.msk.bf16.mxu1 %vm6838_vm2, %v15356_v60 }
0x2321   : > { %21944 = vmatmul.mubr.msk.bf16.gmra.mxu1 %vm6838_vm2, %v15357_v20  ;;  %v15510_v18 = vpop.f32.mrf.mxu0 }
0x2322   : > { %21968 = vmatpush3.bf16.msra.mxu1 %v23162_v49 }
0x2323   : > { %v21958_v62 = vpop.f32.mrf.mxu0  ;;  %21969 = vmatprep.subr.bf16.mxu1 %v23163_v25 }
0x2324   : > { %v15542_v27 = vpack.c.bf16 %v21958_v62, %v21957_v17 }
0x2325   : > { %v15513_v0 = vpop.f32.mrf.mxu0 }
0x2326   : > { %v15541_v36 = vpack.c.bf16 %v15513_v0, %v15510_v18  ;;  %21970 = vmatpush3.bf16.msra.mxu1 %v23163_v25  ;;  %v14903_v0 = vpop.f32.mrf.mxu1 }
0x2327   : > { %v21961_v48 = vpop.f32.mrf.mxu0  ;;  %21995 = vmatprep.subr.bf16.mxu1 %v23164_v21 }
0x2328   : > { %21971 = vmatprep.mubr.msk.bf16.mxu1 %vm6838_vm2, %v15541_v36 }
0x2329   : > { %v15526_v57 = vpop.f32.mrf.mxu0  ;;  %21972 = vmatmul.mubr.msk.bf16.vlgmr.msra.gmra.mxu1 %vm6838_vm2, %v15542_v27  ;;  %v23176_v27 = vld [vmem:[%s28387_s10] sm:$0xff]  }
0x232a   : > { %21996 = vmatpush3.bf16.msra.mxu1 %v23164_v21  ;;  %22083 = vmatprep.mubr.msk.bf16.mxu0 %vm6838_vm2, %v23176_v27 }
0x232b   : > { %v21962_v40 = vpop.f32.mrf.mxu0  ;;  %21997 = vmatprep.subr.bf16.mxu1 %v23165_v5 }
0x232c   : > { %v15544_v59 = vpack.c.bf16 %v21962_v40, %v21961_v48 }
0x232d   : > { %v15529_v61 = vpop.f32.mrf.mxu0 }
0x232e   : > { %v15543_v47 = vpack.c.bf16 %v15529_v61, %v15526_v57  ;;  %21998 = vmatpush3.bf16.msra.mxu1 %v23165_v5 }
0x232f   : > { %v21989_v16 = vpop.f32.mrf.mxu0  ;;  %21999 = vmatprep.subr.bf16.mxu1 %v23166_v52 }
0x2330   : > { %21975 = vmatprep.mubr.msk.bf16.mxu1 %vm6838_vm2, %v15543_v47 }
0x2331   : > { %21976 = vmatmul.mubr.msk.bf16.gmra.mxu1 %vm6838_vm2, %v15544_v59  ;;  %v15697_v56 = vpop.f32.mrf.mxu0 }
0x2332   : > { %22000 = vmatpush3.bf16.msra.mxu1 %v23166_v52 }
0x2333   : > { %v21990_v37 = vpop.f32.mrf.mxu0  ;;  %22001 = vmatprep.subr.bf16.mxu1 %v23167_v15 }
0x2334   : > { %v15729_v31 = vpack.c.bf16 %v21990_v37, %v21989_v16 }
0x2335   : > { %v15700_v63 = vpop.f32.mrf.mxu0 }
0x2336   : > { %v15728_v33 = vpack.c.bf16 %v15700_v63, %v15697_v56  ;;  %22002 = vmatpush3.bf16.msra.mxu1 %v23167_v15 }
0x2337   : > { %v21993_v39 = vpop.f32.mrf.mxu0  ;;  %22027 = vmatprep.subr.bf16.mxu1 %v23168_v22 }
0x2338   : > { %22003 = vmatprep.mubr.msk.bf16.mxu1 %vm6838_vm2, %v15728_v33 }
0x2339   : > { %v15713_v28 = vpop.f32.mrf.mxu0  ;;  %22004 = vmatmul.mubr.msk.bf16.vlgmr.msra.gmra.mxu1 %vm6838_vm2, %v15729_v31 }
0x233a   : > { %22028 = vmatpush3.bf16.msra.mxu1 %v23168_v22 }
0x233b   : > { %v21994_v2 = vpop.f32.mrf.mxu0  ;;  %22029 = vmatprep.subr.bf16.mxu1 %v23169_v9 }
0x233c   : > { %v15731_v24 = vpack.c.bf16 %v21994_v2, %v21993_v39 }
0x233d   : > { %v15716_v6 = vpop.f32.mrf.mxu0 }
0x233e   : > { %v15730_v34 = vpack.c.bf16 %v15716_v6, %v15713_v28  ;;  %22030 = vmatpush3.bf16.msra.mxu1 %v23169_v9 }
0x233f   : > { %v22021_v19 = vpop.f32.mrf.mxu0  ;;  %22031 = vmatprep.subr.bf16.mxu1 %v23170_v58 }
0x2340   : > { %22007 = vmatprep.mubr.msk.bf16.mxu1 %vm6838_vm2, %v15730_v34 }
0x2341   : > { %22008 = vmatmul.mubr.msk.bf16.gmra.mxu1 %vm6838_vm2, %v15731_v24  ;;  %v15884_v54 = vpop.f32.mrf.mxu0 }
0x2342   : > { %22032 = vmatpush3.bf16.msra.mxu1 %v23170_v58 }
0x2343   : > { %v22022_v43 = vpop.f32.mrf.mxu0  ;;  %22033 = vmatprep.subr.bf16.mxu1 %v23171_v3 }
0x2344   : > { %v15916_v32 = vpack.c.bf16 %v22022_v43, %v22021_v19 }
0x2345   : > { %v15887_v46 = vpop.f32.mrf.mxu0 }
0x2346   : > { %v15915_v44 = vpack.c.bf16 %v15887_v46, %v15884_v54  ;;  %22034 = vmatpush3.bf16.msra.mxu1 %v23171_v3 }
0x2347   : > { %v22025_v38 = vpop.f32.mrf.mxu0  ;;  %22059 = vmatprep.subr.bf16.mxu1 %v23172_v29 }
0x2348   : > { %22035 = vmatprep.mubr.msk.bf16.mxu1 %vm6838_vm2, %v15915_v44 }
0x2349   : > { %v15900_v42 = vpop.f32.mrf.mxu0  ;;  %22036 = vmatmul.mubr.msk.bf16.vlgmr.msra.gmra.mxu1 %vm6838_vm2, %v15916_v32 }
0x234a   : > { %22060 = vmatpush3.bf16.msra.mxu1 %v23172_v29 }
0x234b   : > { %v22026_v1 = vpop.f32.mrf.mxu0  ;;  %22061 = vmatprep.subr.bf16.mxu1 %v23173_v50 }
0x234c   : > { %v15918_v30 = vpack.c.bf16 %v22026_v1, %v22025_v38 }
0x234d   : > { %v15903_v11 = vpop.f32.mrf.mxu0 }
0x234e   : > { %v15917_v23 = vpack.c.bf16 %v15903_v11, %v15900_v42  ;;  %22062 = vmatpush3.bf16.msra.mxu1 %v23173_v50 }
0x234f   : > { %v22053_v8 = vpop.f32.mrf.mxu0  ;;  %22063 = vmatprep.subr.bf16.mxu1 %v23174_v53 }
0x2350   : > { %22039 = vmatprep.mubr.msk.bf16.mxu1 %vm6838_vm2, %v15917_v23 }
0x2351   : > { %22040 = vmatmul.mubr.msk.bf16.gmra.mxu1 %vm6838_vm2, %v15918_v30  ;;  %v16071_v26 = vpop.f32.mrf.mxu0 }
0x2352   : > { %22064 = vmatpush3.bf16.msra.mxu1 %v23174_v53 }
0x2353   : > { %v22054_v51 = vpop.f32.mrf.mxu0  ;;  %22065 = vmatprep.subr.bf16.mxu1 %v23175_v35 }
0x2354   : > { %v16103_v60 = vpack.c.bf16 %v22054_v51, %v22053_v8 }
0x2355   : > { %v16074_v49 = vpop.f32.mrf.mxu0 }
0x2356   : > { %v16102_v7 = vpack.c.bf16 %v16074_v49, %v16071_v26  ;;  %22066 = vmatpush3.bf16.msra.mxu1 %v23175_v35 }
0x2357   : > { %v22057_v20 = vpop.f32.mrf.mxu0 }
0x2358   : > { %22067 = vmatprep.mubr.msk.bf16.mxu1 %vm6838_vm2, %v16102_v7 }
0x2359   : > { %v16087_v17 = vpop.f32.mrf.mxu0  ;;  %22068 = vmatmul.mubr.msk.bf16.vlgmr.msra.gmra.mxu1 %vm6838_vm2, %v16103_v60 }
0x235b   : > { %v22058_v25 = vpop.f32.mrf.mxu0 }
0x235c   : > { %v16105_v21 = vpack.c.bf16 %v22058_v25, %v22057_v20 }
0x235d   : > { %v16090_v18 = vpop.f32.mrf.mxu0 }
0x235e   : > { %v16104_v62 = vpack.c.bf16 %v16090_v18, %v16087_v17 }
0x2360   : > { %22071 = vmatprep.mubr.msk.bf16.mxu1 %vm6838_vm2, %v16104_v62 }
0x2361   : > { %22072 = vmatmul.mubr.msk.bf16.gmra.mxu1 %vm6838_vm2, %v16105_v21 }
0x23b9   : > { %v21877_v36 = vpop.f32.mrf.mxu1 }
0x23ba   : > { %v15096_v48 = vadd.f32 %v21877_v36, %v28115_v14  ;;  %v14904_v14 = vadd.f32 %v14903_v0, %v28129_v13 }
0x23bb   : > { %v15063_v5 = vpop.f32.mrf.mxu1 }
0x23bc   : > { %v15094_v57 = vadd.f32 %v15063_v5, %v28117_v45 }
0x23bd   : > { %v21878_v40 = vpop.f32.mrf.mxu1 }
0x23be   : > { %v15097_v52 = vadd.f32 %v21878_v40, %v28119_v55 }
0x23bf   : > { %v15066_v61 = vpop.f32.mrf.mxu1 }
0x23c0   : > { %v15095_v47 = vadd.f32 %v15066_v61, %v28121_v10 }
0x23c1   : > { %v21881_v59 = vpop.f32.mrf.mxu1 }
0x23c2   : > { %v15100_v16 = vadd.f32 %v21881_v59, %v28123_v4 }
0x23c3   : > { %v15079_v15 = vpop.f32.mrf.mxu1 }
0x23c4   : > { %v15098_v56 = vadd.f32 %v15079_v15, %v28125_v12 }
0x23c5   : > { %v21882_v37 = vpop.f32.mrf.mxu1 }
0x23c6   : > { %v15101_v22 = vadd.f32 %v21882_v37, %v28127_v41 }
0x23c7   : > { %v15082_v63 = vpop.f32.mrf.mxu1 }
0x23c8   : > { %v15099_v33 = vadd.f32 %v15082_v63, %v14904_v14 }
0x23c9   : > { %v21909_v45 = vpop.f32.mrf.mxu1 }
0x23ca   : > { %v15283_v31 = vadd.f32 %v21909_v45, %v15096_v48 }
0x23cb   : > { %v15250_v39 = vpop.f32.mrf.mxu1 }
0x23cc   : > { %v15281_v55 = vadd.f32 %v15250_v39, %v15094_v57 }
0x23cd   : > { %v21910_v9 = vpop.f32.mrf.mxu1 }
0x23ce   : > { %v15284_v28 = vadd.f32 %v21910_v9, %v15097_v52 }
0x23cf   : > { %v15253_v10 = vpop.f32.mrf.mxu1 }
0x23d0   : > { %v15282_v2 = vadd.f32 %v15253_v10, %v15095_v47 }
0x23d1   : > { %v21913_v58 = vpop.f32.mrf.mxu1 }
0x23d2   : > { %v15287_v4 = vadd.f32 %v21913_v58, %v15100_v16 }
0x23d3   : > { %v15266_v6 = vpop.f32.mrf.mxu1 }
0x23d4   : > { %v15285_v34 = vadd.f32 %v15266_v6, %v15098_v56 }
0x23d5   : > { %v21914_v12 = vpop.f32.mrf.mxu1 }
0x23d6   : > { %v15288_v24 = vadd.f32 %v21914_v12, %v15101_v22 }
0x23d7   : > { %v15269_v19 = vpop.f32.mrf.mxu1 }
0x23d8   : > { %v15286_v13 = vadd.f32 %v15269_v19, %v15099_v33 }
0x23d9   : > { %v21941_v3 = vpop.f32.mrf.mxu1 }
0x23da   : > { %v15470_v41 = vadd.f32 %v21941_v3, %v15283_v31 }
0x23db   : > { %v15437_v54 = vpop.f32.mrf.mxu1 }
0x23dc   : > { %v15468_v43 = vadd.f32 %v15437_v54, %v15281_v55 }
0x23dd   : > { %v21942_v29 = vpop.f32.mrf.mxu1 }
0x23de   : > { %v15471_v46 = vadd.f32 %v21942_v29, %v15284_v28  ;;  %v18833_v28 = vld [vmem:[%s28399_s22] ss:$0 sm:$0xff] }
0x23df   : > { %v15440_v44 = vpop.f32.mrf.mxu1 }
0x23e0   : > { %v15469_v32 = vadd.f32 %v15440_v44, %v15282_v2 }
0x23e1   : > { %v21945_v38 = vpop.f32.mrf.mxu1 }
0x23e2   : > { %v15474_v22 = vadd.f32 %v21945_v38, %v15287_v4 }
0x23e3   : > { %v15453_v50 = vpop.f32.mrf.mxu1 }
0x23e4   : > { %v15472_v55 = vadd.f32 %v15453_v50, %v15285_v34 }
0x23e5   : > { %v21946_v42 = vpop.f32.mrf.mxu1 }
0x23e6   : > { %v15475_v9 = vadd.f32 %v21946_v42, %v15288_v24 }
0x23e7   : > { %v15456_v1 = vpop.f32.mrf.mxu1 }
0x23e8   : > { %v15473_v19 = vadd.f32 %v15456_v1, %v15286_v13 }
0x23e9   : > { %v21973_v53 = vpop.f32.mrf.mxu1 }
0x23ea   : > { %v15657_v40 = vadd.f32 %v21973_v53, %v15470_v41 }
0x23eb   : > { %v15624_v11 = vpop.f32.mrf.mxu1 }
0x23ec   : > { %v15655_v61 = vadd.f32 %v15624_v11, %v15468_v43 }
0x23ed   : > { %v21974_v23 = vpop.f32.mrf.mxu1 }
0x23ee   : > { %v15658_v47 = vadd.f32 %v21974_v23, %v15471_v46 }
0x23ef   : > { %v15627_v30 = vpop.f32.mrf.mxu1 }
0x23f0   : > { %v15656_v15 = vadd.f32 %v15627_v30, %v15469_v32 }
0x23f1   : > { %v21977_v8 = vpop.f32.mrf.mxu1 }
0x23f2   : > { %v15661_v2 = vadd.f32 %v21977_v8, %v15474_v22 }
0x23f3   : > { %v15640_v35 = vpop.f32.mrf.mxu1 }
0x23f4   : > { %v15659_v3 = vadd.f32 %v15640_v35, %v15472_v55 }
0x23f5   : > { %v21978_v26 = vpop.f32.mrf.mxu1 }
0x23f6   : > { %v15662_v41 = vadd.f32 %v21978_v26, %v15475_v9 }
0x23f7   : > { %v15643_v51 = vpop.f32.mrf.mxu1 }
0x23f8   : > { %v15660_v44 = vadd.f32 %v15643_v51, %v15473_v19 }
0x23f9   : > { %v22005_v49 = vpop.f32.mrf.mxu1 }
0x23fa   : > { %v15844_v59 = vadd.f32 %v22005_v49, %v15657_v40  ;;  %v23183_v40 = vld [vmem:[%s28387_s10 + $0x38] sm:$0xff]  }
0x23fb   : > { %v15811_v7 = vpop.f32.mrf.mxu1 }
0x23fc   : > { %v15842_v56 = vadd.f32 %v15811_v7, %v15655_v61  ;;  %v23185_v61 = vld [vmem:[%s28387_s10 + $0x48] sm:$0xff]  }
0x23fd   : > { %v22006_v60 = vpop.f32.mrf.mxu1 }
0x23fe   : > { %v15845_v37 = vadd.f32 %v22006_v60, %v15658_v47  ;;  %v23186_v47 = vld [vmem:[%s28387_s10 + $0x50] sm:$0xff]  }
0x23ff   : > { %v15814_v20 = vpop.f32.mrf.mxu1 }
0x2400   : > { %v15843_v33 = vadd.f32 %v15814_v20, %v15656_v15  ;;  %v23189_v15 = vld [vmem:[%s28387_s10 + $0x68] sm:$0xff]  }
0x2401   : > { %v22009_v17 = vpop.f32.mrf.mxu1 }
0x2402   : > { %v15848_v54 = vadd.f32 %v22009_v17, %v15661_v2 }
0x2403   : > { %v15827_v25 = vpop.f32.mrf.mxu1 }
0x2404   : > { %v15846_v34 = vadd.f32 %v15827_v25, %v15659_v3 }
0x2405   : > { %v22010_v18 = vpop.f32.mrf.mxu1 }
0x2406   : > { %v15849_v24 = vadd.f32 %v22010_v18, %v15662_v41 }
0x2407   : > { %v15830_v62 = vpop.f32.mrf.mxu1 }
0x2408   : > { %v15847_v11 = vadd.f32 %v15830_v62, %v15660_v44  ;;  %v23177_v62 = vld [vmem:[%s28387_s10 + $0x8] sm:$0xff]  }
0x2409   : > { %v22037_v21 = vpop.f32.mrf.mxu1 }
0x240a   : > { %v16031_v14 = vadd.f32 %v22037_v21, %v15844_v59  ;;  %v23187_v59 = vld [vmem:[%s28387_s10 + $0x58] sm:$0xff]  }
0x240b   : > { %v15998_v0 = vpop.f32.mrf.mxu1 }
0x240c   : > { %v16029_v45 = vadd.f32 %v15998_v0, %v15842_v56  ;;  %v23190_v56 = vld [vmem:[%s28387_s10 + $0x70] sm:$0xff]  }
0x240d   : > { %v22038_v36 = vpop.f32.mrf.mxu1 }
0x240e   : > { %v16032_v31 = vadd.f32 %v22038_v36, %v15845_v37  ;;  %v23178_v36 = vld [vmem:[%s28387_s10 + $0x10] sm:$0xff]   ;;  %v23191_v37 = vld [vmem:[%s28387_s10 + $0x78] sm:$0xff]  }
0x240f   : > { %v16001_v27 = vpop.f32.mrf.mxu1 }
0x2410   : > { %v16030_v58 = vadd.f32 %v16001_v27, %v15843_v33  ;;  %v23179_v27 = vld [vmem:[%s28387_s10 + $0x18] sm:$0xff]  }
0x2411   : > { %v22041_v48 = vpop.f32.mrf.mxu1 }
0x2412   : > { %v16035_v38 = vadd.f32 %v22041_v48, %v15848_v54  ;;  %v23180_v48 = vld [vmem:[%s28387_s10 + $0x20] sm:$0xff]  }
0x2413   : > { %v16014_v5 = vpop.f32.mrf.mxu1 }
0x2414   : > { %v16033_v30 = vadd.f32 %v16014_v5, %v15846_v34  ;;  %v23181_v5 = vld [vmem:[%s28387_s10 + $0x28] sm:$0xff]  }
0x2415   : > { %v22042_v57 = vpop.f32.mrf.mxu1 }
0x2416   : > { %v16036_v8 = vadd.f32 %v22042_v57, %v15849_v24  ;;  %v23182_v57 = vld [vmem:[%s28387_s10 + $0x30] sm:$0xff]  }
0x2417   : > { %v16017_v52 = vpop.f32.mrf.mxu1 }
0x2418   : > { %v16034_v26 = vadd.f32 %v16017_v52, %v15847_v11  ;;  %v23184_v52 = vld [vmem:[%s28387_s10 + $0x40] sm:$0xff]  }
0x2419   : > { %v22069_v16 = vpop.f32.mrf.mxu1 }
0x241a   : > { %v16218_v39 = vadd.f32 %v22069_v16, %v16031_v14  ;;  %v23188_v16 = vld [vmem:[%s28387_s10 + $0x60] sm:$0xff]  }
0x241b   : > { %v16185_v63 = vpop.f32.mrf.mxu1 }
0x241c   : > { %v16216_v6 = vadd.f32 %v16185_v63, %v16029_v45  ;;  %v16233_v43 = vadd.f32 %v18833_v28, %v16218_v39 }
0x241d   : > { %v22070_v10 = vpop.f32.mrf.mxu1 }
0x241e   : > { %v16219_v12 = vadd.f32 %v22070_v10, %v16032_v31  ;;  %v16231_v50 = vadd.f32 %v18833_v28, %v16216_v6 }
0x241f   : > { %v16188_v4 = vpop.f32.mrf.mxu1 }
0x2420   : > { %v16234_v29 = vadd.f32 %v18833_v28, %v16219_v12  ;;  %v16217_v46 = vadd.f32 %v16188_v4, %v16030_v58 }
0x2421   : > { %v22073_v32 = vpop.f32.mrf.mxu1 }
0x2422   : > { %v16232_v42 = vadd.f32 %v18833_v28, %v16217_v46  ;;  %v16272_v53 = vpack.c.bf16 %v16234_v29, %v16233_v43  ;;  %v16222_v13 = vadd.f32 %v22073_v32, %v16035_v38 }
0x2423   : > { %v16201_v23 = vpop.f32.mrf.mxu1 }
0x2424   : > { %v16271_v1 = vpack.c.bf16 %v16232_v42, %v16231_v50  ;;  %v16220_v49 = vadd.f32 %v16201_v23, %v16033_v30  ;;  %v16237_v20 = vadd.f32 %v18833_v28, %v16222_v13 }
0x2425   : > { %v22074_v35 = vpop.f32.mrf.mxu1 }
0x2426   : > { %v16223_v7 = vadd.f32 %v22074_v35, %v16036_v8  ;;  %v16235_v25 = vadd.f32 %v18833_v28, %v16220_v49 }
0x2427   : > { %v16204_v60 = vpop.f32.mrf.mxu1 }
0x2428   : > { %v16238_v51 = vadd.f32 %v18833_v28, %v16223_v7  ;;  %v16221_v17 = vadd.f32 %v16204_v60, %v16034_v26 }
0x242a   : > { %v16236_v18 = vadd.f32 %v18833_v28, %v16221_v17  ;;  %v16274_v21 = vpack.c.bf16 %v16238_v51, %v16237_v20 }
0x242c   : > { %22075 = vmatprep.subr.bf16.mxu0 %v16274_v21  ;;  %v16273_v0 = vpack.c.bf16 %v16236_v18, %v16235_v25 }
0x242d   : > { %22076 = vmatpush3.bf16.msra.mxu0 %v16274_v21 }
0x242e   : > { %22077 = vmatprep.subr.bf16.mxu0 %v16273_v0 }
0x2431   : > { %22078 = vmatpush3.bf16.msra.mxu0 %v16273_v0 }
0x2432   : > { %22079 = vmatprep.subr.bf16.mxu0 %v16272_v53 }
0x2435   : > { %22080 = vmatpush3.bf16.msra.mxu0 %v16272_v53 }
0x2436   : > { %22081 = vmatprep.subr.bf16.mxu0 %v16271_v1 }
0x2439   : > { %22082 = vmatpush3.bf16.msra.mxu0 %v16271_v1 }
0x243c   : > { %22084 = vmatmul.mubr.msk.bf16.vlgmr.msra.gmra.mxu0 %vm6838_vm2, %v23177_v62 }
0x243d   : > { %22087 = vmatprep.mubr.msk.bf16.mxu0 %vm6838_vm2, %v23178_v36 }
0x2444   : > { %22088 = vmatmul.mubr.msk.bf16.gmra.mxu0 %vm6838_vm2, %v23179_v27 }
0x2445   : > { %22091 = vmatprep.mubr.msk.bf16.mxu0 %vm6838_vm2, %v23180_v48 }
0x244c   : > { %22092 = vmatmul.mubr.msk.bf16.gmra.mxu0 %vm6838_vm2, %v23181_v5 }
0x244d   : > { %22095 = vmatprep.mubr.msk.bf16.mxu0 %vm6838_vm2, %v23182_v57 }
0x2454   : > { %22096 = vmatmul.mubr.msk.bf16.gmra.mxu0 %vm6838_vm2, %v23183_v40 }
0x2455   : > { %22099 = vmatprep.mubr.msk.bf16.mxu0 %vm6838_vm2, %v23184_v52 }
0x245c   : > { %22100 = vmatmul.mubr.msk.bf16.gmra.mxu0 %vm6838_vm2, %v23185_v61 }
0x245d   : > { %22103 = vmatprep.mubr.msk.bf16.mxu0 %vm6838_vm2, %v23186_v47 }
0x2464   : > { %22104 = vmatmul.mubr.msk.bf16.gmra.mxu0 %vm6838_vm2, %v23187_v59 }
0x2465   : > { %22107 = vmatprep.mubr.msk.bf16.mxu0 %vm6838_vm2, %v23188_v16 }
0x246c   : > { %22108 = vmatmul.mubr.msk.bf16.gmra.mxu0 %vm6838_vm2, %v23189_v15 }
0x246d   : > { %22111 = vmatprep.mubr.msk.bf16.mxu0 %vm6838_vm2, %v23190_v56 }
0x2474   : > { %22112 = vmatmul.mubr.msk.bf16.gmra.mxu0 %vm6838_vm2, %v23191_v37 }
0x24fc   : > { %v22085_v14 = vpop.f32.mrf.mxu0 }
0x24fd   : > { %16567 = vst.msk [vmem:[%s28308_s11 + $0x10] sm:$0xff] %vm16564_vm5, %v22085_v14 }
0x24fe   : > { %v16437_v22 = vpop.f32.mrf.mxu0 }
0x24ff   : > { %16565 = vst.msk [vmem:[%s28308_s11] sm:$0xff] %vm16564_vm5, %v16437_v22 }
0x2500   : > { %v22086_v63 = vpop.f32.mrf.mxu0 }
0x2501   : > { %16568 = vst.msk [vmem:[%s28308_s11 + $0x18] sm:$0xff] %vm16564_vm5, %v22086_v63 }
0x2502   : > { %v16440_v33 = vpop.f32.mrf.mxu0 }
0x2503   : > { %16566 = vst.msk [vmem:[%s28308_s11 + $0x8] sm:$0xff] %vm16564_vm5, %v16440_v33 }
0x2504   : > { %v22089_v45 = vpop.f32.mrf.mxu0 }
0x2505   : > { %16571 = vst.msk [vmem:[%s28308_s11 + $0x30] sm:$0xff] %vm16564_vm5, %v22089_v45 }
0x2506   : > { %v16453_v31 = vpop.f32.mrf.mxu0 }
0x2507   : > { %16569 = vst.msk [vmem:[%s28308_s11 + $0x20] sm:$0xff] %vm16564_vm5, %v16453_v31 }
0x2508   : > { %v22090_v39 = vpop.f32.mrf.mxu0 }
0x2509   : > { %16572 = vst.msk [vmem:[%s28308_s11 + $0x38] sm:$0xff] %vm16564_vm5, %v22090_v39 }
0x250a   : > { %v16456_v55 = vpop.f32.mrf.mxu0 }
0x250b   : > { %16570 = vst.msk [vmem:[%s28308_s11 + $0x28] sm:$0xff] %vm16564_vm5, %v16456_v55 }
0x250c   : > { %v22093_v9 = vpop.f32.mrf.mxu0 }
0x250d   : > { %16575 = vst.msk [vmem:[%s28308_s11 + $0x50] sm:$0xff] %vm16564_vm5, %v22093_v9 }
0x250e   : > { %v16469_v28 = vpop.f32.mrf.mxu0 }
0x250f   : > { %16573 = vst.msk [vmem:[%s28308_s11 + $0x40] sm:$0xff] %vm16564_vm5, %v16469_v28 }
0x2510   : > { %v22094_v10 = vpop.f32.mrf.mxu0 }
0x2511   : > { %16576 = vst.msk [vmem:[%s28308_s11 + $0x58] sm:$0xff] %vm16564_vm5, %v22094_v10 }
0x2512   : > { %v16472_v2 = vpop.f32.mrf.mxu0 }
0x2513   : > { %16574 = vst.msk [vmem:[%s28308_s11 + $0x48] sm:$0xff] %vm16564_vm5, %v16472_v2 }
0x2514   : > { %v22097_v58 = vpop.f32.mrf.mxu0 }
0x2515   : > { %16579 = vst.msk [vmem:[%s28308_s11 + $0x70] sm:$0xff] %vm16564_vm5, %v22097_v58 }
0x2516   : > { %v16485_v6 = vpop.f32.mrf.mxu0 }
0x2517   : > { %16577 = vst.msk [vmem:[%s28308_s11 + $0x60] sm:$0xff] %vm16564_vm5, %v16485_v6 }
0x2518   : > { %v22098_v12 = vpop.f32.mrf.mxu0 }
0x2519   : > { %16580 = vst.msk [vmem:[%s28308_s11 + $0x78] sm:$0xff] %vm16564_vm5, %v22098_v12 }
0x251a   : > { %v16488_v19 = vpop.f32.mrf.mxu0 }
0x251b   : > { %16578 = vst.msk [vmem:[%s28308_s11 + $0x68] sm:$0xff] %vm16564_vm5, %v16488_v19 }
0x251c   : > { %v22101_v3 = vpop.f32.mrf.mxu0 }
0x251d   : > { %16583 = vst.msk [vmem:[%s28308_s11 + $0x90] sm:$0xff] %vm16564_vm5, %v22101_v3 }
0x251e   : > { %v16501_v41 = vpop.f32.mrf.mxu0 }
0x251f   : > { %16581 = vst.msk [vmem:[%s28308_s11 + $0x80] sm:$0xff] %vm16564_vm5, %v16501_v41 }
0x2520   : > { %v22102_v4 = vpop.f32.mrf.mxu0 }
0x2521   : > { %16584 = vst.msk [vmem:[%s28308_s11 + $0x98] sm:$0xff] %vm16564_vm5, %v22102_v4 }
0x2522   : > { %v16504_v54 = vpop.f32.mrf.mxu0 }
0x2523   : > { %16582 = vst.msk [vmem:[%s28308_s11 + $0x88] sm:$0xff] %vm16564_vm5, %v16504_v54 }
0x2524   : > { %v22105_v43 = vpop.f32.mrf.mxu0 }
0x2525   : > { %16587 = vst.msk [vmem:[%s28308_s11 + $0xb0] sm:$0xff] %vm16564_vm5, %v22105_v43 }
0x2526   : > { %v16517_v29 = vpop.f32.mrf.mxu0 }
0x2527   : > { %16585 = vst.msk [vmem:[%s28308_s11 + $0xa0] sm:$0xff] %vm16564_vm5, %v16517_v29 }
0x2528   : > { %v22106_v46 = vpop.f32.mrf.mxu0 }
0x2529   : > { %16588 = vst.msk [vmem:[%s28308_s11 + $0xb8] sm:$0xff] %vm16564_vm5, %v22106_v46 }
0x252a   : > { %v16520_v44 = vpop.f32.mrf.mxu0 }
0x252b   : > { %16586 = vst.msk [vmem:[%s28308_s11 + $0xa8] sm:$0xff] %vm16564_vm5, %v16520_v44 }
0x252c   : > { %v22109_v34 = vpop.f32.mrf.mxu0 }
0x252d   : > { %16591 = vst.msk [vmem:[%s28308_s11 + $0xd0] sm:$0xff] %vm16564_vm5, %v22109_v34 }
0x252e   : > { %v16533_v24 = vpop.f32.mrf.mxu0 }
0x252f   : > { %16589 = vst.msk [vmem:[%s28308_s11 + $0xc0] sm:$0xff] %vm16564_vm5, %v16533_v24 }
0x2530   : > { %v22110_v32 = vpop.f32.mrf.mxu0 }
0x2531   : > { %16592 = vst.msk [vmem:[%s28308_s11 + $0xd8] sm:$0xff] %vm16564_vm5, %v22110_v32 }
0x2532   : > { %v16536_v38 = vpop.f32.mrf.mxu0 }
0x2533   : > { %16590 = vst.msk [vmem:[%s28308_s11 + $0xc8] sm:$0xff] %vm16564_vm5, %v16536_v38 }
0x2534   : > { %v22113_v50 = vpop.f32.mrf.mxu0 }
0x2535   : > { %16595 = vst.msk [vmem:[%s28308_s11 + $0xf0] sm:$0xff] %vm16564_vm5, %v22113_v50 }
0x2536   : > { %v16549_v42 = vpop.f32.mrf.mxu0 }
0x2537   : > { %16593 = vst.msk [vmem:[%s28308_s11 + $0xe0] sm:$0xff] %vm16564_vm5, %v16549_v42 }
0x2538   : > { %v22114_v53 = vpop.f32.mrf.mxu0 }
0x2539   : > { %16596 = vst.msk [vmem:[%s28308_s11 + $0xf8] sm:$0xff] %vm16564_vm5, %v22114_v53 }
0x253a   : > { %v16552_v11 = vpop.f32.mrf.mxu0 }
0x253b   : > { %16594 = vst.msk [vmem:[%s28308_s11 + $0xe8] sm:$0xff] %vm16564_vm5, %v16552_v11 }
0x253c PF: > { %s33_s4 = sadd.s32 1, %s23243_s4  }
0x253d   : > { %p30_p4 = scmp.ge.s32.totalorder %s33_s4, 4  }
0x253f   :  { %32 = sbr.rel (!%p30_p4) target bundleno = 11 (0xb), region = 231 }

</bundles_post_ra>
